<compile_context>
chip_gen: v5e
topology: v5e:2x2
jax: 0.10.0
libtpu: 0.0.40
codegen_flags: <defaults>
</compile_context>

<pallas_src>
import jax
import jax.numpy as jnp
from jax.experimental import pallas as pl
from jax.experimental.pallas import tpu as pltpu


def _se_proj_bn_kernel(se_ref, w1_ref, b1_ref, w2_ref, b2_ref,
                       x_ref, w3_ref, gamma_ref, beta_ref, o_ref):
    # ---- squeeze-excite MLP on the [C,1] squeeze column -------------------
    h = jnp.dot(w1_ref[...], se_ref[...],
                preferred_element_type=jnp.float32) + b1_ref[...]       # [80, 1]
    h = jnp.maximum(h, 0.0)                                             # ReLU
    g = jnp.dot(w2_ref[...], h,
                preferred_element_type=jnp.float32) + b2_ref[...]       # [320, 1]
    gate = 1.0 / (1.0 + jnp.exp(-g))                                    # Sigmoid, [320, 1]

    # ---- gate the feature map and project (1x1 conv == matmul) ------------
    xg = x_ref[...] * gate                                              # [320,196] * [320,1]
    y = jnp.dot(w3_ref[...], xg,
                preferred_element_type=jnp.float32)                     # [320, 196]

    # ---- BatchNorm2d (training semantics: biased batch stats over H*W) ----
    # One-pass stats reduced over the spatial (lane) axis, then a single
    # fused per-channel scale/shift FMA over the big tensor.
    inv_n = 1.0 / y.shape[1]
    s1 = jnp.sum(y, axis=1, keepdims=True)                              # [320, 1]
    s2 = jnp.sum(y * y, axis=1, keepdims=True)                          # [320, 1]
    mean = s1 * inv_n
    var = jnp.maximum(s2 * inv_n - mean * mean, 0.0)                    # biased var
    scale = gamma_ref[...] * jax.lax.rsqrt(var + 1e-5)                  # [320, 1]
    shift = beta_ref[...] - mean * scale                                # [320, 1]
    o_ref[...] = y * scale + shift


def se_proj_bn(x175, x176, params):
    """x175: [1,320,14,14] NCHW, x176: [1,320,1,1] NCHW -> [1,320,14,14] NCHW."""
    n, c, h, w = x175.shape
    assert n == 1
    hw = h * w

    # Free views of NCHW (no transposes, no extra HBM round trips).
    x_c_hw = x175.reshape(c, hw)           # [320, 196]
    se_col = x176.reshape(c, 1)            # [320, 1]

    vmem = pl.BlockSpec(memory_space=pltpu.MemorySpace.VMEM)

    out_c_hw = pl.pallas_call(
        _se_proj_bn_kernel,
        out_shape=jax.ShapeDtypeStruct((c, hw), jnp.float32),
        in_specs=[vmem] * 9,
        out_specs=vmem,
        cost_estimate=pl.CostEstimate(
            flops=2 * c * c * hw + 4 * 80 * c + 8 * c * hw,
            transcendentals=2 * c,
            bytes_accessed=4 * (2 * c * hw + c * c + 2 * 80 * c + 6 * c),
        ),
    )(se_col,
      params["w1"], params["b1"],
      params["w2"], params["b2"],
      x_c_hw,
      params["w3"],
      params["gamma"], params["beta"])

    return out_c_hw.reshape(n, c, h, w)    # free view back to NCHW


def _reference(x175, x176, params):
    """Pure-JAX reference with the same math (for a correctness check)."""
    n, c, h, w = x175.shape
    se = x176.reshape(c, 1)
    hh = jnp.maximum(params["w1"] @ se + params["b1"], 0.0)
    g = params["w2"] @ hh + params["b2"]
    gate = jax.nn.sigmoid(g)
    x = x175.reshape(c, h * w)
    y = params["w3"] @ (x * gate)
    mean = y.mean(axis=1, keepdims=True)
    var = ((y - mean) ** 2).mean(axis=1, keepdims=True)
    yh = (y - mean) * jax.lax.rsqrt(var + 1e-5)
    return (yh * params["gamma"] + params["beta"]).reshape(n, c, h, w)


def init_params(key):
    """Deterministic synthetic parameters matching the PyTorch module's shapes.

    Conv weights are stored [Cout, Cin] so the kernel computes y = W @ x.
    Biases / BN params are stored as [C, 1] columns (channels on sublanes).
    """
    ks = jax.random.split(key, 7)
    c_in, c_mid = 320, 80
    # conv2d56: Conv2d(320, 80, 1x1) -> weight [80, 320], bias [80, 1]
    w1 = jax.random.normal(ks[0], (c_mid, c_in), jnp.float32) * 0.05
    b1 = jax.random.normal(ks[1], (c_mid, 1), jnp.float32) * 0.05
    # conv2d57: Conv2d(80, 320, 1x1) -> weight [320, 80], bias [320, 1]
    w2 = jax.random.normal(ks[2], (c_in, c_mid), jnp.float32) * 0.05
    b2 = jax.random.normal(ks[3], (c_in, 1), jnp.float32) * 0.05
    # conv2d58: Conv2d(320, 320, 1x1, bias=False) -> weight [320, 320]
    w3 = jax.random.normal(ks[4], (c_in, c_in), jnp.float32) * 0.02
    # batchnorm2d36 affine params
    gamma = jnp.ones((c_in, 1), jnp.float32) + 0.1 * jax.random.normal(ks[5], (c_in, 1), jnp.float32)
    beta = 0.1 * jax.random.normal(ks[6], (c_in, 1), jnp.float32)
    return {"w1": w1, "b1": b1, "w2": w2, "b2": b2, "w3": w3,
            "gamma": gamma, "beta": beta}


if __name__ == "__main__":
    key = jax.random.PRNGKey(0)
    k_x175, k_x176, k_params = jax.random.split(key, 3)

    # Shapes fixed by the module's channel counts (320 / 80) and the reference
    # tensors' spatial extent (14x14).
    x175 = jax.random.normal(k_x175, (1, 320, 14, 14), jnp.float32)   # feature map (NCHW)
    x176 = jax.random.normal(k_x176, (1, 320, 1, 1), jnp.float32)     # squeeze vector (NCHW)

    params = init_params(k_params)

    out = se_proj_bn(x175, x176, params)
    jax.block_until_ready(out)
    assert out.shape == (1, 320, 14, 14), out.shape

    ref = _reference(x175, x176, params)
    assert jnp.allclose(out, ref, rtol=1e-3, atol=1e-3), float(jnp.max(jnp.abs(out - ref)))

    print("KERNEL_OK")
</pallas_src>

<mosaic_0001>
module attributes {stable_mosaic.version = 11 : i64} {
  func.func @_se_proj_bn_kernel(%arg0: memref<320x1xf32, #tpu.memory_space<vmem>>, %arg1: memref<80x320xf32, #tpu.memory_space<vmem>>, %arg2: memref<80x1xf32, #tpu.memory_space<vmem>>, %arg3: memref<320x80xf32, #tpu.memory_space<vmem>>, %arg4: memref<320x1xf32, #tpu.memory_space<vmem>>, %arg5: memref<320x196xf32, #tpu.memory_space<vmem>>, %arg6: memref<320x320xf32, #tpu.memory_space<vmem>>, %arg7: memref<320x1xf32, #tpu.memory_space<vmem>>, %arg8: memref<320x1xf32, #tpu.memory_space<vmem>>, %arg9: memref<320x196xf32, #tpu.memory_space<vmem>>) attributes {dimension_semantics = [], scalar_prefetch = 0 : i64, scratch_operands = 0 : i64, tpu.core_type = #tpu.core_type<tc>} {
    %c0 = arith.constant 0 : index
    %c0_0 = arith.constant 0 : index
    %0 = vector.load %arg1[%c0, %c0_0] : memref<80x320xf32, #tpu.memory_space<vmem>>, vector<80x320xf32>
    %c0_1 = arith.constant 0 : index
    %c0_2 = arith.constant 0 : index
    %1 = vector.load %arg0[%c0_1, %c0_2] : memref<320x1xf32, #tpu.memory_space<vmem>>, vector<320x1xf32>
    %cst = arith.constant dense<0.000000e+00> : vector<80x1xf32>
    %2 = tpu.matmul %0, %1, %cst {dimension_numbers = #tpu.dot_dimension_numbers<[1], [0], [0], [1], [0, 0, 1, 1], [], []>} : vector<80x320xf32>, vector<320x1xf32>, vector<80x1xf32> -> vector<80x1xf32>
    %c0_3 = arith.constant 0 : index
    %c0_4 = arith.constant 0 : index
    %3 = vector.load %arg2[%c0_3, %c0_4] : memref<80x1xf32, #tpu.memory_space<vmem>>, vector<80x1xf32>
    %4 = arith.addf %2, %3 : vector<80x1xf32>
    %cst_5 = arith.constant 0.000000e+00 : f32
    %5 = vector.broadcast %cst_5 : f32 to vector<80x1xf32>
    %6 = arith.maximumf %4, %5 : vector<80x1xf32>
    %c0_6 = arith.constant 0 : index
    %c0_7 = arith.constant 0 : index
    %7 = vector.load %arg3[%c0_6, %c0_7] : memref<320x80xf32, #tpu.memory_space<vmem>>, vector<320x80xf32>
    %cst_8 = arith.constant dense<0.000000e+00> : vector<320x1xf32>
    %8 = tpu.matmul %7, %6, %cst_8 {dimension_numbers = #tpu.dot_dimension_numbers<[1], [0], [0], [1], [0, 0, 1, 1], [], []>} : vector<320x80xf32>, vector<80x1xf32>, vector<320x1xf32> -> vector<320x1xf32>
    %c0_9 = arith.constant 0 : index
    %c0_10 = arith.constant 0 : index
    %9 = vector.load %arg4[%c0_9, %c0_10] : memref<320x1xf32, #tpu.memory_space<vmem>>, vector<320x1xf32>
    %10 = arith.addf %8, %9 : vector<320x1xf32>
    %cst_11 = arith.constant 0.000000e+00 : f32
    %11 = vector.broadcast %cst_11 : f32 to vector<320x1xf32>
    %12 = arith.subf %11, %10 : vector<320x1xf32>
    %13 = math.exp %12 : vector<320x1xf32>
    %cst_12 = arith.constant 1.000000e+00 : f32
    %14 = vector.broadcast %cst_12 : f32 to vector<320x1xf32>
    %15 = arith.addf %14, %13 : vector<320x1xf32>
    %cst_13 = arith.constant 1.000000e+00 : f32
    %16 = vector.broadcast %cst_13 : f32 to vector<320x1xf32>
    %17 = arith.divf %16, %15 : vector<320x1xf32>
    %c0_14 = arith.constant 0 : index
    %c0_15 = arith.constant 0 : index
    %18 = vector.load %arg5[%c0_14, %c0_15] : memref<320x196xf32, #tpu.memory_space<vmem>>, vector<320x196xf32>
    %19 = vector.broadcast %17 : vector<320x1xf32> to vector<320x196xf32>
    %20 = arith.mulf %18, %19 : vector<320x196xf32>
    %c0_16 = arith.constant 0 : index
    %c0_17 = arith.constant 0 : index
    %21 = vector.load %arg6[%c0_16, %c0_17] : memref<320x320xf32, #tpu.memory_space<vmem>>, vector<320x320xf32>
    %cst_18 = arith.constant dense<0.000000e+00> : vector<320x196xf32>
    %22 = tpu.matmul %21, %20, %cst_18 {dimension_numbers = #tpu.dot_dimension_numbers<[1], [0], [0], [1], [0, 0, 1, 1], [], []>} : vector<320x320xf32>, vector<320x196xf32>, vector<320x196xf32> -> vector<320x196xf32>
    %cst_19 = arith.constant dense<0.000000e+00> : vector<320xf32>
    %23 = vector.multi_reduction <add>, %22, %cst_19 [1] : vector<320x196xf32> to vector<320xf32>
    %24 = vector.shape_cast %23 : vector<320xf32> to vector<320x1xf32>
    %25 = arith.mulf %22, %22 : vector<320x196xf32>
    %cst_20 = arith.constant dense<0.000000e+00> : vector<320xf32>
    %26 = vector.multi_reduction <add>, %25, %cst_20 [1] : vector<320x196xf32> to vector<320xf32>
    %27 = vector.shape_cast %26 : vector<320xf32> to vector<320x1xf32>
    %cst_21 = arith.constant 0.00510204071 : f32
    %28 = vector.broadcast %cst_21 : f32 to vector<320x1xf32>
    %29 = arith.mulf %24, %28 : vector<320x1xf32>
    %cst_22 = arith.constant 0.00510204071 : f32
    %30 = vector.broadcast %cst_22 : f32 to vector<320x1xf32>
    %31 = arith.mulf %27, %30 : vector<320x1xf32>
    %32 = arith.mulf %29, %29 : vector<320x1xf32>
    %33 = arith.subf %31, %32 : vector<320x1xf32>
    %cst_23 = arith.constant 0.000000e+00 : f32
    %34 = vector.broadcast %cst_23 : f32 to vector<320x1xf32>
    %35 = arith.maximumf %33, %34 : vector<320x1xf32>
    %c0_24 = arith.constant 0 : index
    %c0_25 = arith.constant 0 : index
    %36 = vector.load %arg7[%c0_24, %c0_25] : memref<320x1xf32, #tpu.memory_space<vmem>>, vector<320x1xf32>
    %cst_26 = arith.constant 9.99999974E-6 : f32
    %37 = vector.broadcast %cst_26 : f32 to vector<320x1xf32>
    %38 = arith.addf %35, %37 : vector<320x1xf32>
    %39 = math.rsqrt %38 : vector<320x1xf32>
    %40 = arith.mulf %36, %39 : vector<320x1xf32>
    %c0_27 = arith.constant 0 : index
    %c0_28 = arith.constant 0 : index
    %41 = vector.load %arg8[%c0_27, %c0_28] : memref<320x1xf32, #tpu.memory_space<vmem>>, vector<320x1xf32>
    %42 = arith.mulf %29, %40 : vector<320x1xf32>
    %43 = arith.subf %41, %42 : vector<320x1xf32>
    %44 = vector.broadcast %40 : vector<320x1xf32> to vector<320x196xf32>
    %45 = arith.mulf %22, %44 : vector<320x196xf32>
    %46 = vector.broadcast %43 : vector<320x1xf32> to vector<320x196xf32>
    %47 = arith.addf %45, %46 : vector<320x196xf32>
    %c0_29 = arith.constant 0 : index
    %c0_30 = arith.constant 0 : index
    %48 = vector.load %arg9[%c0_29, %c0_30] : memref<320x196xf32, #tpu.memory_space<vmem>>, vector<320x196xf32>
    tpu.vector_store %arg9[%c0_29, %c0_30], %47 {strides = array<i32>} : memref<320x196xf32, #tpu.memory_space<vmem>>, vector<320x196xf32>,
    return
  }
}

</mosaic_0001>

<bundles_post_ra>
// kernel: tpu_custom_call.1
= control target key start
LH: loop header
LB: loop body
LE: loop exit
PB: predicated region body
PF: predicated region fallthrough
CT: control target
= control target key end

     0   :  { %vm112_vm0 = vcmask 523264   ;;  %vm374_vm1 = vcmask 654336   ;;  %s9414_s0 = inlined_call_operand.vmem [shape: f32[320,1], index: 0, kind: input, shape index: {}]   ;;  %s9415_s1 = inlined_call_operand.vmem [shape: f32[80,320], index: 1, kind: input, shape index: {}]   ;;  %s9416_s2 = inlined_call_operand.vmem [shape: f32[80,1], index: 2, kind: input, shape index: {}]   ;;  %s9417_s3 = inlined_call_operand.vmem [shape: f32[320,80], index: 3, kind: input, shape index: {}]   ;;  %s9418_s4 = inlined_call_operand.vmem [shape: f32[320,1], index: 4, kind: input, shape index: {}]   ;;  %s9419_s5 = inlined_call_operand.vmem [shape: f32[320,196], index: 5, kind: input, shape index: {}]   ;;  %s9420_s6 = inlined_call_operand.vmem [shape: f32[320,320], index: 6, kind: input, shape index: {}]   ;;  %s9421_s7 = inlined_call_operand.vmem [shape: f32[320,1], index: 7, kind: input, shape index: {}]   ;;  %s9422_s8 = inlined_call_operand.vmem [shape: f32[320,1], index: 8, kind: input, shape index: {}]   ;;  %s9423_s9 = inlined_call_operand.vmem [shape: f32[320,196], index: 9, kind: output, shape index: {}]  }
   0x1   :  { %v77_v0 = vld [vmem:[%s9414_s0 + $0x78] sm:$0xff]  ;;  %v76_v1 = vld [vmem:[%s9414_s0 + $0x70] sm:$0xff]  ;;  %v75_v4 = vld [vmem:[%s9414_s0 + $0x68] sm:$0xff] }
   0x2   :  { %v93_v2 = vld [vmem:[%s9414_s0 + $0xf8] sm:$0xff]  ;;  %143 = vmatpush.msra.mxu0 %v77_v0  ;;  %v92_v3 = vld [vmem:[%s9414_s0 + $0xf0] sm:$0xff]  ;;  %v91_v5 = vld [vmem:[%s9414_s0 + $0xe8] sm:$0xff] }
   0x3   :  { %190 = vmatpush.msra.mxu1 %v93_v2  ;;  %v74_v6 = vld [vmem:[%s9414_s0 + $0x60] sm:$0xff]  ;;  %v101_v8 = vld [vmem:[%s9414_s0 + $0x138] sm:$0xff]  ;;  %v100_v11 = vld [vmem:[%s9414_s0 + $0x130] sm:$0xff] }
   0x4   :  { %144 = vmatpush.msra.mxu0 %v76_v1  ;;  %v90_v7 = vld [vmem:[%s9414_s0 + $0xe0] sm:$0xff]  ;;  %v73_v9 = vld [vmem:[%s9414_s0 + $0x58] sm:$0xff]  ;;  %245 = vmatpush.msra.mxu2 %v101_v8  ;;  %v99_v12 = vld [vmem:[%s9414_s0 + $0x128] sm:$0xff] }
   0x5   :  { %191 = vmatpush.msra.mxu1 %v92_v3  ;;  %v89_v10 = vld [vmem:[%s9414_s0 + $0xd8] sm:$0xff]  ;;  %v72_v13 = vld [vmem:[%s9414_s0 + $0x50] sm:$0xff]  ;;  %v98_v15 = vld [vmem:[%s9414_s0 + $0x120] sm:$0xff] }
   0x6   :  { %145 = vmatpush.msra.mxu0 %v75_v4  ;;  %v88_v14 = vld [vmem:[%s9414_s0 + $0xd0] sm:$0xff]  ;;  %246 = vmatpush.msra.mxu2 %v100_v11  ;;  %v71_v16 = vld [vmem:[%s9414_s0 + $0x48] sm:$0xff]  ;;  %v97_v18 = vld [vmem:[%s9414_s0 + $0x118] sm:$0xff] }
   0x7   :  { %192 = vmatpush.msra.mxu1 %v91_v5  ;;  %v87_v17 = vld [vmem:[%s9414_s0 + $0xc8] sm:$0xff]  ;;  %v70_v19 = vld [vmem:[%s9414_s0 + $0x40] sm:$0xff]  ;;  %v96_v21 = vld [vmem:[%s9414_s0 + $0x110] sm:$0xff] }
   0x8   :  { %146 = vmatpush.msra.mxu0 %v74_v6  ;;  %247 = vmatpush.msra.mxu2 %v99_v12  ;;  %v86_v20 = vld [vmem:[%s9414_s0 + $0xc0] sm:$0xff]  ;;  %v69_v22 = vld [vmem:[%s9414_s0 + $0x38] sm:$0xff]  ;;  %v95_v24 = vld [vmem:[%s9414_s0 + $0x108] sm:$0xff] }
   0x9   :  { %193 = vmatpush.msra.mxu1 %v90_v7  ;;  %v85_v23 = vld [vmem:[%s9414_s0 + $0xb8] sm:$0xff]  ;;  %v68_v25 = vld [vmem:[%s9414_s0 + $0x30] sm:$0xff]  ;;  %v94_v27 = vld [vmem:[%s9414_s0 + $0x100] sm:$0xff] }
   0xa   :  { %147 = vmatpush.msra.mxu0 %v73_v9  ;;  %248 = vmatpush.msra.mxu2 %v98_v15  ;;  %v84_v26 = vld [vmem:[%s9414_s0 + $0xb0] sm:$0xff]  ;;  %v67_v28 = vld [vmem:[%s9414_s0 + $0x28] sm:$0xff]  ;;  %v66_v31 = vld [vmem:[%s9414_s0 + $0x20] sm:$0xff] }
   0xb   :  { %194 = vmatpush.msra.mxu1 %v89_v10  ;;  %v83_v29 = vld [vmem:[%s9414_s0 + $0xa8] sm:$0xff]  ;;  %v34_v30 = vld [vmem:[%s9415_s1 + $0x10] sm:$0xff]  ;;  %v82_v32 = vld [vmem:[%s9414_s0 + $0xa0] sm:$0xff] }
   0xc   :  { %148 = vmatpush.msra.mxu0 %v72_v13  ;;  %249 = vmatpush.msra.mxu2 %v97_v18  ;;  %v65_v33 = vld [vmem:[%s9414_s0 + $0x18] sm:$0xff]  ;;  %v64_v35 = vld [vmem:[%s9414_s0 + $0x10] sm:$0xff]  ;;  %v63_v37 = vld [vmem:[%s9414_s0 + $0x8] sm:$0xff] }
   0xd   :  { %195 = vmatpush.msra.mxu1 %v88_v14  ;;  %v81_v34 = vld [vmem:[%s9414_s0 + $0x98] sm:$0xff]  ;;  %v80_v36 = vld [vmem:[%s9414_s0 + $0x90] sm:$0xff]  ;;  %v79_v38 = vld [vmem:[%s9414_s0 + $0x88] sm:$0xff] }
   0xe   :  { %149 = vmatpush.msra.mxu0 %v71_v16  ;;  %250 = vmatpush.msra.mxu2 %v96_v21  ;;  %v37_v39 = vld [vmem:[%s9415_s1 + $0x28] sm:$0xff]  ;;  %v62_v40 = vld [vmem:[%s9414_s0] sm:$0xff]  ;;  %v35_v45 = vld [vmem:[%s9415_s1 + $0x18] sm:$0xff] }
   0xf   :  { %196 = vmatpush.msra.mxu1 %v87_v17  ;;  %v78_v41 = vld [vmem:[%s9414_s0 + $0x80] sm:$0xff]  ;;  %v33_v43 = vld [vmem:[%s9415_s1 + $0x8] sm:$0xff]  ;;  %v43_v47 = vld [vmem:[%s9415_s1 + $0x58] sm:$0xff] }
  0x10   :  { %150 = vmatpush.msra.mxu0 %v70_v19  ;;  %251 = vmatpush.msra.mxu2 %v95_v24  ;;  %v32_v42 = vld [vmem:[%s9415_s1] sm:$0xff]  ;;  %v38_v48 = vld [vmem:[%s9415_s1 + $0x30] sm:$0xff]  ;;  %v39_v49 = vld [vmem:[%s9415_s1 + $0x38] sm:$0xff] }
  0x11   :  { %197 = vmatpush.msra.mxu1 %v86_v20  ;;  %v40_v44 = vld [vmem:[%s9415_s1 + $0x40] sm:$0xff]  ;;  %v46_v50 = vld [vmem:[%s9415_s1 + $0x70] sm:$0xff]  ;;  %v41_v51 = vld [vmem:[%s9415_s1 + $0x48] sm:$0xff] }
  0x12   :  { %151 = vmatpush.msra.mxu0 %v69_v22  ;;  %252 = vmatpush.msra.mxu2 %v94_v27  ;;  %v36_v46 = vld [vmem:[%s9415_s1 + $0x20] sm:$0xff]  ;;  %v42_v52 = vld [vmem:[%s9415_s1 + $0x50] sm:$0xff]  ;;  %v49_v53 = vld [vmem:[%s9415_s1 + $0x88] sm:$0xff] }
  0x13   :  { %198 = vmatpush.msra.mxu1 %v85_v23  ;;  %4699 = vmatmul.msk.f32.vlgmr.msra.gmra.mxu2 %vm112_vm0, %v34_v30  ;;  %v44_v54 = vld [vmem:[%s9415_s1 + $0x60] sm:$0xff]  ;;  %v45_v55 = vld [vmem:[%s9415_s1 + $0x68] sm:$0xff]  ;;  %v47_v57 = vld [vmem:[%s9415_s1 + $0x78] sm:$0xff] }
  0x14   :  { %152 = vmatpush.msra.mxu0 %v68_v25  ;;  %v52_v56 = vld [vmem:[%s9415_s1 + $0xa0] sm:$0xff]  ;;  %v55_v59 = vld [vmem:[%s9415_s1 + $0xb8] sm:$0xff]  ;;  %v50_v60 = vld [vmem:[%s9415_s1 + $0x90] sm:$0xff] }
  0x15   :  { %199 = vmatpush.msra.mxu1 %v84_v26  ;;  %v48_v58 = vld [vmem:[%s9415_s1 + $0x80] sm:$0xff]  ;;  %v51_v61 = vld [vmem:[%s9415_s1 + $0x98] sm:$0xff]  ;;  %v58_v62 = vld [vmem:[%s9415_s1 + $0xd0] sm:$0xff] }
  0x16   :  { %153 = vmatpush.msra.mxu0 %v67_v28  ;;  %v53_v63 = vld [vmem:[%s9415_s1 + $0xa8] sm:$0xff]  ;;  %v54_v0 = vld [vmem:[%s9415_s1 + $0xb0] sm:$0xff]  ;;  %v56_v2 = vld [vmem:[%s9415_s1 + $0xc0] sm:$0xff] }
  0x17   :  { %200 = vmatpush.msra.mxu1 %v83_v29  ;;  %v61_v1 = vld [vmem:[%s9415_s1 + $0xe8] sm:$0xff]  ;;  %v59_v4 = vld [vmem:[%s9415_s1 + $0xd8] sm:$0xff]  ;;  %v60_v5 = vld [vmem:[%s9415_s1 + $0xe0] sm:$0xff] }
  0x18   :  { %154 = vmatpush.msra.mxu0 %v66_v31  ;;  %v57_v3 = vld [vmem:[%s9415_s1 + $0xc8] sm:$0xff] }
  0x19   :  { %201 = vmatpush.msra.mxu1 %v82_v32 }
  0x1a   :  { %155 = vmatpush.msra.mxu0 %v65_v33  ;;  %v110_v33 = vld [vmem:[%s9416_s2 + $0x40] sm:$0xff] }
  0x1b   :  { %202 = vmatpush.msra.mxu1 %v81_v34  ;;  %4700 = vmatmul.msk.f32.gmra.mxu2 %vm112_vm0, %v37_v39  ;;  %v109_v34 = vld [vmem:[%s9416_s2 + $0x38] sm:$0xff]  ;;  %v107_v39 = vld [vmem:[%s9416_s2 + $0x28] sm:$0xff] }
  0x1c   :  { %156 = vmatpush.msra.mxu0 %v64_v35 }
  0x1d   :  { %203 = vmatpush.msra.mxu1 %v80_v36  ;;  %v108_v36 = vld [vmem:[%s9416_s2 + $0x30] sm:$0xff] }
  0x1e   :  { %157 = vmatpush.msra.mxu0 %v63_v37  ;;  %v111_v37 = vld [vmem:[%s9416_s2 + $0x48] sm:$0xff] }
  0x1f   :  { %204 = vmatpush.msra.mxu1 %v79_v38 }
  0x20   :  { %158 = vmatpush.msra.mxu0 %v62_v40 }
  0x21   :  { %205 = vmatpush.msra.mxu1 %v78_v41  ;;  %159 = vmatmul.f32.vlgmr.msra.gmra.mxu0 %v32_v42 }
  0x22   :  { %206 = vmatmul.f32.vlgmr.msra.gmra.mxu1 %v33_v43 }
  0x23   :  { %4701 = vmatmul.msk.f32.gmra.mxu2 %vm112_vm0, %v40_v44 }
  0x29   :  { %162 = vmatmul.f32.gmra.mxu0 %v35_v45  ;;  %v106_v45 = vld [vmem:[%s9416_s2 + $0x20] sm:$0xff] }
  0x2a   :  { %209 = vmatmul.f32.gmra.mxu1 %v36_v46 }
  0x2b   :  { %4702 = vmatmul.msk.f32.gmra.mxu2 %vm112_vm0, %v43_v47 }
  0x31   :  { %165 = vmatmul.f32.gmra.mxu0 %v38_v48 }
  0x32   :  { %212 = vmatmul.f32.gmra.mxu1 %v39_v49 }
  0x33   :  { %4703 = vmatmul.msk.f32.gmra.mxu2 %vm112_vm0, %v46_v50  ;;  %v105_v50 = vld [vmem:[%s9416_s2 + $0x18] sm:$0xff] }
  0x39   :  { %168 = vmatmul.f32.gmra.mxu0 %v41_v51 }
  0x3a   :  { %215 = vmatmul.f32.gmra.mxu1 %v42_v52 }
  0x3b   :  { %4704 = vmatmul.msk.f32.gmra.mxu2 %vm112_vm0, %v49_v53 }
  0x41   :  { %171 = vmatmul.f32.gmra.mxu0 %v44_v54 }
  0x42   :  { %218 = vmatmul.f32.gmra.mxu1 %v45_v55  ;;  %v104_v55 = vld [vmem:[%s9416_s2 + $0x10] sm:$0xff] }
  0x43   :  { %4705 = vmatmul.msk.f32.gmra.mxu2 %vm112_vm0, %v52_v56 }
  0x49   :  { %174 = vmatmul.f32.gmra.mxu0 %v47_v57 }
  0x4a   :  { %221 = vmatmul.f32.gmra.mxu1 %v48_v58 }
  0x4b   :  { %4706 = vmatmul.msk.f32.gmra.mxu2 %vm112_vm0, %v55_v59 }
  0x51   :  { %177 = vmatmul.f32.gmra.mxu0 %v50_v60  ;;  %v103_v60 = vld [vmem:[%s9416_s2 + $0x8] sm:$0xff] }
  0x52   :  { %224 = vmatmul.f32.gmra.mxu1 %v51_v61 }
  0x53   :  { %4707 = vmatmul.msk.f32.gmra.mxu2 %vm112_vm0, %v58_v62 }
  0x59   :  { %180 = vmatmul.f32.gmra.mxu0 %v53_v63 }
  0x5a   :  { %227 = vmatmul.f32.gmra.mxu1 %v54_v0 }
  0x5b   :  { %4708 = vmatmul.msk.f32.gmra.mxu2 %vm112_vm0, %v61_v1  ;;  %v102_v1 = vld [vmem:[%s9416_s2] sm:$0xff] }
  0x61   :  { %183 = vmatmul.f32.gmra.mxu0 %v56_v2 }
  0x62   :  { %230 = vmatmul.f32.gmra.mxu1 %v57_v3 }
  0x69   :  { %186 = vmatmul.f32.gmra.mxu0 %v59_v4 }
  0x6a   :  { %233 = vmatmul.f32.gmra.mxu1 %v60_v5 }
  0x96   :  { %v5406_v6 = vpop.f32.mrf.mxu2 }
  0x9e   :  { %v5408_v7 = vpop.f32.mrf.mxu0  ;;  %v5412_v9 = vpop.f32.mrf.mxu2 }
  0x9f   :  { %v5410_v8 = vpop.f32.mrf.mxu1 }
  0xa6   :  { %v163_v10 = vpop.f32.mrf.mxu0  ;;  %v5416_v12 = vpop.f32.mrf.mxu2 }
  0xa7   :  { %v5414_v11 = vpop.f32.mrf.mxu1  ;;  %v164_v2 = vadd.f32 %v163_v10, %v103_v60 }
  0xae   :  { %v166_v13 = vpop.f32.mrf.mxu0  ;;  %v5418_v15 = vpop.f32.mrf.mxu2 }
  0xaf   :  { %v213_v14 = vpop.f32.mrf.mxu1  ;;  %v167_v61 = vadd.f32 %v166_v13, %v104_v55  ;;  %v211_v13 = vadd.f32 %v5414_v11, %v164_v2 }
  0xb6   :  { %v169_v16 = vpop.f32.mrf.mxu0  ;;  %v266_v18 = vpop.f32.mrf.mxu2 }
  0xb7   :  { %v216_v17 = vpop.f32.mrf.mxu1  ;;  %v170_v56 = vadd.f32 %v169_v16, %v105_v50  ;;  %v161_v16 = vadd.f32 %v5408_v7, %v102_v1 }
  0xb9   :  { %v217_v3 = vadd.f32 %v216_v17, %v170_v56 }
  0xbe   :  { %v172_v19 = vpop.f32.mrf.mxu0  ;;  %v269_v21 = vpop.f32.mrf.mxu2 }
  0xbf   :  { %v219_v20 = vpop.f32.mrf.mxu1  ;;  %v173_v51 = vadd.f32 %v172_v19, %v106_v45  ;;  %v214_v19 = vadd.f32 %v213_v14, %v167_v61 }
  0xc1   :  { %v220_v62 = vadd.f32 %v219_v20, %v173_v51  ;;  %v264_v20 = vadd.f32 %v5418_v15, %v217_v3  ;;  %v261_v10 = vadd.f32 %v5416_v12, %v214_v19  ;;  %v297_v12 = vld [vmem:[%s9417_s3 + $0x18] sm:$0xff] }
  0xc3   :  { %v287_v7 = vmax.f32 %v264_v20, 0.0 }
  0xc6   :  { %v175_v22 = vpop.f32.mrf.mxu0  ;;  %v272_v24 = vpop.f32.mrf.mxu2 }
  0xc7   :  { %v222_v23 = vpop.f32.mrf.mxu1  ;;  %v176_v47 = vadd.f32 %v175_v22, %v107_v39  ;;  %v267_v22 = vadd.f32 %v266_v18, %v220_v62  ;;  %v286_v18 = vmax.f32 %v261_v10, 0.0  ;;  %v334_v39 = vld [vmem:[%s9418_s4] sm:$0xff] }
  0xc8   :  { %v338_v10 = vld [vmem:[%s9418_s4 + $0x20] sm:$0xff] }
  0xc9   :  { %v223_v57 = vadd.f32 %v222_v23, %v176_v47  ;;  %v288_v17 = vmax.f32 %v267_v22, 0.0 }
  0xcb   :  { %v270_v4 = vadd.f32 %v269_v21, %v223_v57  ;;  %v258_v21 = vadd.f32 %v5412_v9, %v211_v13  ;;  %v295_v9 = vld [vmem:[%s9417_s3 + $0x8] sm:$0xff]  ;;  %v313_v57 = vld [vmem:[%s9417_s3 + $0x98] sm:$0xff] }
  0xcd   :  { %v285_v11 = vmax.f32 %v258_v21, 0.0 }
  0xce   :  { %v178_v25 = vpop.f32.mrf.mxu0  ;;  %v275_v27 = vpop.f32.mrf.mxu2 }
  0xcf   :  { %v225_v26 = vpop.f32.mrf.mxu1  ;;  %v179_v42 = vadd.f32 %v178_v25, %v108_v36  ;;  %v208_v25 = vadd.f32 %v5410_v8, %v161_v16  ;;  %v294_v8 = vld [vmem:[%s9417_s3] sm:$0xff]  ;;  %v308_v36 = vld [vmem:[%s9417_s3 + $0x70] sm:$0xff] }
  0xd1   :  { %v226_v52 = vadd.f32 %v225_v26, %v179_v42  ;;  %v255_v14 = vadd.f32 %v5406_v6, %v208_v25  ;;  %v296_v6 = vld [vmem:[%s9417_s3 + $0x10] sm:$0xff]  ;;  %v298_v26 = vld [vmem:[%s9417_s3 + $0x20] sm:$0xff] }
  0xd3   :  { %v273_v63 = vadd.f32 %v272_v24, %v226_v52  ;;  %v289_v24 = vmax.f32 %v270_v4, 0.0  ;;  %v284_v15 = vmax.f32 %v255_v14, 0.0  ;;  %v314_v4 = vld [vmem:[%s9417_s3 + $0xa0] sm:$0xff] }
  0xd5   :  { %v290_v23 = vmax.f32 %v273_v63, 0.0  ;;  %v337_v63 = vld [vmem:[%s9418_s4 + $0x18] sm:$0xff] }
  0xd6   :  { %v181_v28 = vpop.f32.mrf.mxu0  ;;  %v278_v30 = vpop.f32.mrf.mxu2 }
  0xd7   :  { %v228_v29 = vpop.f32.mrf.mxu1  ;;  %v182_v38 = vadd.f32 %v181_v28, %v109_v34  ;;  %v300_v28 = vld [vmem:[%s9417_s3 + $0x30] sm:$0xff]  ;;  %v306_v34 = vld [vmem:[%s9417_s3 + $0x60] sm:$0xff] }
  0xd9   :  { %v229_v48 = vadd.f32 %v228_v29, %v182_v38  ;;  %v301_v29 = vld [vmem:[%s9417_s3 + $0x38] sm:$0xff]  ;;  %v310_v38 = vld [vmem:[%s9417_s3 + $0x80] sm:$0xff] }
  0xdb   :  { %v276_v58 = vadd.f32 %v275_v27, %v229_v48  ;;  %v299_v27 = vld [vmem:[%s9417_s3 + $0x28] sm:$0xff] }
  0xdd   :  { %v291_v5 = vmax.f32 %v276_v58, 0.0 }
  0xde   :  { %v184_v31 = vpop.f32.mrf.mxu0  ;;  %v281_v46 = vpop.f32.mrf.mxu2 }
  0xdf   :  { %v231_v32 = vpop.f32.mrf.mxu1  ;;  %v185_v35 = vadd.f32 %v184_v31, %v110_v33  ;;  %v303_v31 = vld [vmem:[%s9417_s3 + $0x48] sm:$0xff]  ;;  %v305_v33 = vld [vmem:[%s9417_s3 + $0x58] sm:$0xff] }
  0xe1   :  { %v232_v43 = vadd.f32 %v231_v32, %v185_v35  ;;  %v304_v32 = vld [vmem:[%s9417_s3 + $0x50] sm:$0xff]  ;;  %v307_v35 = vld [vmem:[%s9417_s3 + $0x68] sm:$0xff] }
  0xe3   :  { %v279_v53 = vadd.f32 %v278_v30, %v232_v43  ;;  %v302_v30 = vld [vmem:[%s9417_s3 + $0x40] sm:$0xff]  ;;  %v311_v43 = vld [vmem:[%s9417_s3 + $0x88] sm:$0xff] }
  0xe5   :  { %v292_v0 = vmax.f32 %v279_v53, 0.0 }
  0xe6   :  { %v187_v40 = vpop.f32.mrf.mxu0 }
  0xe7   :  { %v234_v41 = vpop.f32.mrf.mxu1  ;;  %v188_v44 = vadd.f32 %v187_v40, %v111_v37  ;;  %v309_v37 = vld [vmem:[%s9417_s3 + $0x78] sm:$0xff] }
  0xe9   :  { %v235_v49 = vadd.f32 %v234_v41, %v188_v44  ;;  %v5135_v41 = vmov 0  }
  0xea   :  { %4878 = vset.pattern.permute.xlu0 %v5135_v41  ;;  %4879 = vset.pattern.permute.xlu1 %v5135_v41 }
  0xeb   :  { %v282_v54 = vadd.f32 %v281_v46, %v235_v49  ;;  %4880 = vset.pattern.permute.xlu2 %v5135_v41  ;;  %v335_v46 = vld [vmem:[%s9418_s4 + $0x8] sm:$0xff]  ;;  %v312_v49 = vld [vmem:[%s9417_s3 + $0x90] sm:$0xff] }
  0xed   :  { %v293_v59 = vmax.f32 %v282_v54, 0.0  ;;  %v336_v54 = vld [vmem:[%s9418_s4 + $0x10] sm:$0xff] }
  0xef   :  { %501 = vmatpush.msra.mxu3 %v293_v59 }
  0xf1   :  { %502 = vmatpush.msra.mxu3 %v292_v0 }
  0xf3   :  { %503 = vmatpush.msra.mxu3 %v291_v5 }
  0xf5   :  { %504 = vmatpush.msra.mxu3 %v290_v23 }
  0xf7   :  { %505 = vmatpush.msra.mxu3 %v289_v24 }
  0xf9   :  { %506 = vmatpush.msra.mxu3 %v288_v17 }
  0xfb   :  { %507 = vmatpush.msra.mxu3 %v287_v7 }
  0xfd   :  { %508 = vmatpush.msra.mxu3 %v286_v18 }
  0xff   :  { %509 = vmatpush.msra.mxu3 %v285_v11 }
 0x101   :  { %510 = vmatpush.msra.mxu3 %v284_v15 }
 0x102   :  { %4709 = vmatmul.msk.f32.vlgmr.msra.gmra.mxu3 %vm374_vm1, %v294_v8  ;;  %v315_v8 = vld [vmem:[%s9417_s3 + $0xa8] sm:$0xff] }
 0x10a   :  { %4710 = vmatmul.msk.f32.gmra.mxu3 %vm374_vm1, %v295_v9 }
 0x112   :  { %4711 = vmatmul.msk.f32.gmra.mxu3 %vm374_vm1, %v296_v6 }
 0x11a   :  { %4712 = vmatmul.msk.f32.gmra.mxu3 %vm374_vm1, %v297_v12 }
 0x122   :  { %4713 = vmatmul.msk.f32.gmra.mxu3 %vm374_vm1, %v298_v26 }
 0x12a   :  { %4714 = vmatmul.msk.f32.gmra.mxu3 %vm374_vm1, %v299_v27 }
 0x132   :  { %4715 = vmatmul.msk.f32.gmra.mxu3 %vm374_vm1, %v300_v28 }
 0x13a   :  { %4716 = vmatmul.msk.f32.gmra.mxu3 %vm374_vm1, %v301_v29 }
 0x142   :  { %4717 = vmatmul.msk.f32.gmra.mxu3 %vm374_vm1, %v302_v30 }
 0x14a   :  { %4718 = vmatmul.msk.f32.gmra.mxu3 %vm374_vm1, %v303_v31 }
 0x152   :  { %4719 = vmatmul.msk.f32.gmra.mxu3 %vm374_vm1, %v304_v32  ;;  %v339_v32 = vld [vmem:[%s9418_s4 + $0x28] sm:$0xff] }
 0x15a   :  { %4720 = vmatmul.msk.f32.gmra.mxu3 %vm374_vm1, %v305_v33 }
 0x162   :  { %4721 = vmatmul.msk.f32.gmra.mxu3 %vm374_vm1, %v306_v34 }
 0x16a   :  { %4722 = vmatmul.msk.f32.gmra.mxu3 %vm374_vm1, %v307_v35 }
 0x172   :  { %4723 = vmatmul.msk.f32.gmra.mxu3 %vm374_vm1, %v308_v36 }
 0x17a   :  { %4724 = vmatmul.msk.f32.gmra.mxu3 %vm374_vm1, %v309_v37 }
 0x182   :  { %4725 = vmatmul.msk.f32.gmra.mxu3 %vm374_vm1, %v310_v38 }
 0x185   :  { %v512_v40 = vpop.f32.mrf.mxu3 }
 0x186   :  { %v513_v42 = vadd.f32 %v512_v40, %v334_v39  ;;  %v316_v40 = vld [vmem:[%s9417_s3 + $0xb0] sm:$0xff] }
 0x188   :  { %v632_v44 = vsub.f32 0.0, %v513_v42 }
 0x18a   :  { %v672_v45 = vmul.f32 1.442695, %v632_v44  ;;  %4726 = vmatmul.msk.f32.gmra.mxu3 %vm374_vm1, %v311_v43 }
 0x18c   :  { %4881 = vpow2.f32 %v672_v45 }
 0x18d   :  { %v515_v47 = vpop.f32.mrf.mxu3 }
 0x18e   :  { %v516_v48 = vadd.f32 %v515_v47, %v335_v46 }
 0x190   :  { %v633_v50 = vsub.f32 0.0, %v516_v48 }
 0x192   :  { %v4882_v51 = vpop.eup %4881  ;;  %v674_v52 = vmul.f32 1.442695, %v633_v50  ;;  %4727 = vmatmul.msk.f32.gmra.mxu3 %vm374_vm1, %v312_v49  ;;  %v340_v50 = vld [vmem:[%s9418_s4 + $0x30] sm:$0xff] }
 0x193   :  { %v752_v53 = vadd.f32 1.0, %v4882_v51 }
 0x194   :  { %4883 = vpow2.f32 %v674_v52 }
 0x195   :  { %4885 = vrcp.f32 %v752_v53  ;;  %v518_v55 = vpop.f32.mrf.mxu3  ;;  %v803_v5 = vand.u32 2147483648, %v752_v53  ;;  %v801_v22 = vand.u32 2147483647, %v752_v53  ;;  %vm797_vm3 = vweird.f32 %v752_v53 }
 0x196   :  { %v519_v56 = vadd.f32 %v518_v55, %v336_v54 }
 0x197   :  { %v804_v17 = vor.u32 1.1754944e-38, %v803_v5  ;;  %vm802_vm5 = vcmp.eq.f32.partialorder %v801_v22, 8.507059e+37 }
 0x198   :  { %v634_v58 = vsub.f32 0.0, %v519_v56 }
 0x19a   :  { %v4884_v59 = vpop.eup %4883  ;;  %v676_v60 = vmul.f32 1.442695, %v634_v58  ;;  %4728 = vmatmul.msk.f32.gmra.mxu3 %vm374_vm1, %v313_v57  ;;  %v317_v58 = vld [vmem:[%s9417_s3 + $0xb8] sm:$0xff] }
 0x19b   :  { %v4886_v61 = vpop.eup %4885  ;;  %v753_v62 = vadd.f32 1.0, %v4884_v59 }
 0x19c   :  { %4887 = vpow2.f32 %v676_v60  ;;  %v793_v0 = vmul.f32 %v4886_v61, %v752_v53  ;;  %vm798_vm2 = vweird.f32 %v4886_v61 }
 0x19d   :  { %4889 = vrcp.f32 %v753_v62  ;;  %v521_v1 = vpop.f32.mrf.mxu3  ;;  %vm799_vm4 = vmor %vm797_vm3, %vm798_vm2  ;;  %v818_v9 = vand.u32 2147483648, %v753_v62  ;;  %v816_v26 = vand.u32 2147483647, %v753_v62  ;;  %vm812_vm7 = vweird.f32 %v753_v62 }
 0x19e   :  { %v522_v2 = vadd.f32 %v521_v1, %v337_v63  ;;  %v794_v3 = vsub.f32 1.0, %v793_v0 }
 0x19f   :  { %v819_v33 = vor.u32 1.1754944e-38, %v818_v9  ;;  %vm817_vm9 = vcmp.eq.f32.partialorder %v816_v26, 8.507059e+37 }
 0x1a0   :  { %v635_v16 = vsub.f32 0.0, %v522_v2  ;;  %v795_v19 = vmul.f32 %v4886_v61, %v794_v3 }
 0x1a2   :  { %v4888_v23 = vpop.eup %4887  ;;  %v678_v13 = vmul.f32 1.442695, %v635_v16  ;;  %4729 = vmatmul.msk.f32.gmra.mxu3 %vm374_vm1, %v314_v4  ;;  %v796_v20 = vadd.f32 %v4886_v61, %v795_v19  ;;  %v341_v4 = vld [vmem:[%s9418_s4 + $0x38] sm:$0xff] }
 0x1a3   :  { %v4890_v24 = vpop.eup %4889  ;;  %v754_v25 = vadd.f32 1.0, %v4888_v23 }
 0x1a4   :  { %4891 = vpow2.f32 %v678_v13  ;;  %v800_v21 = vsel %vm799_vm4, %v4886_v61, %v796_v20  ;;  %v808_v7 = vmul.f32 %v4890_v24, %v753_v62  ;;  %vm813_vm6 = vweird.f32 %v4890_v24 }
 0x1a5   :  { %4893 = vrcp.f32 %v754_v25  ;;  %v524_v14 = vpop.f32.mrf.mxu3  ;;  %v805_v18 = vsel %vm802_vm5, %v804_v17, %v800_v21  ;;  %vm814_vm8 = vmor %vm812_vm7, %vm813_vm6  ;;  %v833_v41 = vand.u32 2147483648, %v754_v25  ;;  %v831_v44 = vand.u32 2147483647, %v754_v25 }
 0x1a6   :  { %v525_v11 = vadd.f32 %v524_v14, %v338_v10  ;;  %1474 = vperm.xlu0 %4878, %v805_v18   ;;  %v809_v15 = vsub.f32 1.0, %v808_v7  ;;  %vm827_vm11 = vweird.f32 %v754_v25 }
 0x1a7   :  { %v834_v51 = vor.u32 1.1754944e-38, %v833_v41  ;;  %vm832_vm13 = vcmp.eq.f32.partialorder %v831_v44, 8.507059e+37 }
 0x1a8   :  { %v636_v6 = vsub.f32 0.0, %v525_v11  ;;  %v810_v12 = vmul.f32 %v4890_v24, %v809_v15 }
 0x1aa   :  { %v4892_v27 = vpop.eup %4891  ;;  %v680_v28 = vmul.f32 1.442695, %v636_v6  ;;  %4730 = vmatmul.msk.f32.gmra.mxu3 %vm374_vm1, %v315_v8  ;;  %v811_v29 = vadd.f32 %v4890_v24, %v810_v12  ;;  %v342_v8 = vld [vmem:[%s9418_s4 + $0x40] sm:$0xff] }
 0x1ab   :  { %v4894_v30 = vpop.eup %4893  ;;  %v755_v31 = vadd.f32 1.0, %v4892_v27 }
 0x1ac   :  { %4895 = vpow2.f32 %v680_v28  ;;  %v815_v34 = vsel %vm814_vm8, %v4890_v24, %v811_v29  ;;  %v823_v35 = vmul.f32 %v4894_v30, %v754_v25  ;;  %vm828_vm10 = vweird.f32 %v4894_v30  ;;  %v318_v24 = vld [vmem:[%s9417_s3 + $0xc0] sm:$0xff] }
 0x1ad   :  { %4897 = vrcp.f32 %v755_v31  ;;  %v527_v36 = vpop.f32.mrf.mxu3  ;;  %v820_v37 = vsel %vm817_vm9, %v819_v33, %v815_v34  ;;  %vm829_vm12 = vmor %vm827_vm11, %vm828_vm10  ;;  %v848_v59 = vand.u32 2147483648, %v755_v31  ;;  %v846_v62 = vand.u32 2147483647, %v755_v31 }
 0x1ae   :  { %v528_v38 = vadd.f32 %v527_v36, %v339_v32  ;;  %1479 = vperm.xlu0 %4878, %v820_v37   ;;  %v824_v39 = vsub.f32 1.0, %v823_v35  ;;  %vm842_vm15 = vweird.f32 %v755_v31 }
 0x1af   :  { %v849_v5 = vor.u32 1.1754944e-38, %v848_v59  ;;  %vm847_vm3 = vcmp.eq.f32.partialorder %v846_v62, 8.507059e+37 }
 0x1b0   :  { %v637_v42 = vsub.f32 0.0, %v528_v38  ;;  %v825_v43 = vmul.f32 %v4894_v30, %v824_v39 }
 0x1b2   :  { %v4896_v45 = vpop.eup %4895  ;;  %v682_v46 = vmul.f32 1.442695, %v637_v42  ;;  %4731 = vmatmul.msk.f32.gmra.mxu3 %vm374_vm1, %v316_v40  ;;  %v826_v47 = vadd.f32 %v4894_v30, %v825_v43  ;;  %v343_v40 = vld [vmem:[%s9418_s4 + $0x48] sm:$0xff] }
 0x1b3   :  { %v4898_v48 = vpop.eup %4897  ;;  %v756_v49 = vadd.f32 1.0, %v4896_v45 }
 0x1b4   :  { %4899 = vpow2.f32 %v682_v46  ;;  %v830_v52 = vsel %vm829_vm12, %v4894_v30, %v826_v47  ;;  %v838_v53 = vmul.f32 %v4898_v48, %v755_v31  ;;  %vm843_vm14 = vweird.f32 %v4898_v48  ;;  %v319_v30 = vld [vmem:[%s9417_s3 + $0xc8] sm:$0xff] }
 0x1b5   :  { %4901 = vrcp.f32 %v756_v49  ;;  %v530_v54 = vpop.f32.mrf.mxu3  ;;  %v835_v55 = vsel %vm832_vm13, %v834_v51, %v830_v52  ;;  %vm844_vm2 = vmor %vm842_vm15, %vm843_vm14  ;;  %v863_v25 = vand.u32 2147483648, %v756_v49  ;;  %v861_v21 = vand.u32 2147483647, %v756_v49 }
 0x1b6   :  { %v531_v56 = vadd.f32 %v530_v54, %v340_v50  ;;  %1484 = vperm.xlu1 %4879, %v835_v55   ;;  %v839_v57 = vsub.f32 1.0, %v838_v53  ;;  %vm857_vm5 = vweird.f32 %v756_v49 }
 0x1b7   :  { %v864_v9 = vor.u32 1.1754944e-38, %v863_v25  ;;  %vm862_vm7 = vcmp.eq.f32.partialorder %v861_v21, 8.507059e+37 }
 0x1b8   :  { %v638_v60 = vsub.f32 0.0, %v531_v56  ;;  %v840_v61 = vmul.f32 %v4898_v48, %v839_v57 }
 0x1ba   :  { %v4900_v63 = vpop.eup %4899  ;;  %v684_v0 = vmul.f32 1.442695, %v638_v60  ;;  %4732 = vmatmul.msk.f32.gmra.mxu3 %vm374_vm1, %v317_v58  ;;  %v841_v1 = vadd.f32 %v4898_v48, %v840_v61  ;;  %v344_v58 = vld [vmem:[%s9418_s4 + $0x50] sm:$0xff] }
 0x1bb   :  { %v4902_v2 = vpop.eup %4901  ;;  %v757_v3 = vadd.f32 1.0, %v4900_v63 }
 0x1bc   :  { %4903 = vpow2.f32 %v684_v0  ;;  %v845_v16 = vsel %vm844_vm2, %v4898_v48, %v841_v1  ;;  %v853_v19 = vmul.f32 %v4902_v2, %v756_v49  ;;  %vm858_vm4 = vweird.f32 %v4902_v2  ;;  %v320_v48 = vld [vmem:[%s9417_s3 + $0xd0] sm:$0xff] }
 0x1bd   :  { %4905 = vrcp.f32 %v757_v3  ;;  %v533_v22 = vpop.f32.mrf.mxu3  ;;  %v850_v23 = vsel %vm847_vm3, %v849_v5, %v845_v16  ;;  %vm859_vm6 = vmor %vm857_vm5, %vm858_vm4  ;;  %v878_v31 = vand.u32 2147483648, %v757_v3  ;;  %v876_v34 = vand.u32 2147483647, %v757_v3 }
 0x1be   :  { %v534_v13 = vadd.f32 %v533_v22, %v341_v4  ;;  %1489 = vperm.xlu1 %4879, %v850_v23   ;;  %v854_v20 = vsub.f32 1.0, %v853_v19  ;;  %vm872_vm9 = vweird.f32 %v757_v3 }
 0x1bf   :  { %v879_v41 = vor.u32 1.1754944e-38, %v878_v31  ;;  %vm877_vm11 = vcmp.eq.f32.partialorder %v876_v34, 8.507059e+37 }
 0x1c0   :  { %v639_v10 = vsub.f32 0.0, %v534_v13  ;;  %v855_v17 = vmul.f32 %v4902_v2, %v854_v20 }
 0x1c2   :  { %v4904_v7 = vpop.eup %4903  ;;  %v686_v14 = vmul.f32 1.442695, %v639_v10  ;;  %4733 = vmatmul.msk.f32.gmra.mxu3 %vm374_vm1, %v318_v24  ;;  %v856_v18 = vadd.f32 %v4902_v2, %v855_v17  ;;  %v345_v24 = vld [vmem:[%s9418_s4 + $0x58] sm:$0xff] }
 0x1c3   :  { %v4906_v11 = vpop.eup %4905  ;;  %v758_v15 = vadd.f32 1.0, %v4904_v7 }
 0x1c4   :  { %4907 = vpow2.f32 %v686_v14  ;;  %v860_v6 = vsel %vm859_vm6, %v4902_v2, %v856_v18  ;;  %v868_v12 = vmul.f32 %v4906_v11, %v757_v3  ;;  %vm873_vm8 = vweird.f32 %v4906_v11  ;;  %v321_v2 = vld [vmem:[%s9417_s3 + $0xd8] sm:$0xff] }
 0x1c5   :  { %4909 = vrcp.f32 %v758_v15  ;;  %v536_v26 = vpop.f32.mrf.mxu3  ;;  %v865_v27 = vsel %vm862_vm7, %v864_v9, %v860_v6  ;;  %vm874_vm10 = vmor %vm872_vm9, %vm873_vm8  ;;  %v893_v49 = vand.u32 2147483648, %v758_v15  ;;  %v891_v52 = vand.u32 2147483647, %v758_v15 }
 0x1c6   :  { %v537_v28 = vadd.f32 %v536_v26, %v342_v8  ;;  %1494 = vperm.xlu2 %4880, %v865_v27   ;;  %v869_v29 = vsub.f32 1.0, %v868_v12  ;;  %vm887_vm13 = vweird.f32 %v758_v15 }
 0x1c7   :  { %v894_v59 = vor.u32 1.1754944e-38, %v893_v49  ;;  %vm892_vm15 = vcmp.eq.f32.partialorder %v891_v52, 8.507059e+37 }
 0x1c8   :  { %v640_v32 = vsub.f32 0.0, %v537_v28  ;;  %v870_v33 = vmul.f32 %v4906_v11, %v869_v29 }
 0x1ca   :  { %v4908_v35 = vpop.eup %4907  ;;  %v688_v36 = vmul.f32 1.442695, %v640_v32  ;;  %4734 = vmatmul.msk.f32.gmra.mxu3 %vm374_vm1, %v319_v30  ;;  %v871_v37 = vadd.f32 %v4906_v11, %v870_v33  ;;  %v346_v30 = vld [vmem:[%s9418_s4 + $0x60] sm:$0xff] }
 0x1cb   :  { %v4910_v38 = vpop.eup %4909  ;;  %v759_v39 = vadd.f32 1.0, %v4908_v35 }
 0x1cc   :  { %4911 = vpow2.f32 %v688_v36  ;;  %v875_v42 = vsel %vm874_vm10, %v4906_v11, %v871_v37  ;;  %v883_v43 = vmul.f32 %v4910_v38, %v758_v15  ;;  %vm888_vm12 = vweird.f32 %v4910_v38  ;;  %v322_v11 = vld [vmem:[%s9417_s3 + $0xe0] sm:$0xff] }
 0x1cd   :  { %4913 = vrcp.f32 %v759_v39  ;;  %v539_v44 = vpop.f32.mrf.mxu3  ;;  %v880_v45 = vsel %vm877_vm11, %v879_v41, %v875_v42  ;;  %vm889_vm14 = vmor %vm887_vm13, %vm888_vm12  ;;  %v908_v3 = vand.u32 2147483648, %v759_v39  ;;  %v906_v16 = vand.u32 2147483647, %v759_v39 }
 0x1ce   :  { %v540_v46 = vadd.f32 %v539_v44, %v343_v40  ;;  %1499 = vperm.xlu2 %4880, %v880_v45   ;;  %v884_v47 = vsub.f32 1.0, %v883_v43  ;;  %vm902_vm3 = vweird.f32 %v759_v39 }
 0x1cf   :  { %v909_v25 = vor.u32 1.1754944e-38, %v908_v3  ;;  %vm907_vm5 = vcmp.eq.f32.partialorder %v906_v16, 8.507059e+37 }
 0x1d0   :  { %v641_v50 = vsub.f32 0.0, %v540_v46  ;;  %v885_v51 = vmul.f32 %v4910_v38, %v884_v47 }
 0x1d2   :  { %v4912_v53 = vpop.eup %4911  ;;  %v690_v54 = vmul.f32 1.442695, %v641_v50  ;;  %4735 = vmatmul.msk.f32.gmra.mxu3 %vm374_vm1, %v320_v48  ;;  %v886_v55 = vadd.f32 %v4910_v38, %v885_v51  ;;  %v347_v48 = vld [vmem:[%s9418_s4 + $0x68] sm:$0xff] }
 0x1d3   :  { %v4914_v56 = vpop.eup %4913  ;;  %v760_v57 = vadd.f32 1.0, %v4912_v53 }
 0x1d4   :  { %4915 = vpow2.f32 %v690_v54  ;;  %v890_v60 = vsel %vm889_vm14, %v4910_v38, %v886_v55  ;;  %v898_v61 = vmul.f32 %v4914_v56, %v759_v39  ;;  %vm903_vm2 = vweird.f32 %v4914_v56  ;;  %v323_v38 = vld [vmem:[%s9417_s3 + $0xe8] sm:$0xff] }
 0x1d5   :  { %4917 = vrcp.f32 %v760_v57  ;;  %v542_v62 = vpop.f32.mrf.mxu3  ;;  %v895_v63 = vsel %vm892_vm15, %v894_v59, %v890_v60  ;;  %vm904_vm4 = vmor %vm902_vm3, %vm903_vm2  ;;  %v923_v15 = vand.u32 2147483648, %v760_v57  ;;  %v921_v6 = vand.u32 2147483647, %v760_v57 }
 0x1d6   :  { %v543_v0 = vadd.f32 %v542_v62, %v344_v58  ;;  %1504 = vperm.xlu0 %4878, %v895_v63   ;;  %v899_v1 = vsub.f32 1.0, %v898_v61  ;;  %vm917_vm7 = vweird.f32 %v760_v57 }
 0x1d7   :  { %v924_v31 = vor.u32 1.1754944e-38, %v923_v15  ;;  %vm922_vm9 = vcmp.eq.f32.partialorder %v921_v6, 8.507059e+37 }
 0x1d8   :  { %v642_v4 = vsub.f32 0.0, %v543_v0  ;;  %v900_v5 = vmul.f32 %v4914_v56, %v899_v1 }
 0x1da   :  { %v4916_v19 = vpop.eup %4915  ;;  %v692_v22 = vmul.f32 1.442695, %v642_v4  ;;  %4736 = vmatmul.msk.f32.gmra.mxu3 %vm374_vm1, %v321_v2  ;;  %v901_v23 = vadd.f32 %v4914_v56, %v900_v5  ;;  %v348_v2 = vld [vmem:[%s9418_s4 + $0x70] sm:$0xff] }
 0x1db   :  { %v4918_v13 = vpop.eup %4917  ;;  %v761_v20 = vadd.f32 1.0, %v4916_v19 }
 0x1dc   :  { %4919 = vpow2.f32 %v692_v22  ;;  %v905_v10 = vsel %vm904_vm4, %v4914_v56, %v901_v23  ;;  %v913_v17 = vmul.f32 %v4918_v13, %v760_v57  ;;  %vm918_vm6 = vweird.f32 %v4918_v13  ;;  %v324_v56 = vld [vmem:[%s9417_s3 + $0xf0] sm:$0xff] }
 0x1dd   :  { %4921 = vrcp.f32 %v761_v20  ;;  %v545_v21 = vpop.f32.mrf.mxu3  ;;  %v910_v7 = vsel %vm907_vm5, %v909_v25, %v905_v10  ;;  %vm919_vm8 = vmor %vm917_vm7, %vm918_vm6  ;;  %v938_v39 = vand.u32 2147483648, %v761_v20  ;;  %v936_v42 = vand.u32 2147483647, %v761_v20 }
 0x1de   :  { %v546_v14 = vadd.f32 %v545_v21, %v345_v24  ;;  %1509 = vperm.xlu1 %4879, %v910_v7   ;;  %v914_v18 = vsub.f32 1.0, %v913_v17  ;;  %vm932_vm11 = vweird.f32 %v761_v20 }
 0x1df   :  { %v939_v49 = vor.u32 1.1754944e-38, %v938_v39  ;;  %vm937_vm13 = vcmp.eq.f32.partialorder %v936_v42, 8.507059e+37 }
 0x1e0   :  { %v643_v8 = vsub.f32 0.0, %v546_v14  ;;  %v915_v9 = vmul.f32 %v4918_v13, %v914_v18 }
 0x1e2   :  { %v4920_v12 = vpop.eup %4919  ;;  %v694_v26 = vmul.f32 1.442695, %v643_v8  ;;  %4737 = vmatmul.msk.f32.gmra.mxu3 %vm374_vm1, %v322_v11  ;;  %v916_v27 = vadd.f32 %v4918_v13, %v915_v9  ;;  %v349_v11 = vld [vmem:[%s9418_s4 + $0x78] sm:$0xff] }
 0x1e3   :  { %v4922_v28 = vpop.eup %4921  ;;  %v762_v29 = vadd.f32 1.0, %v4920_v12 }
 0x1e4   :  { %4923 = vpow2.f32 %v694_v26  ;;  %v920_v32 = vsel %vm919_vm8, %v4918_v13, %v916_v27  ;;  %v928_v33 = vmul.f32 %v4922_v28, %v761_v20  ;;  %vm933_vm10 = vweird.f32 %v4922_v28  ;;  %v325_v13 = vld [vmem:[%s9417_s3 + $0xf8] sm:$0xff] }
 0x1e5   :  { %4925 = vrcp.f32 %v762_v29  ;;  %v548_v34 = vpop.f32.mrf.mxu3  ;;  %v925_v35 = vsel %vm922_vm9, %v924_v31, %v920_v32  ;;  %vm934_vm12 = vmor %vm932_vm11, %vm933_vm10  ;;  %v953_v57 = vand.u32 2147483648, %v762_v29  ;;  %v951_v60 = vand.u32 2147483647, %v762_v29 }
 0x1e6   :  { %v549_v36 = vadd.f32 %v548_v34, %v346_v30  ;;  %1514 = vperm.xlu2 %4880, %v925_v35   ;;  %v929_v37 = vsub.f32 1.0, %v928_v33  ;;  %vm947_vm15 = vweird.f32 %v762_v29 }
 0x1e7   :  { %v954_v3 = vor.u32 1.1754944e-38, %v953_v57  ;;  %vm952_vm3 = vcmp.eq.f32.partialorder %v951_v60, 8.507059e+37 }
 0x1e8   :  { %v644_v40 = vsub.f32 0.0, %v549_v36  ;;  %v930_v41 = vmul.f32 %v4922_v28, %v929_v37 }
 0x1ea   :  { %v4924_v43 = vpop.eup %4923  ;;  %v696_v44 = vmul.f32 1.442695, %v644_v40  ;;  %4738 = vmatmul.msk.f32.gmra.mxu3 %vm374_vm1, %v323_v38  ;;  %v931_v45 = vadd.f32 %v4922_v28, %v930_v41  ;;  %v350_v38 = vld [vmem:[%s9418_s4 + $0x80] sm:$0xff] }
 0x1eb   :  { %v4926_v46 = vpop.eup %4925  ;;  %v763_v47 = vadd.f32 1.0, %v4924_v43 }
 0x1ec   :  { %4927 = vpow2.f32 %v696_v44  ;;  %v935_v50 = vsel %vm934_vm12, %v4922_v28, %v931_v45  ;;  %v943_v51 = vmul.f32 %v4926_v46, %v762_v29  ;;  %vm948_vm14 = vweird.f32 %v4926_v46  ;;  %v326_v28 = vld [vmem:[%s9417_s3 + $0x100] sm:$0xff] }
 0x1ed   :  { %4929 = vrcp.f32 %v763_v47  ;;  %v551_v52 = vpop.f32.mrf.mxu3  ;;  %v940_v53 = vsel %vm937_vm13, %v939_v49, %v935_v50  ;;  %vm949_vm2 = vmor %vm947_vm15, %vm948_vm14  ;;  %v968_v20 = vand.u32 2147483648, %v763_v47  ;;  %v966_v10 = vand.u32 2147483647, %v763_v47 }
 0x1ee   :  { %v552_v54 = vadd.f32 %v551_v52, %v347_v48  ;;  %1519 = vperm.xlu0 %4878, %v940_v53   ;;  %v944_v55 = vsub.f32 1.0, %v943_v51  ;;  %vm962_vm5 = vweird.f32 %v763_v47 }
 0x1ef   :  { %v969_v15 = vor.u32 1.1754944e-38, %v968_v20  ;;  %vm967_vm7 = vcmp.eq.f32.partialorder %v966_v10, 8.507059e+37 }
 0x1f0   :  { %v645_v58 = vsub.f32 0.0, %v552_v54  ;;  %v945_v59 = vmul.f32 %v4926_v46, %v944_v55 }
 0x1f2   :  { %v4928_v61 = vpop.eup %4927  ;;  %v698_v62 = vmul.f32 1.442695, %v645_v58  ;;  %4739 = vmatmul.msk.f32.gmra.mxu3 %vm374_vm1, %v324_v56  ;;  %v946_v63 = vadd.f32 %v4926_v46, %v945_v59  ;;  %v351_v56 = vld [vmem:[%s9418_s4 + $0x88] sm:$0xff] }
 0x1f3   :  { %v4930_v0 = vpop.eup %4929  ;;  %v764_v1 = vadd.f32 1.0, %v4928_v61 }
 0x1f4   :  { %4931 = vpow2.f32 %v698_v62  ;;  %v950_v4 = vsel %vm949_vm2, %v4926_v46, %v946_v63  ;;  %v958_v5 = vmul.f32 %v4930_v0, %v763_v47  ;;  %vm963_vm4 = vweird.f32 %v4930_v0  ;;  %v327_v46 = vld [vmem:[%s9417_s3 + $0x108] sm:$0xff] }
 0x1f5   :  { %4933 = vrcp.f32 %v764_v1  ;;  %v554_v16 = vpop.f32.mrf.mxu3  ;;  %v955_v19 = vsel %vm952_vm3, %v954_v3, %v950_v4  ;;  %vm964_vm6 = vmor %vm962_vm5, %vm963_vm4  ;;  %v983_v29 = vand.u32 2147483648, %v764_v1  ;;  %v981_v32 = vand.u32 2147483647, %v764_v1 }
 0x1f6   :  { %v555_v22 = vadd.f32 %v554_v16, %v348_v2  ;;  %1524 = vperm.xlu1 %4879, %v955_v19   ;;  %v959_v23 = vsub.f32 1.0, %v958_v5  ;;  %vm977_vm9 = vweird.f32 %v764_v1 }
 0x1f7   :  { %v984_v39 = vor.u32 1.1754944e-38, %v983_v29  ;;  %vm982_vm11 = vcmp.eq.f32.partialorder %v981_v32, 8.507059e+37 }
 0x1f8   :  { %v646_v24 = vsub.f32 0.0, %v555_v22  ;;  %v960_v25 = vmul.f32 %v4930_v0, %v959_v23 }
 0x1fa   :  { %v4932_v17 = vpop.eup %4931  ;;  %v700_v21 = vmul.f32 1.442695, %v646_v24  ;;  %4740 = vmatmul.msk.f32.gmra.mxu3 %vm374_vm1, %v325_v13  ;;  %v961_v7 = vadd.f32 %v4930_v0, %v960_v25  ;;  %v352_v13 = vld [vmem:[%s9418_s4 + $0x90] sm:$0xff] }
 0x1fb   :  { %v4934_v14 = vpop.eup %4933  ;;  %v765_v18 = vadd.f32 1.0, %v4932_v17 }
 0x1fc   :  { %4935 = vpow2.f32 %v700_v21  ;;  %v965_v8 = vsel %vm964_vm6, %v4930_v0, %v961_v7  ;;  %v973_v9 = vmul.f32 %v4934_v14, %v764_v1  ;;  %vm978_vm8 = vweird.f32 %v4934_v14  ;;  %v328_v0 = vld [vmem:[%s9417_s3 + $0x110] sm:$0xff] }
 0x1fd   :  { %4937 = vrcp.f32 %v765_v18  ;;  %v557_v6 = vpop.f32.mrf.mxu3  ;;  %v970_v12 = vsel %vm967_vm7, %v969_v15, %v965_v8  ;;  %vm979_vm10 = vmor %vm977_vm9, %vm978_vm8  ;;  %v998_v47 = vand.u32 2147483648, %v765_v18  ;;  %v996_v50 = vand.u32 2147483647, %v765_v18 }
 0x1fe   :  { %v558_v26 = vadd.f32 %v557_v6, %v349_v11  ;;  %1529 = vperm.xlu2 %4880, %v970_v12   ;;  %v974_v27 = vsub.f32 1.0, %v973_v9  ;;  %vm992_vm13 = vweird.f32 %v765_v18 }
 0x1ff   :  { %v999_v57 = vor.u32 1.1754944e-38, %v998_v47  ;;  %vm997_vm15 = vcmp.eq.f32.partialorder %v996_v50, 8.507059e+37 }
 0x200   :  { %v647_v30 = vsub.f32 0.0, %v558_v26  ;;  %v975_v31 = vmul.f32 %v4934_v14, %v974_v27 }
 0x202   :  { %v4936_v33 = vpop.eup %4935  ;;  %v702_v34 = vmul.f32 1.442695, %v647_v30  ;;  %4741 = vmatmul.msk.f32.gmra.mxu3 %vm374_vm1, %v326_v28  ;;  %v976_v35 = vadd.f32 %v4934_v14, %v975_v31  ;;  %v353_v28 = vld [vmem:[%s9418_s4 + $0x98] sm:$0xff] }
 0x203   :  { %v4938_v36 = vpop.eup %4937  ;;  %v766_v37 = vadd.f32 1.0, %v4936_v33 }
 0x204   :  { %4939 = vpow2.f32 %v702_v34  ;;  %v980_v40 = vsel %vm979_vm10, %v4934_v14, %v976_v35  ;;  %v988_v41 = vmul.f32 %v4938_v36, %v765_v18  ;;  %vm993_vm12 = vweird.f32 %v4938_v36  ;;  %v329_v14 = vld [vmem:[%s9417_s3 + $0x118] sm:$0xff] }
 0x205   :  { %4941 = vrcp.f32 %v766_v37  ;;  %v560_v42 = vpop.f32.mrf.mxu3  ;;  %v985_v43 = vsel %vm982_vm11, %v984_v39, %v980_v40  ;;  %vm994_vm14 = vmor %vm992_vm13, %vm993_vm12  ;;  %v1013_v1 = vand.u32 2147483648, %v766_v37  ;;  %v1011_v4 = vand.u32 2147483647, %v766_v37 }
 0x206   :  { %v561_v44 = vadd.f32 %v560_v42, %v350_v38  ;;  %1534 = vperm.xlu0 %4878, %v985_v43   ;;  %v989_v45 = vsub.f32 1.0, %v988_v41  ;;  %vm1007_vm3 = vweird.f32 %v766_v37 }
 0x207   :  { %v1014_v20 = vor.u32 1.1754944e-38, %v1013_v1  ;;  %vm1012_vm5 = vcmp.eq.f32.partialorder %v1011_v4, 8.507059e+37 }
 0x208   :  { %v648_v48 = vsub.f32 0.0, %v561_v44  ;;  %v990_v49 = vmul.f32 %v4938_v36, %v989_v45 }
 0x20a   :  { %v4940_v51 = vpop.eup %4939  ;;  %v704_v52 = vmul.f32 1.442695, %v648_v48  ;;  %4742 = vmatmul.msk.f32.gmra.mxu3 %vm374_vm1, %v327_v46  ;;  %v991_v53 = vadd.f32 %v4938_v36, %v990_v49  ;;  %v354_v46 = vld [vmem:[%s9418_s4 + $0xa0] sm:$0xff] }
 0x20b   :  { %v4942_v54 = vpop.eup %4941  ;;  %v767_v55 = vadd.f32 1.0, %v4940_v51 }
 0x20c   :  { %4943 = vpow2.f32 %v704_v52  ;;  %v995_v58 = vsel %vm994_vm14, %v4938_v36, %v991_v53  ;;  %v1003_v59 = vmul.f32 %v4942_v54, %v766_v37  ;;  %vm1008_vm2 = vweird.f32 %v4942_v54  ;;  %v330_v36 = vld [vmem:[%s9417_s3 + $0x120] sm:$0xff] }
 0x20d   :  { %4945 = vrcp.f32 %v767_v55  ;;  %v563_v60 = vpop.f32.mrf.mxu3  ;;  %v1000_v61 = vsel %vm997_vm15, %v999_v57, %v995_v58  ;;  %vm1009_vm4 = vmor %vm1007_vm3, %vm1008_vm2  ;;  %v1028_v18 = vand.u32 2147483648, %v767_v55  ;;  %v1026_v8 = vand.u32 2147483647, %v767_v55 }
 0x20e   :  { %v564_v62 = vadd.f32 %v563_v60, %v351_v56  ;;  %1539 = vperm.xlu1 %4879, %v1000_v61   ;;  %v1004_v63 = vsub.f32 1.0, %v1003_v59  ;;  %vm1022_vm7 = vweird.f32 %v767_v55 }
 0x20f   :  { %v1029_v29 = vor.u32 1.1754944e-38, %v1028_v18  ;;  %vm1027_vm9 = vcmp.eq.f32.partialorder %v1026_v8, 8.507059e+37 }
 0x210   :  { %v649_v2 = vsub.f32 0.0, %v564_v62  ;;  %v1005_v3 = vmul.f32 %v4942_v54, %v1004_v63 }
 0x212   :  { %v4944_v5 = vpop.eup %4943  ;;  %v706_v16 = vmul.f32 1.442695, %v649_v2  ;;  %4743 = vmatmul.msk.f32.gmra.mxu3 %vm374_vm1, %v328_v0  ;;  %v1006_v19 = vadd.f32 %v4942_v54, %v1005_v3  ;;  %v355_v0 = vld [vmem:[%s9418_s4 + $0xa8] sm:$0xff] }
 0x213   :  { %v4946_v22 = vpop.eup %4945  ;;  %v768_v23 = vadd.f32 1.0, %v4944_v5 }
 0x214   :  { %4947 = vpow2.f32 %v706_v16  ;;  %v1010_v24 = vsel %vm1009_vm4, %v4942_v54, %v1006_v19  ;;  %v1018_v25 = vmul.f32 %v4946_v22, %v767_v55  ;;  %vm1023_vm6 = vweird.f32 %v4946_v22  ;;  %v331_v54 = vld [vmem:[%s9417_s3 + $0x128] sm:$0xff] }
 0x215   :  { %4949 = vrcp.f32 %v768_v23  ;;  %v566_v10 = vpop.f32.mrf.mxu3  ;;  %v1015_v17 = vsel %vm1012_vm5, %v1014_v20, %v1010_v24  ;;  %vm1024_vm8 = vmor %vm1022_vm7, %vm1023_vm6  ;;  %v1043_v37 = vand.u32 2147483648, %v768_v23  ;;  %v1041_v40 = vand.u32 2147483647, %v768_v23 }
 0x216   :  { %v567_v21 = vadd.f32 %v566_v10, %v352_v13  ;;  %1544 = vperm.xlu2 %4880, %v1015_v17   ;;  %v1019_v7 = vsub.f32 1.0, %v1018_v25  ;;  %vm1037_vm11 = vweird.f32 %v768_v23 }
 0x217   :  { %v1044_v47 = vor.u32 1.1754944e-38, %v1043_v37  ;;  %vm1042_vm13 = vcmp.eq.f32.partialorder %v1041_v40, 8.507059e+37 }
 0x218   :  { %v650_v11 = vsub.f32 0.0, %v567_v21  ;;  %v1020_v15 = vmul.f32 %v4946_v22, %v1019_v7 }
 0x21a   :  { %v4948_v9 = vpop.eup %4947  ;;  %v708_v6 = vmul.f32 1.442695, %v650_v11  ;;  %4744 = vmatmul.msk.f32.gmra.mxu3 %vm374_vm1, %v329_v14  ;;  %v1021_v12 = vadd.f32 %v4946_v22, %v1020_v15  ;;  %v356_v14 = vld [vmem:[%s9418_s4 + $0xb0] sm:$0xff] }
 0x21b   :  { %v4950_v26 = vpop.eup %4949  ;;  %v769_v27 = vadd.f32 1.0, %v4948_v9 }
 0x21c   :  { %4951 = vpow2.f32 %v708_v6  ;;  %v1025_v30 = vsel %vm1024_vm8, %v4946_v22, %v1021_v12  ;;  %v1033_v31 = vmul.f32 %v4950_v26, %v768_v23  ;;  %vm1038_vm10 = vweird.f32 %v4950_v26  ;;  %v332_v22 = vld [vmem:[%s9417_s3 + $0x130] sm:$0xff] }
 0x21d   :  { %4953 = vrcp.f32 %v769_v27  ;;  %v569_v32 = vpop.f32.mrf.mxu3  ;;  %v1030_v33 = vsel %vm1027_vm9, %v1029_v29, %v1025_v30  ;;  %vm1039_vm12 = vmor %vm1037_vm11, %vm1038_vm10  ;;  %v1058_v55 = vand.u32 2147483648, %v769_v27  ;;  %v1056_v58 = vand.u32 2147483647, %v769_v27 }
 0x21e   :  { %v570_v34 = vadd.f32 %v569_v32, %v353_v28  ;;  %1549 = vperm.xlu0 %4878, %v1030_v33   ;;  %v1034_v35 = vsub.f32 1.0, %v1033_v31  ;;  %vm1052_vm15 = vweird.f32 %v769_v27 }
 0x21f   :  { %v1059_v1 = vor.u32 1.1754944e-38, %v1058_v55  ;;  %vm1057_vm3 = vcmp.eq.f32.partialorder %v1056_v58, 8.507059e+37 }
 0x220   :  { %v651_v38 = vsub.f32 0.0, %v570_v34  ;;  %v1035_v39 = vmul.f32 %v4950_v26, %v1034_v35 }
 0x222   :  { %v4952_v41 = vpop.eup %4951  ;;  %v710_v42 = vmul.f32 1.442695, %v651_v38  ;;  %4745 = vmatmul.msk.f32.gmra.mxu3 %vm374_vm1, %v330_v36  ;;  %v1036_v43 = vadd.f32 %v4950_v26, %v1035_v39  ;;  %v357_v36 = vld [vmem:[%s9418_s4 + $0xb8] sm:$0xff] }
 0x223   :  { %v4954_v44 = vpop.eup %4953  ;;  %v770_v45 = vadd.f32 1.0, %v4952_v41 }
 0x224   :  { %4955 = vpow2.f32 %v710_v42  ;;  %v1040_v48 = vsel %vm1039_vm12, %v4950_v26, %v1036_v43  ;;  %v1048_v49 = vmul.f32 %v4954_v44, %v769_v27  ;;  %vm1053_vm14 = vweird.f32 %v4954_v44  ;;  %v333_v26 = vld [vmem:[%s9417_s3 + $0x138] sm:$0xff] }
 0x225   :  { %4957 = vrcp.f32 %v770_v45  ;;  %v572_v50 = vpop.f32.mrf.mxu3  ;;  %v1045_v51 = vsel %vm1042_vm13, %v1044_v47, %v1040_v48  ;;  %vm1054_vm2 = vmor %vm1052_vm15, %vm1053_vm14  ;;  %v1073_v23 = vand.u32 2147483648, %v770_v45  ;;  %v1071_v24 = vand.u32 2147483647, %v770_v45 }
 0x226   :  { %v573_v52 = vadd.f32 %v572_v50, %v354_v46  ;;  %1554 = vperm.xlu1 %4879, %v1045_v51   ;;  %v1049_v53 = vsub.f32 1.0, %v1048_v49  ;;  %vm1067_vm5 = vweird.f32 %v770_v45 }
 0x227   :  { %v1074_v18 = vor.u32 1.1754944e-38, %v1073_v23  ;;  %vm1072_vm7 = vcmp.eq.f32.partialorder %v1071_v24, 8.507059e+37 }
 0x228   :  { %v652_v56 = vsub.f32 0.0, %v573_v52  ;;  %v1050_v57 = vmul.f32 %v4954_v44, %v1049_v53  ;;  %v358_v53 = vld [vmem:[%s9418_s4 + $0xc0] sm:$0xff] }
 0x22a   :  { %v4956_v59 = vpop.eup %4955  ;;  %v712_v60 = vmul.f32 1.442695, %v652_v56  ;;  %4746 = vmatmul.msk.f32.gmra.mxu3 %vm374_vm1, %v331_v54  ;;  %v1051_v61 = vadd.f32 %v4954_v44, %v1050_v57 }
 0x22b   :  { %v4958_v62 = vpop.eup %4957  ;;  %v771_v63 = vadd.f32 1.0, %v4956_v59 }
 0x22c   :  { %4959 = vpow2.f32 %v712_v60  ;;  %v1055_v2 = vsel %vm1054_vm2, %v4954_v44, %v1051_v61  ;;  %v1063_v3 = vmul.f32 %v4958_v62, %v770_v45  ;;  %vm1068_vm4 = vweird.f32 %v4958_v62 }
 0x22d   :  { %4961 = vrcp.f32 %v771_v63  ;;  %v575_v4 = vpop.f32.mrf.mxu3  ;;  %v1060_v5 = vsel %vm1057_vm3, %v1059_v1, %v1055_v2  ;;  %vm1069_vm6 = vmor %vm1067_vm5, %vm1068_vm4  ;;  %v1088_v27 = vand.u32 2147483648, %v771_v63  ;;  %v1086_v30 = vand.u32 2147483647, %v771_v63 }
 0x22e   :  { %v576_v16 = vadd.f32 %v575_v4, %v355_v0  ;;  %1559 = vperm.xlu2 %4880, %v1060_v5   ;;  %v1064_v19 = vsub.f32 1.0, %v1063_v3  ;;  %vm1082_vm9 = vweird.f32 %v771_v63 }
 0x22f   :  { %v1089_v37 = vor.u32 1.1754944e-38, %v1088_v27  ;;  %vm1087_vm11 = vcmp.eq.f32.partialorder %v1086_v30, 8.507059e+37 }
 0x230   :  { %v653_v13 = vsub.f32 0.0, %v576_v16  ;;  %v1065_v20 = vmul.f32 %v4958_v62, %v1064_v19  ;;  %v359_v16 = vld [vmem:[%s9418_s4 + $0xc8] sm:$0xff] }
 0x232   :  { %v4960_v25 = vpop.eup %4959  ;;  %v714_v10 = vmul.f32 1.442695, %v653_v13  ;;  %4747 = vmatmul.msk.f32.gmra.mxu3 %vm374_vm1, %v332_v22  ;;  %v1066_v17 = vadd.f32 %v4958_v62, %v1065_v20 }
 0x233   :  { %v4962_v21 = vpop.eup %4961  ;;  %v772_v7 = vadd.f32 1.0, %v4960_v25 }
 0x234   :  { %4963 = vpow2.f32 %v714_v10  ;;  %v1070_v11 = vsel %vm1069_vm6, %v4958_v62, %v1066_v17  ;;  %v1078_v15 = vmul.f32 %v4962_v21, %v771_v63  ;;  %vm1083_vm8 = vweird.f32 %v4962_v21 }
 0x235   :  { %4965 = vrcp.f32 %v772_v7  ;;  %v578_v8 = vpop.f32.mrf.mxu3  ;;  %v1075_v9 = vsel %vm1072_vm7, %v1074_v18, %v1070_v11  ;;  %vm1084_vm10 = vmor %vm1082_vm9, %vm1083_vm8  ;;  %v1103_v44 = vand.u32 2147483648, %v772_v7  ;;  %v1101_v47 = vand.u32 2147483647, %v772_v7 }
 0x236   :  { %v579_v6 = vadd.f32 %v578_v8, %v356_v14  ;;  %1564 = vperm.xlu0 %4878, %v1075_v9   ;;  %v1079_v12 = vsub.f32 1.0, %v1078_v15  ;;  %vm1097_vm12 = vweird.f32 %v772_v7  ;;  %v360_v9 = vld [vmem:[%s9418_s4 + $0xd0] sm:$0xff] }
 0x237   :  { %v1104_v54 = vor.u32 1.1754944e-38, %v1103_v44  ;;  %vm1102_vm14 = vcmp.eq.f32.partialorder %v1101_v47, 8.507059e+37 }
 0x238   :  { %v654_v28 = vsub.f32 0.0, %v579_v6  ;;  %v1080_v29 = vmul.f32 %v4962_v21, %v1079_v12 }
 0x23a   :  { %v4964_v31 = vpop.eup %4963  ;;  %v716_v32 = vmul.f32 1.442695, %v654_v28  ;;  %4748 = vmatmul.msk.f32.gmra.mxu3 %vm374_vm1, %v333_v26  ;;  %v1081_v33 = vadd.f32 %v4962_v21, %v1080_v29 }
 0x23b   :  { %v4966_v34 = vpop.eup %4965  ;;  %v773_v35 = vadd.f32 1.0, %v4964_v31 }
 0x23c   :  { %4967 = vpow2.f32 %v716_v32  ;;  %v1085_v38 = vsel %vm1084_vm10, %v4962_v21, %v1081_v33  ;;  %v1093_v39 = vmul.f32 %v4966_v34, %v772_v7  ;;  %vm1098_vm1 = vweird.f32 %v4966_v34 }
 0x23d   :  { %4969 = vrcp.f32 %v773_v35  ;;  %v581_v40 = vpop.f32.mrf.mxu3  ;;  %v1090_v41 = vsel %vm1087_vm11, %v1089_v37, %v1085_v38  ;;  %vm1099_vm13 = vmor %vm1097_vm12, %vm1098_vm1  ;;  %v1118_v61 = vand.u32 2147483648, %v773_v35  ;;  %v1116_v0 = vand.u32 2147483647, %v773_v35 }
 0x23e   :  { %v582_v42 = vadd.f32 %v581_v40, %v357_v36  ;;  %1569 = vperm.xlu1 %4879, %v1090_v41   ;;  %v1094_v43 = vsub.f32 1.0, %v1093_v39  ;;  %vm1112_vm2 = vweird.f32 %v773_v35  ;;  %v361_v40 = vld [vmem:[%s9418_s4 + $0xd8] sm:$0xff] }
 0x23f   :  { %v1119_v19 = vor.u32 1.1754944e-38, %v1118_v61  ;;  %vm1117_vm4 = vcmp.eq.f32.partialorder %v1116_v0, 8.507059e+37 }
 0x240   :  { %v655_v45 = vsub.f32 0.0, %v582_v42  ;;  %v1095_v46 = vmul.f32 %v4966_v34, %v1094_v43 }
 0x242   :  { %v4968_v48 = vpop.eup %4967  ;;  %v718_v49 = vmul.f32 1.442695, %v655_v45  ;;  %v1096_v50 = vadd.f32 %v4966_v34, %v1095_v46 }
 0x243   :  { %v4970_v51 = vpop.eup %4969  ;;  %v774_v52 = vadd.f32 1.0, %v4968_v48 }
 0x244   :  { %4971 = vpow2.f32 %v718_v49  ;;  %v1100_v55 = vsel %vm1099_vm13, %v4966_v34, %v1096_v50  ;;  %v1108_v56 = vmul.f32 %v4970_v51, %v773_v35  ;;  %vm1113_vm15 = vweird.f32 %v4970_v51 }
 0x245   :  { %4973 = vrcp.f32 %v774_v52  ;;  %v584_v57 = vpop.f32.mrf.mxu3  ;;  %v1105_v58 = vsel %vm1102_vm14, %v1104_v54, %v1100_v55  ;;  %vm1114_vm3 = vmor %vm1112_vm2, %vm1113_vm15  ;;  %v1133_v10 = vand.u32 2147483648, %v774_v52  ;;  %v1131_v7 = vand.u32 2147483647, %v774_v52 }
 0x246   :  { %v585_v59 = vadd.f32 %v584_v57, %v358_v53  ;;  %1574 = vperm.xlu2 %4880, %v1105_v58   ;;  %v1109_v60 = vsub.f32 1.0, %v1108_v56  ;;  %vm1127_vm6 = vweird.f32 %v774_v52  ;;  %v362_v57 = vld [vmem:[%s9418_s4 + $0xe0] sm:$0xff] }
 0x247   :  { %v1134_v6 = vor.u32 1.1754944e-38, %v1133_v10  ;;  %vm1132_vm8 = vcmp.eq.f32.partialorder %v1131_v7, 8.507059e+37 }
 0x248   :  { %v656_v62 = vsub.f32 0.0, %v585_v59  ;;  %v1110_v63 = vmul.f32 %v4970_v51, %v1109_v60 }
 0x24a   :  { %v4972_v1 = vpop.eup %4971  ;;  %v720_v2 = vmul.f32 1.442695, %v656_v62  ;;  %v1111_v3 = vadd.f32 %v4970_v51, %v1110_v63  ;;  %v5704_v63 = vpop.permute.xlu0 %1474 }
 0x24b   :  { %v4974_v4 = vpop.eup %4973  ;;  %v775_v5 = vadd.f32 1.0, %v4972_v1 }
 0x24c   :  { %4975 = vpow2.f32 %v720_v2  ;;  %v1115_v22 = vsel %vm1114_vm3, %v4970_v51, %v1111_v3  ;;  %v1123_v23 = vmul.f32 %v4974_v4, %v774_v52  ;;  %vm1128_vm5 = vweird.f32 %v4974_v4 }
 0x24d   :  { %4977 = vrcp.f32 %v775_v5  ;;  %v587_v13 = vpop.f32.mrf.mxu3  ;;  %v1120_v20 = vsel %vm1117_vm4, %v1119_v19, %v1115_v22  ;;  %vm1129_vm7 = vmor %vm1127_vm6, %vm1128_vm5  ;;  %v1148_v31 = vand.u32 2147483648, %v775_v5  ;;  %v1146_v34 = vand.u32 2147483647, %v775_v5 }
 0x24e   :  { %v588_v24 = vadd.f32 %v587_v13, %v359_v16  ;;  %1579 = vperm.xlu0 %4878, %v1120_v20   ;;  %v1124_v25 = vsub.f32 1.0, %v1123_v23  ;;  %vm1142_vm10 = vweird.f32 %v775_v5  ;;  %v363_v20 = vld [vmem:[%s9418_s4 + $0xe8] sm:$0xff] }
 0x24f   :  { %v1149_v41 = vor.u32 1.1754944e-38, %v1148_v31  ;;  %vm1147_vm1 = vcmp.eq.f32.partialorder %v1146_v34, 8.507059e+37  ;;  %v364_v31 = vld [vmem:[%s9418_s4 + $0xf0] sm:$0xff] }
 0x250   :  { %v657_v17 = vsub.f32 0.0, %v588_v24  ;;  %v1125_v21 = vmul.f32 %v4974_v4, %v1124_v25  ;;  %v5709_v25 = vpop.permute.xlu2 %1494 }
 0x252   :  { %v4976_v14 = vpop.eup %4975  ;;  %v722_v18 = vmul.f32 1.442695, %v657_v17  ;;  %v1126_v11 = vadd.f32 %v4974_v4, %v1125_v21 }
 0x253   :  { %v4978_v15 = vpop.eup %4977  ;;  %v776_v8 = vadd.f32 1.0, %v4976_v14  ;;  %v5711_v14 = vpop.permute.xlu1 %1484 }
 0x254   :  { %4979 = vpow2.f32 %v722_v18  ;;  %v1130_v12 = vsel %vm1129_vm7, %v4974_v4, %v1126_v11  ;;  %v1138_v26 = vmul.f32 %v4978_v15, %v775_v5  ;;  %vm1143_vm9 = vweird.f32 %v4978_v15 }
 0x255   :  { %4981 = vrcp.f32 %v776_v8  ;;  %v590_v27 = vpop.f32.mrf.mxu3  ;;  %v1135_v28 = vsel %vm1132_vm8, %v1134_v6, %v1130_v12  ;;  %vm1144_vm11 = vmor %vm1142_vm10, %vm1143_vm9  ;;  %v1163_v48 = vand.u32 2147483648, %v776_v8  ;;  %v1161_v51 = vand.u32 2147483647, %v776_v8 }
 0x256   :  { %v591_v29 = vadd.f32 %v590_v27, %v360_v9  ;;  %1584 = vperm.xlu1 %4879, %v1135_v28   ;;  %v1139_v30 = vsub.f32 1.0, %v1138_v26  ;;  %vm1157_vm13 = vweird.f32 %v776_v8 }
 0x257   :  { %v1164_v58 = vor.u32 1.1754944e-38, %v1163_v48  ;;  %vm1162_vm15 = vcmp.eq.f32.partialorder %v1161_v51, 8.507059e+37  ;;  %v365_v51 = vld [vmem:[%s9418_s4 + $0xf8] sm:$0xff] }
 0x258   :  { %v658_v32 = vsub.f32 0.0, %v591_v29  ;;  %v1140_v33 = vmul.f32 %v4978_v15, %v1139_v30 }
 0x25a   :  { %v4980_v35 = vpop.eup %4979  ;;  %v724_v36 = vmul.f32 1.442695, %v658_v32  ;;  %v1141_v37 = vadd.f32 %v4978_v15, %v1140_v33 }
 0x25b   :  { %v4982_v38 = vpop.eup %4981  ;;  %v777_v39 = vadd.f32 1.0, %v4980_v35 }
 0x25c   :  { %4983 = vpow2.f32 %v724_v36  ;;  %v1145_v42 = vsel %vm1144_vm11, %v4978_v15, %v1141_v37  ;;  %v1153_v43 = vmul.f32 %v4982_v38, %v776_v8  ;;  %vm1158_vm12 = vweird.f32 %v4982_v38  ;;  %v5713_v8 = vpop.permute.xlu0 %1479  ;;  %v5718_v37 = vpop.permute.xlu2 %1499 }
 0x25d   :  { %4985 = vrcp.f32 %v777_v39  ;;  %v593_v44 = vpop.f32.mrf.mxu3  ;;  %v1150_v45 = vsel %vm1147_vm1, %v1149_v41, %v1145_v42  ;;  %vm1159_vm14 = vmor %vm1157_vm13, %vm1158_vm12  ;;  %v1178_v2 = vand.u32 2147483648, %v777_v39  ;;  %v1176_v5 = vand.u32 2147483647, %v777_v39  ;;  %v5720_v41 = vpop.permute.xlu1 %1489 }
 0x25e   :  { %v594_v46 = vadd.f32 %v593_v44, %v361_v40  ;;  %1589 = vperm.xlu1 %4879, %v1150_v45   ;;  %v1154_v47 = vsub.f32 1.0, %v1153_v43  ;;  %vm1172_vm3 = vweird.f32 %v777_v39 }
 0x25f   :  { %v1179_v24 = vor.u32 1.1754944e-38, %v1178_v2  ;;  %vm1177_vm5 = vcmp.eq.f32.partialorder %v1176_v5, 8.507059e+37 }
 0x260   :  { %v659_v49 = vsub.f32 0.0, %v594_v46  ;;  %v1155_v50 = vmul.f32 %v4982_v38, %v1154_v47 }
 0x262   :  { %v4984_v52 = vpop.eup %4983  ;;  %v726_v53 = vmul.f32 1.442695, %v659_v49  ;;  %v1156_v54 = vadd.f32 %v4982_v38, %v1155_v50 }
 0x263   :  { %v4986_v55 = vpop.eup %4985  ;;  %v778_v56 = vadd.f32 1.0, %v4984_v52 }
 0x264   :  { %4987 = vpow2.f32 %v726_v53  ;;  %v1160_v59 = vsel %vm1159_vm14, %v4982_v38, %v1156_v54  ;;  %v1168_v60 = vmul.f32 %v4986_v55, %v777_v39  ;;  %vm1173_vm2 = vweird.f32 %v4986_v55  ;;  %v5722_v42 = vpop.permute.xlu0 %1504 }
 0x265   :  { %4989 = vrcp.f32 %v778_v56  ;;  %v596_v61 = vpop.f32.mrf.mxu3  ;;  %v1165_v62 = vsel %vm1162_vm15, %v1164_v58, %v1160_v59  ;;  %vm1174_vm4 = vmor %vm1172_vm3, %vm1173_vm2  ;;  %v1193_v15 = vand.u32 2147483648, %v778_v56  ;;  %v1191_v12 = vand.u32 2147483647, %v778_v56 }
 0x266   :  { %v597_v0 = vadd.f32 %v596_v61, %v362_v57  ;;  %1594 = vperm.xlu0 %4878, %v1165_v62   ;;  %v1169_v1 = vsub.f32 1.0, %v1168_v60  ;;  %vm1187_vm7 = vweird.f32 %v778_v56  ;;  %v5727_v57 = vpop.permute.xlu2 %1514  ;;  %v5729_v61 = vpop.permute.xlu1 %1509 }
 0x267   :  { %v1194_v32 = vor.u32 1.1754944e-38, %v1193_v15  ;;  %vm1192_vm9 = vcmp.eq.f32.partialorder %v1191_v12, 8.507059e+37 }
 0x268   :  { %v660_v3 = vsub.f32 0.0, %v597_v0  ;;  %v1170_v4 = vmul.f32 %v4986_v55, %v1169_v1 }
 0x26a   :  { %v4988_v16 = vpop.eup %4987  ;;  %v728_v19 = vmul.f32 1.442695, %v660_v3  ;;  %v1171_v22 = vadd.f32 %v4986_v55, %v1170_v4 }
 0x26b   :  { %v4990_v23 = vpop.eup %4989  ;;  %v779_v13 = vadd.f32 1.0, %v4988_v16 }
 0x26c   :  { %4991 = vpow2.f32 %v728_v19  ;;  %v1175_v10 = vsel %vm1174_vm4, %v4986_v55, %v1171_v22  ;;  %v1183_v17 = vmul.f32 %v4990_v23, %v778_v56  ;;  %vm1188_vm6 = vweird.f32 %v4990_v23  ;;  %v5731_v62 = vpop.permute.xlu0 %1519  ;;  %v366_v22 = vld [vmem:[%s9418_s4 + $0x100] sm:$0xff] }
 0x26d   :  { %4993 = vrcp.f32 %v779_v13  ;;  %v599_v21 = vpop.f32.mrf.mxu3  ;;  %v1180_v7 = vsel %vm1177_vm5, %v1179_v24, %v1175_v10  ;;  %vm1189_vm8 = vmor %vm1187_vm7, %vm1188_vm6  ;;  %v1208_v40 = vand.u32 2147483648, %v779_v13  ;;  %v1206_v45 = vand.u32 2147483647, %v779_v13 }
 0x26e   :  { %v600_v18 = vadd.f32 %v599_v21, %v363_v20  ;;  %1599 = vperm.xlu2 %4880, %v1180_v7   ;;  %v1184_v11 = vsub.f32 1.0, %v1183_v17  ;;  %vm1202_vm11 = vweird.f32 %v779_v13  ;;  %v5739_v17 = vpop.permute.xlu2 %1529 }
 0x26f   :  { %v1209_v52 = vor.u32 1.1754944e-38, %v1208_v40  ;;  %vm1207_vm12 = vcmp.eq.f32.partialorder %v1206_v45, 8.507059e+37  ;;  %v1422_v40 = vld [vmem:[%s9419_s5 + $0xf0] sm:$0xff] }
 0x270   :  { %v661_v9 = vsub.f32 0.0, %v600_v18  ;;  %v1185_v6 = vmul.f32 %v4990_v23, %v1184_v11  ;;  %v5741_v11 = vpop.permute.xlu1 %1524 }
 0x272   :  { %v4992_v26 = vpop.eup %4991  ;;  %v730_v27 = vmul.f32 1.442695, %v661_v9  ;;  %v1186_v28 = vadd.f32 %v4990_v23, %v1185_v6 }
 0x273   :  { %v4994_v29 = vpop.eup %4993  ;;  %v780_v30 = vadd.f32 1.0, %v4992_v26 }
 0x274   :  { %4995 = vpow2.f32 %v730_v27  ;;  %v1190_v33 = vsel %vm1189_vm8, %v4990_v23, %v1186_v28  ;;  %v1198_v34 = vmul.f32 %v4994_v29, %v779_v13  ;;  %vm1203_vm10 = vweird.f32 %v4994_v29 }
 0x275   :  { %4997 = vrcp.f32 %v780_v30  ;;  %v602_v35 = vpop.f32.mrf.mxu3  ;;  %v1195_v36 = vsel %vm1192_vm9, %v1194_v32, %v1190_v33  ;;  %vm1204_vm1 = vmor %vm1202_vm11, %vm1203_vm10  ;;  %v1223_v60 = vand.u32 2147483648, %v780_v30  ;;  %v1221_v2 = vand.u32 2147483647, %v780_v30 }
 0x276   :  { %v603_v38 = vadd.f32 %v602_v35, %v364_v31  ;;  %1604 = vperm.xlu1 %4879, %v1195_v36   ;;  %v1199_v39 = vsub.f32 1.0, %v1198_v34  ;;  %vm1217_vm14 = vweird.f32 %v780_v30  ;;  %v367_v31 = vld [vmem:[%s9418_s4 + $0x108] sm:$0xff] }
 0x277   :  { %v1224_v23 = vor.u32 1.1754944e-38, %v1223_v60  ;;  %vm1222_vm2 = vcmp.eq.f32.partialorder %v1221_v2, 8.507059e+37 }
 0x278   :  { %v662_v43 = vsub.f32 0.0, %v603_v38  ;;  %v1200_v44 = vmul.f32 %v4994_v29, %v1199_v39  ;;  %v5743_v15 = vpop.permute.xlu0 %1534  ;;  %v1545_v38 = vpop.permute.xlu2 %1544 }
 0x27a   :  { %v4996_v46 = vpop.eup %4995  ;;  %v732_v47 = vmul.f32 1.442695, %v662_v43  ;;  %v1201_v48 = vadd.f32 %v4994_v29, %v1200_v44  ;;  %v1423_v43 = vld [vmem:[%s9419_s5 + $0xf8] sm:$0xff]  ;;  %v1420_v44 = vld [vmem:[%s9419_s5 + $0xe0] sm:$0xff] }
 0x27b   :  { %v4998_v49 = vpop.eup %4997  ;;  %v781_v50 = vadd.f32 1.0, %v4996_v46  ;;  %v1421_v46 = vld [vmem:[%s9419_s5 + $0xe8] sm:$0xff] }
 0x27c   :  { %4999 = vpow2.f32 %v732_v47  ;;  %v1205_v53 = vsel %vm1204_vm1, %v4994_v29, %v1201_v48  ;;  %v1213_v54 = vmul.f32 %v4998_v49, %v780_v30  ;;  %vm1218_vm13 = vweird.f32 %v4998_v49 }
 0x27d   :  { %5001 = vrcp.f32 %v781_v50  ;;  %v605_v55 = vpop.f32.mrf.mxu3  ;;  %v1210_v56 = vsel %vm1207_vm12, %v1209_v52, %v1205_v53  ;;  %vm1219_vm15 = vmor %vm1217_vm14, %vm1218_vm13  ;;  %v1238_v18 = vand.u32 2147483648, %v781_v50  ;;  %v1236_v12 = vand.u32 2147483647, %v781_v50  ;;  %v1418_v53 = vld [vmem:[%s9419_s5 + $0xd0] sm:$0xff] }
 0x27e   :  { %v606_v58 = vadd.f32 %v605_v55, %v365_v51  ;;  %1609 = vperm.xlu0 %4878, %v1210_v56   ;;  %v1214_v59 = vsub.f32 1.0, %v1213_v54  ;;  %vm1232_vm4 = vweird.f32 %v781_v50  ;;  %v1419_v54 = vld [vmem:[%s9419_s5 + $0xd8] sm:$0xff] }
 0x27f   :  { %v1239_v32 = vor.u32 1.1754944e-38, %v1238_v18  ;;  %vm1237_vm6 = vcmp.eq.f32.partialorder %v1236_v12, 8.507059e+37  ;;  %v1414_v18 = vld [vmem:[%s9419_s5 + $0xb0] sm:$0xff] }
 0x280   :  { %v663_v0 = vsub.f32 0.0, %v606_v58  ;;  %v1215_v1 = vmul.f32 %v4998_v49, %v1214_v59  ;;  %v1540_v48 = vpop.permute.xlu1 %1539  ;;  %v1700_v58 = vmul.f32 %v1545_v38, %v1420_v44 }
 0x282   :  { %v5000_v3 = vpop.eup %4999  ;;  %v734_v4 = vmul.f32 1.442695, %v663_v0  ;;  %v1216_v5 = vadd.f32 %v4998_v49, %v1215_v1  ;;  %v5774_v0 = vmul.f32 %v1545_v38, %v1421_v46  ;;  %v369_v46 = vld [vmem:[%s9418_s4 + $0x118] sm:$0xff] }
 0x283   :  { %v5002_v16 = vpop.eup %5001  ;;  %v5733_v19 = vadd.f32 1.0, %v5000_v3 }
 0x284   :  { %5003 = vpow2.f32 %v734_v4  ;;  %v1220_v13 = vsel %vm1219_vm15, %v4998_v49, %v1216_v5  ;;  %v1228_v20 = vmul.f32 %v5002_v16, %v781_v50  ;;  %vm1233_vm3 = vweird.f32 %v5002_v16  ;;  %v368_v4 = vld [vmem:[%s9418_s4 + $0x110] sm:$0xff] }
 0x285   :  { %5005 = vrcp.f32 %v5733_v19  ;;  %v608_v24 = vpop.f32.mrf.mxu3  ;;  %v1225_v10 = vsel %vm1222_vm2, %v1224_v23, %v1220_v13  ;;  %vm1234_vm5 = vmor %vm1232_vm4, %vm1233_vm3  ;;  %v1253_v47 = vand.u32 2147483648, %v5733_v19  ;;  %v1251_v52 = vand.u32 2147483647, %v5733_v19  ;;  %v1416_v23 = vld [vmem:[%s9419_s5 + $0xc0] sm:$0xff] }
 0x286   :  { %v609_v21 = vadd.f32 %v608_v24, %v366_v22  ;;  %1614 = vperm.xlu2 %4880, %v1225_v10   ;;  %v1229_v7 = vsub.f32 1.0, %v1228_v20  ;;  %vm1247_vm8 = vweird.f32 %v5733_v19  ;;  %v5785_v22 = vmul.f32 %v1540_v48, %v1419_v54  ;;  %v1417_v10 = vld [vmem:[%s9419_s5 + $0xc8] sm:$0xff] }
 0x287   :  { %v1254_v5 = vor.u32 1.1754944e-38, %v1253_v47  ;;  %vm1252_vm10 = vcmp.eq.f32.partialorder %v1251_v52, 8.507059e+37  ;;  %v1696_v12 = vmul.f32 %v5743_v15, %v1416_v23  ;;  %v1402_v23 = vld [vmem:[%s9419_s5 + $0x50] sm:$0xff] }
 0x288   :  { %v664_v9 = vsub.f32 0.0, %v609_v21  ;;  %v1230_v6 = vmul.f32 %v5002_v16, %v1229_v7 }
 0x28a   :  { %v5004_v26 = vpop.eup %5003  ;;  %v736_v27 = vmul.f32 1.442695, %v664_v9  ;;  %v1231_v28 = vadd.f32 %v5002_v16, %v1230_v6 }
 0x28b   :  { %v5006_v29 = vpop.eup %5005  ;;  %v5745_v30 = vadd.f32 1.0, %v5004_v26  ;;  %v1415_v26 = vld [vmem:[%s9419_s5 + $0xb8] sm:$0xff] }
 0x28c   :  { %5007 = vpow2.f32 %v736_v27  ;;  %v1235_v33 = vsel %vm1234_vm5, %v5002_v16, %v1231_v28  ;;  %v1243_v34 = vmul.f32 %v5006_v29, %v5733_v19  ;;  %vm1248_vm7 = vweird.f32 %v5006_v29 }
 0x28d   :  { %5009 = vrcp.f32 %v5745_v30  ;;  %v611_v35 = vpop.f32.mrf.mxu3  ;;  %v1240_v36 = vsel %vm1237_vm6, %v1239_v32, %v1235_v33  ;;  %vm1249_vm9 = vmor %vm1247_vm8, %vm1248_vm7  ;;  %v1698_v16 = vmul.f32 %v1540_v48, %v1418_v53  ;;  %vm1262_vm11 = vweird.f32 %v5745_v30  ;;  %v1410_v32 = vld [vmem:[%s9419_s5 + $0x90] sm:$0xff]  ;;  %v1411_v33 = vld [vmem:[%s9419_s5 + $0x98] sm:$0xff] }
 0x28e   :  { %v612_v39 = vadd.f32 %v611_v35, %v367_v31  ;;  %1619 = vperm.xlu1 %4879, %v1240_v36   ;;  %v1244_v45 = vsub.f32 1.0, %v1243_v34  ;;  %v1268_v21 = vand.u32 2147483648, %v5745_v30  ;;  %v1266_v6 = vand.u32 2147483647, %v5745_v30  ;;  %v1409_v53 = vld [vmem:[%s9419_s5 + $0x88] sm:$0xff] }
 0x28f   :  { %v5811_v28 = vmul.f32 %v5743_v15, %v1417_v10  ;;  %v1694_v34 = vmul.f32 %v5739_v17, %v1414_v18  ;;  %v1413_v15 = vld [vmem:[%s9419_s5 + $0xa8] sm:$0xff]  ;;  %v5854_v48 = vmul.f32 %v5731_v62, %v1411_v33  ;;  %v1400_v33 = vld [vmem:[%s9419_s5 + $0x40] sm:$0xff] }
 0x290   :  { %v665_v49 = vsub.f32 0.0, %v612_v39  ;;  %v1550_v50 = vpop.permute.xlu0 %1549  ;;  %v1245_v51 = vmul.f32 %v5006_v29, %v1244_v45  ;;  %v1269_v36 = vor.u32 1.1754944e-38, %v1268_v21  ;;  %vm5840_vm13 = vcmp.eq.f32.partialorder %v1266_v6, 8.507059e+37 }
 0x291   :  { %v1702_v55 = vmul.f32 %v1550_v50, %v1422_v40  ;;  %v5772_v56 = vmul.f32 %v1550_v50, %v1423_v43  ;;  %v5837_v40 = vmul.f32 %v5739_v17, %v1415_v26  ;;  %v1690_v17 = vmul.f32 %v5731_v62, %v1410_v32  ;;  %v370_v26 = vld [vmem:[%s9418_s4 + $0x120] sm:$0xff] }
 0x292   :  { %v5008_v59 = vpop.eup %5007  ;;  %v738_v60 = vmul.f32 1.442695, %v665_v49  ;;  %v1246_v1 = vadd.f32 %v5006_v29, %v1245_v51  ;;  %v5858_v49 = vmul.f32 %v5741_v11, %v1413_v15  ;;  %v1408_v51 = vld [vmem:[%s9419_s5 + $0x80] sm:$0xff]  ;;  %v1401_v15 = vld [vmem:[%s9419_s5 + $0x48] sm:$0xff]  ;;  %v1680_v44 = vmul.f32 %v5709_v25, %v1400_v33 }
 0x293   :  { %v5777_v2 = vpop.eup %5009  ;;  %v5779_v3 = vadd.f32 1.0, %v5008_v59  ;;  %1992 = vmatpush.msrb.mxu1 %v1702_v55  ;;  %4829 = vmatpush.msrb.mxu2 %v1702_v55 }
 0x294   :  { %5011 = vpow2.f32 %v738_v60  ;;  %4861 = vmatpush.msrb.mxu3 %v5772_v56  ;;  %v1250_v19 = vsel %vm1249_vm9, %v5006_v29, %v1246_v1  ;;  %v1258_v13 = vmul.f32 %v5777_v2, %v5745_v30  ;;  %vm1263_vm1 = vweird.f32 %v5777_v2  ;;  %v1412_v29 = vld [vmem:[%s9419_s5 + $0xa0] sm:$0xff] }
 0x295   :  { %5013 = vrcp.f32 %v5779_v3  ;;  %v614_v20 = vpop.f32.mrf.mxu3  ;;  %1993 = vmatpush.msrb.mxu1 %v1700_v58  ;;  %4830 = vmatpush.msrb.mxu2 %v1700_v58  ;;  %v1255_v24 = vsel %vm1252_vm10, %v1254_v5, %v1250_v19  ;;  %vm5831_vm12 = vmor %vm1262_vm11, %vm1263_vm1  ;;  %v1692_v47 = vmul.f32 %v5741_v11, %v1412_v29  ;;  %vm1277_vm14 = vweird.f32 %v5779_v3  ;;  %v1406_v58 = vld [vmem:[%s9419_s5 + $0x70] sm:$0xff] }
 0x296   :  { %v615_v7 = vadd.f32 %v614_v20, %v368_v4  ;;  %4862 = vmatpush.msrb.mxu3 %v5774_v0  ;;  %1624 = vperm.xlu0 %4878, %v1255_v24   ;;  %v1259_v9 = vsub.f32 1.0, %v1258_v13  ;;  %v1283_v54 = vand.u32 2147483648, %v5779_v3  ;;  %v1281_v60 = vand.u32 2147483647, %v5779_v3  ;;  %v1403_v13 = vld [vmem:[%s9419_s5 + $0x58] sm:$0xff] }
 0x297   :  { %1994 = vmatpush.msrb.mxu1 %v1698_v16  ;;  %4831 = vmatpush.msrb.mxu2 %v1698_v16  ;;  %v1688_v1 = vmul.f32 %v5727_v57, %v1408_v51  ;;  %v5888_v5 = vmul.f32 %v5727_v57, %v1409_v53  ;;  %v1404_v16 = vld [vmem:[%s9419_s5 + $0x60] sm:$0xff]  ;;  %v1686_v20 = vmul.f32 %v5729_v61, %v1406_v58  ;;  %v1405_v57 = vld [vmem:[%s9419_s5 + $0x68] sm:$0xff]  ;;  %v1394_v51 = vld [vmem:[%s9419_s5 + $0x10] sm:$0xff] }
 0x298   :  { %v666_v27 = vsub.f32 0.0, %v615_v7  ;;  %4863 = vmatpush.msrb.mxu3 %v5785_v22  ;;  %v1260_v31 = vmul.f32 %v5777_v2, %v1259_v9  ;;  %v1284_v10 = vor.u32 1.1754944e-38, %v1283_v54  ;;  %vm5917_vm3 = vcmp.eq.f32.partialorder %v1281_v60, 8.507059e+37 }
 0x299   :  { %1995 = vmatpush.msrb.mxu1 %v1696_v12  ;;  %4832 = vmatpush.msrb.mxu2 %v1696_v12  ;;  %v5931_v29 = vmul.f32 %v5718_v37, %v1403_v13  ;;  %v1392_v13 = vld [vmem:[%s9419_s5] sm:$0xff] }
 0x29a   :  { %v5012_v38 = vpop.eup %5011  ;;  %v740_v39 = vmul.f32 1.442695, %v666_v27  ;;  %4864 = vmatpush.msrb.mxu3 %v5811_v28  ;;  %v1261_v43 = vadd.f32 %v5777_v2, %v1260_v31  ;;  %v1684_v27 = vmul.f32 %v5722_v42, %v1404_v16  ;;  %v5935_v31 = vmul.f32 %v5722_v42, %v1405_v57 }
 0x29b   :  { %v5844_v45 = vpop.eup %5013  ;;  %v5846_v30 = vadd.f32 1.0, %v5012_v38  ;;  %1996 = vmatpush.msrb.mxu1 %v1694_v34  ;;  %4833 = vmatpush.msrb.mxu2 %v1694_v34  ;;  %v1398_v38 = vld [vmem:[%s9419_s5 + $0x30] sm:$0xff] }
 0x29c   :  { %5015 = vpow2.f32 %v740_v39  ;;  %4865 = vmatpush.msrb.mxu3 %v5837_v40  ;;  %v1265_v50 = vsel %vm5831_vm12, %v5777_v2, %v1261_v43  ;;  %v1273_v52 = vmul.f32 %v5844_v45, %v5779_v3  ;;  %vm1278_vm15 = vweird.f32 %v5844_v45  ;;  %v1407_v2 = vld [vmem:[%s9419_s5 + $0x78] sm:$0xff] }
 0x29d   :  { %5017 = vrcp.f32 %v5846_v30  ;;  %v617_v62 = vpop.f32.mrf.mxu3  ;;  %1997 = vmatpush.msrb.mxu1 %v1692_v47  ;;  %4834 = vmatpush.msrb.mxu2 %v1692_v47  ;;  %v1270_v11 = vsel %vm5840_vm13, %v1269_v36, %v1265_v50  ;;  %vm5908_vm2 = vmor %vm1277_vm14, %vm1278_vm15  ;;  %v5914_v18 = vmul.f32 %v5729_v61, %v1407_v2  ;;  %v1682_v61 = vmul.f32 %v5718_v37, %v1402_v23  ;;  %v371_v2 = vld [vmem:[%s9418_s4 + $0x128] sm:$0xff] }
 0x29e   :  { %v618_v55 = vadd.f32 %v617_v62, %v369_v46  ;;  %4866 = vmatpush.msrb.mxu3 %v5858_v49  ;;  %1629 = vperm.xlu2 %4880, %v1270_v11   ;;  %v1274_v59 = vsub.f32 1.0, %v1273_v52  ;;  %vm1292_vm4 = vweird.f32 %v5846_v30  ;;  %v1298_v35 = vand.u32 2147483648, %v5846_v30  ;;  %v1395_v52 = vld [vmem:[%s9419_s5 + $0x18] sm:$0xff] }
 0x29f   :  { %1998 = vmatpush.msrb.mxu1 %v1690_v17  ;;  %4835 = vmatpush.msrb.mxu2 %v1690_v17  ;;  %v1296_v43 = vand.u32 2147483647, %v5846_v30  ;;  %v5965_v47 = vmul.f32 %v5709_v25, %v1401_v15  ;;  %v1396_v17 = vld [vmem:[%s9419_s5 + $0x20] sm:$0xff]  ;;  %v1678_v62 = vmul.f32 %v5720_v41, %v1398_v38  ;;  %v1397_v25 = vld [vmem:[%s9419_s5 + $0x28] sm:$0xff]  ;;  %v6006_v16 = vmul.f32 %v5713_v8, %v1395_v52  ;;  %v372_v15 = vld [vmem:[%s9418_s4 + $0x130] sm:$0xff] }
 0x2a0   :  { %v667_v4 = vsub.f32 0.0, %v618_v55  ;;  %4867 = vmatpush.msrb.mxu3 %v5854_v48  ;;  %v1275_v19 = vmul.f32 %v5844_v45, %v1274_v59  ;;  %v1299_v53 = vor.u32 1.1754944e-38, %v1298_v35 }
 0x2a1   :  { %1999 = vmatpush.msrb.mxu1 %v1688_v1  ;;  %4836 = vmatpush.msrb.mxu2 %v1688_v1  ;;  %vm5994_vm7 = vcmp.eq.f32.partialorder %v1296_v43, 8.507059e+37 }
 0x2a2   :  { %v5016_v21 = vpop.eup %5015  ;;  %v742_v7 = vmul.f32 1.442695, %v667_v4  ;;  %4868 = vmatpush.msrb.mxu3 %v5888_v5  ;;  %v1276_v9 = vadd.f32 %v5844_v45, %v1275_v19  ;;  %v1676_v4 = vmul.f32 %v5711_v14, %v1396_v17  ;;  %v6010_v19 = vmul.f32 %v5711_v14, %v1397_v25  ;;  %v1393_v14 = vld [vmem:[%s9419_s5 + $0x8] sm:$0xff] }
 0x2a3   :  { %v5921_v12 = vpop.eup %5017  ;;  %v5923_v3 = vadd.f32 1.0, %v5016_v21  ;;  %2000 = vmatpush.msrb.mxu1 %v1686_v20  ;;  %4837 = vmatpush.msrb.mxu2 %v1686_v20 }
 0x2a4   :  { %5019 = vpow2.f32 %v742_v7  ;;  %4869 = vmatpush.msrb.mxu3 %v5914_v18  ;;  %v1280_v32 = vsel %vm5908_vm2, %v5844_v45, %v1276_v9  ;;  %v1288_v34 = vmul.f32 %v5921_v12, %v5846_v30  ;;  %vm1293_vm5 = vweird.f32 %v5921_v12  ;;  %v1399_v45 = vld [vmem:[%s9419_s5 + $0x38] sm:$0xff] }
 0x2a5   :  { %5021 = vrcp.f32 %v5923_v3  ;;  %v620_v37 = vpop.f32.mrf.mxu3  ;;  %2001 = vmatpush.msrb.mxu1 %v1684_v27  ;;  %4838 = vmatpush.msrb.mxu2 %v1684_v27  ;;  %v1285_v42 = vsel %vm5917_vm3, %v1284_v10, %v1280_v32  ;;  %vm5985_vm6 = vmor %vm1292_vm4, %vm1293_vm5  ;;  %v5991_v58 = vmul.f32 %v5720_v41, %v1399_v45  ;;  %v1674_v41 = vmul.f32 %v5713_v8, %v1394_v51  ;;  %v1752_v27 = vld [vmem:[%s9420_s6] sm:$0xff] }
 0x2a6   :  { %v621_v36 = vadd.f32 %v620_v37, %v370_v26  ;;  %4870 = vmatpush.msrb.mxu3 %v5935_v31  ;;  %1634 = vperm.xlu2 %4880, %v1285_v42   ;;  %v1289_v39 = vsub.f32 1.0, %v1288_v34  ;;  %vm1307_vm8 = vweird.f32 %v5923_v3  ;;  %v1313_v24 = vand.u32 2147483648, %v5923_v3 }
 0x2a7   :  { %2002 = vmatpush.msrb.mxu1 %v1682_v61  ;;  %4839 = vmatpush.msrb.mxu2 %v1682_v61  ;;  %v1311_v7 = vand.u32 2147483647, %v5923_v3  ;;  %v1672_v9 = vmul.f32 %v5704_v63, %v1392_v13 }
 0x2a8   :  { %v668_v46 = vsub.f32 0.0, %v621_v36  ;;  %4871 = vmatpush.msrb.mxu3 %v5931_v29  ;;  %v1290_v50 = vmul.f32 %v5921_v12, %v1289_v39  ;;  %v1314_v32 = vor.u32 1.1754944e-38, %v1313_v24 }
 0x2a9   :  { %2003 = vmatpush.msrb.mxu1 %v1680_v44  ;;  %4840 = vmatpush.msrb.mxu2 %v1680_v44  ;;  %vm1312_vm11 = vcmp.eq.f32.partialorder %v1311_v7, 8.507059e+37 }
 0x2aa   :  { %v5020_v54 = vpop.eup %5019  ;;  %v744_v55 = vmul.f32 1.442695, %v668_v46  ;;  %4872 = vmatpush.msrb.mxu3 %v5965_v47  ;;  %v1291_v59 = vadd.f32 %v5921_v12, %v1290_v50  ;;  %v1755_v46 = vld [vmem:[%s9420_s6 + $0x18] sm:$0xff] }
 0x2ab   :  { %v5022_v1 = vpop.eup %5021  ;;  %v5998_v30 = vadd.f32 1.0, %v5020_v54  ;;  %2004 = vmatpush.msrb.mxu1 %v1678_v62  ;;  %4841 = vmatpush.msrb.mxu2 %v1678_v62 }
 0x2ac   :  { %5023 = vpow2.f32 %v744_v55  ;;  %4873 = vmatpush.msrb.mxu3 %v5991_v58  ;;  %v1295_v23 = vsel %vm5985_vm6, %v5921_v12, %v1291_v59  ;;  %v1303_v20 = vmul.f32 %v5022_v1, %v5923_v3  ;;  %vm1308_vm9 = vweird.f32 %v5022_v1  ;;  %v373_v55 = vld [vmem:[%s9418_s4 + $0x138] sm:$0xff] }
 0x2ad   :  { %5025 = vrcp.f32 %v5998_v30  ;;  %v623_v8 = vpop.f32.mrf.mxu3  ;;  %2005 = vmatpush.msrb.mxu1 %v1676_v4  ;;  %4842 = vmatpush.msrb.mxu2 %v1676_v4  ;;  %v1300_v57 = vsel %vm5994_vm7, %v1299_v53, %v1295_v23  ;;  %v6032_v12 = vmul.f32 %v5704_v63, %v1393_v14  ;;  %vm6039_vm10 = vmor %vm1307_vm8, %vm1308_vm9  ;;  %vm1322_vm1 = vweird.f32 %v5998_v30 }
 0x2ae   :  { %v624_v10 = vadd.f32 %v623_v8, %v371_v2  ;;  %4874 = vmatpush.msrb.mxu3 %v6010_v19  ;;  %1639 = vperm.xlu0 %4878, %v1300_v57   ;;  %v1304_v21 = vsub.f32 1.0, %v1303_v20  ;;  %v1328_v39 = vand.u32 2147483648, %v5998_v30  ;;  %v1326_v45 = vand.u32 2147483647, %v5998_v30  ;;  %v1758_v8 = vld [vmem:[%s9420_s6 + $0x30] sm:$0xff] }
 0x2af   :  { %2006 = vmatpush.msrb.mxu1 %v1674_v41  ;;  %4843 = vmatpush.msrb.mxu2 %v1674_v41 }
 0x2b0   :  { %v669_v6 = vsub.f32 0.0, %v624_v10  ;;  %4875 = vmatpush.msrb.mxu3 %v6006_v16  ;;  %v1305_v26 = vmul.f32 %v5022_v1, %v1304_v21  ;;  %v1329_v52 = vor.u32 1.1754944e-38, %v1328_v39  ;;  %vm1327_vm14 = vcmp.eq.f32.partialorder %v1326_v45, 8.507059e+37  ;;  %v1764_v45 = vld [vmem:[%s9420_s6 + $0x60] sm:$0xff] }
 0x2b1   :  { %2007 = vmatpush.msrb.mxu1 %v1672_v9  ;;  %4844 = vmatpush.msrb.mxu2 %v1672_v9 }
 0x2b2   :  { %v5024_v33 = vpop.eup %5023  ;;  %v746_v34 = vmul.f32 1.442695, %v669_v6  ;;  %4876 = vmatpush.msrb.mxu3 %v6032_v12  ;;  %v1306_v63 = vadd.f32 %v5022_v1, %v1305_v26  ;;  %2008 = vmatmul.f32.vlgmr.msrb.gmra.mxu1 %v1752_v27 }
 0x2b3   :  { %v5026_v37 = vpop.eup %5025  ;;  %v788_v42 = vadd.f32 1.0, %v5024_v33  ;;  %2422 = vmatmul.f32.vlgmr.msrb.gmra.mxu3 %v1755_v46 }
 0x2b4   :  { %5027 = vpow2.f32 %v746_v34  ;;  %v1310_v3 = vsel %vm6039_vm10, %v5022_v1, %v1306_v63  ;;  %v1318_v35 = vmul.f32 %v5026_v37, %v5998_v30  ;;  %vm1323_vm12 = vweird.f32 %v5026_v37  ;;  %v1761_v34 = vld [vmem:[%s9420_s6 + $0x48] sm:$0xff] }
 0x2b5   :  { %5029 = vrcp.f32 %v788_v42  ;;  %v626_v36 = vpop.f32.mrf.mxu3  ;;  %v1315_v38 = vsel %vm1312_vm11, %v1314_v32, %v1310_v3  ;;  %vm6056_vm13 = vmor %vm1322_vm1, %vm1323_vm12  ;;  %vm1337_vm15 = vweird.f32 %v788_v42  ;;  %v1343_v2 = vand.u32 2147483648, %v788_v42 }
 0x2b6   :  { %v627_v43 = vadd.f32 %v626_v36, %v372_v15  ;;  %1644 = vperm.xlu1 %4879, %v1315_v38   ;;  %v1319_v44 = vsub.f32 1.0, %v1318_v35  ;;  %v1341_v23 = vand.u32 2147483647, %v788_v42 }
 0x2b7   :  { %v1344_v57 = vor.u32 1.1754944e-38, %v1343_v2 }
 0x2b8   :  { %v670_v17 = vsub.f32 0.0, %v627_v43  ;;  %v1320_v50 = vmul.f32 %v5026_v37, %v1319_v44  ;;  %vm1342_vm4 = vcmp.eq.f32.partialorder %v1341_v23, 8.507059e+37 }
 0x2ba   :  { %v5028_v62 = vpop.eup %5027  ;;  %v748_v25 = vmul.f32 1.442695, %v670_v17  ;;  %v1321_v11 = vadd.f32 %v5026_v37, %v1320_v50  ;;  %2011 = vmatmul.f32.gmra.mxu1 %v1755_v46 }
 0x2bb   :  { %v5030_v53 = vpop.eup %5029  ;;  %v789_v54 = vadd.f32 1.0, %v5028_v62  ;;  %2425 = vmatmul.f32.gmra.mxu3 %v1758_v8 }
 0x2bc   :  { %5031 = vpow2.f32 %v748_v25  ;;  %v1325_v59 = vsel %vm6056_vm13, %v5026_v37, %v1321_v11  ;;  %v1333_v60 = vmul.f32 %v5030_v53, %v788_v42  ;;  %vm1338_vm2 = vweird.f32 %v5030_v53 }
 0x2bd   :  { %5033 = vrcp.f32 %v789_v54  ;;  %v629_v1 = vpop.f32.mrf.mxu3  ;;  %v1330_v30 = vsel %vm1327_vm14, %v1329_v52, %v1325_v59  ;;  %vm1339_vm3 = vmor %vm1337_vm15, %vm1338_vm2  ;;  %v1358_v27 = vand.u32 2147483648, %v789_v54  ;;  %vm1352_vm5 = vweird.f32 %v789_v54 }
 0x2be   :  { %v630_v4 = vadd.f32 %v629_v1, %v373_v55  ;;  %1649 = vperm.xlu2 %4880, %v1330_v30   ;;  %v1334_v41 = vsub.f32 1.0, %v1333_v60  ;;  %v1356_v32 = vand.u32 2147483647, %v789_v54  ;;  %v6074_v55 = vpop.permute.xlu2 %1559  ;;  %v1767_v60 = vld [vmem:[%s9420_s6 + $0x78] sm:$0xff]  ;;  %vm2814_vm2 = vcmask 556032  }
 0x2bf   :  { %v1359_v63 = vor.u32 1.1754944e-38, %v1358_v27 }
 0x2c0   :  { %v671_v13 = vsub.f32 0.0, %v630_v4  ;;  %v1335_v20 = vmul.f32 %v5030_v53, %v1334_v41  ;;  %vm1357_vm8 = vcmp.eq.f32.partialorder %v1356_v32, 8.507059e+37  ;;  %v6079_v4 = vpop.permute.xlu1 %1554 }
 0x2c2   :  { %v5032_v14 = vpop.eup %5031  ;;  %v750_v24 = vmul.f32 1.442695, %v671_v13  ;;  %v1336_v10 = vadd.f32 %v5030_v53, %v1335_v20  ;;  %2014 = vmatmul.f32.gmra.mxu1 %v1758_v8  ;;  %v1770_v13 = vld [vmem:[%s9420_s6 + $0x90] sm:$0xff]  ;;  %v1773_v8 = vld [vmem:[%s9420_s6 + $0xa8] sm:$0xff] }
 0x2c3   :  { %v5034_v21 = vpop.eup %5033  ;;  %v790_v7 = vadd.f32 1.0, %v5032_v14  ;;  %2428 = vmatmul.f32.gmra.mxu3 %v1761_v34 }
 0x2c4   :  { %5035 = vpow2.f32 %v750_v24  ;;  %v1340_v9 = vsel %vm1339_vm3, %v5030_v53, %v1336_v10  ;;  %v1348_v6 = vmul.f32 %v5034_v21, %v789_v54  ;;  %vm1353_vm6 = vweird.f32 %v5034_v21 }
 0x2c5   :  { %5037 = vrcp.f32 %v790_v7  ;;  %v1345_v26 = vsel %vm1342_vm4, %v1344_v57, %v1340_v9  ;;  %vm1354_vm7 = vmor %vm1352_vm5, %vm1353_vm6  ;;  %v1373_v39 = vand.u32 2147483648, %v790_v7  ;;  %vm1367_vm9 = vweird.f32 %v790_v7  ;;  %v6091_v57 = vpop.permute.xlu0 %1564  ;;  %v1785_v9 = vld [vmem:[%s9420_s6 + $0x108] sm:$0xff] }
 0x2c6   :  { %1654 = vperm.xlu0 %4878, %v1345_v26   ;;  %v1349_v61 = vsub.f32 1.0, %v1348_v6  ;;  %v1371_v44 = vand.u32 2147483647, %v790_v7  ;;  %v6081_v23 = vpop.permute.xlu2 %1574  ;;  %2041 = vmatmul.f32.vlgmr.msrb.gmra.mxu2 %v1785_v9  ;;  %v1455_v6 = vld [vmem:[%s9419_s5 + $0x1f8] sm:$0xff]  ;;  %v1454_v26 = vld [vmem:[%s9419_s5 + $0x1f0] sm:$0xff] }
 0x2c7   :  { %v1374_v17 = vor.u32 1.1754944e-38, %v1373_v39 }
 0x2c8   :  { %v1350_v33 = vmul.f32 %v5034_v21, %v1349_v61  ;;  %vm1372_vm1 = vcmp.eq.f32.partialorder %v1371_v44, 8.507059e+37  ;;  %v6086_v20 = vpop.permute.xlu1 %1569  ;;  %v1450_v44 = vld [vmem:[%s9419_s5 + $0x1d0] sm:$0xff] }
 0x2ca   :  { %v5036_v37 = vpop.eup %5035  ;;  %v1351_v42 = vadd.f32 %v5034_v21, %v1350_v33  ;;  %2017 = vmatmul.f32.gmra.mxu1 %v1761_v34  ;;  %v1779_v33 = vld [vmem:[%s9420_s6 + $0xd8] sm:$0xff] }
 0x2cb   :  { %v5038_v15 = vpop.eup %5037  ;;  %v791_v3 = vadd.f32 1.0, %v5036_v37  ;;  %2431 = vmatmul.f32.gmra.mxu3 %v1764_v45  ;;  %v1788_v37 = vld [vmem:[%s9420_s6 + $0x120] sm:$0xff] }
 0x2cc   :  { %v1355_v35 = vsel %vm1354_vm7, %v5034_v21, %v1351_v42  ;;  %v1363_v36 = vmul.f32 %v5038_v15, %v790_v7  ;;  %vm1368_vm10 = vweird.f32 %v5038_v15  ;;  %v1776_v7 = vld [vmem:[%s9420_s6 + $0xc0] sm:$0xff] }
 0x2cd   :  { %5039 = vrcp.f32 %v791_v3  ;;  %v1360_v38 = vsel %vm1357_vm8, %v1359_v63, %v1355_v35  ;;  %vm1369_vm11 = vmor %vm1367_vm9, %vm1368_vm10  ;;  %v1388_v11 = vand.u32 2147483648, %v791_v3  ;;  %vm1382_vm12 = vweird.f32 %v791_v3  ;;  %v6097_v10 = vpop.permute.xlu0 %1579  ;;  %v6127_v35 = vld [vmem:[%s9420_s6 + $0x138] sm:$0xff] }
 0x2ce   :  { %1659 = vperm.xlu1 %4879, %v1360_v38   ;;  %v1364_v43 = vsub.f32 1.0, %v1363_v36  ;;  %v1386_v54 = vand.u32 2147483647, %v791_v3  ;;  %v6093_v14 = vpop.permute.xlu2 %1599  ;;  %2044 = vmatmul.f32.gmra.mxu2 %v1788_v37  ;;  %v1453_v36 = vld [vmem:[%s9419_s5 + $0x1e8] sm:$0xff]  ;;  %v1452_v38 = vld [vmem:[%s9419_s5 + $0x1e0] sm:$0xff] }
 0x2cf   :  { %v1389_v1 = vor.u32 1.1754944e-38, %v1388_v11  ;;  %v1446_v11 = vld [vmem:[%s9419_s5 + $0x1b0] sm:$0xff] }
 0x2d0   :  { %v1365_v46 = vmul.f32 %v5038_v15, %v1364_v43  ;;  %vm1387_vm15 = vcmp.eq.f32.partialorder %v1386_v54, 8.507059e+37  ;;  %v6095_v24 = vpop.permute.xlu1 %1584 }
 0x2d2   :  { %v1366_v50 = vadd.f32 %v5038_v15, %v1365_v46  ;;  %2020 = vmatmul.f32.gmra.mxu1 %v1764_v45  ;;  %v6142_v45 = vld [vmem:[%s9420_s6 + $0x150] sm:$0xff]  ;;  %v1451_v46 = vld [vmem:[%s9419_s5 + $0x1d8] sm:$0xff] }
 0x2d3   :  { %v5040_v51 = vpop.eup %5039  ;;  %2434 = vmatmul.f32.gmra.mxu3 %v1767_v60 }
 0x2d4   :  { %v1370_v52 = vsel %vm1369_vm11, %v5038_v15, %v1366_v50  ;;  %v1378_v62 = vmul.f32 %v5040_v51, %v791_v3  ;;  %vm1383_vm13 = vweird.f32 %v5040_v51  ;;  %v1782_v3 = vld [vmem:[%s9420_s6 + $0xf0] sm:$0xff] }
 0x2d5   :  { %v1375_v25 = vsel %vm1372_vm1, %v1374_v17, %v1370_v52  ;;  %vm1384_vm14 = vmor %vm1382_vm12, %vm1383_vm13  ;;  %v1449_v52 = vld [vmem:[%s9419_s5 + $0x1c8] sm:$0xff] }
 0x2d6   :  { %1664 = vperm.xlu2 %4880, %v1375_v25   ;;  %v1379_v53 = vsub.f32 1.0, %v1378_v62  ;;  %2047 = vmatmul.f32.gmra.mxu2 %v6127_v35 }
 0x2d8   :  { %v1380_v59 = vmul.f32 %v5040_v51, %v1379_v53  ;;  %v6111_v27 = vpop.permute.xlu1 %1589  ;;  %v6113_v61 = vpop.permute.xlu0 %1594  ;;  %v1447_v53 = vld [vmem:[%s9419_s5 + $0x1b8] sm:$0xff] }
 0x2da   :  { %v1381_v30 = vadd.f32 %v5040_v51, %v1380_v59  ;;  %2023 = vmatmul.f32.gmra.mxu1 %v1767_v60  ;;  %v1444_v60 = vld [vmem:[%s9419_s5 + $0x1a0] sm:$0xff] }
 0x2db   :  { %2437 = vmatmul.f32.gmra.mxu3 %v1770_v13 }
 0x2dc   :  { %v1385_v2 = vsel %vm1384_vm14, %v5040_v51, %v1381_v30  ;;  %v1448_v51 = vld [vmem:[%s9419_s5 + $0x1c0] sm:$0xff] }
 0x2dd   :  { %v1390_v41 = vsel %vm1387_vm15, %v1389_v1, %v1385_v2  ;;  %v1445_v1 = vld [vmem:[%s9419_s5 + $0x1a8] sm:$0xff] }
 0x2de   :  { %1669 = vperm.xlu0 %4878, %v1390_v41   ;;  %2050 = vmatmul.f32.gmra.mxu2 %v6142_v45  ;;  %v1442_v41 = vld [vmem:[%s9419_s5 + $0x190] sm:$0xff] }
 0x2e0   :  { %v1615_v21 = vpop.permute.xlu2 %1614 }
 0x2e1   :  { %v1728_v54 = vmul.f32 %v1615_v21, %v1448_v51  ;;  %v1729_v59 = vmul.f32 %v1615_v21, %v1449_v52 }
 0x2e2   :  { %2026 = vmatmul.f32.gmra.mxu1 %v1770_v13  ;;  %v1443_v13 = vld [vmem:[%s9419_s5 + $0x198] sm:$0xff] }
 0x2e3   :  { %2440 = vmatmul.f32.gmra.mxu3 %v1773_v8 }
 0x2e8   :  { %v1605_v42 = vpop.permute.xlu1 %1604 }
 0x2e9   :  { %v1725_v21 = vmul.f32 %v1605_v42, %v1445_v1  ;;  %v1834_v1 = vld [vmem:[%s9420_s6 + $0x290] sm:$0xff] }
 0x2ea   :  { %2029 = vmatmul.f32.gmra.mxu1 %v1773_v8  ;;  %v1724_v8 = vmul.f32 %v1605_v42, %v1444_v60  ;;  %v6250_v60 = vld [vmem:[%s9420_s6 + $0x8] sm:$0xff] }
 0x2eb   :  { %2443 = vmatmul.f32.gmra.mxu3 %v1776_v7 }
 0x2f0   :  { %v1610_v15 = vpop.permute.xlu0 %1609 }
 0x2f1   :  { %v1726_v30 = vmul.f32 %v1610_v15, %v1446_v11  ;;  %v1727_v2 = vmul.f32 %v1610_v15, %v1447_v53  ;;  %v1425_v53 = vld [vmem:[%s9419_s5 + $0x108] sm:$0xff] }
 0x2f2   :  { %2032 = vmatmul.f32.gmra.mxu1 %v1776_v7  ;;  %v1440_v7 = vld [vmem:[%s9419_s5 + $0x180] sm:$0xff] }
 0x2f3   :  { %2446 = vmatmul.f32.gmra.mxu3 %v1779_v33 }
 0x2f8   :  { %v1630_v32 = vpop.permute.xlu2 %1629 }
 0x2f9   :  { %v1735_v34 = vmul.f32 %v1630_v32, %v1455_v6  ;;  %v1734_v63 = vmul.f32 %v1630_v32, %v1454_v26  ;;  %v1722_v6 = vmul.f32 %v6093_v14, %v1442_v41  ;;  %v1723_v26 = vmul.f32 %v6093_v14, %v1443_v13  ;;  %v1438_v32 = vld [vmem:[%s9419_s5 + $0x170] sm:$0xff]  ;;  %v1436_v14 = vld [vmem:[%s9419_s5 + $0x160] sm:$0xff]  ;;  %v6275_v41 = vld [vmem:[%s9420_s6 + $0x38] sm:$0xff] }
 0x2fa   :  { %2035 = vmatmul.f32.gmra.mxu1 %v1779_v33  ;;  %v1439_v33 = vld [vmem:[%s9419_s5 + $0x178] sm:$0xff]  ;;  %v1718_v42 = vmul.f32 %v6111_v27, %v1438_v32  ;;  %v1840_v13 = vld [vmem:[%s9420_s6 + $0x2c0] sm:$0xff] }
 0x2fb   :  { %2129 = vmatpush.msrb.mxu0 %v1734_v63  ;;  %4845 = vmatpush.msra.mxu1 %v1734_v63  ;;  %v1719_v15 = vmul.f32 %v6111_v27, %v1439_v33  ;;  %v1432_v27 = vld [vmem:[%s9419_s5 + $0x140] sm:$0xff] }
 0x2fc   :  { %2540 = vmatpush.msra.mxu2 %v1735_v34  ;;  %2449 = vmatmul.f32.gmra.mxu3 %v1782_v3  ;;  %v1720_v34 = vmul.f32 %v6113_v61, %v1440_v7  ;;  %v6289_v7 = vld [vmem:[%s9420_s6 + $0x50] sm:$0xff] }
 0x300   :  { %v1620_v39 = vpop.permute.xlu1 %1619 }
 0x301   :  { %v1730_v62 = vmul.f32 %v1620_v39, %v1450_v44  ;;  %v1731_v25 = vmul.f32 %v1620_v39, %v1451_v46  ;;  %v1433_v39 = vld [vmem:[%s9419_s5 + $0x148] sm:$0xff]  ;;  %v1431_v46 = vld [vmem:[%s9419_s5 + $0x138] sm:$0xff] }
 0x302   :  { %2038 = vmatmul.f32.gmra.mxu1 %v1782_v3  ;;  %v1435_v3 = vld [vmem:[%s9419_s5 + $0x158] sm:$0xff]  ;;  %v1711_v52 = vmul.f32 %v6086_v20, %v1431_v46 }
 0x303   :  { %v1715_v44 = vmul.f32 %v6097_v10, %v1435_v3  ;;  %v6321_v3 = vld [vmem:[%s9420_s6 + $0x80] sm:$0xff] }
 0x304   :  { %2452 = vmatmul.f32.gmra.mxu3 %v1785_v9  ;;  %v1441_v9 = vld [vmem:[%s9419_s5 + $0x188] sm:$0xff] }
 0x305   :  { %v1721_v63 = vmul.f32 %v6113_v61, %v1441_v9  ;;  %v1434_v61 = vld [vmem:[%s9419_s5 + $0x150] sm:$0xff]  ;;  %v1843_v9 = vld [vmem:[%s9420_s6 + $0x2d8] sm:$0xff] }
 0x308   :  { %v1625_v43 = vpop.permute.xlu0 %1624 }
 0x309   :  { %v1733_v17 = vmul.f32 %v1625_v43, %v1453_v36  ;;  %v1732_v50 = vmul.f32 %v1625_v43, %v1452_v38  ;;  %v1716_v36 = vmul.f32 %v6095_v24, %v1436_v14  ;;  %v1714_v43 = vmul.f32 %v6097_v10, %v1434_v61  ;;  %v1428_v10 = vld [vmem:[%s9419_s5 + $0x120] sm:$0xff]  ;;  %v1809_v14 = vld [vmem:[%s9420_s6 + $0x1c8] sm:$0xff] }
 0x30b   :  { %2130 = vmatpush.msrb.mxu0 %v1732_v50  ;;  %4846 = vmatpush.msra.mxu1 %v1732_v50  ;;  %v1429_v50 = vld [vmem:[%s9419_s5 + $0x128] sm:$0xff] }
 0x30c   :  { %2541 = vmatpush.msra.mxu2 %v1733_v17  ;;  %2455 = vmatmul.f32.gmra.mxu3 %v1788_v37  ;;  %v1437_v37 = vld [vmem:[%s9419_s5 + $0x168] sm:$0xff]  ;;  %v1713_v17 = vmul.f32 %v6081_v23, %v1433_v39  ;;  %v1709_v11 = vmul.f32 %v6091_v57, %v1429_v50  ;;  %v1812_v39 = vld [vmem:[%s9420_s6 + $0x1e0] sm:$0xff]  ;;  %v1467_v50 = vld [vmem:[%s9419_s5 + $0x258] sm:$0xff] }
 0x30d   :  { %2131 = vmatpush.msrb.mxu0 %v1730_v62  ;;  %4847 = vmatpush.msra.mxu1 %v1730_v62  ;;  %v1717_v38 = vmul.f32 %v6095_v24, %v1437_v37  ;;  %v1430_v24 = vld [vmem:[%s9419_s5 + $0x130] sm:$0xff]  ;;  %v1427_v62 = vld [vmem:[%s9419_s5 + $0x118] sm:$0xff] }
 0x30e   :  { %2542 = vmatpush.msra.mxu2 %v1731_v25  ;;  %v1710_v51 = vmul.f32 %v6086_v20, %v1430_v24  ;;  %v1708_v25 = vmul.f32 %v6091_v57, %v1428_v10  ;;  %v1424_v20 = vld [vmem:[%s9419_s5 + $0x100] sm:$0xff]  ;;  %v1466_v10 = vld [vmem:[%s9419_s5 + $0x250] sm:$0xff] }
 0x30f   :  { %2132 = vmatpush.msrb.mxu0 %v1728_v54  ;;  %4848 = vmatpush.msra.mxu1 %v1728_v54  ;;  %v1704_v57 = vmul.f32 %v6079_v4, %v1424_v20 }
 0x310   :  { %2543 = vmatpush.msra.mxu2 %v1729_v59  ;;  %v1707_v59 = vmul.f32 %v6074_v55, %v1427_v62  ;;  %v1465_v62 = vld [vmem:[%s9419_s5 + $0x248] sm:$0xff] }
 0x311   :  { %2133 = vmatpush.msrb.mxu0 %v1726_v30  ;;  %4849 = vmatpush.msra.mxu1 %v1726_v30  ;;  %v1837_v30 = vld [vmem:[%s9420_s6 + $0x2a8] sm:$0xff] }
 0x312   :  { %2544 = vmatpush.msra.mxu2 %v1727_v2  ;;  %v1800_v2 = vld [vmem:[%s9420_s6 + $0x180] sm:$0xff] }
 0x313   :  { %2134 = vmatpush.msrb.mxu0 %v1724_v8  ;;  %4850 = vmatpush.msra.mxu1 %v1724_v8  ;;  %v1803_v8 = vld [vmem:[%s9420_s6 + $0x198] sm:$0xff] }
 0x314   :  { %2545 = vmatpush.msra.mxu2 %v1725_v21  ;;  %2458 = vmatmul.f32.gmra.mxu3 %v6127_v35  ;;  %v1712_v35 = vmul.f32 %v6081_v23, %v1432_v27  ;;  %v1426_v23 = vld [vmem:[%s9419_s5 + $0x110] sm:$0xff]  ;;  %v1471_v27 = vld [vmem:[%s9419_s5 + $0x278] sm:$0xff] }
 0x315   :  { %2135 = vmatpush.msrb.mxu0 %v1722_v6  ;;  %4851 = vmatpush.msra.mxu1 %v1722_v6  ;;  %v1706_v54 = vmul.f32 %v6074_v55, %v1426_v23  ;;  %v1797_v55 = vld [vmem:[%s9420_s6 + $0x168] sm:$0xff]  ;;  %v1806_v6 = vld [vmem:[%s9420_s6 + $0x1b0] sm:$0xff] }
 0x316   :  { %2546 = vmatpush.msra.mxu2 %v1723_v26  ;;  %v6297_v26 = vpop.permute.xlu2 %1634 }
 0x317   :  { %2136 = vmatpush.msrb.mxu0 %v1720_v34  ;;  %4852 = vmatpush.msra.mxu1 %v1720_v34  ;;  %v6307_v34 = vld [vmem:[%s9420_s6 + $0x68] sm:$0xff] }
 0x318   :  { %2547 = vmatpush.msra.mxu2 %v1721_v63  ;;  %v1846_v63 = vld [vmem:[%s9420_s6 + $0x2f0] sm:$0xff] }
 0x319   :  { %2137 = vmatpush.msrb.mxu0 %v1718_v42  ;;  %4853 = vmatpush.msra.mxu1 %v1718_v42 }
 0x31a   :  { %2548 = vmatpush.msra.mxu2 %v1719_v15 }
 0x31b   :  { %2138 = vmatpush.msrb.mxu0 %v1716_v36  ;;  %4854 = vmatpush.msra.mxu1 %v1716_v36  ;;  %v1849_v36 = vld [vmem:[%s9420_s6 + $0x308] sm:$0xff] }
 0x31c   :  { %2549 = vmatpush.msra.mxu2 %v1717_v38  ;;  %2461 = vmatmul.f32.gmra.mxu3 %v6142_v45  ;;  %v1705_v45 = vmul.f32 %v6079_v4, %v1425_v53  ;;  %v6263_v4 = vld [vmem:[%s9420_s6 + $0x20] sm:$0xff]  ;;  %v1470_v38 = vld [vmem:[%s9419_s5 + $0x270] sm:$0xff]  ;;  %v6357_v53 = vld [vmem:[%s9420_s6 + $0x98] sm:$0xff] }
 0x31d   :  { %2139 = vmatpush.msrb.mxu0 %v1714_v43  ;;  %4855 = vmatpush.msra.mxu1 %v1714_v43  ;;  %v1468_v43 = vld [vmem:[%s9419_s5 + $0x260] sm:$0xff] }
 0x31e   :  { %2550 = vmatpush.msra.mxu2 %v1715_v44  ;;  %v1650_v37 = vpop.permute.xlu2 %1649  ;;  %v1469_v44 = vld [vmem:[%s9419_s5 + $0x268] sm:$0xff] }
 0x31f   :  { %2140 = vmatpush.msrb.mxu0 %v1712_v35  ;;  %4856 = vmatpush.msra.mxu1 %v1712_v35 }
 0x320   :  { %2551 = vmatpush.msra.mxu2 %v1713_v17  ;;  %v6299_v32 = vpop.permute.xlu0 %1639 }
 0x321   :  { %2141 = vmatpush.msrb.mxu0 %v1710_v51  ;;  %4857 = vmatpush.msra.mxu1 %v1710_v51 }
 0x322   :  { %2552 = vmatpush.msra.mxu2 %v1711_v52 }
 0x323   :  { %2142 = vmatpush.msrb.mxu0 %v1708_v25  ;;  %4858 = vmatpush.msra.mxu1 %v1708_v25  ;;  %v1464_v25 = vld [vmem:[%s9419_s5 + $0x240] sm:$0xff] }
 0x324   :  { %2553 = vmatpush.msra.mxu2 %v1709_v11  ;;  %2464 = vmatmul.f32.gmra.mxu3 %v1797_v55 }
 0x325   :  { %2143 = vmatpush.msrb.mxu0 %v1706_v54  ;;  %4859 = vmatpush.msra.mxu1 %v1706_v54  ;;  %v1463_v54 = vld [vmem:[%s9419_s5 + $0x238] sm:$0xff] }
 0x326   :  { %2554 = vmatpush.msra.mxu2 %v1707_v59  ;;  %v1852_v59 = vld [vmem:[%s9420_s6 + $0x320] sm:$0xff] }
 0x327   :  { %2144 = vmatpush.msrb.mxu0 %v1704_v57  ;;  %4860 = vmatpush.msra.mxu1 %v1704_v57 }
 0x328   :  { %2555 = vmatpush.msra.mxu2 %v1705_v45  ;;  %2145 = vmatmul.f32.vlgmr.msrb.gmra.mxu0 %v6250_v60  ;;  %v1645_v15 = vpop.permute.xlu1 %1644  ;;  %v1462_v45 = vld [vmem:[%s9419_s5 + $0x230] sm:$0xff] }
 0x329   :  { %2226 = vmatmul.f32.vlgmr.msra.gmra.mxu1 %v1834_v1  ;;  %2053 = vmatmul.f32.gmra.mxu2 %v1797_v55  ;;  %v1815_v55 = vld [vmem:[%s9420_s6 + $0x1f8] sm:$0xff] }
 0x32c   :  { %2467 = vmatmul.f32.gmra.mxu3 %v1800_v2 }
 0x32f   :  { %v6284_v21 = vpop.f32.mrf.mxu1 }
 0x330   :  { %2148 = vmatmul.f32.gmra.mxu0 %v6263_v4  ;;  %9544 = vst [vmem:[#allocation2_spill] sm:$0xff] %v6284_v21  ;;  %v1665_v24 = vpop.permute.xlu2 %1664  ;;  %v6677_v21 = vld [vmem:[%s9420_s6 + $0x1e8] sm:$0xff] }
 0x331   :  { %2229 = vmatmul.f32.gmra.mxu1 %v1837_v30  ;;  %2056 = vmatmul.f32.gmra.mxu2 %v1800_v2  ;;  %v1748_v52 = vmul.f32 %v1665_v24, %v1468_v43  ;;  %v1749_v23 = vmul.f32 %v1665_v24, %v1469_v44  ;;  %v1461_v30 = vld [vmem:[%s9419_s5 + $0x228] sm:$0xff]  ;;  %v1818_v44 = vld [vmem:[%s9420_s6 + $0x210] sm:$0xff] }
 0x334   :  { %2470 = vmatmul.f32.gmra.mxu3 %v1803_v8 }
 0x337   :  { %v6302_v33 = vpop.f32.mrf.mxu1 }
 0x338   :  { %2151 = vmatmul.f32.gmra.mxu0 %v6275_v41  ;;  %v1655_v42 = vpop.permute.xlu0 %1654 }
 0x339   :  { %2232 = vmatmul.f32.gmra.mxu1 %v1840_v13  ;;  %2059 = vmatmul.f32.gmra.mxu2 %v1803_v8  ;;  %v1745_v1 = vmul.f32 %v1655_v42, %v1465_v62  ;;  %v1744_v2 = vmul.f32 %v1655_v42, %v1464_v25  ;;  %v1743_v13 = vmul.f32 %v1650_v37, %v1463_v54  ;;  %v1460_v8 = vld [vmem:[%s9419_s5 + $0x220] sm:$0xff]  ;;  %v1457_v42 = vld [vmem:[%s9419_s5 + $0x208] sm:$0xff]  ;;  %v6531_v62 = vld [vmem:[%s9420_s6 + $0x158] sm:$0xff] }
 0x33a   :  { %v1737_v43 = vmul.f32 %v6297_v26, %v1457_v42  ;;  %v6536_v25 = vld [vmem:[%s9420_s6 + $0x28] sm:$0xff] }
 0x33c   :  { %2473 = vmatmul.f32.gmra.mxu3 %v1806_v6 }
 0x33f   :  { %v6316_v61 = vpop.f32.mrf.mxu1 }
 0x340   :  { %2154 = vmatmul.f32.gmra.mxu0 %v6289_v7  ;;  %v1660_v51 = vpop.permute.xlu1 %1659 }
 0x341   :  { %2235 = vmatmul.f32.gmra.mxu1 %v1843_v9  ;;  %2062 = vmatmul.f32.gmra.mxu2 %v1806_v6  ;;  %v1746_v11 = vmul.f32 %v1660_v51, %v1466_v10  ;;  %v1747_v20 = vmul.f32 %v1660_v51, %v1467_v50  ;;  %v1742_v9 = vmul.f32 %v1650_v37, %v1462_v45  ;;  %v1459_v6 = vld [vmem:[%s9419_s5 + $0x218] sm:$0xff]  ;;  %v1456_v37 = vld [vmem:[%s9419_s5 + $0x200] sm:$0xff]  ;;  %v6513_v50 = vld [vmem:[%s9420_s6 + $0x10] sm:$0xff] }
 0x342   :  { %v1736_v24 = vmul.f32 %v6297_v26, %v1456_v37  ;;  %v1858_v26 = vld [vmem:[%s9420_s6 + $0x350] sm:$0xff]  ;;  %v6508_v10 = vld [vmem:[%s9420_s6 + $0x140] sm:$0xff] }
 0x343   :  { %v6559_v45 = vld [vmem:[%s9420_s6 + $0x40] sm:$0xff] }
 0x344   :  { %2476 = vmatmul.f32.gmra.mxu3 %v1809_v14  ;;  %v6614_v37 = vld [vmem:[%s9420_s6 + $0x300] sm:$0xff] }
 0x347   :  { %v6365_v57 = vpop.f32.mrf.mxu1 }
 0x348   :  { %2157 = vmatmul.f32.gmra.mxu0 %v6307_v34 }
 0x349   :  { %2238 = vmatmul.f32.gmra.mxu1 %v1846_v63  ;;  %2065 = vmatmul.f32.gmra.mxu2 %v1809_v14  ;;  %v1458_v63 = vld [vmem:[%s9419_s5 + $0x210] sm:$0xff]  ;;  %v1741_v14 = vmul.f32 %v1645_v15, %v1461_v30 }
 0x34c   :  { %2479 = vmatmul.f32.gmra.mxu3 %v1812_v39 }
 0x350   :  { %2160 = vmatmul.f32.gmra.mxu0 %v6321_v3  ;;  %v1670_v46 = vpop.permute.xlu0 %1669 }
 0x351   :  { %2241 = vmatmul.f32.gmra.mxu1 %v1849_v36  ;;  %v1750_v35 = vmul.f32 %v1670_v46, %v1470_v38  ;;  %v1751_v17 = vmul.f32 %v1670_v46, %v1471_v27  ;;  %2068 = vmatmul.f32.gmra.mxu2 %v1812_v39  ;;  %v1740_v36 = vmul.f32 %v1645_v15, %v1460_v8  ;;  %v6396_v27 = vld [vmem:[%s9420_s6 + $0xb0] sm:$0xff]  ;;  %v1855_v15 = vld [vmem:[%s9420_s6 + $0x338] sm:$0xff]  ;;  %v6408_v46 = vpop.f32.mrf.mxu1 }
 0x352   :  { %v1739_v38 = vmul.f32 %v6299_v32, %v1459_v6  ;;  %v1738_v39 = vmul.f32 %v6299_v32, %v1458_v63  ;;  %v6415_v32 = vld [vmem:[%s9420_s6 + $0xc8] sm:$0xff]  ;;  %v6584_v8 = vld [vmem:[%s9420_s6 + $0x58] sm:$0xff] }
 0x353   :  { %2274 = vmatpush.msrb.mxu1 %v1750_v35  ;;  %2685 = vmatpush.msra.mxu0 %v1751_v17  ;;  %v1821_v35 = vld [vmem:[%s9420_s6 + $0x228] sm:$0xff]  ;;  %v1870_v17 = vld [vmem:[%s9420_s6 + $0x3b0] sm:$0xff] }
 0x354   :  { %2482 = vmatmul.f32.gmra.mxu3 %v1815_v55 }
 0x355   :  { %2275 = vmatpush.msrb.mxu1 %v1748_v52  ;;  %2686 = vmatpush.msra.mxu0 %v1749_v23  ;;  %v6520_v52 = vld [vmem:[%s9420_s6 + $0x2a0] sm:$0xff] }
 0x357   :  { %2276 = vmatpush.msrb.mxu1 %v1746_v11  ;;  %2687 = vmatpush.msra.mxu0 %v1747_v20  ;;  %v6541_v11 = vld [vmem:[%s9420_s6 + $0x2b8] sm:$0xff] }
 0x358   :  { %2163 = vmatmul.f32.gmra.mxu0 %v6357_v53 }
 0x359   :  { %2244 = vmatmul.f32.gmra.mxu1 %v1852_v59  ;;  %2688 = vmatpush.msra.mxu0 %v1745_v1  ;;  %v6554_v59 = vld [vmem:[%s9420_s6 + $0x170] sm:$0xff] }
 0x35a   :  { %2277 = vmatpush.msrb.mxu1 %v1744_v2  ;;  %2071 = vmatmul.f32.gmra.mxu2 %v1815_v55  ;;  %v6564_v1 = vld [vmem:[%s9420_s6 + $0x2d0] sm:$0xff]  ;;  %v6577_v2 = vld [vmem:[%s9420_s6 + $0x188] sm:$0xff] }
 0x35b   :  { %2689 = vmatpush.msra.mxu0 %v1743_v13 }
 0x35c   :  { %2278 = vmatpush.msrb.mxu1 %v1742_v9  ;;  %2485 = vmatmul.f32.gmra.mxu3 %v1818_v44  ;;  %v6589_v9 = vld [vmem:[%s9420_s6 + $0x2e8] sm:$0xff] }
 0x35d   :  { %2690 = vmatpush.msra.mxu0 %v1741_v14  ;;  %v6602_v14 = vld [vmem:[%s9420_s6 + $0x1a0] sm:$0xff] }
 0x35e   :  { %2279 = vmatpush.msrb.mxu1 %v1740_v36  ;;  %v6609_v36 = vld [vmem:[%s9420_s6 + $0x70] sm:$0xff] }
 0x35f   :  { %2691 = vmatpush.msra.mxu0 %v1739_v38 }
 0x360   :  { %2280 = vmatpush.msrb.mxu1 %v1738_v39  ;;  %2166 = vmatmul.f32.gmra.mxu0 %v6396_v27 }
 0x361   :  { %2247 = vmatmul.f32.gmra.mxu1 %v1855_v15  ;;  %2692 = vmatpush.msra.mxu0 %v1737_v43  ;;  %v6627_v15 = vld [vmem:[%s9420_s6 + $0x1b8] sm:$0xff] }
 0x362   :  { %2281 = vmatpush.msrb.mxu1 %v1736_v24  ;;  %2074 = vmatmul.f32.gmra.mxu2 %v1818_v44  ;;  %v6634_v44 = vld [vmem:[%s9420_s6 + $0x88] sm:$0xff]  ;;  %v6639_v24 = vld [vmem:[%s9420_s6 + $0x318] sm:$0xff] }
 0x364   :  { %2403 = vmatpush.msra.mxu1 %v5772_v56  ;;  %v6426_v56 = vpop.f32.mrf.mxu1  ;;  %2488 = vmatmul.f32.gmra.mxu3 %v1821_v35 }
 0x366   :  { %2404 = vmatpush.msra.mxu1 %v5774_v0  ;;  %v6432_v0 = vld [vmem:[%s9420_s6 + $0xe0] sm:$0xff] }
 0x368   :  { %2405 = vmatpush.msra.mxu1 %v5785_v22  ;;  %2169 = vmatmul.f32.gmra.mxu0 %v6415_v32  ;;  %v1861_v22 = vld [vmem:[%s9420_s6 + $0x368] sm:$0xff] }
 0x369   :  { %2250 = vmatmul.f32.gmra.mxu1 %v1858_v26 }
 0x36a   :  { %2406 = vmatpush.msra.mxu1 %v5811_v28  ;;  %2077 = vmatmul.f32.gmra.mxu2 %v1821_v35  ;;  %v1824_v28 = vld [vmem:[%s9420_s6 + $0x240] sm:$0xff] }
 0x36c   :  { %2407 = vmatpush.msra.mxu1 %v5837_v40  ;;  %2491 = vmatmul.f32.gmra.mxu3 %v1824_v28  ;;  %v6445_v40 = vpop.f32.mrf.mxu1 }
 0x36e   :  { %2408 = vmatpush.msra.mxu1 %v5858_v49  ;;  %v6450_v49 = vld [vmem:[%s9420_s6 + $0xf8] sm:$0xff] }
 0x370   :  { %2409 = vmatpush.msra.mxu1 %v5854_v48  ;;  %2172 = vmatmul.f32.gmra.mxu0 %v6432_v0  ;;  %v1864_v48 = vld [vmem:[%s9420_s6 + $0x380] sm:$0xff] }
 0x371   :  { %2253 = vmatmul.f32.gmra.mxu1 %v1861_v22  ;;  %v6652_v22 = vld [vmem:[%s9420_s6 + $0x1d0] sm:$0xff] }
 0x372   :  { %2410 = vmatpush.msra.mxu1 %v5888_v5  ;;  %2080 = vmatmul.f32.gmra.mxu2 %v1824_v28  ;;  %v6459_v5 = vld [vmem:[%s9420_s6 + $0x258] sm:$0xff] }
 0x374   :  { %2411 = vmatpush.msra.mxu1 %v5914_v18  ;;  %v6469_v18 = vld [vmem:[%s9420_s6 + $0x110] sm:$0xff] }
 0x376   :  { %2412 = vmatpush.msra.mxu1 %v5935_v31  ;;  %v6475_v31 = vpop.f32.mrf.mxu1 }
 0x377   :  { %9545 = vst [vmem:[#allocation3_spill] sm:$0xff] %v6475_v31  ;;  %v6784_v31 = vld [vmem:[%s9420_s6 + $0x118] sm:$0xff] }
 0x378   :  { %2413 = vmatpush.msra.mxu1 %v5931_v29  ;;  %2175 = vmatmul.f32.gmra.mxu0 %v6450_v49  ;;  %v1867_v29 = vld [vmem:[%s9420_s6 + $0x398] sm:$0xff] }
 0x379   :  { %2256 = vmatmul.f32.gmra.mxu1 %v1864_v48  ;;  %v6659_v48 = vld [vmem:[%s9420_s6 + $0xa0] sm:$0xff] }
 0x37a   :  { %2414 = vmatpush.msra.mxu1 %v5965_v47  ;;  %2083 = vmatmul.f32.gmra.mxu2 %v6459_v5  ;;  %v6480_v47 = vld [vmem:[%s9420_s6 + $0x270] sm:$0xff] }
 0x37c   :  { %2415 = vmatpush.msra.mxu1 %v5991_v58  ;;  %v6486_v58 = vpop.f32.mrf.mxu2 }
 0x37d   :  { %9546 = vst [vmem:[#allocation4_spill] sm:$0xff] %v6486_v58  ;;  %v6739_v58 = vld [vmem:[%s9420_s6 + $0x378] sm:$0xff] }
 0x37e   :  { %2416 = vmatpush.msra.mxu1 %v6010_v19  ;;  %v6491_v19 = vld [vmem:[%s9420_s6 + $0x128] sm:$0xff]  ;;  %9570 = vst [vmem:[#allocation28_spill] sm:$0xff] %v6739_v58 }
 0x380   :  { %2417 = vmatpush.msra.mxu1 %v6006_v16  ;;  %2178 = vmatmul.f32.gmra.mxu0 %v6469_v18  ;;  %v6499_v16 = vld [vmem:[%s9420_s6 + $0x288] sm:$0xff] }
 0x381   :  { %2259 = vmatmul.f32.gmra.mxu1 %v1867_v29  ;;  %v6664_v29 = vld [vmem:[%s9420_s6 + $0x330] sm:$0xff] }
 0x382   :  { %2418 = vmatpush.msra.mxu1 %v6032_v12  ;;  %2086 = vmatmul.f32.gmra.mxu2 %v6480_v47  ;;  %v6502_v12 = vpop.f32.mrf.mxu1 }
 0x383   :  { %9547 = vst [vmem:[#allocation5_spill] sm:$0xff] %v6502_v12  ;;  %v6759_v12 = vld [vmem:[%s9420_s6 + $0x100] sm:$0xff] }
 0x384   :  { %v6515_v51 = vpop.f32.mrf.mxu2 }
 0x385   :  { %9548 = vst [vmem:[#allocation6_spill] sm:$0xff] %v6515_v51  ;;  %v6734_v51 = vld [vmem:[%s9420_s6 + $0xe8] sm:$0xff] }
 0x388   :  { %2181 = vmatmul.f32.gmra.mxu0 %v6491_v19 }
 0x389   :  { %2262 = vmatmul.f32.gmra.mxu1 %v1870_v17 }
 0x38a   :  { %2089 = vmatmul.f32.gmra.mxu2 %v6499_v16  ;;  %v6525_v23 = vpop.f32.mrf.mxu1 }
 0x38b   :  { %9549 = vst [vmem:[#allocation7_spill] sm:$0xff] %v6525_v23 }
 0x38c   :  { %v6544_v20 = vpop.f32.mrf.mxu2 }
 0x38d   :  { %9550 = vst [vmem:[#allocation8_spill] sm:$0xff] %v6544_v20 }
 0x390   :  { %2184 = vmatmul.f32.gmra.mxu0 %v6508_v10 }
 0x391   :  { %4749 = vmatmul.msk.f32.vlgmr.msrb.gmra.mxu1 %vm112_vm0, %v6513_v50 }
 0x392   :  { %2092 = vmatmul.f32.gmra.mxu2 %v6520_v52  ;;  %v6549_v54 = vpop.f32.mrf.mxu1 }
 0x393   :  { %9551 = vst [vmem:[#allocation9_spill] sm:$0xff] %v6549_v54 }
 0x394   :  { %v6570_v55 = vpop.f32.mrf.mxu2 }
 0x395   :  { %9552 = vst [vmem:[#allocation10_spill] sm:$0xff] %v6570_v55  ;;  %v6714_v55 = vld [vmem:[%s9420_s6 + $0x360] sm:$0xff] }
 0x396   :  { %9566 = vst [vmem:[#allocation24_spill] sm:$0xff] %v6714_v55 }
 0x398   :  { %2187 = vmatmul.f32.gmra.mxu0 %v6531_v62 }
 0x399   :  { %4750 = vmatmul.msk.f32.gmra.mxu1 %vm112_vm0, %v6536_v25 }
 0x39a   :  { %2095 = vmatmul.f32.gmra.mxu2 %v6541_v11 }
 0x3a0   :  { %2190 = vmatmul.f32.gmra.mxu0 %v6554_v59 }
 0x3a1   :  { %4751 = vmatmul.msk.f32.gmra.mxu1 %vm112_vm0, %v6559_v45 }
 0x3a2   :  { %2098 = vmatmul.f32.gmra.mxu2 %v6564_v1 }
 0x3a5   :  { %v6572_v30 = vpop.f32.mrf.mxu0 }
 0x3a6   :  { %9553 = vst [vmem:[#allocation11_spill] sm:$0xff] %v6572_v30  ;;  %v6579_v13 = vpop.f32.mrf.mxu1 }
 0x3a7   :  { %9554 = vst [vmem:[#allocation12_spill] sm:$0xff] %v6579_v13  ;;  %v6727_v13 = vld [vmem:[%s9420_s6 + $0x218] sm:$0xff] }
 0x3a8   :  { %2193 = vmatmul.f32.gmra.mxu0 %v6577_v2 }
 0x3a9   :  { %4752 = vmatmul.msk.f32.gmra.mxu1 %vm112_vm0, %v6584_v8 }
 0x3aa   :  { %2101 = vmatmul.f32.gmra.mxu2 %v6589_v9 }
 0x3ac   :  { %v6595_v6 = vpop.f32.mrf.mxu2 }
 0x3ad   :  { %9555 = vst [vmem:[#allocation13_spill] sm:$0xff] %v6595_v6  ;;  %v6597_v63 = vpop.f32.mrf.mxu0 }
 0x3ae   :  { %v6604_v42 = vpop.f32.mrf.mxu1 }
 0x3af   :  { %9556 = vst [vmem:[#allocation14_spill] sm:$0xff] %v6604_v42  ;;  %v6709_v42 = vld [vmem:[%s9420_s6 + $0xd0] sm:$0xff] }
 0x3b0   :  { %2196 = vmatmul.f32.gmra.mxu0 %v6602_v14 }
 0x3b1   :  { %4753 = vmatmul.msk.f32.gmra.mxu1 %vm112_vm0, %v6609_v36 }
 0x3b2   :  { %2104 = vmatmul.f32.gmra.mxu2 %v6614_v37 }
 0x3b4   :  { %v6620_v38 = vpop.f32.mrf.mxu2 }
 0x3b5   :  { %9557 = vst [vmem:[#allocation15_spill] sm:$0xff] %v6620_v38  ;;  %v6622_v39 = vpop.f32.mrf.mxu0  ;;  %v6689_v38 = vld [vmem:[%s9420_s6 + $0x348] sm:$0xff] }
 0x3b6   :  { %v6629_v43 = vpop.f32.mrf.mxu1  ;;  %9563 = vst [vmem:[#allocation21_spill] sm:$0xff] %v6689_v38 }
 0x3b7   :  { %9558 = vst [vmem:[#allocation16_spill] sm:$0xff] %v6629_v43  ;;  %v6702_v43 = vld [vmem:[%s9420_s6 + $0x200] sm:$0xff] }
 0x3b8   :  { %2199 = vmatmul.f32.gmra.mxu0 %v6627_v15 }
 0x3b9   :  { %4754 = vmatmul.msk.f32.gmra.mxu1 %vm112_vm0, %v6634_v44 }
 0x3ba   :  { %2107 = vmatmul.f32.gmra.mxu2 %v6639_v24 }
 0x3bc   :  { %v6645_v26 = vpop.f32.mrf.mxu2 }
 0x3bd   :  { %9559 = vst [vmem:[#allocation17_spill] sm:$0xff] %v6645_v26  ;;  %v6647_v35 = vpop.f32.mrf.mxu0 }
 0x3be   :  { %v6654_v28 = vpop.f32.mrf.mxu1 }
 0x3bf   :  { %9560 = vst [vmem:[#allocation18_spill] sm:$0xff] %v6654_v28  ;;  %v6684_v28 = vld [vmem:[%s9420_s6 + $0xb8] sm:$0xff] }
 0x3c0   :  { %2202 = vmatmul.f32.gmra.mxu0 %v6652_v22 }
 0x3c1   :  { %4755 = vmatmul.msk.f32.gmra.mxu1 %vm112_vm0, %v6659_v48 }
 0x3c2   :  { %2110 = vmatmul.f32.gmra.mxu2 %v6664_v29 }
 0x3c4   :  { %v6670_v17 = vpop.f32.mrf.mxu2 }
 0x3c5   :  { %9561 = vst [vmem:[#allocation19_spill] sm:$0xff] %v6670_v17  ;;  %v6672_v30 = vpop.f32.mrf.mxu0 }
 0x3c6   :  { %v6679_v26 = vpop.f32.mrf.mxu1 }
 0x3c7   :  { %9562 = vst [vmem:[#allocation20_spill] sm:$0xff] %v6679_v26 }
 0x3c8   :  { %2205 = vmatmul.f32.gmra.mxu0 %v6677_v21 }
 0x3c9   :  { %4756 = vmatmul.msk.f32.gmra.mxu1 %vm112_vm0, %v6684_v28 }
 0x3ca   :  { %2113 = vmatmul.f32.gmra.mxu2 %v6689_v38 }
 0x3cc   :  { %v6695_v17 = vpop.f32.mrf.mxu2 }
 0x3cd   :  { %9564 = vst [vmem:[#allocation22_spill] sm:$0xff] %v6695_v17  ;;  %v6697_v26 = vpop.f32.mrf.mxu0 }
 0x3ce   :  { %v6704_v6 = vpop.f32.mrf.mxu1 }
 0x3cf   :  { %9565 = vst [vmem:[#allocation23_spill] sm:$0xff] %v6704_v6 }
 0x3d0   :  { %2208 = vmatmul.f32.gmra.mxu0 %v6702_v43 }
 0x3d1   :  { %4757 = vmatmul.msk.f32.gmra.mxu1 %vm112_vm0, %v6709_v42 }
 0x3d2   :  { %2116 = vmatmul.f32.gmra.mxu2 %v6714_v55 }
 0x3d4   :  { %v6720_v17 = vpop.f32.mrf.mxu2 }
 0x3d5   :  { %9567 = vst [vmem:[#allocation25_spill] sm:$0xff] %v6720_v17  ;;  %v6722_v6 = vpop.f32.mrf.mxu0 }
 0x3d6   :  { %9568 = vst [vmem:[#allocation26_spill] sm:$0xff] %v6722_v6  ;;  %v6729_v20 = vpop.f32.mrf.mxu1 }
 0x3d7   :  { %9569 = vst [vmem:[#allocation27_spill] sm:$0xff] %v6729_v20  ;;  %v6750_v20 = vld [vmem:[%s9420_s6 + $0x230] sm:$0xff] }
 0x3d8   :  { %2211 = vmatmul.f32.gmra.mxu0 %v6727_v13 }
 0x3d9   :  { %4758 = vmatmul.msk.f32.gmra.mxu1 %vm112_vm0, %v6734_v51 }
 0x3da   :  { %2119 = vmatmul.f32.gmra.mxu2 %v6739_v58  ;;  %v6764_v58 = vld [vmem:[%s9420_s6 + $0x390] sm:$0xff] }
 0x3db   :  { %9574 = vst [vmem:[#allocation32_spill] sm:$0xff] %v6764_v58 }
 0x3dd   :  { %v6745_v17 = vpop.f32.mrf.mxu0  ;;  %v6752_v54 = vpop.f32.mrf.mxu2 }
 0x3de   :  { %9571 = vst [vmem:[#allocation29_spill] sm:$0xff] %v6745_v17  ;;  %v6754_v23 = vpop.f32.mrf.mxu1 }
 0x3df   :  { %9572 = vst [vmem:[#allocation30_spill] sm:$0xff] %v6752_v54 }
 0x3e0   :  { %9573 = vst [vmem:[#allocation31_spill] sm:$0xff] %v6754_v23  ;;  %2214 = vmatmul.f32.gmra.mxu0 %v6750_v20  ;;  %v6775_v23 = vld [vmem:[%s9420_s6 + $0x248] sm:$0xff] }
 0x3e1   :  { %4759 = vmatmul.msk.f32.gmra.mxu1 %vm112_vm0, %v6759_v12  ;;  %9576 = vst [vmem:[#allocation34_spill] sm:$0xff] %v6775_v23 }
 0x3e2   :  { %2122 = vmatmul.f32.gmra.mxu2 %v6764_v58  ;;  %v6789_v58 = vld [vmem:[%s9420_s6 + $0x3a8] sm:$0xff] }
 0x3e3   :  { %9579 = vst [vmem:[#allocation37_spill] sm:$0xff] %v6789_v58 }
 0x3e5   :  { %v6770_v54 = vpop.f32.mrf.mxu0  ;;  %v6777_v55 = vpop.f32.mrf.mxu2 }
 0x3e6   :  { %9575 = vst [vmem:[#allocation33_spill] sm:$0xff] %v6770_v54  ;;  %v6779_v17 = vpop.f32.mrf.mxu1 }
 0x3e7   :  { %9577 = vst [vmem:[#allocation35_spill] sm:$0xff] %v6777_v55 }
 0x3e8   :  { %9578 = vst [vmem:[#allocation36_spill] sm:$0xff] %v6779_v17  ;;  %2217 = vmatmul.f32.gmra.mxu0 %v6775_v23  ;;  %v6800_v17 = vld [vmem:[%s9420_s6 + $0x260] sm:$0xff]  ;;  %v6809_v23 = vld [vmem:[%s9420_s6 + $0x130] sm:$0xff] }
 0x3e9   :  { %4760 = vmatmul.msk.f32.gmra.mxu1 %vm112_vm0, %v6784_v31  ;;  %9581 = vst [vmem:[#allocation39_spill] sm:$0xff] %v6800_v17 }
 0x3ea   :  { %2125 = vmatmul.f32.gmra.mxu2 %v6789_v58 }
 0x3ed   :  { %v6795_v55 = vpop.f32.mrf.mxu0  ;;  %v6802_v54 = vpop.f32.mrf.mxu2 }
 0x3ee   :  { %9580 = vst [vmem:[#allocation38_spill] sm:$0xff] %v6795_v55  ;;  %v6804_v38 = vpop.f32.mrf.mxu1 }
 0x3ef   :  { %9582 = vst [vmem:[#allocation40_spill] sm:$0xff] %v6802_v54  ;;  %v6820_v54 = vld [vmem:[%s9420_s6 + $0x278] sm:$0xff] }
 0x3f0   :  { %9583 = vst [vmem:[#allocation41_spill] sm:$0xff] %v6804_v38  ;;  %2220 = vmatmul.f32.gmra.mxu0 %v6800_v17  ;;  %v6829_v17 = vld [vmem:[%s9420_s6 + $0x148] sm:$0xff] }
 0x3f1   :  { %4761 = vmatmul.msk.f32.gmra.mxu1 %vm112_vm0, %v6809_v23 }
 0x3f2   :  { %2556 = vmatmul.f32.vlgmr.msra.gmra.mxu2 %v6250_v60 }
 0x3f5   :  { %v6815_v58 = vpop.f32.mrf.mxu0  ;;  %v6822_v38 = vpop.f32.mrf.mxu2 }
 0x3f6   :  { %9584 = vst [vmem:[#allocation42_spill] sm:$0xff] %v6815_v58  ;;  %v6824_v55 = vpop.f32.mrf.mxu1 }
 0x3f7   :  { %9585 = vst [vmem:[#allocation43_spill] sm:$0xff] %v6822_v38  ;;  %v6844_v38 = vld [vmem:[%s9420_s6 + $0x160] sm:$0xff] }
 0x3f8   :  { %9586 = vst [vmem:[#allocation44_spill] sm:$0xff] %v6824_v55  ;;  %2223 = vmatmul.f32.gmra.mxu0 %v6820_v54 }
 0x3f9   :  { %4762 = vmatmul.msk.f32.gmra.mxu1 %vm112_vm0, %v6829_v17 }
 0x3fa   :  { %2559 = vmatmul.f32.gmra.mxu2 %v6263_v4 }
 0x3fd   :  { %v6835_v60 = vpop.f32.mrf.mxu0  ;;  %v6837_v58 = vpop.f32.mrf.mxu2 }
 0x3fe   :  { %9587 = vst [vmem:[#allocation45_spill] sm:$0xff] %v6837_v58  ;;  %v6839_v6 = vpop.f32.mrf.mxu1 }
 0x3ff   :  { %9588 = vst [vmem:[#allocation46_spill] sm:$0xff] %v6839_v6  ;;  %v6860_v6 = vld [vmem:[%s9420_s6 + $0x178] sm:$0xff] }
 0x400   :  { %4789 = vmatmul.msk.f32.vlgmr.msra.gmra.mxu0 %vm112_vm0, %v6513_v50 }
 0x401   :  { %4763 = vmatmul.msk.f32.gmra.mxu1 %vm112_vm0, %v6844_v38 }
 0x402   :  { %2562 = vmatmul.f32.gmra.mxu2 %v6275_v41 }
 0x405   :  { %v6851_v4 = vpop.f32.mrf.mxu0  ;;  %v6853_v55 = vpop.f32.mrf.mxu2 }
 0x406   :  { %9589 = vst [vmem:[#allocation47_spill] sm:$0xff] %v6853_v55  ;;  %v6855_v58 = vpop.f32.mrf.mxu1 }
 0x407   :  { %9590 = vst [vmem:[#allocation48_spill] sm:$0xff] %v6855_v58  ;;  %v6876_v58 = vld [vmem:[%s9420_s6 + $0x190] sm:$0xff] }
 0x408   :  { %4790 = vmatmul.msk.f32.gmra.mxu0 %vm112_vm0, %v6536_v25 }
 0x409   :  { %4764 = vmatmul.msk.f32.gmra.mxu1 %vm112_vm0, %v6860_v6 }
 0x40a   :  { %2565 = vmatmul.f32.gmra.mxu2 %v6289_v7 }
 0x40d   :  { %v6867_v41 = vpop.f32.mrf.mxu0  ;;  %v6869_v50 = vpop.f32.mrf.mxu2 }
 0x40e   :  { %9591 = vst [vmem:[#allocation49_spill] sm:$0xff] %v6867_v41  ;;  %v6871_v55 = vpop.f32.mrf.mxu1  ;;  %v7053_v41 = vld [vmem:[%s9420_s6 + $0x298] sm:$0xff] }
 0x40f   :  { %9592 = vst [vmem:[#allocation50_spill] sm:$0xff] %v6869_v50 }
 0x410   :  { %9593 = vst [vmem:[#allocation51_spill] sm:$0xff] %v6871_v55  ;;  %4791 = vmatmul.msk.f32.gmra.mxu0 %vm112_vm0, %v6559_v45  ;;  %v6892_v55 = vld [vmem:[%s9420_s6 + $0x1a8] sm:$0xff] }
 0x411   :  { %4765 = vmatmul.msk.f32.gmra.mxu1 %vm112_vm0, %v6876_v58 }
 0x412   :  { %2568 = vmatmul.f32.gmra.mxu2 %v6307_v34 }
 0x415   :  { %v6883_v7 = vpop.f32.mrf.mxu0  ;;  %v6885_v25 = vpop.f32.mrf.mxu2 }
 0x416   :  { %9594 = vst [vmem:[#allocation52_spill] sm:$0xff] %v6883_v7  ;;  %v6887_v50 = vpop.f32.mrf.mxu1  ;;  %v6908_v7 = vld [vmem:[%s9420_s6 + $0x1c0] sm:$0xff] }
 0x417   :  { %9595 = vst [vmem:[#allocation53_spill] sm:$0xff] %v6885_v25 }
 0x418   :  { %4792 = vmatmul.msk.f32.gmra.mxu0 %vm112_vm0, %v6584_v8 }
 0x419   :  { %4766 = vmatmul.msk.f32.gmra.mxu1 %vm112_vm0, %v6892_v55 }
 0x41a   :  { %2571 = vmatmul.f32.gmra.mxu2 %v6321_v3 }
 0x41d   :  { %v6899_v34 = vpop.f32.mrf.mxu0  ;;  %v6901_v45 = vpop.f32.mrf.mxu2 }
 0x41e   :  { %9596 = vst [vmem:[#allocation54_spill] sm:$0xff] %v6899_v34  ;;  %v6903_v25 = vpop.f32.mrf.mxu1  ;;  %v6924_v34 = vld [vmem:[%s9420_s6 + $0x1d8] sm:$0xff] }
 0x41f   :  { %9597 = vst [vmem:[#allocation55_spill] sm:$0xff] %v6901_v45 }
 0x420   :  { %4793 = vmatmul.msk.f32.gmra.mxu0 %vm112_vm0, %v6609_v36 }
 0x421   :  { %4767 = vmatmul.msk.f32.gmra.mxu1 %vm112_vm0, %v6908_v7 }
 0x422   :  { %2574 = vmatmul.f32.gmra.mxu2 %v6357_v53 }
 0x425   :  { %v6915_v3 = vpop.f32.mrf.mxu0  ;;  %v6917_v8 = vpop.f32.mrf.mxu2 }
 0x426   :  { %9598 = vst [vmem:[#allocation56_spill] sm:$0xff] %v6915_v3  ;;  %v6919_v45 = vpop.f32.mrf.mxu1  ;;  %v6940_v3 = vld [vmem:[%s9420_s6 + $0x1f0] sm:$0xff] }
 0x427   :  { %9599 = vst [vmem:[#allocation57_spill] sm:$0xff] %v6917_v8 }
 0x428   :  { %4794 = vmatmul.msk.f32.gmra.mxu0 %vm112_vm0, %v6634_v44 }
 0x429   :  { %4768 = vmatmul.msk.f32.gmra.mxu1 %vm112_vm0, %v6924_v34 }
 0x42a   :  { %2577 = vmatmul.f32.gmra.mxu2 %v6396_v27 }
 0x42d   :  { %v6931_v53 = vpop.f32.mrf.mxu0  ;;  %v6933_v36 = vpop.f32.mrf.mxu2 }
 0x42e   :  { %9600 = vst [vmem:[#allocation58_spill] sm:$0xff] %v6931_v53  ;;  %v6935_v8 = vpop.f32.mrf.mxu1  ;;  %v6956_v53 = vld [vmem:[%s9420_s6 + $0x208] sm:$0xff] }
 0x42f   :  { %9601 = vst [vmem:[#allocation59_spill] sm:$0xff] %v6933_v36 }
 0x430   :  { %4795 = vmatmul.msk.f32.gmra.mxu0 %vm112_vm0, %v6659_v48 }
 0x431   :  { %4769 = vmatmul.msk.f32.gmra.mxu1 %vm112_vm0, %v6940_v3 }
 0x432   :  { %2580 = vmatmul.f32.gmra.mxu2 %v6415_v32 }
 0x435   :  { %v6947_v27 = vpop.f32.mrf.mxu0  ;;  %v6949_v44 = vpop.f32.mrf.mxu2 }
 0x436   :  { %9602 = vst [vmem:[#allocation60_spill] sm:$0xff] %v6947_v27  ;;  %v6951_v36 = vpop.f32.mrf.mxu1  ;;  %v6972_v27 = vld [vmem:[%s9420_s6 + $0x220] sm:$0xff] }
 0x437   :  { %9603 = vst [vmem:[#allocation61_spill] sm:$0xff] %v6949_v44 }
 0x438   :  { %4796 = vmatmul.msk.f32.gmra.mxu0 %vm112_vm0, %v6684_v28 }
 0x439   :  { %4770 = vmatmul.msk.f32.gmra.mxu1 %vm112_vm0, %v6956_v53 }
 0x43a   :  { %2583 = vmatmul.f32.gmra.mxu2 %v6432_v0 }
 0x43d   :  { %v6963_v32 = vpop.f32.mrf.mxu0  ;;  %v6965_v48 = vpop.f32.mrf.mxu2 }
 0x43e   :  { %9604 = vst [vmem:[#allocation62_spill] sm:$0xff] %v6963_v32  ;;  %v6967_v44 = vpop.f32.mrf.mxu1  ;;  %v6988_v32 = vld [vmem:[%s9420_s6 + $0x238] sm:$0xff] }
 0x43f   :  { %9605 = vst [vmem:[#allocation63_spill] sm:$0xff] %v6965_v48 }
 0x440   :  { %4797 = vmatmul.msk.f32.gmra.mxu0 %vm112_vm0, %v6709_v42 }
 0x441   :  { %4771 = vmatmul.msk.f32.gmra.mxu1 %vm112_vm0, %v6972_v27 }
 0x442   :  { %2586 = vmatmul.f32.gmra.mxu2 %v6450_v49 }
 0x445   :  { %v6979_v0 = vpop.f32.mrf.mxu0  ;;  %v6981_v28 = vpop.f32.mrf.mxu2 }
 0x446   :  { %9606 = vst [vmem:[#allocation64_spill] sm:$0xff] %v6979_v0  ;;  %v6983_v48 = vpop.f32.mrf.mxu1 }
 0x447   :  { %9607 = vst [vmem:[#allocation65_spill] sm:$0xff] %v6981_v28  ;;  %v7004_v28 = vld [vmem:[%s9420_s6 + $0x250] sm:$0xff] }
 0x448   :  { %4798 = vmatmul.msk.f32.gmra.mxu0 %vm112_vm0, %v6734_v51 }
 0x449   :  { %4772 = vmatmul.msk.f32.gmra.mxu1 %vm112_vm0, %v6988_v32 }
 0x44a   :  { %2589 = vmatmul.f32.gmra.mxu2 %v6469_v18 }
 0x44d   :  { %v6995_v49 = vpop.f32.mrf.mxu0  ;;  %v6997_v42 = vpop.f32.mrf.mxu2 }
 0x44e   :  { %9608 = vst [vmem:[#allocation66_spill] sm:$0xff] %v6995_v49  ;;  %v6999_v0 = vpop.f32.mrf.mxu1 }
 0x44f   :  { %9609 = vst [vmem:[#allocation67_spill] sm:$0xff] %v6997_v42  ;;  %v7020_v42 = vld [vmem:[%s9420_s6 + $0x268] sm:$0xff] }
 0x450   :  { %4799 = vmatmul.msk.f32.gmra.mxu0 %vm112_vm0, %v6759_v12 }
 0x451   :  { %4773 = vmatmul.msk.f32.gmra.mxu1 %vm112_vm0, %v7004_v28 }
 0x452   :  { %2592 = vmatmul.f32.gmra.mxu2 %v6491_v19 }
 0x455   :  { %v7011_v18 = vpop.f32.mrf.mxu0  ;;  %v7013_v51 = vpop.f32.mrf.mxu2 }
 0x456   :  { %9610 = vst [vmem:[#allocation68_spill] sm:$0xff] %v7011_v18  ;;  %v7015_v49 = vpop.f32.mrf.mxu1 }
 0x457   :  { %9611 = vst [vmem:[#allocation69_spill] sm:$0xff] %v7013_v51  ;;  %v7036_v51 = vld [vmem:[%s9420_s6 + $0x280] sm:$0xff] }
 0x458   :  { %4800 = vmatmul.msk.f32.gmra.mxu0 %vm112_vm0, %v6784_v31  ;;  %v2423_v31 = vpop.f32.mrf.mxu3  ;;  %2494 = vmatmul.f32.gmra.mxu3 %v6459_v5 }
 0x459   :  { %4774 = vmatmul.msk.f32.gmra.mxu1 %vm112_vm0, %v7020_v42 }
 0x45a   :  { %2595 = vmatmul.f32.gmra.mxu2 %v6508_v10 }
 0x45d   :  { %v7027_v19 = vpop.f32.mrf.mxu0  ;;  %v7029_v12 = vpop.f32.mrf.mxu2 }
 0x45e   :  { %9612 = vst [vmem:[#allocation70_spill] sm:$0xff] %v7027_v19  ;;  %v7031_v18 = vpop.f32.mrf.mxu1 }
 0x45f   :  { %9613 = vst [vmem:[#allocation71_spill] sm:$0xff] %v7029_v12 }
 0x460   :  { %4801 = vmatmul.msk.f32.gmra.mxu0 %vm112_vm0, %v6809_v23  ;;  %v2426_v5 = vpop.f32.mrf.mxu3  ;;  %2497 = vmatmul.f32.gmra.mxu3 %v6480_v47 }
 0x461   :  { %4775 = vmatmul.msk.f32.gmra.mxu1 %vm112_vm0, %v7036_v51 }
 0x462   :  { %2598 = vmatmul.f32.gmra.mxu2 %v6531_v62 }
 0x465   :  { %v7044_v10 = vpop.f32.mrf.mxu0  ;;  %v7046_v19 = vpop.f32.mrf.mxu2 }
 0x466   :  { %9614 = vst [vmem:[#allocation72_spill] sm:$0xff] %v7044_v10  ;;  %v7048_v12 = vpop.f32.mrf.mxu1 }
 0x467   :  { %9615 = vst [vmem:[#allocation73_spill] sm:$0xff] %v7046_v19  ;;  %v7070_v19 = vld [vmem:[%s9420_s6 + $0x2b0] sm:$0xff] }
 0x468   :  { %4802 = vmatmul.msk.f32.gmra.mxu0 %vm112_vm0, %v6829_v17  ;;  %v2429_v47 = vpop.f32.mrf.mxu3  ;;  %2500 = vmatmul.f32.gmra.mxu3 %v6499_v16 }
 0x469   :  { %4776 = vmatmul.msk.f32.gmra.mxu1 %vm112_vm0, %v7053_v41 }
 0x46a   :  { %2601 = vmatmul.f32.gmra.mxu2 %v6554_v59 }
 0x46d   :  { %v7061_v23 = vpop.f32.mrf.mxu0  ;;  %v7063_v62 = vpop.f32.mrf.mxu2 }
 0x46e   :  { %9616 = vst [vmem:[#allocation74_spill] sm:$0xff] %v7061_v23  ;;  %v7065_v10 = vpop.f32.mrf.mxu1 }
 0x46f   :  { %9617 = vst [vmem:[#allocation75_spill] sm:$0xff] %v7063_v62  ;;  %v7087_v62 = vld [vmem:[%s9420_s6 + $0x2c8] sm:$0xff] }
 0x470   :  { %4803 = vmatmul.msk.f32.gmra.mxu0 %vm112_vm0, %v6844_v38  ;;  %9621 = vst [vmem:[#allocation79_spill] sm:$0xff] %v7087_v62  ;;  %v7093_v16 = vpop.f32.mrf.mxu3  ;;  %2503 = vmatmul.f32.gmra.mxu3 %v6520_v52 }
 0x471   :  { %4777 = vmatmul.msk.f32.gmra.mxu1 %vm112_vm0, %v7070_v19 }
 0x472   :  { %2604 = vmatmul.f32.gmra.mxu2 %v6577_v2 }
 0x475   :  { %v7078_v59 = vpop.f32.mrf.mxu0  ;;  %v7080_v17 = vpop.f32.mrf.mxu2 }
 0x476   :  { %9618 = vst [vmem:[#allocation76_spill] sm:$0xff] %v7078_v59  ;;  %v7082_v23 = vpop.f32.mrf.mxu1 }
 0x477   :  { %9619 = vst [vmem:[#allocation77_spill] sm:$0xff] %v7080_v17  ;;  %v7104_v17 = vld [vmem:[%s9420_s6 + $0x2e0] sm:$0xff] }
 0x478   :  { %9620 = vst [vmem:[#allocation78_spill] sm:$0xff] %v7082_v23  ;;  %4804 = vmatmul.msk.f32.gmra.mxu0 %vm112_vm0, %v6860_v6  ;;  %v7110_v6 = vpop.f32.mrf.mxu3  ;;  %2506 = vmatmul.f32.gmra.mxu3 %v6541_v11 }
 0x479   :  { %4778 = vmatmul.msk.f32.gmra.mxu1 %vm112_vm0, %v7087_v62 }
 0x47a   :  { %2607 = vmatmul.f32.gmra.mxu2 %v6602_v14  ;;  %v2150_v14 = vadd.f32 %v6597_v63, %v6302_v33 }
 0x47c   :  { %v7126_v11 = vadd.f32 %v6887_v50, %v2150_v14 }
 0x47d   :  { %v7097_v2 = vpop.f32.mrf.mxu0  ;;  %v2560_v38 = vpop.f32.mrf.mxu2 }
 0x47e   :  { %9622 = vst [vmem:[#allocation80_spill] sm:$0xff] %v7097_v2  ;;  %v7099_v59 = vpop.f32.mrf.mxu1  ;;  %v2561_v52 = vadd.f32 %v2560_v38, %v2423_v31 }
 0x47f   :  { %9623 = vst [vmem:[#allocation81_spill] sm:$0xff] %v7099_v59 }
 0x480   :  { %4805 = vmatmul.msk.f32.gmra.mxu0 %vm112_vm0, %v6876_v58  ;;  %v7123_v58 = vld [vmem:[%s9420_s6 + $0x2f8] sm:$0xff] }
 0x481   :  { %4779 = vmatmul.msk.f32.gmra.mxu1 %vm112_vm0, %v7104_v17 }
 0x482   :  { %2610 = vmatmul.f32.gmra.mxu2 %v6627_v15  ;;  %v7135_v15 = vpop.f32.mrf.mxu3  ;;  %2509 = vmatmul.f32.gmra.mxu3 %v6564_v1  ;;  %v7150_v1 = vld [vmem:[%s9420_s6 + $0x310] sm:$0xff] }
 0x485   :  { %v2697_v2 = vpop.f32.mrf.mxu0  ;;  %v2563_v59 = vpop.f32.mrf.mxu2 }
 0x486   :  { %v7116_v62 = vpop.f32.mrf.mxu1  ;;  %v7118_v23 = vadd.f32 %v2697_v2, %v2561_v52  ;;  %v2564_v31 = vadd.f32 %v2563_v59, %v2426_v5  ;;  %v2977_v59 = vmul.f32 %v7126_v11, %v7126_v11 }
 0x488   :  { %4806 = vmatmul.msk.f32.gmra.mxu0 %vm112_vm0, %v6892_v55  ;;  %v2819_v33 = vsel %vm2814_vm2, %v7118_v23, 0.0  ;;  %v2978_v50 = vmul.f32 %v7118_v23, %v7118_v23  ;;  %v2153_v55 = vadd.f32 %v6622_v39, %v6316_v61 }
 0x489   :  { %4780 = vmatmul.msk.f32.gmra.mxu1 %vm112_vm0, %v7123_v58  ;;  %v2820_v63 = vadd.f32 %v2819_v33, %v7126_v11 }
 0x48a   :  { %2613 = vmatmul.f32.gmra.mxu2 %v6652_v22  ;;  %v3059_v22 = vsel %vm2814_vm2, %v2978_v50, 0.0  ;;  %v7154_v5 = vadd.f32 %v6903_v25, %v2153_v55 }
 0x48b   :  { %2821 = vadd.xlane.f32.xlu2 %v2820_v63  ;;  %v3060_v33 = vadd.f32 %v3059_v22, %v2977_v59  ;;  %v7165_v63 = vpop.f32.mrf.mxu3  ;;  %2512 = vmatmul.f32.gmra.mxu3 %v6589_v9 }
 0x48d   :  { %v2700_v2 = vpop.f32.mrf.mxu0  ;;  %v2566_v38 = vpop.f32.mrf.mxu2 }
 0x48e   :  { %v7143_v52 = vpop.f32.mrf.mxu1  ;;  %v7145_v14 = vadd.f32 %v2700_v2, %v2564_v31  ;;  %v2567_v25 = vadd.f32 %v2566_v38, %v2429_v47 }
 0x490   :  { %4807 = vmatmul.msk.f32.gmra.mxu0 %vm112_vm0, %v6908_v7  ;;  %v2823_v61 = vsel %vm2814_vm2, %v7145_v14, 0.0  ;;  %v2980_v31 = vmul.f32 %v7145_v14, %v7145_v14  ;;  %v2156_v7 = vadd.f32 %v6647_v35, %v6365_v57  ;;  %v2979_v57 = vmul.f32 %v7154_v5, %v7154_v5 }
 0x491   :  { %4781 = vmatmul.msk.f32.gmra.mxu1 %vm112_vm0, %v7150_v1  ;;  %v2824_v39 = vadd.f32 %v2823_v61, %v7154_v5 }
 0x492   :  { %2616 = vmatmul.f32.gmra.mxu2 %v6677_v21  ;;  %v7174_v50 = vadd.f32 %v6919_v45, %v2156_v7  ;;  %v7183_v21 = vld [vmem:[%s9420_s6 + $0x328] sm:$0xff]  ;;  %v3063_v9 = vsel %vm2814_vm2, %v2980_v31, 0.0 }
 0x493   :  { %2825 = vadd.xlane.f32.xlu0 %v2824_v39  ;;  %3061 = vadd.xlane.f32.xlu2 %v3060_v33  ;;  %v3064_v47 = vadd.f32 %v3063_v9, %v2979_v57  ;;  %v7199_v39 = vpop.f32.mrf.mxu3 }
 0x494   :  { %v2981_v61 = vmul.f32 %v7174_v50, %v7174_v50  ;;  %2515 = vmatmul.f32.gmra.mxu3 %v6614_v37 }
 0x495   :  { %v2703_v55 = vpop.f32.mrf.mxu0  ;;  %v2569_v2 = vpop.f32.mrf.mxu2 }
 0x496   :  { %v7176_v22 = vpop.f32.mrf.mxu1  ;;  %v7178_v59 = vadd.f32 %v2703_v55, %v2567_v25  ;;  %v2159_v25 = vadd.f32 %v6672_v30, %v6408_v46 }
 0x498   :  { %4808 = vmatmul.msk.f32.gmra.mxu0 %vm112_vm0, %v6924_v34  ;;  %v2827_v35 = vsel %vm2814_vm2, %v7178_v59, 0.0  ;;  %v2982_v45 = vmul.f32 %v7178_v59, %v7178_v59  ;;  %v2570_v34 = vadd.f32 %v2569_v2, %v7093_v16  ;;  %v7208_v7 = vadd.f32 %v6935_v8, %v2159_v25 }
 0x499   :  { %4782 = vmatmul.msk.f32.gmra.mxu1 %vm112_vm0, %v7183_v21  ;;  %v2828_v38 = vadd.f32 %v2827_v35, %v7174_v50  ;;  %v2162_v35 = vadd.f32 %v6697_v26, %v6426_v56 }
 0x49a   :  { %v3067_v33 = vsel %vm2814_vm2, %v2982_v45, 0.0  ;;  %2619 = vmatmul.f32.gmra.mxu2 %v6702_v43  ;;  %v7217_v43 = vld [vmem:[%s9420_s6 + $0x340] sm:$0xff]  ;;  %v2983_v8 = vmul.f32 %v7208_v7, %v7208_v7 }
 0x49b   :  { %3065 = vadd.xlane.f32.xlu0 %v3064_v47  ;;  %2829 = vadd.xlane.f32.xlu2 %v2828_v38  ;;  %v3068_v31 = vadd.f32 %v3067_v33, %v2981_v61  ;;  %v7229_v16 = vpop.f32.mrf.mxu3  ;;  %v7239_v38 = vadd.f32 %v6951_v36, %v2162_v35 }
 0x49c   :  { %2518 = vmatmul.f32.gmra.mxu3 %v6639_v24 }
 0x49d   :  { %v2706_v55 = vpop.f32.mrf.mxu0  ;;  %3069 = vadd.xlane.f32.xlu1 %v3068_v31  ;;  %v2572_v9 = vpop.f32.mrf.mxu2  ;;  %9624 = vst [vmem:[#allocation82_spill] sm:$0xff] %v7239_v38  ;;  %v2985_v36 = vmul.f32 %v7239_v38, %v7239_v38  ;;  %v9626_v31 = vld [vmem:[#allocation26_spill] sm:$0xff] }
 0x49e   :  { %v7210_v57 = vpop.f32.mrf.mxu1  ;;  %v7212_v37 = vadd.f32 %v2706_v55, %v2570_v34  ;;  %v2573_v2 = vadd.f32 %v2572_v9, %v7110_v6  ;;  %v2165_v55 = vadd.f32 %v9626_v31, %v6445_v40 }
 0x4a0   :  { %4809 = vmatmul.msk.f32.gmra.mxu0 %vm112_vm0, %v6940_v3  ;;  %v2831_v46 = vsel %vm2814_vm2, %v7212_v37, 0.0  ;;  %v2984_v30 = vmul.f32 %v7212_v37, %v7212_v37 }
 0x4a1   :  { %4783 = vmatmul.msk.f32.gmra.mxu1 %vm112_vm0, %v7217_v43  ;;  %v2832_v45 = vadd.f32 %v2831_v46, %v7208_v7 }
 0x4a2   :  { %v3071_v3 = vsel %vm2814_vm2, %v2984_v30, 0.0  ;;  %2622 = vmatmul.f32.gmra.mxu2 %v6727_v13  ;;  %v7248_v13 = vld [vmem:[%s9420_s6 + $0x358] sm:$0xff]  ;;  %v7270_v30 = vadd.f32 %v6967_v44, %v2165_v55 }
 0x4a3   :  { %v3072_v47 = vadd.f32 %v3071_v3, %v2983_v8  ;;  %v7260_v33 = vpop.f32.mrf.mxu3 }
 0x4a4   :  { %2521 = vmatmul.f32.gmra.mxu3 %v6664_v29  ;;  %9627 = vst [vmem:[#allocation26_spill] sm:$0xff] %v7270_v30  ;;  %v2987_v3 = vmul.f32 %v7270_v30, %v7270_v30 }
 0x4a5   :  { %v2709_v61 = vpop.f32.mrf.mxu0  ;;  %2833 = vadd.xlane.f32.xlu1 %v2832_v45  ;;  %3073 = vadd.xlane.f32.xlu2 %v3072_v47  ;;  %v2575_v34 = vpop.f32.mrf.mxu2  ;;  %v9629_v45 = vld [vmem:[#allocation21_spill] sm:$0xff] }
 0x4a6   :  { %v7241_v24 = vpop.f32.mrf.mxu1  ;;  %v7243_v6 = vadd.f32 %v2709_v61, %v2573_v2  ;;  %v2576_v25 = vadd.f32 %v2575_v34, %v7135_v15  ;;  %v9630_v61 = vld [vmem:[#allocation34_spill] sm:$0xff]  ;;  %v9631_v34 = vld [vmem:[#allocation3_spill] sm:$0xff] }
 0x4a8   :  { %9625 = vst [vmem:[#allocation83_spill] sm:$0xff] %v7243_v6  ;;  %4810 = vmatmul.msk.f32.gmra.mxu0 %vm112_vm0, %v6956_v53  ;;  %v2986_v56 = vmul.f32 %v7243_v6, %v7243_v6  ;;  %v2835_v26 = vsel %vm2814_vm2, %v7243_v6, 0.0 }
 0x4a9   :  { %4784 = vmatmul.msk.f32.gmra.mxu1 %vm112_vm0, %v7248_v13  ;;  %v2836_v46 = vadd.f32 %v2835_v26, %v7239_v38 }
 0x4aa   :  { %v3075_v53 = vsel %vm2814_vm2, %v2986_v56, 0.0  ;;  %2625 = vmatmul.f32.gmra.mxu2 %v6750_v20  ;;  %v7279_v20 = vld [vmem:[%s9420_s6 + $0x370] sm:$0xff]  ;;  %v9632_v56 = vld [vmem:[#allocation29_spill] sm:$0xff] }
 0x4ab   :  { %v3076_v9 = vadd.f32 %v3075_v53, %v2985_v36  ;;  %v7291_v35 = vpop.f32.mrf.mxu3  ;;  %v2168_v26 = vadd.f32 %v9632_v56, %v9631_v34 }
 0x4ac   :  { %2524 = vmatmul.f32.gmra.mxu3 %v9629_v45  ;;  %v9636_v45 = vld [vmem:[#allocation39_spill] sm:$0xff] }
 0x4ad   :  { %v2712_v8 = vpop.f32.mrf.mxu0  ;;  %3077 = vadd.xlane.f32.xlu0 %v3076_v9  ;;  %2837 = vadd.xlane.f32.xlu2 %v2836_v46  ;;  %v2578_v2 = vpop.f32.mrf.mxu2  ;;  %v7301_v53 = vadd.f32 %v6983_v48, %v2168_v26  ;;  %v7310_v46 = vld [vmem:[%s9420_s6 + $0x388] sm:$0xff] }
 0x4ae   :  { %v7272_v29 = vpop.f32.mrf.mxu1  ;;  %v7274_v15 = vadd.f32 %v2712_v8, %v2576_v25  ;;  %v2579_v47 = vadd.f32 %v2578_v2, %v7165_v63 }
 0x4af   :  { %9633 = vst [vmem:[#allocation21_spill] sm:$0xff] %v7301_v53  ;;  %v2989_v2 = vmul.f32 %v7301_v53, %v7301_v53 }
 0x4b0   :  { %9628 = vst [vmem:[#allocation84_spill] sm:$0xff] %v7274_v15  ;;  %4811 = vmatmul.msk.f32.gmra.mxu0 %vm112_vm0, %v6972_v27  ;;  %v2988_v40 = vmul.f32 %v7274_v15, %v7274_v15  ;;  %v2839_v44 = vsel %vm2814_vm2, %v7274_v15, 0.0 }
 0x4b1   :  { %4785 = vmatmul.msk.f32.gmra.mxu1 %vm112_vm0, %v7279_v20  ;;  %v2840_v25 = vadd.f32 %v2839_v44, %v7270_v30  ;;  %v9635_v44 = vld [vmem:[#allocation24_spill] sm:$0xff] }
 0x4b2   :  { %v3079_v27 = vsel %vm2814_vm2, %v2988_v40, 0.0  ;;  %2628 = vmatmul.f32.gmra.mxu2 %v9630_v61 }
 0x4b3   :  { %v3080_v36 = vadd.f32 %v3079_v27, %v2987_v3  ;;  %v7322_v40 = vpop.f32.mrf.mxu3  ;;  %v9638_v27 = vld [vmem:[#allocation33_spill] sm:$0xff] }
 0x4b4   :  { %2527 = vmatmul.f32.gmra.mxu3 %v9635_v44  ;;  %v9641_v44 = vld [vmem:[#allocation28_spill] sm:$0xff] }
 0x4b5   :  { %v2715_v31 = vpop.f32.mrf.mxu0  ;;  %3081 = vadd.xlane.f32.xlu1 %v3080_v36  ;;  %2841 = vadd.xlane.f32.xlu0 %v2840_v25  ;;  %v2581_v55 = vpop.f32.mrf.mxu2 }
 0x4b6   :  { %v7303_v9 = vpop.f32.mrf.mxu1  ;;  %v7305_v63 = vadd.f32 %v2715_v31, %v2579_v47  ;;  %v2582_v3 = vadd.f32 %v2581_v55, %v7199_v39  ;;  %v9637_v47 = vld [vmem:[#allocation5_spill] sm:$0xff]  ;;  %v7341_v55 = vld [vmem:[%s9420_s6 + $0x3a0] sm:$0xff] }
 0x4b7   :  { %v2171_v61 = vadd.f32 %v9638_v27, %v9637_v47 }
 0x4b8   :  { %9634 = vst [vmem:[#allocation34_spill] sm:$0xff] %v7305_v63  ;;  %4812 = vmatmul.msk.f32.gmra.mxu0 %vm112_vm0, %v6988_v32  ;;  %v2843_v48 = vsel %vm2814_vm2, %v7305_v63, 0.0  ;;  %v2990_v8 = vmul.f32 %v7305_v63, %v7305_v63 }
 0x4b9   :  { %4786 = vmatmul.msk.f32.gmra.mxu1 %vm112_vm0, %v7310_v46  ;;  %v2844_v34 = vadd.f32 %v2843_v48, %v7301_v53  ;;  %v7332_v26 = vadd.f32 %v6999_v0, %v2171_v61 }
 0x4ba   :  { %v3083_v32 = vsel %vm2814_vm2, %v2990_v8, 0.0  ;;  %2631 = vmatmul.f32.gmra.mxu2 %v9636_v45  ;;  %v9643_v45 = vld [vmem:[#allocation38_spill] sm:$0xff] }
 0x4bb   :  { %v3084_v56 = vadd.f32 %v3083_v32, %v2989_v2  ;;  %9639 = vst [vmem:[#allocation3_spill] sm:$0xff] %v7332_v26  ;;  %v2991_v8 = vmul.f32 %v7332_v26, %v7332_v26  ;;  %v7353_v2 = vpop.f32.mrf.mxu3  ;;  %v9642_v32 = vld [vmem:[#allocation7_spill] sm:$0xff] }
 0x4bc   :  { %2530 = vmatmul.f32.gmra.mxu3 %v9641_v44  ;;  %v2174_v47 = vadd.f32 %v9643_v45, %v9642_v32  ;;  %v9647_v32 = vld [vmem:[#allocation9_spill] sm:$0xff]  ;;  %v9648_v45 = vld [vmem:[#allocation42_spill] sm:$0xff] }
 0x4bd   :  { %v2718_v36 = vpop.f32.mrf.mxu0  ;;  %2845 = vadd.xlane.f32.xlu1 %v2844_v34  ;;  %3085 = vadd.xlane.f32.xlu2 %v3084_v56  ;;  %v2584_v25 = vpop.f32.mrf.mxu2 }
 0x4be   :  { %v7334_v31 = vpop.f32.mrf.mxu1  ;;  %v7336_v39 = vadd.f32 %v2718_v36, %v2582_v3  ;;  %v2585_v3 = vadd.f32 %v2584_v25, %v7229_v16  ;;  %v7363_v34 = vadd.f32 %v7015_v49, %v2174_v47  ;;  %v2177_v47 = vadd.f32 %v9648_v45, %v9647_v32  ;;  %v9652_v32 = vld [vmem:[#allocation4_spill] sm:$0xff] }
 0x4bf   :  { %v2180_v45 = vadd.f32 %v6835_v60, %v9652_v32 }
 0x4c0   :  { %9640 = vst [vmem:[#allocation29_spill] sm:$0xff] %v7336_v39  ;;  %4813 = vmatmul.msk.f32.gmra.mxu0 %vm112_vm0, %v7004_v28  ;;  %v2992_v0 = vmul.f32 %v7336_v39, %v7336_v39  ;;  %v2847_v48 = vsel %vm2814_vm2, %v7336_v39, 0.0 }
 0x4c1   :  { %4787 = vmatmul.msk.f32.gmra.mxu1 %vm112_vm0, %v7341_v55  ;;  %v2848_v61 = vadd.f32 %v2847_v48, %v7332_v26  ;;  %9644 = vst [vmem:[#allocation24_spill] sm:$0xff] %v7363_v34  ;;  %v9724_v26 = vld [vmem:[#allocation71_spill] sm:$0xff] }
 0x4c2   :  { %v3087_v28 = vsel %vm2814_vm2, %v2992_v0, 0.0  ;;  %2634 = vmatmul.f32.gmra.mxu2 %v6820_v54  ;;  %v7372_v54 = vld [vmem:[%s9420_s6 + $0x3b8] sm:$0xff]  ;;  %v2993_v0 = vmul.f32 %v7363_v34, %v7363_v34 }
 0x4c3   :  { %v3088_v27 = vadd.f32 %v3087_v28, %v2991_v8  ;;  %v7384_v48 = vpop.f32.mrf.mxu3  ;;  %v9646_v8 = vld [vmem:[#allocation32_spill] sm:$0xff] }
 0x4c4   :  { %2533 = vmatmul.f32.gmra.mxu3 %v9646_v8  ;;  %v5121_v28 = vld [vmem:[%s9420_s6 + $0x290] sm:$0xff] }
 0x4c5   :  { %v2721_v56 = vpop.f32.mrf.mxu0  ;;  %3089 = vadd.xlane.f32.xlu0 %v3088_v27  ;;  %2849 = vadd.xlane.f32.xlu2 %v2848_v61  ;;  %v2587_v36 = vpop.f32.mrf.mxu2 }
 0x4c6   :  { %v7365_v44 = vpop.f32.mrf.mxu1  ;;  %v7367_v16 = vadd.f32 %v2721_v56, %v2585_v3  ;;  %v2588_v3 = vadd.f32 %v2587_v36, %v7260_v33  ;;  %v7396_v56 = vadd.f32 %v7031_v18, %v2177_v47  ;;  %v5122_v18 = vld [vmem:[%s9420_s6] sm:$0xff] }
 0x4c8   :  { %9645 = vst [vmem:[#allocation39_spill] sm:$0xff] %v7367_v16  ;;  %4814 = vmatmul.msk.f32.gmra.mxu0 %vm112_vm0, %v7020_v42  ;;  %v2994_v49 = vmul.f32 %v7367_v16, %v7367_v16  ;;  %v2851_v25 = vsel %vm2814_vm2, %v7367_v16, 0.0 }
 0x4c9   :  { %4788 = vmatmul.msk.f32.gmra.mxu1 %vm112_vm0, %v7372_v54  ;;  %v2852_v61 = vadd.f32 %v2851_v25, %v7363_v34  ;;  %9649 = vst [vmem:[#allocation5_spill] sm:$0xff] %v7396_v56 }
 0x4ca   :  { %v3091_v42 = vsel %vm2814_vm2, %v2994_v49, 0.0  ;;  %2637 = vmatmul.f32.gmra.mxu2 %v5121_v28  ;;  %v5123_v28 = vld [vmem:[%s9420_s6 + $0x2a8] sm:$0xff] }
 0x4cb   :  { %v3092_v27 = vadd.f32 %v3091_v42, %v2993_v0  ;;  %v2995_v0 = vmul.f32 %v7396_v56, %v7396_v56  ;;  %v7413_v42 = vpop.f32.mrf.mxu3 }
 0x4cd   :  { %v2724_v16 = vpop.f32.mrf.mxu0  ;;  %3093 = vadd.xlane.f32.xlu1 %v3092_v27  ;;  %2853 = vadd.xlane.f32.xlu0 %v2852_v61  ;;  %v2590_v33 = vpop.f32.mrf.mxu2  ;;  %v7425_v61 = vadd.f32 %v7048_v12, %v2180_v45 }
 0x4ce   :  { %v7398_v36 = vpop.f32.mrf.mxu1  ;;  %v7400_v49 = vadd.f32 %v2724_v16, %v2588_v3  ;;  %v9651_v16 = vld [vmem:[#allocation37_spill] sm:$0xff] }
 0x4cf   :  { %2536 = vmatmul.f32.gmra.mxu3 %v9651_v16  ;;  %9653 = vst [vmem:[#allocation28_spill] sm:$0xff] %v7425_v61  ;;  %v2997_v12 = vmul.f32 %v7425_v61, %v7425_v61 }
 0x4d0   :  { %9650 = vst [vmem:[#allocation33_spill] sm:$0xff] %v7400_v49  ;;  %4815 = vmatmul.msk.f32.gmra.mxu0 %vm112_vm0, %v7036_v51  ;;  %v2855_v8 = vsel %vm2814_vm2, %v7400_v49, 0.0  ;;  %v2996_v25 = vmul.f32 %v7400_v49, %v7400_v49  ;;  %v2591_v51 = vadd.f32 %v2590_v33, %v7291_v35 }
 0x4d1   :  { %2419 = vmatmul.f32.vlgmr.msra.gmra.mxu1 %v5122_v18  ;;  %v2856_v47 = vadd.f32 %v2855_v8, %v7396_v56 }
 0x4d2   :  { %v3095_v3 = vsel %vm2814_vm2, %v2996_v25, 0.0  ;;  %2640 = vmatmul.f32.gmra.mxu2 %v5123_v28 }
 0x4d3   :  { %v3096_v27 = vadd.f32 %v3095_v3, %v2995_v0  ;;  %v7444_v3 = vpop.f32.mrf.mxu3 }
 0x4d5   :  { %v2727_v18 = vpop.f32.mrf.mxu0  ;;  %2857 = vadd.xlane.f32.xlu1 %v2856_v47  ;;  %3097 = vadd.xlane.f32.xlu2 %v3096_v27  ;;  %v2593_v35 = vpop.f32.mrf.mxu2 }
 0x4d6   :  { %v7427_v33 = vpop.f32.mrf.mxu1  ;;  %v7429_v25 = vadd.f32 %v2727_v18, %v2591_v51  ;;  %v2594_v0 = vadd.f32 %v2593_v35, %v7322_v40  ;;  %v5124_v51 = vld [vmem:[%s9420_s6 + $0x2c0] sm:$0xff] }
 0x4d8   :  { %9654 = vst [vmem:[#allocation7_spill] sm:$0xff] %v7429_v25  ;;  %4816 = vmatmul.msk.f32.gmra.mxu0 %vm112_vm0, %v7053_v41  ;;  %v2998_v60 = vmul.f32 %v7429_v25, %v7429_v25  ;;  %v2859_v8 = vsel %vm2814_vm2, %v7429_v25, 0.0  ;;  %v9655_v41 = vld [vmem:[#allocation6_spill] sm:$0xff] }
 0x4d9   :  { %v2183_v28 = vadd.f32 %v6851_v4, %v9655_v41  ;;  %v2860_v45 = vadd.f32 %v2859_v8, %v7425_v61  ;;  %v9663_v25 = vld [vmem:[#allocation78_spill] sm:$0xff] }
 0x4da   :  { %v3099_v16 = vsel %vm2814_vm2, %v2998_v60, 0.0  ;;  %2643 = vmatmul.f32.gmra.mxu2 %v5124_v51 }
 0x4db   :  { %v3100_v32 = vadd.f32 %v3099_v16, %v2997_v12  ;;  %v7450_v47 = vadd.f32 %v7065_v10, %v2183_v28  ;;  %v9659_v16 = vld [vmem:[#allocation8_spill] sm:$0xff] }
 0x4dd   :  { %9656 = vst [vmem:[#allocation38_spill] sm:$0xff] %v7450_v47  ;;  %v2730_v27 = vpop.f32.mrf.mxu0  ;;  %3101 = vadd.xlane.f32.xlu0 %v3100_v32  ;;  %2861 = vadd.xlane.f32.xlu2 %v2860_v45  ;;  %v2596_v40 = vpop.f32.mrf.mxu2  ;;  %v2999_v10 = vmul.f32 %v7450_v47, %v7450_v47  ;;  %v9661_v45 = vld [vmem:[#allocation50_spill] sm:$0xff] }
 0x4de   :  { %v7452_v18 = vpop.f32.mrf.mxu1  ;;  %v7454_v35 = vadd.f32 %v2730_v27, %v2594_v0  ;;  %v2597_v8 = vadd.f32 %v2596_v40, %v7353_v2  ;;  %v5125_v0 = vld [vmem:[%s9420_s6 + $0x2d8] sm:$0xff]  ;;  %v7472_v32 = vpop.f32.mrf.mxu3  ;;  %v9662_v27 = vld [vmem:[#allocation12_spill] sm:$0xff] }
 0x4df   :  { %9657 = vst [vmem:[#allocation32_spill] sm:$0xff] %v7452_v18 }
 0x4e0   :  { %9658 = vst [vmem:[#allocation9_spill] sm:$0xff] %v7454_v35  ;;  %4817 = vmatmul.msk.f32.gmra.mxu0 %vm112_vm0, %v7070_v19  ;;  %v3000_v4 = vmul.f32 %v7454_v35, %v7454_v35  ;;  %v2863_v60 = vsel %vm2814_vm2, %v7454_v35, 0.0  ;;  %v9660_v19 = vld [vmem:[#allocation49_spill] sm:$0xff]  ;;  %v2228_v35 = vadd.f32 %v9662_v27, %v9661_v45  ;;  %v9671_v27 = vld [vmem:[#allocation14_spill] sm:$0xff] }
 0x4e1   :  { %v2186_v51 = vadd.f32 %v9660_v19, %v9659_v16  ;;  %v2864_v28 = vadd.f32 %v2863_v60, %v7450_v47  ;;  %v9670_v45 = vld [vmem:[#allocation53_spill] sm:$0xff] }
 0x4e2   :  { %v3103_v12 = vsel %vm2814_vm2, %v3000_v4, 0.0  ;;  %2646 = vmatmul.f32.gmra.mxu2 %v5125_v0 }
 0x4e3   :  { %v3104_v41 = vadd.f32 %v3103_v12, %v2999_v10  ;;  %v7477_v2 = vadd.f32 %v9663_v25, %v2186_v51  ;;  %v9667_v10 = vld [vmem:[#allocation79_spill] sm:$0xff] }
 0x4e5   :  { %9664 = vst [vmem:[#allocation42_spill] sm:$0xff] %v7477_v2  ;;  %v2733_v40 = vpop.f32.mrf.mxu0  ;;  %3105 = vadd.xlane.f32.xlu1 %v3104_v41  ;;  %2865 = vadd.xlane.f32.xlu0 %v2864_v28  ;;  %v2599_v4 = vpop.f32.mrf.mxu2  ;;  %v3001_v25 = vmul.f32 %v7477_v2, %v7477_v2 }
 0x4e6   :  { %v2364_v61 = vpop.f32.mrf.mxu1  ;;  %v7479_v0 = vadd.f32 %v2733_v40, %v2597_v8  ;;  %v2600_v16 = vadd.f32 %v2599_v4, %v7384_v48  ;;  %v9669_v8 = vld [vmem:[#allocation52_spill] sm:$0xff]  ;;  %v2231_v40 = vadd.f32 %v9671_v27, %v9670_v45  ;;  %v9678_v27 = vld [vmem:[#allocation55_spill] sm:$0xff] }
 0x4e7   :  { %v7481_v34 = vadd.f32 %v2364_v61, %v2228_v35  ;;  %v5126_v61 = vld [vmem:[%s9420_s6 + $0x2f0] sm:$0xff]  ;;  %v9668_v35 = vld [vmem:[#allocation10_spill] sm:$0xff] }
 0x4e8   :  { %9665 = vst [vmem:[#allocation37_spill] sm:$0xff] %v7479_v0  ;;  %4818 = vmatmul.msk.f32.gmra.mxu0 %vm112_vm0, %v9667_v10  ;;  %v2867_v60 = vsel %vm2814_vm2, %v7479_v0, 0.0  ;;  %v3002_v12 = vmul.f32 %v7479_v0, %v7479_v0  ;;  %v2189_v51 = vadd.f32 %v9669_v8, %v9668_v35  ;;  %v9672_v10 = vld [vmem:[#allocation81_spill] sm:$0xff]  ;;  %v5127_v8 = vld [vmem:[%s9420_s6 + $0x308] sm:$0xff] }
 0x4e9   :  { %9666 = vst [vmem:[#allocation4_spill] sm:$0xff] %v7481_v34  ;;  %v2868_v41 = vadd.f32 %v2867_v60, %v7477_v2  ;;  %v9707_v2 = vld [vmem:[#allocation27_spill] sm:$0xff] }
 0x4ea   :  { %v3107_v19 = vsel %vm2814_vm2, %v3002_v12, 0.0  ;;  %2649 = vmatmul.f32.gmra.mxu2 %v5126_v61  ;;  %v7502_v47 = vadd.f32 %v9672_v10, %v2189_v51  ;;  %v7506_v61 = vpop.f32.mrf.mxu3  ;;  %v9676_v51 = vld [vmem:[#allocation13_spill] sm:$0xff] }
 0x4eb   :  { %v3108_v28 = vadd.f32 %v3107_v19, %v3001_v25 }
 0x4ec   :  { %9673 = vst [vmem:[#allocation6_spill] sm:$0xff] %v7502_v47  ;;  %v3003_v19 = vmul.f32 %v7502_v47, %v7502_v47 }
 0x4ed   :  { %v2736_v48 = vpop.f32.mrf.mxu0  ;;  %2869 = vadd.xlane.f32.xlu1 %v2868_v41  ;;  %3109 = vadd.xlane.f32.xlu2 %v3108_v28  ;;  %v2602_v4 = vpop.f32.mrf.mxu2 }
 0x4ee   :  { %v2367_v12 = vpop.f32.mrf.mxu1  ;;  %v7504_v0 = vadd.f32 %v2736_v48, %v2600_v16  ;;  %v2603_v35 = vadd.f32 %v2602_v4, %v7413_v42 }
 0x4ef   :  { %v7508_v49 = vadd.f32 %v2367_v12, %v2231_v40  ;;  %v9679_v40 = vld [vmem:[#allocation16_spill] sm:$0xff] }
 0x4f0   :  { %9674 = vst [vmem:[#allocation8_spill] sm:$0xff] %v7504_v0  ;;  %4819 = vmatmul.msk.f32.gmra.mxu0 %vm112_vm0, %v7104_v17  ;;  %v3004_v60 = vmul.f32 %v7504_v0, %v7504_v0  ;;  %v2871_v25 = vsel %vm2814_vm2, %v7504_v0, 0.0  ;;  %v9677_v17 = vld [vmem:[#allocation54_spill] sm:$0xff]  ;;  %v2234_v10 = vadd.f32 %v9679_v40, %v9678_v27  ;;  %v9685_v27 = vld [vmem:[#allocation57_spill] sm:$0xff] }
 0x4f1   :  { %9675 = vst [vmem:[#allocation49_spill] sm:$0xff] %v7508_v49  ;;  %v2192_v41 = vadd.f32 %v9677_v17, %v9676_v51  ;;  %v2872_v45 = vadd.f32 %v2871_v25, %v7502_v47  ;;  %v5128_v51 = vld [vmem:[%s9420_s6 + $0x320] sm:$0xff]  ;;  %v9683_v17 = vld [vmem:[#allocation15_spill] sm:$0xff] }
 0x4f2   :  { %v3111_v16 = vsel %vm2814_vm2, %v3004_v60, 0.0  ;;  %2652 = vmatmul.f32.gmra.mxu2 %v5127_v8  ;;  %v7533_v8 = vpop.f32.mrf.mxu3  ;;  %v9686_v40 = vld [vmem:[#allocation18_spill] sm:$0xff] }
 0x4f3   :  { %v3112_v28 = vadd.f32 %v3111_v16, %v3003_v19  ;;  %v7529_v48 = vadd.f32 %v7116_v62, %v2192_v41 }
 0x4f5   :  { %9680 = vst [vmem:[#allocation50_spill] sm:$0xff] %v7529_v48  ;;  %v2739_v42 = vpop.f32.mrf.mxu0  ;;  %3113 = vadd.xlane.f32.xlu0 %v3112_v28  ;;  %2873 = vadd.xlane.f32.xlu2 %v2872_v45  ;;  %v2605_v4 = vpop.f32.mrf.mxu2  ;;  %v3005_v19 = vmul.f32 %v7529_v48, %v7529_v48 }
 0x4f6   :  { %v2370_v12 = vpop.f32.mrf.mxu1  ;;  %v7531_v60 = vadd.f32 %v2739_v42, %v2603_v35  ;;  %v2606_v16 = vadd.f32 %v2605_v4, %v7444_v3 }
 0x4f7   :  { %v7535_v0 = vadd.f32 %v2370_v12, %v2234_v10  ;;  %v2237_v10 = vadd.f32 %v9686_v40, %v9685_v27 }
 0x4f8   :  { %9681 = vst [vmem:[#allocation12_spill] sm:$0xff] %v7531_v60  ;;  %4820 = vmatmul.msk.f32.gmra.mxu0 %vm112_vm0, %v7123_v58  ;;  %v3006_v25 = vmul.f32 %v7531_v60, %v7531_v60  ;;  %v2875_v62 = vsel %vm2814_vm2, %v7531_v60, 0.0  ;;  %v9684_v58 = vld [vmem:[#allocation56_spill] sm:$0xff] }
 0x4f9   :  { %9682 = vst [vmem:[#allocation78_spill] sm:$0xff] %v7535_v0  ;;  %v2195_v41 = vadd.f32 %v9684_v58, %v9683_v17  ;;  %v2876_v45 = vadd.f32 %v2875_v62, %v7529_v48  ;;  %v5129_v58 = vld [vmem:[%s9420_s6 + $0x338] sm:$0xff] }
 0x4fa   :  { %v3115_v35 = vsel %vm2814_vm2, %v3006_v25, 0.0  ;;  %2655 = vmatmul.f32.gmra.mxu2 %v5128_v51  ;;  %v7562_v17 = vpop.f32.mrf.mxu3 }
 0x4fb   :  { %v3116_v28 = vadd.f32 %v3115_v35, %v3005_v19  ;;  %v7556_v42 = vadd.f32 %v7143_v52, %v2195_v41  ;;  %v9690_v41 = vld [vmem:[#allocation17_spill] sm:$0xff] }
 0x4fd   :  { %9687 = vst [vmem:[#allocation79_spill] sm:$0xff] %v7556_v42  ;;  %v2742_v3 = vpop.f32.mrf.mxu0  ;;  %3117 = vadd.xlane.f32.xlu1 %v3116_v28  ;;  %2877 = vadd.xlane.f32.xlu0 %v2876_v45  ;;  %v2608_v4 = vpop.f32.mrf.mxu2  ;;  %v3007_v19 = vmul.f32 %v7556_v42, %v7556_v42 }
 0x4fe   :  { %v2373_v12 = vpop.f32.mrf.mxu1  ;;  %v7558_v25 = vadd.f32 %v2742_v3, %v2606_v16  ;;  %v2822_v51 = vpop.xlane.xlu2 %2821  ;;  %v2609_v16 = vadd.f32 %v2608_v4, %v7472_v32  ;;  %v9693_v3 = vld [vmem:[#allocation20_spill] sm:$0xff] }
 0x4ff   :  { %v7560_v60 = vadd.f32 %v2373_v12, %v2237_v10  ;;  %v7580_v40 = vmul.f32 0.0051020407, %v2822_v51  ;;  %v9692_v10 = vld [vmem:[#allocation59_spill] sm:$0xff] }
 0x500   :  { %9688 = vst [vmem:[#allocation10_spill] sm:$0xff] %v7558_v25  ;;  %4821 = vmatmul.msk.f32.gmra.mxu0 %vm112_vm0, %v7150_v1  ;;  %v2879_v62 = vsel %vm2814_vm2, %v7558_v25, 0.0  ;;  %v3008_v52 = vmul.f32 %v7558_v25, %v7558_v25  ;;  %v9691_v1 = vld [vmem:[#allocation58_spill] sm:$0xff]  ;;  %v2240_v12 = vadd.f32 %v9693_v3, %v9692_v10  ;;  %v9698_v10 = vld [vmem:[#allocation60_spill] sm:$0xff] }
 0x501   :  { %9689 = vst [vmem:[#allocation52_spill] sm:$0xff] %v7560_v60  ;;  %v2198_v28 = vadd.f32 %v9691_v1, %v9690_v41  ;;  %v2880_v45 = vadd.f32 %v2879_v62, %v7556_v42  ;;  %v3296_v51 = vmul.f32 %v7580_v40, %v7580_v40  ;;  %v9699_v42 = vld [vmem:[#allocation61_spill] sm:$0xff] }
 0x502   :  { %v3119_v35 = vsel %vm2814_vm2, %v3008_v52, 0.0  ;;  %2658 = vmatmul.f32.gmra.mxu2 %v5129_v58 }
 0x503   :  { %v3120_v27 = vadd.f32 %v3119_v35, %v3007_v19  ;;  %v7585_v32 = vadd.f32 %v7176_v22, %v2198_v28  ;;  %v7591_v19 = vpop.f32.mrf.mxu3 }
 0x505   :  { %9694 = vst [vmem:[#allocation53_spill] sm:$0xff] %v7585_v32  ;;  %v2745_v4 = vpop.f32.mrf.mxu0  ;;  %2881 = vadd.xlane.f32.xlu1 %v2880_v45  ;;  %3121 = vadd.xlane.f32.xlu2 %v3120_v27  ;;  %v2611_v52 = vpop.f32.mrf.mxu2  ;;  %v5130_v27 = vld [vmem:[%s9420_s6 + $0x350] sm:$0xff] }
 0x506   :  { %v2376_v48 = vpop.f32.mrf.mxu1  ;;  %v7587_v58 = vadd.f32 %v2745_v4, %v2609_v16  ;;  %v2826_v25 = vpop.xlane.xlu0 %2825  ;;  %v2612_v28 = vadd.f32 %v2611_v52, %v7506_v61 }
 0x507   :  { %v7589_v41 = vadd.f32 %v2376_v48, %v2240_v12  ;;  %v3062_v62 = vpop.xlane.xlu2 %3061  ;;  %v3009_v48 = vmul.f32 %v7585_v32, %v7585_v32  ;;  %v7610_v12 = vmul.f32 0.0051020407, %v2826_v25 }
 0x508   :  { %9695 = vst [vmem:[#allocation14_spill] sm:$0xff] %v7587_v58  ;;  %v3256_v35 = vmul.f32 0.0051020407, %v3062_v62  ;;  %4822 = vmatmul.msk.f32.gmra.mxu0 %vm112_vm0, %v7183_v21  ;;  %v3010_v22 = vmul.f32 %v7587_v58, %v7587_v58  ;;  %v2883_v16 = vsel %vm2814_vm2, %v7587_v58, 0.0  ;;  %v9697_v21 = vld [vmem:[#allocation19_spill] sm:$0xff] }
 0x509   :  { %9696 = vst [vmem:[#allocation81_spill] sm:$0xff] %v7589_v41  ;;  %v2201_v3 = vadd.f32 %v9698_v10, %v9697_v21  ;;  %v2884_v62 = vadd.f32 %v2883_v16, %v7585_v32  ;;  %v3297_v16 = vmul.f32 %v7610_v12, %v7610_v12  ;;  %v9706_v32 = vld [vmem:[#allocation63_spill] sm:$0xff]  ;;  %v9725_v41 = vld [vmem:[#allocation44_spill] sm:$0xff] }
 0x50a   :  { %v3336_v1 = vsub.f32 %v3256_v35, %v3296_v51  ;;  %v3123_v45 = vsel %vm2814_vm2, %v3010_v22, 0.0  ;;  %2661 = vmatmul.f32.gmra.mxu2 %v5130_v27  ;;  %v9700_v51 = vld [vmem:[#allocation23_spill] sm:$0xff] }
 0x50b   :  { %v3124_v4 = vadd.f32 %v3123_v45, %v3009_v48  ;;  %v2243_v35 = vadd.f32 %v9700_v51, %v9699_v42  ;;  %v7616_v61 = vadd.f32 %v7210_v57, %v2201_v3  ;;  %v7626_v45 = vpop.f32.mrf.mxu3 }
 0x50c   :  { %v3376_v58 = vmax.f32 %v3336_v1, 0.0 }
 0x50d   :  { %9701 = vst [vmem:[#allocation13_spill] sm:$0xff] %v7616_v61  ;;  %v2748_v52 = vpop.f32.mrf.mxu0  ;;  %3125 = vadd.xlane.f32.xlu0 %v3124_v4  ;;  %2885 = vadd.xlane.f32.xlu2 %v2884_v62  ;;  %v2614_v22 = vpop.f32.mrf.mxu2  ;;  %v3011_v4 = vmul.f32 %v7616_v61, %v7616_v61 }
 0x50e   :  { %v7618_v27 = vadd.f32 1e-05, %v3376_v58  ;;  %v2379_v47 = vpop.f32.mrf.mxu1  ;;  %v7620_v21 = vadd.f32 %v2748_v52, %v2612_v28  ;;  %v3066_v25 = vpop.xlane.xlu0 %3065  ;;  %v2615_v51 = vadd.f32 %v2614_v22, %v7533_v8  ;;  %v9704_v52 = vld [vmem:[#allocation22_spill] sm:$0xff] }
 0x50f   :  { %v7624_v48 = vadd.f32 %v2379_v47, %v2243_v35  ;;  %v3257_v1 = vmul.f32 0.0051020407, %v3066_v25  ;;  %v2830_v42 = vpop.xlane.xlu2 %2829  ;;  %v9705_v25 = vld [vmem:[#allocation62_spill] sm:$0xff] }
 0x510   :  { %9702 = vst [vmem:[#allocation54_spill] sm:$0xff] %v7620_v21  ;;  %5041 = vrsqrt.f32 %v7618_v27  ;;  %v7629_v57 = vmul.f32 0.0051020407, %v2830_v42  ;;  %4823 = vmatmul.msk.f32.gmra.mxu0 %vm112_vm0, %v7217_v43  ;;  %v3070_v58 = vpop.xlane.xlu1 %3069  ;;  %v3012_v28 = vmul.f32 %v7620_v21, %v7620_v21  ;;  %v2887_v10 = vsel %vm2814_vm2, %v7620_v21, 0.0  ;;  %v5131_v43 = vld [vmem:[%s9420_s6 + $0x368] sm:$0xff] }
 0x511   :  { %9703 = vst [vmem:[#allocation55_spill] sm:$0xff] %v7624_v48  ;;  %v3337_v47 = vsub.f32 %v3257_v1, %v3297_v16  ;;  %v3258_v3 = vmul.f32 0.0051020407, %v3070_v58  ;;  %v2204_v42 = vadd.f32 %v9705_v25, %v9704_v52  ;;  %v2888_v1 = vadd.f32 %v2887_v10, %v7616_v61 }
 0x512   :  { %v3298_v62 = vmul.f32 %v7629_v57, %v7629_v57  ;;  %v3127_v35 = vsel %vm2814_vm2, %v3012_v28, 0.0  ;;  %2664 = vmatmul.f32.gmra.mxu2 %v5131_v43  ;;  %v2246_v48 = vadd.f32 %v9707_v2, %v9706_v32  ;;  %vm3511_vm4 = vweird.f32 %v7618_v27 }
 0x513   :  { %v3128_v16 = vadd.f32 %v3127_v35, %v3011_v4  ;;  %v3377_v58 = vmax.f32 %v3337_v47, 0.0  ;;  %v7652_v8 = vadd.f32 %v7241_v24, %v2204_v42  ;;  %v9711_v42 = vld [vmem:[#allocation65_spill] sm:$0xff] }
 0x514   :  { %v3338_v21 = vsub.f32 %v3258_v3, %v3298_v62  ;;  %v7662_v3 = vpop.f32.mrf.mxu3 }
 0x515   :  { %9708 = vst [vmem:[#allocation16_spill] sm:$0xff] %v7652_v8  ;;  %v2751_v22 = vpop.f32.mrf.mxu0  ;;  %3129 = vadd.xlane.f32.xlu1 %v3128_v16  ;;  %2889 = vadd.xlane.f32.xlu0 %v2888_v1  ;;  %v2617_v28 = vpop.f32.mrf.mxu2  ;;  %v7664_v2 = vadd.f32 1e-05, %v3377_v58  ;;  %v9712_v16 = vld [vmem:[#allocation31_spill] sm:$0xff] }
 0x516   :  { %v7654_v56 = vpop.eup %5041  ;;  %v3378_v43 = vmax.f32 %v3338_v21, 0.0  ;;  %v2382_v39 = vpop.f32.mrf.mxu1  ;;  %v7656_v52 = vadd.f32 %v2751_v22, %v2615_v51  ;;  %v2249_v1 = vadd.f32 %v9712_v16, %v9711_v42  ;;  %v5133_v16 = vld [vmem:[%s9420_s6 + $0x398] sm:$0xff] }
 0x517   :  { %v3506_v10 = vmul.f32 %v7654_v56, %v7618_v27  ;;  %v7660_v47 = vadd.f32 %v2382_v39, %v2246_v48  ;;  %v3013_v39 = vmul.f32 %v7652_v8, %v7652_v8  ;;  %v2618_v48 = vadd.f32 %v2617_v28, %v7562_v17 }
 0x518   :  { %9709 = vst [vmem:[#allocation15_spill] sm:$0xff] %v7656_v52  ;;  %v7666_v24 = vadd.f32 1e-05, %v3378_v43  ;;  %4824 = vmatmul.msk.f32.gmra.mxu0 %vm112_vm0, %v7248_v13  ;;  %v2891_v32 = vsel %vm2814_vm2, %v7656_v52, 0.0  ;;  %v3014_v21 = vmul.f32 %v7656_v52, %v7656_v52  ;;  %v5132_v13 = vld [vmem:[%s9420_s6 + $0x380] sm:$0xff]  ;;  %v7689_v28 = vpop.xlane.xlu2 %3073  ;;  %vm3512_vm3 = vweird.f32 %v7654_v56 }
 0x519   :  { %9710 = vst [vmem:[#allocation56_spill] sm:$0xff] %v7660_v47  ;;  %v3507_v4 = vmul.f32 %v7654_v56, %v3506_v10  ;;  %v2892_v35 = vadd.f32 %v2891_v32, %v7652_v8  ;;  %vm3513_vm5 = vmor %vm3511_vm4, %vm3512_vm3  ;;  %vm3521_vm10 = vweird.f32 %v7664_v2 }
 0x51a   :  { %5043 = vrsqrt.f32 %v7666_v24  ;;  %v3131_v62 = vsel %vm2814_vm2, %v3014_v21, 0.0  ;;  %2667 = vmatmul.f32.gmra.mxu2 %v5132_v13  ;;  %v9714_v21 = vld [vmem:[#allocation25_spill] sm:$0xff]  ;;  %vm3531_vm7 = vweird.f32 %v7666_v24 }
 0x51b   :  { %v3508_v51 = vmul.f32 0.5, %v3507_v4  ;;  %v3132_v25 = vadd.f32 %v3131_v62, %v3013_v39  ;;  %5045 = vrsqrt.f32 %v7664_v2  ;;  %v9715_v4 = vld [vmem:[#allocation64_spill] sm:$0xff] }
 0x51c   :  { %v2207_v32 = vadd.f32 %v9715_v4, %v9714_v21  ;;  %v7697_v62 = vpop.f32.mrf.mxu3  ;;  %v9719_v21 = vld [vmem:[#allocation36_spill] sm:$0xff] }
 0x51d   :  { %v2754_v58 = vpop.f32.mrf.mxu0  ;;  %2893 = vadd.xlane.f32.xlu1 %v2892_v35  ;;  %3133 = vadd.xlane.f32.xlu2 %v3132_v25  ;;  %v7687_v17 = vpop.f32.mrf.mxu2  ;;  %v3509_v22 = vsub.f32 1.5, %v3508_v51 }
 0x51e   :  { %v2385_v43 = vpop.f32.mrf.mxu1  ;;  %v7691_v10 = vadd.f32 %v2754_v58, %v2618_v48  ;;  %v7706_v48 = vadd.f32 %v7272_v29, %v2207_v32  ;;  %v7716_v58 = vpop.xlane.xlu1 %2833  ;;  %v3416_v29 = vld [vmem:[%s9421_s7 + $0x8] sm:$0xff] }
 0x51f   :  { %v7695_v39 = vadd.f32 %v2385_v43, %v2249_v1  ;;  %v3510_v51 = vmul.f32 %v7654_v56, %v3509_v22  ;;  %v9718_v43 = vld [vmem:[#allocation67_spill] sm:$0xff] }
 0x520   :  { %9713 = vst [vmem:[#allocation57_spill] sm:$0xff] %v7691_v10  ;;  %v5044_v13 = vpop.eup %5043  ;;  %4825 = vmatmul.msk.f32.gmra.mxu0 %vm112_vm0, %v7279_v20  ;;  %v2895_v35 = vsel %vm2814_vm2, %v7691_v10, 0.0  ;;  %v2252_v4 = vadd.f32 %v9719_v21, %v9718_v43  ;;  %v9722_v43 = vld [vmem:[#allocation41_spill] sm:$0xff] }
 0x521   :  { %9716 = vst [vmem:[#allocation18_spill] sm:$0xff] %v7695_v39  ;;  %v3526_v25 = vmul.f32 %v5044_v13, %v7666_v24  ;;  %v7709_v42 = vpop.eup %5045  ;;  %v2896_v1 = vadd.f32 %v2895_v35, %v7706_v48  ;;  %v3514_v22 = vsel %vm3513_vm5, %v7654_v56, %v3510_v51  ;;  %v7736_v51 = vpop.xlane.xlu2 %2837  ;;  %vm3532_vm6 = vweird.f32 %v5044_v13 }
 0x522   :  { %9717 = vst [vmem:[#allocation17_spill] sm:$0xff] %v7706_v48  ;;  %2670 = vmatmul.f32.gmra.mxu2 %v5133_v16  ;;  %v3516_v32 = vmul.f32 %v7709_v42, %v7664_v2  ;;  %v3896_v8 = vmul.f32 %v3514_v22, %v3416_v29  ;;  %v9721_v22 = vld [vmem:[#allocation69_spill] sm:$0xff]  ;;  %vm3533_vm8 = vmor %vm3531_vm7, %vm3532_vm6  ;;  %vm3522_vm9 = vweird.f32 %v7709_v42 }
 0x523   :  { %v3527_v20 = vmul.f32 %v5044_v13, %v3526_v25  ;;  %v7730_v25 = vpop.xlane.xlu0 %3077  ;;  %v2255_v21 = vadd.f32 %v9722_v43, %v9721_v22  ;;  %v3418_v22 = vld [vmem:[%s9421_s7 + $0x18] sm:$0xff]  ;;  %v3936_v43 = vld [vmem:[%s9422_s8 + $0x8] sm:$0xff]  ;;  %vm3523_vm11 = vmor %vm3521_vm10, %vm3522_vm9 }
 0x524   :  { %v7734_v39 = vpop.f32.mrf.mxu3 }
 0x525   :  { %v3528_v16 = vmul.f32 0.5, %v3527_v20  ;;  %v7726_v27 = vpop.f32.mrf.mxu0  ;;  %2897 = vadd.xlane.f32.xlu2 %v2896_v1  ;;  %v7728_v35 = vpop.f32.mrf.mxu2  ;;  %v3517_v20 = vmul.f32 %v7709_v42, %v3516_v32  ;;  %v5134_v1 = vld [vmem:[%s9420_s6 + $0x3b0] sm:$0xff] }
 0x526   :  { %v2388_v61 = vpop.f32.mrf.mxu1 }
 0x527   :  { %v7732_v52 = vadd.f32 %v2388_v61, %v2252_v4  ;;  %v3529_v56 = vsub.f32 1.5, %v3528_v16  ;;  %v3518_v4 = vmul.f32 0.5, %v3517_v20  ;;  %v3976_v20 = vmul.f32 %v3896_v8, %v7580_v40 }
 0x528   :  { %4826 = vmatmul.msk.f32.gmra.mxu0 %vm112_vm0, %v7310_v46  ;;  %v7744_v61 = vpop.xlane.xlu1 %3081 }
 0x529   :  { %9720 = vst [vmem:[#allocation58_spill] sm:$0xff] %v7732_v52  ;;  %4062 = vperm.xlu0 %4878, %v3896_v8   ;;  %v3530_v29 = vmul.f32 %v5044_v13, %v3529_v56 }
 0x52a   :  { %2673 = vmatmul.f32.gmra.mxu2 %v5134_v1 }
 0x52b   :  { %v7757_v1 = vpop.xlane.xlu0 %2841  ;;  %v3534_v24 = vsel %vm3533_vm8, %v5044_v13, %v3530_v29 }
 0x52c   :  { %v7755_v47 = vpop.f32.mrf.mxu3 }
 0x52d   :  { %v7748_v16 = vpop.f32.mrf.mxu0  ;;  %v7750_v52 = vpop.f32.mrf.mxu2 }
 0x52e   :  { %v2391_v46 = vpop.f32.mrf.mxu1 }
 0x52f   :  { %v7753_v32 = vadd.f32 %v2391_v46, %v2255_v21  ;;  %v3519_v21 = vsub.f32 1.5, %v3518_v4  ;;  %v7770_v46 = vmul.f32 %v3534_v24, %v3418_v22 }
 0x530   :  { %4827 = vmatmul.msk.f32.gmra.mxu0 %vm112_vm0, %v7341_v55  ;;  %v7761_v56 = vpop.xlane.xlu2 %3085  ;;  %v2258_v55 = vadd.f32 %v9725_v41, %v9724_v26  ;;  %v7780_v13 = vpop.xlane.xlu1 %2845 }
 0x531   :  { %9723 = vst [vmem:[#allocation59_spill] sm:$0xff] %v7753_v32  ;;  %v4016_v32 = vsub.f32 %v3936_v43, %v3976_v20  ;;  %v3520_v40 = vmul.f32 %v7709_v42, %v3519_v21  ;;  %v3978_v4 = vmul.f32 %v7770_v46, %v7629_v57  ;;  %v3417_v57 = vld [vmem:[%s9421_s7 + $0x10] sm:$0xff] }
 0x533   :  { %v3524_v2 = vsel %vm3523_vm11, %v7709_v42, %v3520_v40 }
 0x534   :  { %v7787_v26 = vpop.f32.mrf.mxu3  ;;  %v7802_v21 = vmul.f32 %v3524_v2, %v3417_v57 }
 0x535   :  { %v7774_v0 = vpop.f32.mrf.mxu0  ;;  %v7776_v60 = vpop.f32.mrf.mxu2  ;;  %9727 = vst [vmem:[#allocation19_spill] sm:$0xff] %v7787_v26 }
 0x536   :  { %v2394_v8 = vpop.f32.mrf.mxu1  ;;  %4342 = vperm.xlu1 %4879, %v4016_v32   ;;  %v3938_v32 = vld [vmem:[%s9422_s8 + $0x18] sm:$0xff] }
 0x537   :  { %v7782_v29 = vadd.f32 %v2394_v8, %v2258_v55  ;;  %v9728_v55 = vld [vmem:[#allocation73_spill] sm:$0xff]  ;;  %v9729_v8 = vld [vmem:[#allocation46_spill] sm:$0xff] }
 0x538   :  { %4828 = vmatmul.msk.f32.gmra.mxu0 %vm112_vm0, %v7372_v54  ;;  %v3090_v41 = vpop.xlane.xlu0 %3089  ;;  %v2850_v20 = vpop.xlane.xlu2 %2849  ;;  %v4018_v54 = vsub.f32 %v3938_v32, %v3978_v4 }
 0x539   :  { %9726 = vst [vmem:[#allocation20_spill] sm:$0xff] %v7782_v29  ;;  %v7794_v22 = vmul.f32 0.0051020407, %v2850_v20  ;;  %v3263_v24 = vmul.f32 0.0051020407, %v3090_v41  ;;  %v2261_v29 = vadd.f32 %v9729_v8, %v9728_v55  ;;  %v9734_v55 = vld [vmem:[#allocation48_spill] sm:$0xff] }
 0x53b   :  { %v3303_v43 = vmul.f32 %v7794_v22, %v7794_v22 }
 0x53c   :  { %v7813_v41 = vpop.f32.mrf.mxu3 }
 0x53d   :  { %v3343_v15 = vsub.f32 %v3263_v24, %v3303_v43  ;;  %v7806_v30 = vpop.f32.mrf.mxu0  ;;  %4352 = vperm.xlu2 %4880, %v4018_v54   ;;  %v7808_v20 = vpop.f32.mrf.mxu2  ;;  %9731 = vst [vmem:[#allocation61_spill] sm:$0xff] %v7813_v41  ;;  %v9733_v54 = vld [vmem:[#allocation75_spill] sm:$0xff] }
 0x53e   :  { %v2397_v63 = vpop.f32.mrf.mxu1  ;;  %4067 = vperm.xlu1 %4879, %v7802_v21   ;;  %v2264_v8 = vadd.f32 %v9734_v55, %v9733_v54  ;;  %v3016_v55 = vmul.f32 %v7691_v10, %v7691_v10  ;;  %v3015_v10 = vmul.f32 %v7706_v48, %v7706_v48  ;;  %v9753_v48 = vld [vmem:[#allocation66_spill] sm:$0xff] }
 0x53f   :  { %v3383_v42 = vmax.f32 %v3343_v15, 0.0  ;;  %v7811_v40 = vadd.f32 %v2397_v63, %v2261_v29 }
 0x540   :  { %v3094_v4 = vpop.xlane.xlu1 %3093  ;;  %v2854_v32 = vpop.xlane.xlu0 %2853  ;;  %v3135_v26 = vsel %vm2814_vm2, %v3016_v55, 0.0 }
 0x541   :  { %9730 = vst [vmem:[#allocation60_spill] sm:$0xff] %v7811_v40  ;;  %v3463_v57 = vadd.f32 1e-05, %v3383_v42  ;;  %v7815_v2 = vmul.f32 0.0051020407, %v2854_v32 }
 0x542   :  { %v7817_v24 = vmul.f32 0.0051020407, %v3094_v4  ;;  %v7836_v4 = vmul.f32 0.0051020407, %v7716_v58 }
 0x543   :  { %9732 = vst [vmem:[#allocation23_spill] sm:$0xff] %v7815_v2  ;;  %5047 = vrsqrt.f32 %v3463_v57  ;;  %v7821_v43 = vmul.f32 %v7815_v2, %v7815_v2  ;;  %vm3581_vm1 = vweird.f32 %v3463_v57 }
 0x544   :  { %v7833_v40 = vpop.f32.mrf.mxu3 }
 0x545   :  { %v7825_v15 = vpop.f32.mrf.mxu0  ;;  %v7827_v63 = vpop.f32.mrf.mxu2  ;;  %9737 = vst [vmem:[#allocation63_spill] sm:$0xff] %v7833_v40 }
 0x546   :  { %9735 = vst [vmem:[#allocation22_spill] sm:$0xff] %v7827_v63  ;;  %v2400_v42 = vpop.f32.mrf.mxu1 }
 0x547   :  { %v7831_v32 = vadd.f32 %v2400_v42, %v2264_v8  ;;  %v3299_v8 = vmul.f32 %v7836_v4, %v7836_v4 }
 0x548   :  { %v2858_v53 = vpop.xlane.xlu1 %2857  ;;  %v3098_v49 = vpop.xlane.xlu2 %3097 }
 0x549   :  { %9736 = vst [vmem:[#allocation62_spill] sm:$0xff] %v7831_v32  ;;  %v5048_v6 = vpop.eup %5047  ;;  %v7838_v38 = vmul.f32 0.0051020407, %v2858_v53  ;;  %v3265_v34 = vmul.f32 0.0051020407, %v3098_v49 }
 0x54a   :  { %v3576_v54 = vmul.f32 %v5048_v6, %v3463_v57  ;;  %v3259_v53 = vmul.f32 0.0051020407, %v7689_v28  ;;  %vm3582_vm0 = vweird.f32 %v5048_v6  ;;  %v3423_v28 = vld [vmem:[%s9421_s7 + $0x40] sm:$0xff] }
 0x54b   :  { %v3305_v29 = vmul.f32 %v7838_v38, %v7838_v38  ;;  %vm3583_vm12 = vmor %vm3581_vm1, %vm3582_vm0 }
 0x54c   :  { %v3577_v42 = vmul.f32 %v5048_v6, %v3576_v54  ;;  %v7854_v18 = vpop.f32.mrf.mxu3  ;;  %v3339_v49 = vsub.f32 %v3259_v53, %v3299_v8 }
 0x54d   :  { %v3345_v32 = vsub.f32 %v3265_v34, %v3305_v29  ;;  %v7846_v58 = vpop.f32.mrf.mxu0  ;;  %v7848_v40 = vpop.f32.mrf.mxu2  ;;  %9740 = vst [vmem:[#allocation31_spill] sm:$0xff] %v7854_v18 }
 0x54e   :  { %9738 = vst [vmem:[#allocation27_spill] sm:$0xff] %v7846_v58  ;;  %v3578_v41 = vmul.f32 0.5, %v3577_v42 }
 0x54f   :  { %9739 = vst [vmem:[#allocation65_spill] sm:$0xff] %v7848_v40  ;;  %v3385_v2 = vmax.f32 %v3345_v32, 0.0  ;;  %v3136_v40 = vadd.f32 %v3135_v26, %v3015_v10  ;;  %v3379_v32 = vmax.f32 %v3339_v49, 0.0  ;;  %v2624_v10 = vadd.f32 %v7728_v35, %v7626_v45 }
 0x550   :  { %v3579_v63 = vsub.f32 1.5, %v3578_v41  ;;  %v3102_v54 = vpop.xlane.xlu0 %3101  ;;  %v2862_v34 = vpop.xlane.xlu2 %2861 }
 0x551   :  { %v3465_v29 = vadd.f32 1e-05, %v3385_v2  ;;  %v7856_v58 = vmul.f32 0.0051020407, %v2862_v34  ;;  %v7861_v8 = vmul.f32 0.0051020407, %v3102_v54  ;;  %v7886_v54 = vadd.f32 %v7748_v16, %v2624_v10 }
 0x552   :  { %v3580_v55 = vmul.f32 %v5048_v6, %v3579_v63  ;;  %v7883_v53 = vadd.f32 1e-05, %v3379_v32  ;;  %v9750_v32 = vld [vmem:[#allocation35_spill] sm:$0xff]  ;;  %v9751_v16 = vld [vmem:[#allocation68_spill] sm:$0xff] }
 0x553   :  { %9741 = vst [vmem:[#allocation25_spill] sm:$0xff] %v7856_v58  ;;  %5049 = vrsqrt.f32 %v3465_v29  ;;  %3137 = vadd.xlane.f32.xlu0 %v3136_v40  ;;  %v7865_v41 = vmul.f32 %v7856_v58, %v7856_v58  ;;  %v2213_v10 = vadd.f32 %v9751_v16, %v9750_v32  ;;  %v9752_v40 = vld [vmem:[#allocation30_spill] sm:$0xff]  ;;  %vm3601_vm14 = vweird.f32 %v3465_v29 }
 0x554   :  { %v3584_v42 = vsel %vm3583_vm12, %v5048_v6, %v3580_v55  ;;  %v2621_v6 = vadd.f32 %v7687_v17, %v7591_v19  ;;  %9744 = vst [vmem:[#allocation36_spill] sm:$0xff] %v7886_v54  ;;  %v7890_v55 = vpop.f32.mrf.mxu3  ;;  %5051 = vrsqrt.f32 %v7883_v53  ;;  %v2210_v58 = vadd.f32 %v9753_v48, %v9752_v40 }
 0x555   :  { %9742 = vst [vmem:[#allocation64_spill] sm:$0xff] %v7865_v41  ;;  %v7869_v26 = vmul.f32 %v3584_v42, %v3423_v28  ;;  %v7871_v2 = vpop.f32.mrf.mxu0  ;;  %v7873_v63 = vpop.f32.mrf.mxu2  ;;  %v7893_v42 = vmul.f32 0.0051020407, %v7736_v51  ;;  %vm3541_vm4 = vweird.f32 %v7883_v53 }
 0x556   :  { %9746 = vst [vmem:[#allocation41_spill] sm:$0xff] %v7890_v55  ;;  %v7896_v19 = vadd.f32 %v7726_v27, %v2621_v6  ;;  %v7921_v16 = vadd.f32 %v7303_v9, %v2210_v58  ;;  %v3977_v9 = vmul.f32 %v7802_v21, %v7610_v12 }
 0x557   :  { %v7881_v57 = vmul.f32 %v7869_v26, %v7794_v22  ;;  %v3300_v48 = vmul.f32 %v7893_v42, %v7893_v42 }
 0x558   :  { %v3106_v49 = vpop.xlane.xlu1 %3105  ;;  %v2866_v45 = vpop.xlane.xlu0 %2865  ;;  %9747 = vst [vmem:[#allocation71_spill] sm:$0xff] %v7896_v19  ;;  %v3018_v40 = vmul.f32 %v7896_v19, %v7896_v19  ;;  %v3017_v12 = vmul.f32 %v7921_v16, %v7921_v16 }
 0x559   :  { %9743 = vst [vmem:[#allocation67_spill] sm:$0xff] %v7881_v57  ;;  %v5050_v35 = vpop.eup %5049  ;;  %v7888_v34 = vmul.f32 0.0051020407, %v2866_v45  ;;  %v7898_v17 = vmul.f32 0.0051020407, %v3106_v49  ;;  %v3020_v49 = vmul.f32 %v7886_v54, %v7886_v54 }
 0x55a   :  { %v3596_v28 = vmul.f32 %v5050_v35, %v3465_v29  ;;  %9757 = vst [vmem:[#allocation35_spill] sm:$0xff] %v7921_v16  ;;  %vm3602_vm13 = vweird.f32 %v5050_v35  ;;  %v7933_v58 = vpop.eup %5051  ;;  %v3139_v21 = vsel %vm2814_vm2, %v3018_v40, 0.0 }
 0x55b   :  { %9745 = vst [vmem:[#allocation69_spill] sm:$0xff] %v7888_v34  ;;  %v7902_v22 = vmul.f32 %v7888_v34, %v7888_v34  ;;  %v7918_v34 = vadd.f32 %v7334_v31, %v2213_v10  ;;  %v3143_v31 = vsel %vm2814_vm2, %v3020_v49, 0.0  ;;  %vm3603_vm15 = vmor %vm3601_vm14, %vm3602_vm13  ;;  %v3536_v57 = vmul.f32 %v7933_v58, %v7883_v53 }
 0x55c   :  { %9748 = vst [vmem:[#allocation44_spill] sm:$0xff] %v7898_v17  ;;  %v3597_v45 = vmul.f32 %v5050_v35, %v3596_v28  ;;  %vm3542_vm3 = vweird.f32 %v7933_v58 }
 0x55d   :  { %9749 = vst [vmem:[#allocation73_spill] sm:$0xff] %v7902_v22  ;;  %v7911_v27 = vpop.f32.mrf.mxu0  ;;  %v7913_v6 = vpop.f32.mrf.mxu2  ;;  %vm3543_vm5 = vmor %vm3541_vm4, %vm3542_vm3 }
 0x55e   :  { %9754 = vst [vmem:[#allocation46_spill] sm:$0xff] %v7911_v27  ;;  %v3598_v32 = vmul.f32 0.5, %v3597_v45  ;;  %v3019_v45 = vmul.f32 %v7918_v34, %v7918_v34  ;;  %v2516_v22 = vpop.f32.mrf.mxu3 }
 0x55f   :  { %9755 = vst [vmem:[#allocation75_spill] sm:$0xff] %v7913_v6  ;;  %v3260_v6 = vmul.f32 0.0051020407, %v7730_v25  ;;  %v3425_v25 = vld [vmem:[%s9421_s7 + $0x50] sm:$0xff] }
 0x560   :  { %9756 = vst [vmem:[#allocation48_spill] sm:$0xff] %v7918_v34  ;;  %v3599_v28 = vsub.f32 1.5, %v3598_v32  ;;  %v2870_v51 = vpop.xlane.xlu1 %2869  ;;  %v3110_v55 = vpop.xlane.xlu2 %3109  ;;  %v3937_v32 = vld [vmem:[%s9422_s8 + $0x10] sm:$0xff] }
 0x561   :  { %v7928_v18 = vmul.f32 0.0051020407, %v2870_v51  ;;  %v3340_v51 = vsub.f32 %v3260_v6, %v3300_v48  ;;  %v7950_v49 = vmul.f32 0.0051020407, %v3110_v55  ;;  %v4017_v6 = vsub.f32 %v3937_v32, %v3977_v9 }
 0x562   :  { %v3600_v10 = vmul.f32 %v5050_v35, %v3599_v28  ;;  %v3144_v28 = vadd.f32 %v3143_v31, %v3019_v45  ;;  %v3537_v9 = vmul.f32 %v7933_v58, %v3536_v57 }
 0x563   :  { %9758 = vst [vmem:[#allocation68_spill] sm:$0xff] %v7928_v18  ;;  %v7948_v29 = vmul.f32 %v7928_v18, %v7928_v18  ;;  %v3140_v18 = vadd.f32 %v3139_v21, %v3017_v12  ;;  %v3380_v55 = vmax.f32 %v3340_v51, 0.0  ;;  %v2903_v51 = vsel %vm2814_vm2, %v7886_v54, 0.0 }
 0x564   :  { %v3604_v17 = vsel %vm3603_vm15, %v5050_v35, %v3600_v10  ;;  %v2904_v21 = vadd.f32 %v2903_v51, %v7918_v34 }
 0x565   :  { %v7954_v27 = vpop.f32.mrf.mxu0  ;;  %v7956_v48 = vpop.f32.mrf.mxu2  ;;  %v7958_v41 = vmul.f32 %v3604_v17, %v3425_v25  ;;  %v7969_v17 = vadd.f32 1e-05, %v3380_v55 }
 0x566   :  { %3145 = vadd.xlane.f32.xlu2 %v3144_v28  ;;  %v7987_v28 = vpop.f32.mrf.mxu3 }
 0x567   :  { %4347 = vperm.xlu0 %4878, %v4017_v6   ;;  %v7964_v35 = vmul.f32 %v7958_v41, %v7838_v38  ;;  %v3538_v38 = vmul.f32 0.5, %v3537_v9  ;;  %5053 = vrsqrt.f32 %v7969_v17  ;;  %9762 = vst [vmem:[#allocation86_spill] sm:$0xff] %v7987_v28  ;;  %v3419_v28 = vld [vmem:[%s9421_s7 + $0x20] sm:$0xff]  ;;  %vm3551_vm7 = vweird.f32 %v7969_v17 }
 0x568   :  { %v3114_v31 = vpop.xlane.xlu0 %3113  ;;  %3141 = vadd.xlane.f32.xlu1 %v3140_v18  ;;  %v2874_v10 = vpop.xlane.xlu2 %2873 }
 0x569   :  { %v7967_v45 = vmul.f32 0.0051020407, %v2874_v10  ;;  %v7971_v32 = vmul.f32 0.0051020407, %v3114_v31  ;;  %v3539_v10 = vsub.f32 1.5, %v3538_v38 }
 0x56b   :  { %9759 = vst [vmem:[#allocation30_spill] sm:$0xff] %v7967_v45  ;;  %v7975_v25 = vmul.f32 %v7967_v45, %v7967_v45  ;;  %v3540_v34 = vmul.f32 %v7933_v58, %v3539_v10 }
 0x56c   :  { %9760 = vst [vmem:[#allocation66_spill] sm:$0xff] %v7971_v32  ;;  %v8026_v32 = vmul.f32 0.0051020407, %v7757_v1 }
 0x56d   :  { %9761 = vst [vmem:[#allocation85_spill] sm:$0xff] %v7975_v25  ;;  %v7981_v12 = vpop.f32.mrf.mxu0  ;;  %v7983_v57 = vpop.f32.mrf.mxu2  ;;  %v3544_v10 = vsel %vm3543_vm5, %v7933_v58, %v3540_v34 }
 0x56e   :  { %v5054_v40 = vpop.eup %5053  ;;  %v3301_v1 = vmul.f32 %v8026_v32, %v8026_v32 }
 0x56f   :  { %v3546_v38 = vmul.f32 %v5054_v40, %v7969_v17  ;;  %vm3552_vm6 = vweird.f32 %v5054_v40 }
 0x570   :  { %v3118_v6 = vpop.xlane.xlu1 %3117  ;;  %v2878_v55 = vpop.xlane.xlu0 %2877  ;;  %2905 = vadd.xlane.f32.xlu1 %v2904_v21  ;;  %v3899_v21 = vmul.f32 %v3544_v10, %v3419_v28  ;;  %vm3553_vm8 = vmor %vm3551_vm7, %vm3552_vm6 }
 0x571   :  { %v7989_v31 = vmul.f32 0.0051020407, %v2878_v55  ;;  %v7991_v9 = vmul.f32 0.0051020407, %v3118_v6 }
 0x573   :  { %9763 = vst [vmem:[#allocation87_spill] sm:$0xff] %v7989_v31  ;;  %v7995_v18 = vmul.f32 %v7989_v31, %v7989_v31 }
 0x574   :  { %9764 = vst [vmem:[#allocation88_spill] sm:$0xff] %v7991_v9 }
 0x575   :  { %9765 = vst [vmem:[#allocation89_spill] sm:$0xff] %v7995_v18  ;;  %v7997_v54 = vpop.f32.mrf.mxu0  ;;  %v2653_v51 = vpop.f32.mrf.mxu2 }
 0x576   :  { %9766 = vst [vmem:[#allocation90_spill] sm:$0xff] %v7997_v54  ;;  %v2654_v55 = vadd.f32 %v2653_v51, %v2516_v22  ;;  %v8011_v54 = vpop.f32.mrf.mxu3  ;;  %v3547_v51 = vmul.f32 %v5054_v40, %v3546_v38 }
 0x577   :  { %9768 = vst [vmem:[#allocation92_spill] sm:$0xff] %v8011_v54 }
 0x578   :  { %v2882_v6 = vpop.xlane.xlu1 %2881  ;;  %v3122_v45 = vpop.xlane.xlu2 %3121  ;;  %v3548_v34 = vmul.f32 0.5, %v3547_v51 }
 0x579   :  { %v8005_v31 = vmul.f32 0.0051020407, %v2882_v6  ;;  %v8017_v53 = vmul.f32 0.0051020407, %v3122_v45  ;;  %v3979_v45 = vmul.f32 %v3899_v21, %v7836_v4 }
 0x57a   :  { %v3549_v28 = vsub.f32 1.5, %v3548_v34 }
 0x57b   :  { %9767 = vst [vmem:[#allocation91_spill] sm:$0xff] %v8005_v31  ;;  %v8015_v22 = vmul.f32 %v8005_v31, %v8005_v31 }
 0x57d   :  { %v2790_v18 = vpop.f32.mrf.mxu0  ;;  %v8021_v9 = vpop.f32.mrf.mxu2 }
 0x57e   :  { %9769 = vst [vmem:[#allocation93_spill] sm:$0xff] %v8021_v9  ;;  %v8023_v25 = vadd.f32 %v2790_v18, %v2654_v55  ;;  %4077 = vperm.xlu2 %4880, %v3899_v21   ;;  %v3939_v18 = vld [vmem:[%s9422_s8 + $0x20] sm:$0xff]  ;;  %v2525_v55 = vpop.f32.mrf.mxu3  ;;  %v3261_v21 = vmul.f32 0.0051020407, %v7744_v61  ;;  %v3420_v61 = vld [vmem:[%s9421_s7 + $0x28] sm:$0xff] }
 0x57f   :  { %v4019_v34 = vsub.f32 %v3939_v18, %v3979_v45 }
 0x580   :  { %9770 = vst [vmem:[#allocation94_spill] sm:$0xff] %v8023_v25  ;;  %v3126_v58 = vpop.xlane.xlu0 %3125  ;;  %v2886_v54 = vpop.xlane.xlu2 %2885  ;;  %v3341_v25 = vsub.f32 %v3261_v21, %v3301_v1 }
 0x581   :  { %v8028_v31 = vmul.f32 0.0051020407, %v2886_v54  ;;  %v8031_v38 = vmul.f32 0.0051020407, %v3126_v58  ;;  %v3550_v58 = vmul.f32 %v5054_v40, %v3549_v28  ;;  %v2899_v28 = vsel %vm2814_vm2, %v7896_v19, 0.0 }
 0x583   :  { %9771 = vst [vmem:[#allocation95_spill] sm:$0xff] %v8028_v31  ;;  %v8035_v10 = vmul.f32 %v8028_v31, %v8028_v31  ;;  %v3554_v45 = vsel %vm3553_vm8, %v5054_v40, %v3550_v58 }
 0x584   :  { %v8067_v21 = vmul.f32 %v3554_v45, %v3420_v61  ;;  %v9787_v45 = vld [vmem:[#allocation40_spill] sm:$0xff] }
 0x585   :  { %9772 = vst [vmem:[#allocation96_spill] sm:$0xff] %v8035_v10  ;;  %v8042_v51 = vpop.f32.mrf.mxu0  ;;  %v8044_v54 = vpop.f32.mrf.mxu2 }
 0x586   :  { %9773 = vst [vmem:[#allocation97_spill] sm:$0xff] %v8042_v51  ;;  %v8070_v4 = vpop.f32.mrf.mxu3 }
 0x587   :  { %9774 = vst [vmem:[#allocation98_spill] sm:$0xff] %v8044_v54 }
 0x588   :  { %v3130_v6 = vpop.xlane.xlu1 %3129  ;;  %v2890_v31 = vpop.xlane.xlu0 %2889  ;;  %9778 = vst [vmem:[#allocation102_spill] sm:$0xff] %v8070_v4 }
 0x589   :  { %v8049_v9 = vmul.f32 0.0051020407, %v2890_v31  ;;  %4357 = vperm.xlu1 %4879, %v4019_v34   ;;  %v8052_v51 = vmul.f32 0.0051020407, %v3130_v6  ;;  %v3381_v31 = vmax.f32 %v3341_v25, 0.0  ;;  %v2900_v34 = vadd.f32 %v2899_v28, %v7921_v16 }
 0x58a   :  { %v8096_v16 = vmul.f32 0.0051020407, %v7780_v13  ;;  %v3262_v13 = vmul.f32 0.0051020407, %v7761_v56 }
 0x58b   :  { %9775 = vst [vmem:[#allocation99_spill] sm:$0xff] %v8049_v9  ;;  %v8056_v54 = vmul.f32 %v8049_v9, %v8049_v9  ;;  %v3461_v10 = vadd.f32 1e-05, %v3381_v31  ;;  %v2627_v31 = vadd.f32 %v7750_v52, %v7662_v3 }
 0x58c   :  { %9776 = vst [vmem:[#allocation100_spill] sm:$0xff] %v8052_v51  ;;  %v3302_v51 = vmul.f32 %v8096_v16, %v8096_v16 }
 0x58d   :  { %9777 = vst [vmem:[#allocation101_spill] sm:$0xff] %v8056_v54  ;;  %v8065_v17 = vpop.f32.mrf.mxu0  ;;  %v2662_v6 = vpop.f32.mrf.mxu2  ;;  %5055 = vrsqrt.f32 %v3461_v10  ;;  %v8099_v54 = vadd.f32 %v7774_v0, %v2627_v31  ;;  %vm3561_vm10 = vweird.f32 %v3461_v10 }
 0x58e   :  { %v2663_v1 = vadd.f32 %v2662_v6, %v2525_v55 }
 0x58f   :  { %9786 = vst [vmem:[#allocation110_spill] sm:$0xff] %v8099_v54  ;;  %v2907_v52 = vsel %vm2814_vm2, %v8099_v54, 0.0 }
 0x590   :  { %v2894_v9 = vpop.xlane.xlu1 %2893  ;;  %v3134_v58 = vpop.xlane.xlu2 %3133 }
 0x591   :  { %v8072_v40 = vmul.f32 0.0051020407, %v2894_v9  ;;  %2901 = vadd.xlane.f32.xlu0 %v2900_v34  ;;  %4082 = vperm.xlu1 %4879, %v8067_v21   ;;  %v8079_v18 = vmul.f32 0.0051020407, %v3134_v58  ;;  %v8087_v9 = vpop.f32.mrf.mxu3 }
 0x592   :  { %9783 = vst [vmem:[#allocation107_spill] sm:$0xff] %v8087_v9 }
 0x593   :  { %9779 = vst [vmem:[#allocation103_spill] sm:$0xff] %v8072_v40  ;;  %v8077_v25 = vmul.f32 %v8072_v40, %v8072_v40  ;;  %v5056_v6 = vpop.eup %5055 }
 0x594   :  { %v3556_v58 = vmul.f32 %v5056_v6, %v3461_v10  ;;  %vm3562_vm9 = vweird.f32 %v5056_v6  ;;  %v2633_v10 = vadd.f32 %v7808_v20, %v7734_v39  ;;  %v9796_v39 = vld [vmem:[#allocation45_spill] sm:$0xff]  ;;  %v9797_v20 = vld [vmem:[#allocation74_spill] sm:$0xff] }
 0x595   :  { %9780 = vst [vmem:[#allocation104_spill] sm:$0xff] %v8077_v25  ;;  %v2799_v55 = vpop.f32.mrf.mxu0  ;;  %v8081_v61 = vpop.f32.mrf.mxu2  ;;  %vm3563_vm11 = vmor %vm3561_vm10, %vm3562_vm9 }
 0x596   :  { %9781 = vst [vmem:[#allocation105_spill] sm:$0xff] %v8081_v61  ;;  %v8085_v28 = vadd.f32 %v2799_v55, %v2663_v1  ;;  %v9788_v1 = vld [vmem:[#allocation70_spill] sm:$0xff] }
 0x597   :  { %v2216_v55 = vadd.f32 %v9788_v1, %v9787_v45 }
 0x598   :  { %9782 = vst [vmem:[#allocation106_spill] sm:$0xff] %v8085_v28  ;;  %v3557_v28 = vmul.f32 %v5056_v6, %v3556_v58  ;;  %v3342_v58 = vsub.f32 %v3262_v13, %v3302_v51 }
 0x599   :  { %v8108_v3 = vadd.f32 %v7365_v44, %v2216_v55  ;;  %v2534_v40 = vpop.f32.mrf.mxu3 }
 0x59a   :  { %v3558_v31 = vmul.f32 0.5, %v3557_v28  ;;  %v3382_v25 = vmax.f32 %v3342_v58, 0.0 }
 0x59b   :  { %9789 = vst [vmem:[#allocation40_spill] sm:$0xff] %v8108_v3  ;;  %v2908_v0 = vadd.f32 %v2907_v52, %v8108_v3 }
 0x59c   :  { %v3559_v56 = vsub.f32 1.5, %v3558_v31  ;;  %v2222_v31 = vadd.f32 %v9797_v20, %v9796_v39 }
 0x59d   :  { %v8091_v34 = vpop.f32.mrf.mxu0  ;;  %v8093_v19 = vpop.f32.mrf.mxu2 }
 0x59e   :  { %9784 = vst [vmem:[#allocation108_spill] sm:$0xff] %v8091_v34 }
 0x59f   :  { %9785 = vst [vmem:[#allocation109_spill] sm:$0xff] %v8093_v19  ;;  %v4063_v19 = vpop.permute.xlu0 %4062 }
 0x5a0   :  { %v4257_v34 = vmul.f32 %v4063_v19, %v7126_v11  ;;  %v4258_v61 = vmul.f32 %v4063_v19, %v7118_v23  ;;  %v3560_v11 = vmul.f32 %v5056_v6, %v3559_v56  ;;  %v3022_v56 = vmul.f32 %v8099_v54, %v8099_v54  ;;  %v9859_v54 = vld [vmem:[#allocation97_spill] sm:$0xff] }
 0x5a2   :  { %v3564_v28 = vsel %vm3563_vm11, %v5056_v6, %v3560_v11  ;;  %v3147_v11 = vsel %vm2814_vm2, %v3022_v56, 0.0 }
 0x5a5   :  { %v8111_v9 = vpop.f32.mrf.mxu0  ;;  %4072 = vperm.xlu0 %4878, %v7770_v46   ;;  %v2671_v45 = vpop.f32.mrf.mxu2  ;;  %v3462_v46 = vadd.f32 1e-05, %v3382_v25 }
 0x5a6   :  { %9790 = vst [vmem:[#allocation70_spill] sm:$0xff] %v8111_v9  ;;  %v2672_v1 = vadd.f32 %v2671_v45, %v2534_v40  ;;  %v2630_v9 = vadd.f32 %v7776_v60, %v7697_v62  ;;  %v9792_v60 = vld [vmem:[#allocation43_spill] sm:$0xff]  ;;  %v9793_v62 = vld [vmem:[#allocation72_spill] sm:$0xff] }
 0x5a7   :  { %2909 = vadd.xlane.f32.xlu2 %v2908_v0  ;;  %v2219_v40 = vadd.f32 %v9793_v62, %v9792_v60  ;;  %5057 = vrsqrt.f32 %v3462_v46  ;;  %v8151_v0 = vadd.f32 %v7825_v15, %v2633_v10  ;;  %v3021_v62 = vmul.f32 %v8108_v3, %v8108_v3 }
 0x5a8   :  { %v4343_v44 = vpop.permute.xlu1 %4342  ;;  %v8127_v19 = vadd.f32 %v7806_v30, %v2630_v9  ;;  %vm3571_vm1 = vweird.f32 %v3462_v46 }
 0x5a9   :  { %v4537_v55 = vadd.f32 %v4343_v44, %v4257_v34  ;;  %v4538_v4 = vadd.f32 %v4343_v44, %v4258_v61  ;;  %v3421_v61 = vld [vmem:[%s9421_s7 + $0x30] sm:$0xff]  ;;  %v8139_v25 = vadd.f32 %v7398_v36, %v2219_v40  ;;  %9795 = vst [vmem:[#allocation72_spill] sm:$0xff] %v8151_v0  ;;  %v8161_v44 = vadd.f32 %v7427_v33, %v2222_v31  ;;  %v3422_v40 = vld [vmem:[%s9421_s7 + $0x38] sm:$0xff] }
 0x5aa   :  { %9791 = vst [vmem:[#allocation111_spill] sm:$0xff] %v8127_v19  ;;  %v8141_v30 = vmul.f32 %v3564_v28, %v3421_v61  ;;  %v3941_v36 = vld [vmem:[%s9422_s8 + $0x30] sm:$0xff]  ;;  %v3148_v33 = vadd.f32 %v3147_v11, %v3021_v62  ;;  %v8172_v28 = vpop.xlane.xlu2 %2897 }
 0x5ab   :  { %4617 = vst [vmem:[%s9423_s9 + $0x10] sm:$0xff] %v4537_v55  ;;  %v3023_v34 = vmul.f32 %v8139_v25, %v8139_v25 }
 0x5ac   :  { %4618 = vst.msk [vmem:[%s9423_s9 + $0x18] sm:$0xff] %vm2814_vm2, %v4538_v4  ;;  %v3024_v4 = vmul.f32 %v8127_v19, %v8127_v19  ;;  %v3981_v6 = vmul.f32 %v8141_v30, %v8026_v32 }
 0x5ad   :  { %v2808_v23 = vpop.f32.mrf.mxu0  ;;  %9794 = vst [vmem:[#allocation43_spill] sm:$0xff] %v8139_v25  ;;  %v5058_v52 = vpop.eup %5057 }
 0x5ae   :  { %v8129_v51 = vadd.f32 %v2808_v23, %v2672_v1  ;;  %v3151_v9 = vsel %vm2814_vm2, %v3024_v4, 0.0  ;;  %v3566_v45 = vmul.f32 %v5058_v52, %v3462_v46  ;;  %v4021_v58 = vsub.f32 %v3941_v36, %v3981_v6  ;;  %v3942_v46 = vld [vmem:[%s9422_s8 + $0x38] sm:$0xff] }
 0x5af   :  { %v3152_v13 = vadd.f32 %v3151_v9, %v3023_v34  ;;  %v2915_v1 = vsel %vm2814_vm2, %v8151_v0, 0.0  ;;  %vm3572_vm0 = vweird.f32 %v5058_v52 }
 0x5b0   :  { %v3567_v32 = vmul.f32 %v5058_v52, %v3566_v45  ;;  %v2916_v15 = vadd.f32 %v2915_v1, %v8161_v44  ;;  %vm3573_vm12 = vmor %vm3571_vm1, %vm3572_vm0  ;;  %v4068_v9 = vpop.permute.xlu1 %4067 }
 0x5b1   :  { %v4259_v6 = vmul.f32 %v4068_v9, %v7154_v5  ;;  %v3026_v5 = vmul.f32 %v8151_v0, %v8151_v0 }
 0x5b2   :  { %v3568_v55 = vmul.f32 0.5, %v3567_v32  ;;  %v4353_v20 = vpop.permute.xlu2 %4352 }
 0x5b4   :  { %v3569_v23 = vsub.f32 1.5, %v3568_v55 }
 0x5b6   :  { %v3570_v60 = vmul.f32 %v5058_v52, %v3569_v23 }
 0x5b8   :  { %v3574_v61 = vsel %vm3573_vm12, %v5058_v52, %v3570_v60  ;;  %v2420_v60 = vpop.f32.mrf.mxu1 }
 0x5b9   :  { %v3902_v10 = vmul.f32 %v3574_v61, %v3422_v40 }
 0x5bb   :  { %3153 = vadd.xlane.f32.xlu1 %v3152_v13  ;;  %v3982_v34 = vmul.f32 %v3902_v10, %v8096_v16  ;;  %v4260_v13 = vmul.f32 %v4068_v9, %v7145_v14  ;;  %v3980_v16 = vmul.f32 %v8067_v21, %v7893_v42  ;;  %v3940_v14 = vld [vmem:[%s9422_s8 + $0x28] sm:$0xff]  ;;  %v3025_v42 = vmul.f32 %v8161_v44, %v8161_v44 }
 0x5bd   :  { %v4022_v52 = vsub.f32 %v3942_v46, %v3982_v34 }
 0x5bf   :  { %4367 = vperm.xlu2 %4880, %v4021_v58   ;;  %v4020_v58 = vsub.f32 %v3940_v14, %v3980_v16 }
 0x5c3   :  { %2917 = vadd.xlane.f32.xlu1 %v2916_v15  ;;  %v3155_v15 = vsel %vm2814_vm2, %v3026_v5, 0.0 }
 0x5c4   :  { %v3156_v23 = vadd.f32 %v3155_v15, %v3025_v42 }
 0x5c6   :  { %v8174_v4 = vpop.xlane.xlu0 %3137 }
 0x5cf   :  { %3149 = vadd.xlane.f32.xlu0 %v3148_v33  ;;  %v9798_v33 = vld [vmem:[#allocation77_spill] sm:$0xff] }
 0x5d0   :  { %v2558_v40 = vadd.f32 %v9798_v33, %v2420_v60 }
 0x5d9   :  { %v4348_v36 = vpop.permute.xlu0 %4347  ;;  %v3146_v1 = vpop.xlane.xlu2 %3145 }
 0x5da   :  { %v4539_v45 = vadd.f32 %v4348_v36, %v4259_v6  ;;  %v4540_v39 = vadd.f32 %v4348_v36, %v4260_v13  ;;  %v8201_v21 = vmul.f32 0.0051020407, %v3146_v1  ;;  %v9799_v13 = vld [vmem:[#allocation80_spill] sm:$0xff] }
 0x5db   :  { %v3142_v31 = vpop.xlane.xlu1 %3141  ;;  %v8213_v36 = vadd.f32 %v9799_v13, %v2558_v40 }
 0x5dc   :  { %4619 = vst [vmem:[%s9423_s9 + $0x20] sm:$0xff] %v4539_v45  ;;  %4372 = vperm.xlu1 %4879, %v4022_v52   ;;  %v9801_v45 = vld [vmem:[#allocation2_spill] sm:$0xff]  ;;  %v9803_v52 = vld [vmem:[#allocation51_spill] sm:$0xff]  ;;  %v8232_v1 = vmul.f32 0.0051020407, %v3142_v31 }
 0x5dd   :  { %4620 = vst.msk [vmem:[%s9423_s9 + $0x28] sm:$0xff] %vm2814_vm2, %v4540_v39  ;;  %v9802_v39 = vld [vmem:[#allocation11_spill] sm:$0xff] }
 0x5de   :  { %9800 = vst [vmem:[#allocation45_spill] sm:$0xff] %v8213_v36 }
 0x5e1   :  { %v4078_v62 = vpop.permute.xlu2 %4077 }
 0x5e2   :  { %v4263_v61 = vmul.f32 %v4078_v62, %v7208_v7  ;;  %v4264_v9 = vmul.f32 %v4078_v62, %v7212_v37  ;;  %v2147_v7 = vadd.f32 %v9802_v39, %v9801_v45  ;;  %v2815_v37 = vsel %vm2814_vm2, %v8213_v36, 0.0  ;;  %v9811_v39 = vld [vmem:[#allocation32_spill] sm:$0xff] }
 0x5e3   :  { %v2906_v32 = vpop.xlane.xlu1 %2905  ;;  %4362 = vperm.xlu0 %4878, %v4020_v58  }
 0x5e4   :  { %v8197_v55 = vmul.f32 0.0051020407, %v2906_v32  ;;  %v8227_v16 = vadd.f32 %v9803_v52, %v2147_v7 }
 0x5e6   :  { %v8205_v56 = vmul.f32 %v8197_v55, %v8197_v55  ;;  %9804 = vst [vmem:[#allocation74_spill] sm:$0xff] %v8227_v16  ;;  %v2816_v5 = vadd.f32 %v2815_v37, %v8227_v16 }
 0x5e8   :  { %3157 = vadd.xlane.f32.xlu2 %v3156_v23  ;;  %v9805_v23 = vsub.f32 %v7817_v24, %v7821_v43  ;;  %v9807_v24 = vld [vmem:[#allocation27_spill] sm:$0xff] }
 0x5e9   :  { %v9809_v43 = vld [vmem:[#allocation47_spill] sm:$0xff] }
 0x5ea   :  { %v3384_v60 = vmax.f32 %v9805_v23, 0.0 }
 0x5ec   :  { %v3464_v62 = vadd.f32 1e-05, %v3384_v60  ;;  %v3944_v60 = vld [vmem:[%s9422_s8 + $0x48] sm:$0xff] }
 0x5ee   :  { %5059 = vrsqrt.f32 %v3464_v62  ;;  %vm3591_vm14 = vweird.f32 %v3464_v62 }
 0x5fb   :  { %v4358_v34 = vpop.permute.xlu1 %4357 }
 0x5fc   :  { %v4543_v46 = vadd.f32 %v4358_v34, %v4263_v61  ;;  %v4544_v6 = vadd.f32 %v4358_v34, %v4264_v9  ;;  %v9806_v34 = vld [vmem:[#allocation22_spill] sm:$0xff] }
 0x5fe   :  { %4623 = vst [vmem:[%s9423_s9 + $0x40] sm:$0xff] %v4543_v46  ;;  %v2636_v46 = vadd.f32 %v9806_v34, %v7755_v47  ;;  %v9810_v47 = vld [vmem:[#allocation76_spill] sm:$0xff] }
 0x5ff   :  { %4624 = vst.msk [vmem:[%s9423_s9 + $0x48] sm:$0xff] %vm2814_vm2, %v4544_v6  ;;  %v5060_v6 = vpop.eup %5059 }
 0x600   :  { %4092 = vperm.xlu2 %4880, %v3902_v10   ;;  %v2911_v10 = vsel %vm2814_vm2, %v8127_v19, 0.0  ;;  %vm3592_vm13 = vweird.f32 %v5060_v6 }
 0x601   :  { %v2912_v42 = vadd.f32 %v2911_v10, %v8139_v25  ;;  %vm3593_vm15 = vmor %vm3591_vm14, %vm3592_vm13 }
 0x603   :  { %v4083_v34 = vpop.permute.xlu1 %4082 }
 0x604   :  { %v2902_v14 = vpop.xlane.xlu0 %2901 }
 0x605   :  { %v8230_v58 = vmul.f32 0.0051020407, %v2902_v14 }
 0x606   :  { %2817 = vadd.xlane.f32.xlu1 %v2816_v5 }
 0x607   :  { %v8236_v32 = vmul.f32 %v8230_v58, %v8230_v58 }
 0x60d   :  { %2913 = vadd.xlane.f32.xlu0 %v2912_v42  ;;  %v9813_v42 = vld [vmem:[#allocation23_spill] sm:$0xff] }
 0x617   :  { %v4073_v31 = vpop.permute.xlu0 %4072 }
 0x618   :  { %v4261_v33 = vmul.f32 %v4073_v31, %v7174_v50  ;;  %v4262_v40 = vmul.f32 %v4073_v31, %v7178_v59  ;;  %v3586_v50 = vmul.f32 %v5060_v6, %v3464_v62  ;;  %v8259_v59 = vadd.f32 %v9807_v24, %v2636_v46 }
 0x619   :  { %v2976_v62 = vmul.f32 %v8213_v36, %v8213_v36 }
 0x61a   :  { %v4541_v61 = vadd.f32 %v4353_v20, %v4261_v33  ;;  %v4542_v9 = vadd.f32 %v4353_v20, %v4262_v40  ;;  %9808 = vst [vmem:[#allocation77_spill] sm:$0xff] %v8259_v59  ;;  %v2225_v20 = vadd.f32 %v9810_v47, %v9809_v43  ;;  %v3587_v13 = vmul.f32 %v5060_v6, %v3586_v50  ;;  %v9814_v33 = vld [vmem:[#allocation19_spill] sm:$0xff]  ;;  %v9815_v40 = vld [vmem:[#allocation65_spill] sm:$0xff] }
 0x61b   :  { %v2919_v45 = vsel %vm2814_vm2, %v8259_v59, 0.0  ;;  %v2975_v50 = vmul.f32 %v8227_v16, %v8227_v16 }
 0x61c   :  { %4621 = vst [vmem:[%s9423_s9 + $0x30] sm:$0xff] %v4541_v61  ;;  %v8267_v7 = vadd.f32 %v9811_v39, %v2225_v20  ;;  %v3588_v52 = vmul.f32 0.5, %v3587_v13  ;;  %v2639_v61 = vadd.f32 %v9815_v40, %v9814_v33  ;;  %v8297_v13 = vpop.xlane.xlu2 %2909  ;;  %v9817_v39 = vld [vmem:[#allocation61_spill] sm:$0xff] }
 0x61d   :  { %4622 = vst.msk [vmem:[%s9423_s9 + $0x38] sm:$0xff] %vm2814_vm2, %v4542_v9  ;;  %v3028_v9 = vmul.f32 %v8259_v59, %v8259_v59  ;;  %v3947_v59 = vld [vmem:[%s9422_s8 + $0x60] sm:$0xff] }
 0x61e   :  { %9812 = vst [vmem:[#allocation80_spill] sm:$0xff] %v8267_v7  ;;  %v2920_v37 = vadd.f32 %v2919_v45, %v8267_v7  ;;  %v8287_v46 = vadd.f32 %v7871_v2, %v2639_v61  ;;  %v3027_v47 = vmul.f32 %v8267_v7, %v8267_v7 }
 0x61f   :  { %4097 = vperm.xlu1 %4879, %v7869_v26   ;;  %v3589_v26 = vsub.f32 1.5, %v3588_v52  ;;  %v3159_v24 = vsel %vm2814_vm2, %v3028_v9, 0.0  ;;  %v9824_v9 = vld [vmem:[#allocation83_spill] sm:$0xff] }
 0x620   :  { %9816 = vst [vmem:[#allocation2_spill] sm:$0xff] %v8287_v46  ;;  %v3030_v20 = vmul.f32 %v8287_v46, %v8287_v46  ;;  %v3160_v45 = vadd.f32 %v3159_v24, %v3027_v47 }
 0x621   :  { %4087 = vperm.xlu0 %4878, %v8141_v30   ;;  %v3590_v14 = vmul.f32 %v5060_v6, %v3589_v26  ;;  %v3424_v30 = vld [vmem:[%s9421_s7 + $0x48] sm:$0xff] }
 0x622   :  { %v3163_v52 = vsel %vm2814_vm2, %v3030_v20, 0.0 }
 0x623   :  { %v3594_v5 = vsel %vm3593_vm15, %v5060_v6, %v3590_v14  ;;  %v3055_v6 = vsel %vm2814_vm2, %v2976_v62, 0.0  ;;  %v9818_v14 = vld [vmem:[#allocation4_spill] sm:$0xff] }
 0x624   :  { %v8273_v10 = vmul.f32 %v3594_v5, %v3424_v30  ;;  %v3056_v43 = vadd.f32 %v3055_v6, %v2975_v50  ;;  %v3029_v30 = vmul.f32 %v9818_v14, %v9818_v14  ;;  %v8314_v40 = vpop.permute.xlu2 %4367  ;;  %v4266_v6 = vmul.f32 %v4083_v34, %v9824_v9  ;;  %v9827_v9 = vld [vmem:[#allocation21_spill] sm:$0xff] }
 0x626   :  { %v3984_v23 = vmul.f32 %v8273_v10, %v9813_v42  ;;  %v3164_v5 = vadd.f32 %v3163_v52, %v3029_v30  ;;  %v9819_v42 = vld [vmem:[#allocation64_spill] sm:$0xff] }
 0x628   :  { %v4024_v31 = vsub.f32 %v3944_v60, %v3984_v23  ;;  %v9820_v23 = vsub.f32 %v7861_v8, %v9819_v42  ;;  %v9825_v8 = vld [vmem:[#allocation49_spill] sm:$0xff] }
 0x629   :  { %2921 = vadd.xlane.f32.xlu2 %v2920_v37  ;;  %v2642_v37 = vadd.f32 %v7873_v63, %v9817_v39  ;;  %v9823_v63 = vld [vmem:[#allocation82_spill] sm:$0xff] }
 0x62a   :  { %v3386_v60 = vmax.f32 %v9820_v23, 0.0  ;;  %v4265_v62 = vmul.f32 %v4083_v34, %v9823_v63  ;;  %v3943_v34 = vld [vmem:[%s9422_s8 + $0x40] sm:$0xff] }
 0x62c   :  { %v3466_v61 = vadd.f32 1e-05, %v3386_v60  ;;  %v9848_v60 = vld [vmem:[#allocation81_spill] sm:$0xff] }
 0x62d   :  { %v3037_v19 = vmul.f32 %v9848_v60, %v9848_v60 }
 0x62e   :  { %v8299_v2 = vpop.xlane.xlu1 %3153  ;;  %5061 = vrsqrt.f32 %v3466_v61  ;;  %vm3611_vm4 = vweird.f32 %v3466_v61 }
 0x634   :  { %v5062_v23 = vpop.eup %5061 }
 0x635   :  { %vm3612_vm3 = vweird.f32 %v5062_v23 }
 0x636   :  { %v2918_v24 = vpop.xlane.xlu1 %2917  ;;  %vm3613_vm5 = vmor %vm3611_vm4, %vm3612_vm3 }
 0x637   :  { %v8321_v39 = vmul.f32 0.0051020407, %v2918_v24 }
 0x639   :  { %v8335_v52 = vmul.f32 %v8321_v39, %v8321_v39 }
 0x641   :  { %4382 = vperm.xlu2 %4880, %v4024_v31   ;;  %v9821_v31 = vld [vmem:[#allocation46_spill] sm:$0xff] }
 0x642   :  { %v8304_v26 = vpop.xlane.xlu0 %3149  ;;  %v8312_v33 = vadd.f32 %v9821_v31, %v2642_v37  ;;  %v3606_v31 = vmul.f32 %v5062_v23, %v3466_v61 }
 0x644   :  { %9822 = vst [vmem:[#allocation11_spill] sm:$0xff] %v8312_v33  ;;  %v2927_v50 = vsel %vm2814_vm2, %v8312_v33, 0.0  ;;  %v3032_v63 = vmul.f32 %v8312_v33, %v8312_v33 }
 0x649   :  { %3057 = vadd.xlane.f32.xlu1 %v3056_v43 }
 0x64b   :  { %3161 = vadd.xlane.f32.xlu0 %v3160_v45  ;;  %v2928_v45 = vadd.f32 %v2927_v50, %v9825_v8  ;;  %v9828_v50 = vld [vmem:[#allocation34_spill] sm:$0xff] }
 0x651   :  { %3165 = vadd.xlane.f32.xlu1 %v3164_v5  ;;  %v9826_v5 = vld [vmem:[#allocation67_spill] sm:$0xff] }
 0x652   :  { %v4023_v42 = vsub.f32 %v3943_v34, %v9826_v5 }
 0x655   :  { %v4363_v43 = vpop.permute.xlu0 %4362 }
 0x656   :  { %v4545_v47 = vadd.f32 %v4363_v43, %v4265_v62  ;;  %v4546_v20 = vadd.f32 %v4363_v43, %v4266_v6  ;;  %v3607_v43 = vmul.f32 %v5062_v23, %v3606_v31 }
 0x658   :  { %4625 = vst [vmem:[%s9423_s9 + $0x50] sm:$0xff] %v4545_v47  ;;  %v4373_v47 = vpop.permute.xlu1 %4372 }
 0x659   :  { %4626 = vst.msk [vmem:[%s9423_s9 + $0x58] sm:$0xff] %vm2814_vm2, %v4546_v20  ;;  %2929 = vadd.xlane.f32.xlu1 %v2928_v45  ;;  %v3167_v20 = vsel %vm2814_vm2, %v3032_v63, 0.0  ;;  %v3945_v63 = vld [vmem:[%s9422_s8 + $0x50] sm:$0xff] }
 0x65b   :  { %v3158_v37 = vpop.xlane.xlu2 %3157 }
 0x65c   :  { %v8337_v30 = vmul.f32 0.0051020407, %v3158_v37  ;;  %v3031_v37 = vmul.f32 %v9825_v8, %v9825_v8 }
 0x65e   :  { %v3168_v5 = vadd.f32 %v3167_v20, %v3031_v37  ;;  %v2923_v20 = vsel %vm2814_vm2, %v8287_v46, 0.0  ;;  %v9830_v37 = vld [vmem:[#allocation73_spill] sm:$0xff] }
 0x65f   :  { %4377 = vperm.xlu0 %4878, %v4023_v42   ;;  %v3608_v42 = vmul.f32 0.5, %v3607_v43 }
 0x661   :  { %v3609_v31 = vsub.f32 1.5, %v3608_v42 }
 0x663   :  { %v4093_v62 = vpop.permute.xlu2 %4092 }
 0x664   :  { %v4269_v6 = vmul.f32 %v4093_v62, %v9827_v9  ;;  %v4270_v24 = vmul.f32 %v4093_v62, %v9828_v50  ;;  %v4025_v62 = vsub.f32 %v3945_v63, %v7964_v35  ;;  %v3610_v9 = vmul.f32 %v5062_v23, %v3609_v31  ;;  %v9833_v31 = vld [vmem:[#allocation31_spill] sm:$0xff] }
 0x665   :  { %v8370_v35 = vmul.f32 0.0051020407, %v8299_v2  ;;  %v9832_v2 = vsub.f32 %v7950_v49, %v7948_v29  ;;  %v2648_v63 = vadd.f32 %v7956_v48, %v9833_v31  ;;  %v9837_v49 = vld [vmem:[#allocation63_spill] sm:$0xff] }
 0x666   :  { %v4549_v45 = vadd.f32 %v4373_v47, %v4269_v6  ;;  %v4550_v34 = vadd.f32 %v4373_v47, %v4270_v24  ;;  %v3426_v6 = vld [vmem:[%s9421_s7 + $0x58] sm:$0xff]  ;;  %v3614_v50 = vsel %vm3613_vm5, %v5062_v23, %v3610_v9  ;;  %v9834_v9 = vld [vmem:[#allocation26_spill] sm:$0xff]  ;;  %v9838_v48 = vld [vmem:[#allocation75_spill] sm:$0xff] }
 0x667   :  { %v8363_v24 = vmul.f32 %v3614_v50, %v3426_v6  ;;  %v3388_v42 = vmax.f32 %v9832_v2, 0.0  ;;  %v9835_v50 = vld [vmem:[#allocation84_spill] sm:$0xff] }
 0x668   :  { %4629 = vst [vmem:[%s9423_s9 + $0x70] sm:$0xff] %v4549_v45  ;;  %v2924_v45 = vadd.f32 %v2923_v20, %v9818_v14  ;;  %v9840_v2 = vld [vmem:[#allocation52_spill] sm:$0xff]  ;;  %v9849_v14 = vld [vmem:[#allocation69_spill] sm:$0xff] }
 0x669   :  { %4630 = vst.msk [vmem:[%s9423_s9 + $0x78] sm:$0xff] %vm2814_vm2, %v4550_v34  ;;  %v9829_v34 = vld [vmem:[#allocation44_spill] sm:$0xff]  ;;  %v3468_v15 = vadd.f32 1e-05, %v3388_v42  ;;  %v3035_v42 = vmul.f32 %v9840_v2, %v9840_v2 }
 0x66a   :  { %3169 = vadd.xlane.f32.xlu2 %v3168_v5  ;;  %v9831_v5 = vsub.f32 %v9829_v34, %v9830_v37  ;;  %v8394_v34 = vadd.f32 %v7981_v12, %v2648_v63  ;;  %v2645_v12 = vadd.f32 %v9838_v48, %v9837_v49  ;;  %v9839_v37 = vld [vmem:[#allocation41_spill] sm:$0xff] }
 0x66b   :  { %vm3631_vm10 = vweird.f32 %v3468_v15 }
 0x66c   :  { %9836 = vst [vmem:[#allocation51_spill] sm:$0xff] %v8394_v34  ;;  %v3036_v29 = vmul.f32 %v8394_v34, %v8394_v34 }
 0x672   :  { %4387 = vperm.xlu1 %4879, %v4025_v62  }
 0x67a   :  { %4112 = vperm.xlu1 %4879, %v8363_v24  }
 0x680   :  { %v2914_v43 = vpop.xlane.xlu0 %2913 }
 0x681   :  { %v8366_v47 = vmul.f32 0.0051020407, %v2914_v43 }
 0x682   :  { %4107 = vperm.xlu2 %4880, %v7958_v41   ;;  %v3387_v41 = vmax.f32 %v9831_v5, 0.0  ;;  %v2651_v5 = vadd.f32 %v7983_v57, %v9839_v37 }
 0x683   :  { %v8374_v61 = vmul.f32 %v8366_v47, %v8366_v47 }
 0x684   :  { %v3467_v23 = vadd.f32 1e-05, %v3387_v41  ;;  %v3175_v41 = vsel %vm2814_vm2, %v3036_v29, 0.0 }
 0x686   :  { %5063 = vrsqrt.f32 %v3467_v23  ;;  %vm3621_vm7 = vweird.f32 %v3467_v23 }
 0x687   :  { %5065 = vrsqrt.f32 %v3468_v15 }
 0x689   :  { %2925 = vadd.xlane.f32.xlu0 %v2924_v45 }
 0x693   :  { %v4088_v62 = vpop.permute.xlu0 %4087 }
 0x694   :  { %v4267_v6 = vmul.f32 %v4088_v62, %v9834_v9  ;;  %v4268_v43 = vmul.f32 %v4088_v62, %v9835_v50  ;;  %v8414_v62 = vadd.f32 %v7954_v27, %v2645_v12  ;;  %v3176_v9 = vadd.f32 %v3175_v41, %v3035_v42  ;;  %v9847_v12 = vld [vmem:[#allocation78_spill] sm:$0xff] }
 0x696   :  { %v4547_v20 = vadd.f32 %v8314_v40, %v4267_v6  ;;  %v4548_v45 = vadd.f32 %v8314_v40, %v4268_v43  ;;  %v5064_v40 = vpop.eup %5063  ;;  %9841 = vst [vmem:[#allocation22_spill] sm:$0xff] %v8414_v62  ;;  %v9842_v6 = vld [vmem:[#allocation66_spill] sm:$0xff]  ;;  %v2931_v29 = vsel %vm2814_vm2, %v8414_v62, 0.0 }
 0x697   :  { %v5066_v31 = vpop.eup %5065  ;;  %v3616_v63 = vmul.f32 %v5064_v40, %v3467_v23  ;;  %v2932_v41 = vadd.f32 %v2931_v29, %v9847_v12  ;;  %vm3622_vm6 = vweird.f32 %v5064_v40 }
 0x698   :  { %4627 = vst [vmem:[%s9423_s9 + $0x60] sm:$0xff] %v4547_v20  ;;  %v9845_v20 = vld [vmem:[#allocation90_spill] sm:$0xff]  ;;  %v3626_v49 = vmul.f32 %v5066_v31, %v3468_v15  ;;  %vm3632_vm8 = vweird.f32 %v5066_v31  ;;  %vm3623_vm9 = vmor %vm3621_vm7, %vm3622_vm6 }
 0x699   :  { %4628 = vst.msk [vmem:[%s9423_s9 + $0x68] sm:$0xff] %vm2814_vm2, %v4548_v45  ;;  %v8420_v45 = vadd.f32 %v9845_v20, %v2651_v5  ;;  %v3617_v57 = vmul.f32 %v5064_v40, %v3616_v63  ;;  %vm3633_vm11 = vmor %vm3631_vm10, %vm3632_vm8 }
 0x69a   :  { %v3627_v27 = vmul.f32 %v5066_v31, %v3626_v49 }
 0x69b   :  { %9846 = vst [vmem:[#allocation27_spill] sm:$0xff] %v8420_v45  ;;  %v2939_v37 = vsel %vm2814_vm2, %v8420_v45, 0.0  ;;  %v3618_v42 = vmul.f32 0.5, %v3617_v57  ;;  %v3427_v57 = vld [vmem:[%s9421_s7 + $0x60] sm:$0xff] }
 0x69c   :  { %v3628_v5 = vmul.f32 0.5, %v3627_v27  ;;  %v2922_v27 = vpop.xlane.xlu2 %2921 }
 0x69d   :  { %4102 = vperm.xlu0 %4878, %v8273_v10   ;;  %v9843_v10 = vld [vmem:[#allocation85_spill] sm:$0xff] }
 0x69e   :  { %v9844_v50 = vsub.f32 %v9842_v6, %v9843_v10  ;;  %v2940_v6 = vadd.f32 %v2939_v37, %v9848_v60  ;;  %v2818_v10 = vpop.xlane.xlu1 %2817  ;;  %v3629_v63 = vsub.f32 1.5, %v3628_v5  ;;  %v8436_v5 = vmul.f32 0.0051020407, %v2922_v27 }
 0x6a0   :  { %v3389_v43 = vmax.f32 %v9844_v50, 0.0 }
 0x6a2   :  { %v3469_v48 = vadd.f32 1e-05, %v3389_v43  ;;  %v3630_v43 = vmul.f32 %v5066_v31, %v3629_v63 }
 0x6a4   :  { %3177 = vadd.xlane.f32.xlu1 %v3176_v9  ;;  %5067 = vrsqrt.f32 %v3469_v48  ;;  %v3619_v9 = vsub.f32 1.5, %v3618_v42  ;;  %v3634_v42 = vsel %vm3633_vm11, %v5066_v31, %v3630_v43  ;;  %v3034_v31 = vmul.f32 %v8414_v62, %v8414_v62 }
 0x6a5   :  { %vm3641_vm1 = vweird.f32 %v3469_v48 }
 0x6a6   :  { %v3620_v20 = vmul.f32 %v5064_v40, %v3619_v9  ;;  %v4098_v49 = vpop.permute.xlu1 %4097  ;;  %v3171_v62 = vsel %vm2814_vm2, %v3034_v31, 0.0 }
 0x6a8   :  { %v3624_v29 = vsel %vm3623_vm9, %v5064_v40, %v3620_v20 }
 0x6a9   :  { %v8434_v23 = vmul.f32 %v3624_v29, %v3427_v57  ;;  %v9850_v29 = vld [vmem:[#allocation68_spill] sm:$0xff] }
 0x6aa   :  { %v5068_v50 = vpop.eup %5067 }
 0x6ab   :  { %2933 = vadd.xlane.f32.xlu2 %v2932_v41  ;;  %v3636_v11 = vmul.f32 %v5068_v50, %v3469_v48  ;;  %v3428_v41 = vld [vmem:[%s9421_s7 + $0x68] sm:$0xff]  ;;  %v3987_v15 = vmul.f32 %v8434_v23, %v9849_v14  ;;  %vm3642_vm0 = vweird.f32 %v5068_v50 }
 0x6ac   :  { %2941 = vadd.xlane.f32.xlu1 %v2940_v6  ;;  %v3215_v6 = vmul.f32 0.0051020407, %v2818_v10  ;;  %v8438_v9 = vmul.f32 %v3634_v42, %v3428_v41  ;;  %v8449_v10 = vmul.f32 %v8436_v5, %v8436_v5  ;;  %vm3643_vm12 = vmor %vm3641_vm1, %vm3642_vm0 }
 0x6ad   :  { %v3637_v37 = vmul.f32 %v5068_v50, %v3636_v11  ;;  %v4027_v42 = vsub.f32 %v3947_v59, %v3987_v15  ;;  %v3429_v59 = vld [vmem:[%s9421_s7 + $0x70] sm:$0xff] }
 0x6ae   :  { %v3295_v40 = vmul.f32 %v3215_v6, %v3215_v6  ;;  %v3988_v14 = vmul.f32 %v8438_v9, %v9850_v29 }
 0x6af   :  { %v3638_v63 = vmul.f32 0.5, %v3637_v37 }
 0x6b1   :  { %v3639_v37 = vsub.f32 1.5, %v3638_v63 }
 0x6bc   :  { %v3058_v46 = vpop.xlane.xlu1 %3057 }
 0x6bd   :  { %v3255_v11 = vmul.f32 0.0051020407, %v3058_v46  ;;  %v3948_v46 = vld [vmem:[%s9422_s8 + $0x68] sm:$0xff] }
 0x6be   :  { %v3162_v20 = vpop.xlane.xlu0 %3161 }
 0x6bf   :  { %v3335_v43 = vsub.f32 %v3255_v11, %v3295_v40  ;;  %v8451_v57 = vmul.f32 0.0051020407, %v3162_v20  ;;  %v4028_v40 = vsub.f32 %v3948_v46, %v3988_v14  ;;  %v3033_v11 = vmul.f32 %v9847_v12, %v9847_v12  ;;  %v9851_v46 = vld [vmem:[#allocation3_spill] sm:$0xff] }
 0x6c0   :  { %v3640_v20 = vmul.f32 %v5068_v50, %v3639_v37 }
 0x6c1   :  { %v3375_v27 = vmax.f32 %v3335_v43, 0.0  ;;  %v3172_v63 = vadd.f32 %v3171_v62, %v3033_v11  ;;  %v9852_v62 = vld [vmem:[#allocation29_spill] sm:$0xff] }
 0x6c2   :  { %v3644_v15 = vsel %vm3643_vm12, %v5068_v50, %v3640_v20  ;;  %v4272_v48 = vmul.f32 %v4098_v49, %v9852_v62  ;;  %v3415_v50 = vld [vmem:[%s9421_s7] sm:$0xff] }
 0x6c3   :  { %v3455_v7 = vadd.f32 1e-05, %v3375_v27  ;;  %4397 = vperm.xlu2 %4880, %v4027_v42   ;;  %v8466_v43 = vmul.f32 %v3644_v15, %v3429_v59  ;;  %v4271_v27 = vmul.f32 %v4098_v49, %v9851_v46  ;;  %v9853_v59 = vld [vmem:[#allocation25_spill] sm:$0xff]  ;;  %v8481_v49 = vpop.permute.xlu2 %4382 }
 0x6c4   :  { %v8468_v14 = vpop.xlane.xlu1 %3165  ;;  %v3986_v15 = vmul.f32 %v8363_v24, %v9853_v59 }
 0x6c5   :  { %5069 = vrsqrt.f32 %v3455_v7  ;;  %4402 = vperm.xlu1 %4879, %v4028_v40   ;;  %vm3501_vm14 = vweird.f32 %v3455_v7 }
 0x6c7   :  { %3173 = vadd.xlane.f32.xlu0 %v3172_v63 }
 0x6cb   :  { %v5070_v31 = vpop.eup %5069 }
 0x6cc   :  { %v3496_v29 = vmul.f32 %v5070_v31, %v3455_v7  ;;  %vm3502_vm13 = vweird.f32 %v5070_v31  ;;  %v3946_v7 = vld [vmem:[%s9422_s8 + $0x58] sm:$0xff] }
 0x6cd   :  { %4127 = vperm.xlu1 %4879, %v8466_v43   ;;  %vm3503_vm15 = vmor %vm3501_vm14, %vm3502_vm13 }
 0x6ce   :  { %v3497_v37 = vmul.f32 %v5070_v31, %v3496_v29 }
 0x6d0   :  { %v3498_v42 = vmul.f32 0.5, %v3497_v37  ;;  %v2930_v37 = vpop.xlane.xlu1 %2929 }
 0x6d1   :  { %v4378_v40 = vpop.permute.xlu0 %4377  ;;  %v8495_v24 = vmul.f32 0.0051020407, %v2930_v37 }
 0x6d2   :  { %v3499_v11 = vsub.f32 1.5, %v3498_v42  ;;  %v4551_v63 = vadd.f32 %v4378_v40, %v4271_v27  ;;  %v4552_v41 = vadd.f32 %v4378_v40, %v4272_v48  ;;  %v4026_v27 = vsub.f32 %v3946_v7, %v3986_v15  ;;  %v9857_v15 = vld [vmem:[#allocation5_spill] sm:$0xff] }
 0x6d3   :  { %v8499_v42 = vmul.f32 %v8495_v24, %v8495_v24  ;;  %v3038_v40 = vmul.f32 %v8420_v45, %v8420_v45 }
 0x6d4   :  { %4631 = vst [vmem:[%s9423_s9 + $0x80] sm:$0xff] %v4551_v63  ;;  %v3500_v20 = vmul.f32 %v5070_v31, %v3499_v11 }
 0x6d5   :  { %4632 = vst.msk [vmem:[%s9423_s9 + $0x88] sm:$0xff] %vm2814_vm2, %v4552_v41 }
 0x6d6   :  { %v3504_v29 = vsel %vm3503_vm15, %v5070_v31, %v3500_v20  ;;  %v9856_v20 = vld [vmem:[#allocation93_spill] sm:$0xff] }
 0x6d7   :  { %v8490_v46 = vmul.f32 %v3504_v29, %v3415_v50  ;;  %v9855_v50 = vld [vmem:[#allocation86_spill] sm:$0xff]  ;;  %v9858_v29 = vld [vmem:[#allocation33_spill] sm:$0xff] }
 0x6d8   :  { %v2657_v59 = vadd.f32 %v9856_v20, %v9855_v50  ;;  %v9863_v20 = vld [vmem:[#allocation96_spill] sm:$0xff] }
 0x6d9   :  { %v8493_v62 = vmul.f32 %v8490_v46, %v3215_v6  ;;  %v9854_v6 = vsub.f32 %v8017_v53, %v8015_v22 }
 0x6da   :  { %v8518_v3 = vadd.f32 %v9859_v54, %v2657_v59  ;;  %v9864_v59 = vsub.f32 %v8031_v38, %v9863_v20 }
 0x6db   :  { %4392 = vperm.xlu0 %4878, %v4026_v27   ;;  %v3391_v63 = vmax.f32 %v9854_v6, 0.0 }
 0x6dc   :  { %v3042_v53 = vmul.f32 %v8518_v3, %v8518_v3 }
 0x6dd   :  { %v3170_v48 = vpop.xlane.xlu2 %3169  ;;  %v3471_v25 = vadd.f32 1e-05, %v3391_v63  ;;  %v9862_v63 = vld [vmem:[#allocation56_spill] sm:$0xff] }
 0x6de   :  { %v8501_v41 = vmul.f32 0.0051020407, %v3170_v48  ;;  %v3179_v48 = vsel %vm2814_vm2, %v3038_v40, 0.0  ;;  %v9860_v40 = vld [vmem:[#allocation92_spill] sm:$0xff]  ;;  %v3187_v54 = vsel %vm2814_vm2, %v3042_v53, 0.0  ;;  %v3041_v50 = vmul.f32 %v9862_v63, %v9862_v63  ;;  %v9866_v53 = vld [vmem:[#allocation18_spill] sm:$0xff] }
 0x6df   :  { %v3180_v22 = vadd.f32 %v3179_v48, %v3037_v19  ;;  %5071 = vrsqrt.f32 %v3471_v25  ;;  %vm3661_vm4 = vweird.f32 %v3471_v25 }
 0x6e0   :  { %v3188_v19 = vadd.f32 %v3187_v54, %v3041_v50  ;;  %v3282_v54 = vmul.f32 0.0051020407, %v8468_v14 }
 0x6e4   :  { %v4388_v27 = vpop.permute.xlu1 %4387 }
 0x6e5   :  { %v4108_v11 = vpop.permute.xlu2 %4107 }
 0x6e6   :  { %v4275_v7 = vmul.f32 %v4108_v11, %v9857_v15  ;;  %v4276_v37 = vmul.f32 %v4108_v11, %v9858_v29  ;;  %v9861_v11 = vld [vmem:[#allocation98_spill] sm:$0xff]  ;;  %v3392_v15 = vmax.f32 %v9864_v59, 0.0 }
 0x6e7   :  { %v2660_v6 = vadd.f32 %v9861_v11, %v9860_v40 }
 0x6e8   :  { %v4555_v12 = vadd.f32 %v4388_v27, %v4275_v7  ;;  %v4556_v31 = vadd.f32 %v4388_v27, %v4276_v37  ;;  %v3472_v29 = vadd.f32 1e-05, %v3392_v15 }
 0x6ea   :  { %4635 = vst [vmem:[%s9423_s9 + $0xa0] sm:$0xff] %v4555_v12  ;;  %v5072_v12 = vpop.eup %5071  ;;  %5073 = vrsqrt.f32 %v3472_v29  ;;  %vm3671_vm10 = vweird.f32 %v3472_v29 }
 0x6eb   :  { %4636 = vst.msk [vmem:[%s9423_s9 + $0xa8] sm:$0xff] %vm2814_vm2, %v4556_v31  ;;  %v8538_v31 = vadd.f32 %v8065_v17, %v2660_v6  ;;  %v3656_v7 = vmul.f32 %v5072_v12, %v3471_v25  ;;  %v2935_v17 = vsel %vm2814_vm2, %v8394_v34, 0.0  ;;  %vm3662_vm3 = vweird.f32 %v5072_v12 }
 0x6ec   :  { %3181 = vadd.xlane.f32.xlu2 %v3180_v22  ;;  %v2936_v20 = vadd.f32 %v2935_v17, %v9840_v2  ;;  %vm3663_vm5 = vmor %vm3661_vm4, %vm3662_vm3  ;;  %v9869_v2 = vld [vmem:[#allocation91_spill] sm:$0xff] }
 0x6ed   :  { %9865 = vst [vmem:[#allocation47_spill] sm:$0xff] %v8538_v31  ;;  %v2951_v37 = vsel %vm2814_vm2, %v8538_v31, 0.0  ;;  %v3657_v27 = vmul.f32 %v5072_v12, %v3656_v7 }
 0x6ee   :  { %v2952_v40 = vadd.f32 %v2951_v37, %v9866_v53 }
 0x6ef   :  { %v3658_v11 = vmul.f32 0.5, %v3657_v27  ;;  %v3431_v27 = vld [vmem:[%s9421_s7 + $0x80] sm:$0xff] }
 0x6f0   :  { %v5074_v59 = vpop.eup %5073 }
 0x6f1   :  { %v3659_v50 = vsub.f32 1.5, %v3658_v11  ;;  %v3666_v37 = vmul.f32 %v5074_v59, %v3472_v29  ;;  %vm3672_vm8 = vweird.f32 %v5074_v59 }
 0x6f2   :  { %vm3673_vm11 = vmor %vm3671_vm10, %vm3672_vm8 }
 0x6f3   :  { %v3660_v7 = vmul.f32 %v5072_v12, %v3659_v50  ;;  %v3667_v14 = vmul.f32 %v5074_v59, %v3666_v37 }
 0x6f7   :  { %3189 = vadd.xlane.f32.xlu1 %v3188_v19 }
 0x6fc   :  { %v2926_v48 = vpop.xlane.xlu0 %2925 }
 0x6fd   :  { %v3242_v22 = vmul.f32 0.0051020407, %v2926_v48  ;;  %v3664_v48 = vsel %vm3663_vm5, %v5072_v12, %v3660_v7  ;;  %v9870_v12 = vld [vmem:[#allocation88_spill] sm:$0xff]  ;;  %v9871_v7 = vld [vmem:[#allocation89_spill] sm:$0xff] }
 0x6fe   :  { %v9872_v60 = vsub.f32 %v9870_v12, %v9871_v7 }
 0x6ff   :  { %v3322_v38 = vmul.f32 %v3242_v22, %v3242_v22  ;;  %2953 = vadd.xlane.f32.xlu1 %v2952_v40 }
 0x701   :  { %v3362_v6 = vsub.f32 %v3282_v54, %v3322_v38  ;;  %v8551_v54 = vmul.f32 %v3664_v48, %v3431_v27  ;;  %v3668_v38 = vmul.f32 0.5, %v3667_v14  ;;  %v3390_v27 = vmax.f32 %v9872_v60, 0.0  ;;  %v3951_v14 = vld [vmem:[%s9422_s8 + $0x80] sm:$0xff]  ;;  %v3442_v60 = vld [vmem:[%s9421_s7 + $0xd8] sm:$0xff] }
 0x703   :  { %v3402_v19 = vmax.f32 %v3362_v6, 0.0  ;;  %v9867_v6 = vld [vmem:[#allocation24_spill] sm:$0xff]  ;;  %v3991_v45 = vmul.f32 %v8551_v54, %v9869_v2  ;;  %v3669_v48 = vsub.f32 1.5, %v3668_v38  ;;  %v3470_v38 = vadd.f32 1e-05, %v3390_v27 }
 0x704   :  { %4122 = vperm.xlu2 %4880, %v8438_v9  }
 0x705   :  { %v3482_v15 = vadd.f32 1e-05, %v3402_v19  ;;  %2937 = vadd.xlane.f32.xlu0 %v2936_v20  ;;  %v9868_v19 = vld [vmem:[#allocation39_spill] sm:$0xff]  ;;  %vm3651_vm1 = vweird.f32 %v3470_v38 }
 0x707   :  { %5075 = vrsqrt.f32 %v3482_v15  ;;  %vm3771_vm7 = vweird.f32 %v3482_v15 }
 0x708   :  { %5077 = vrsqrt.f32 %v3470_v38 }
 0x70d   :  { %v5076_v40 = vpop.eup %5075 }
 0x70e   :  { %v3766_v11 = vmul.f32 %v5076_v40, %v3482_v15  ;;  %vm3772_vm6 = vweird.f32 %v5076_v40 }
 0x70f   :  { %v4103_v9 = vpop.permute.xlu0 %4102  ;;  %vm3773_vm9 = vmor %vm3771_vm7, %vm3772_vm6 }
 0x710   :  { %v3767_v17 = vmul.f32 %v5076_v40, %v3766_v11  ;;  %v4273_v50 = vmul.f32 %v4103_v9, %v9867_v6  ;;  %v4274_v20 = vmul.f32 %v4103_v9, %v9868_v19  ;;  %v3670_v9 = vmul.f32 %v5074_v59, %v3669_v48  ;;  %v3432_v6 = vld [vmem:[%s9421_s7 + $0x88] sm:$0xff]  ;;  %v3430_v48 = vld [vmem:[%s9421_s7 + $0x78] sm:$0xff] }
 0x712   :  { %v3768_v34 = vmul.f32 0.5, %v3767_v17  ;;  %v4553_v25 = vadd.f32 %v8481_v49, %v4273_v50  ;;  %v4554_v37 = vadd.f32 %v8481_v49, %v4274_v20  ;;  %v4031_v49 = vsub.f32 %v3951_v14, %v3991_v45  ;;  %v9873_v20 = vld [vmem:[#allocation94_spill] sm:$0xff] }
 0x713   :  { %v3674_v50 = vsel %vm3673_vm11, %v5074_v59, %v3670_v9  ;;  %v9878_v9 = vld [vmem:[#allocation105_spill] sm:$0xff] }
 0x714   :  { %v3769_v11 = vsub.f32 1.5, %v3768_v34  ;;  %4633 = vst [vmem:[%s9423_s9 + $0x90] sm:$0xff] %v4553_v25  ;;  %v8584_v15 = vmul.f32 %v3674_v50, %v3432_v6  ;;  %v9874_v25 = vld [vmem:[#allocation55_spill] sm:$0xff]  ;;  %v3040_v50 = vmul.f32 %v9873_v20, %v9873_v20 }
 0x715   :  { %4634 = vst.msk [vmem:[%s9423_s9 + $0x98] sm:$0xff] %vm2814_vm2, %v4554_v37 }
 0x716   :  { %v3770_v2 = vmul.f32 %v5076_v40, %v3769_v11  ;;  %v9875_v11 = vld [vmem:[#allocation104_spill] sm:$0xff] }
 0x718   :  { %v3774_v34 = vsel %vm3773_vm9, %v5076_v40, %v3770_v2  ;;  %4417 = vperm.xlu1 %4879, %v4031_v49   ;;  %v5078_v40 = vpop.eup %5077  ;;  %v9877_v49 = vld [vmem:[#allocation102_spill] sm:$0xff] }
 0x719   :  { %v8575_v17 = vmul.f32 %v3774_v34, %v3442_v60  ;;  %4117 = vperm.xlu0 %4878, %v8434_v23   ;;  %v3646_v29 = vmul.f32 %v5078_v40, %v3470_v38  ;;  %v2943_v23 = vsel %vm2814_vm2, %v9873_v20, 0.0  ;;  %vm3652_vm0 = vweird.f32 %v5078_v40 }
 0x71a   :  { %v2944_v37 = vadd.f32 %v2943_v23, %v9874_v25  ;;  %vm3653_vm12 = vmor %vm3651_vm1, %vm3652_vm0  ;;  %v9876_v60 = vsub.f32 %v8079_v18, %v9875_v11  ;;  %v2666_v34 = vadd.f32 %v9878_v9, %v9877_v49  ;;  %v9879_v23 = vld [vmem:[#allocation108_spill] sm:$0xff]  ;;  %v9881_v9 = vld [vmem:[#allocation107_spill] sm:$0xff] }
 0x71b   :  { %v8582_v45 = vmul.f32 %v8575_v17, %v3242_v22  ;;  %v3647_v19 = vmul.f32 %v5078_v40, %v3646_v29 }
 0x71c   :  { %v3394_v2 = vmax.f32 %v9876_v60, 0.0  ;;  %v3275_v60 = vmul.f32 0.0051020407, %v8174_v4  ;;  %v9884_v4 = vld [vmem:[#allocation70_spill] sm:$0xff] }
 0x71d   :  { %v3648_v12 = vmul.f32 0.5, %v3647_v19 }
 0x71e   :  { %v2934_v59 = vpop.xlane.xlu2 %2933 }
 0x71f   :  { %v3649_v7 = vsub.f32 1.5, %v3648_v12  ;;  %v8590_v22 = vmul.f32 0.0051020407, %v2934_v59  ;;  %v3183_v12 = vsel %vm2814_vm2, %v3040_v50, 0.0  ;;  %v8619_v59 = vmul.f32 0.0051020407, %v8172_v28 }
 0x720   :  { %4142 = vperm.xlu1 %4879, %v8584_v15  }
 0x721   :  { %v3650_v27 = vmul.f32 %v5078_v40, %v3649_v7  ;;  %v8606_v29 = vmul.f32 %v8590_v22, %v8590_v22  ;;  %v9880_v7 = vld [vmem:[#allocation87_spill] sm:$0xff]  ;;  %v3315_v49 = vmul.f32 %v8619_v59, %v8619_v59 }
 0x723   :  { %v3654_v14 = vsel %vm3653_vm12, %v5078_v40, %v3650_v27  ;;  %v3474_v40 = vadd.f32 1e-05, %v3394_v2  ;;  %v3355_v50 = vsub.f32 %v3275_v60, %v3315_v49 }
 0x724   :  { %v8602_v38 = vmul.f32 %v3654_v14, %v3430_v48  ;;  %v3039_v48 = vmul.f32 %v9874_v25, %v9874_v25  ;;  %v3950_v14 = vld [vmem:[%s9422_s8 + $0x78] sm:$0xff]  ;;  %v4113_v25 = vpop.permute.xlu1 %4112 }
 0x725   :  { %5079 = vrsqrt.f32 %v3474_v40  ;;  %vm3691_vm14 = vweird.f32 %v3474_v40 }
 0x726   :  { %v3990_v27 = vmul.f32 %v8602_v38, %v9880_v7  ;;  %v3184_v2 = vadd.f32 %v3183_v12, %v3039_v48  ;;  %v9883_v7 = vld [vmem:[#allocation59_spill] sm:$0xff]  ;;  %v3395_v48 = vmax.f32 %v3355_v50, 0.0 }
 0x727   :  { %v3047_v18 = vmul.f32 %v9883_v7, %v9883_v7 }
 0x728   :  { %v4030_v28 = vsub.f32 %v3950_v14, %v3990_v27  ;;  %v9885_v27 = vld [vmem:[#allocation28_spill] sm:$0xff]  ;;  %v3475_v60 = vadd.f32 1e-05, %v3395_v48 }
 0x729   :  { %v4277_v14 = vmul.f32 %v4113_v25, %v9885_v27  ;;  %v8656_v27 = vpop.permute.xlu2 %4397 }
 0x72a   :  { %5081 = vrsqrt.f32 %v3475_v60  ;;  %vm3701_vm4 = vweird.f32 %v3475_v60 }
 0x72b   :  { %v5080_v20 = vpop.eup %5079 }
 0x72c   :  { %v3686_v8 = vmul.f32 %v5080_v20, %v3474_v40  ;;  %v3178_v16 = vpop.xlane.xlu1 %3177  ;;  %vm3692_vm13 = vweird.f32 %v5080_v20  ;;  %v3043_v40 = vmul.f32 %v9866_v53, %v9866_v53 }
 0x72d   :  { %2945 = vadd.xlane.f32.xlu2 %v2944_v37  ;;  %v8611_v37 = vadd.f32 %v9879_v23, %v2666_v34  ;;  %v9882_v34 = vld [vmem:[#allocation109_spill] sm:$0xff]  ;;  %vm3693_vm15 = vmor %vm3691_vm14, %vm3692_vm13 }
 0x72f   :  { %v3048_v11 = vmul.f32 %v8611_v37, %v8611_v37 }
 0x730   :  { %v5082_v48 = vpop.eup %5081 }
 0x731   :  { %v3199_v23 = vsel %vm2814_vm2, %v3048_v11, 0.0  ;;  %vm3702_vm3 = vweird.f32 %v5082_v48 }
 0x732   :  { %v3200_v33 = vadd.f32 %v3199_v23, %v3047_v18  ;;  %v9887_v18 = vld [vmem:[#allocation20_spill] sm:$0xff]  ;;  %vm3703_vm5 = vmor %vm3701_vm4, %vm3702_vm3 }
 0x73a   :  { %v3174_v6 = vpop.xlane.xlu0 %3173 }
 0x73b   :  { %v8608_v19 = vmul.f32 0.0051020407, %v3174_v6  ;;  %v2669_v6 = vadd.f32 %v9882_v34, %v9881_v9 }
 0x73d   :  { %v8637_v12 = vadd.f32 %v9884_v4, %v2669_v6 }
 0x73f   :  { %v2963_v11 = vsel %vm2814_vm2, %v8637_v12, 0.0 }
 0x740   :  { %v2964_v6 = vadd.f32 %v2963_v11, %v9887_v18  ;;  %v3434_v11 = vld [vmem:[%s9421_s7 + $0x98] sm:$0xff] }
 0x743   :  { %3185 = vadd.xlane.f32.xlu0 %v3184_v2  ;;  %v9886_v2 = vld [vmem:[#allocation7_spill] sm:$0xff] }
 0x744   :  { %v4278_v9 = vmul.f32 %v4113_v25, %v9886_v2  ;;  %v3696_v2 = vmul.f32 %v5082_v48, %v3475_v60 }
 0x745   :  { %4412 = vperm.xlu2 %4880, %v4030_v28   ;;  %v3687_v28 = vmul.f32 %v5080_v20, %v3686_v8  ;;  %v3949_v8 = vld [vmem:[%s9422_s8 + $0x70] sm:$0xff] }
 0x747   :  { %v3688_v25 = vmul.f32 0.5, %v3687_v28 }
 0x749   :  { %v3689_v4 = vsub.f32 1.5, %v3688_v25  ;;  %v9889_v25 = vld [vmem:[#allocation103_spill] sm:$0xff] }
 0x74a   :  { %3201 = vadd.xlane.f32.xlu1 %v3200_v33  ;;  %v9888_v33 = vld [vmem:[#allocation30_spill] sm:$0xff] }
 0x74b   :  { %v3989_v50 = vmul.f32 %v8466_v43, %v9888_v33  ;;  %v3690_v43 = vmul.f32 %v5080_v20, %v3689_v4  ;;  %v3954_v4 = vld [vmem:[%s9422_s8 + $0x98] sm:$0xff] }
 0x74d   :  { %v4393_v49 = vpop.permute.xlu0 %4392  ;;  %v4029_v23 = vsub.f32 %v3949_v8, %v3989_v50  ;;  %v3044_v8 = vmul.f32 %v8538_v31, %v8538_v31 }
 0x74e   :  { %v4557_v34 = vadd.f32 %v4393_v49, %v4277_v14  ;;  %v4558_v36 = vadd.f32 %v4393_v49, %v4278_v9  ;;  %v2942_v14 = vpop.xlane.xlu1 %2941  ;;  %v3697_v49 = vmul.f32 %v5082_v48, %v3696_v2 }
 0x74f   :  { %v8658_v9 = vmul.f32 0.0051020407, %v2942_v14 }
 0x750   :  { %4637 = vst [vmem:[%s9423_s9 + $0xb0] sm:$0xff] %v4557_v34  ;;  %v3698_v50 = vmul.f32 0.5, %v3697_v49 }
 0x751   :  { %4638 = vst.msk [vmem:[%s9423_s9 + $0xb8] sm:$0xff] %vm2814_vm2, %v4558_v36  ;;  %v3694_v36 = vsel %vm3693_vm15, %v5080_v20, %v3690_v43  ;;  %v8665_v34 = vmul.f32 %v8658_v9, %v8658_v9  ;;  %v9890_v43 = vld [vmem:[#allocation42_spill] sm:$0xff] }
 0x752   :  { %2965 = vadd.xlane.f32.xlu1 %v2964_v6  ;;  %v8669_v33 = vmul.f32 %v3694_v36, %v3434_v11  ;;  %v9891_v36 = vld [vmem:[#allocation37_spill] sm:$0xff] }
 0x754   :  { %v3994_v20 = vmul.f32 %v8669_v33, %v9889_v25  ;;  %v3191_v25 = vsel %vm2814_vm2, %v3044_v8, 0.0 }
 0x756   :  { %v4403_v49 = vpop.permute.xlu1 %4402 }
 0x757   :  { %4407 = vperm.xlu0 %4878, %v4029_v23   ;;  %v3699_v23 = vsub.f32 1.5, %v3698_v50 }
 0x759   :  { %v3700_v50 = vmul.f32 %v5082_v48, %v3699_v23 }
 0x75b   :  { %v3704_v8 = vsel %vm3703_vm5, %v5082_v48, %v3700_v50  ;;  %v9892_v48 = vsub.f32 %v8201_v21, %v8205_v56  ;;  %v9894_v21 = vld [vmem:[#allocation9_spill] sm:$0xff] }
 0x75f   :  { %v3182_v28 = vpop.xlane.xlu2 %3181 }
 0x760   :  { %v8667_v6 = vmul.f32 0.0051020407, %v3182_v28  ;;  %v4034_v28 = vsub.f32 %v3954_v4, %v3994_v20  ;;  %v3435_v20 = vld [vmem:[%s9421_s7 + $0xa0] sm:$0xff] }
 0x761   :  { %v8695_v23 = vmul.f32 %v3704_v8, %v3435_v20 }
 0x767   :  { %v4123_v14 = vpop.permute.xlu2 %4122 }
 0x768   :  { %v4281_v2 = vmul.f32 %v4123_v14, %v9890_v43  ;;  %v4282_v11 = vmul.f32 %v4123_v14, %v9891_v36  ;;  %v3192_v43 = vadd.f32 %v3191_v25, %v3043_v40  ;;  %v2947_v14 = vsel %vm2814_vm2, %v8518_v3, 0.0  ;;  %v2674_v25 = vpop.f32.mrf.mxu2 }
 0x76a   :  { %v4561_v0 = vadd.f32 %v4403_v49, %v4281_v2  ;;  %v4562_v31 = vadd.f32 %v4403_v49, %v4282_v11  ;;  %v3397_v49 = vmax.f32 %v9892_v48, 0.0 }
 0x76b   :  { %4432 = vperm.xlu1 %4879, %v4034_v28   ;;  %v2537_v28 = vpop.f32.mrf.mxu3 }
 0x76c   :  { %4641 = vst [vmem:[%s9423_s9 + $0xd0] sm:$0xff] %v4561_v0  ;;  %v3285_v0 = vmul.f32 0.0051020407, %v3178_v16  ;;  %v3477_v16 = vadd.f32 1e-05, %v3397_v49  ;;  %v2675_v8 = vadd.f32 %v2674_v25, %v2537_v28 }
 0x76d   :  { %4642 = vst.msk [vmem:[%s9423_s9 + $0xd8] sm:$0xff] %vm2814_vm2, %v4562_v31  ;;  %v2948_v31 = vadd.f32 %v2947_v14, %v9862_v63  ;;  %v9893_v14 = vld [vmem:[#allocation38_spill] sm:$0xff] }
 0x76e   :  { %3193 = vadd.xlane.f32.xlu2 %v3192_v43  ;;  %v8706_v43 = vmul.f32 0.0051020407, %v8297_v13  ;;  %vm3721_vm10 = vweird.f32 %v3477_v16 }
 0x773   :  { %4157 = vperm.xlu1 %4879, %v8695_v23  }
 0x778   :  { %v2938_v60 = vpop.xlane.xlu0 %2937 }
 0x779   :  { %v3245_v4 = vmul.f32 0.0051020407, %v2938_v60  ;;  %v3278_v60 = vmul.f32 0.0051020407, %v8304_v26 }
 0x77b   :  { %v3325_v40 = vmul.f32 %v3245_v4, %v3245_v4 }
 0x77d   :  { %v3365_v2 = vsub.f32 %v3285_v0, %v3325_v40 }
 0x77f   :  { %v3405_v36 = vmax.f32 %v3365_v2, 0.0 }
 0x781   :  { %v3485_v11 = vadd.f32 1e-05, %v3405_v36  ;;  %2949 = vadd.xlane.f32.xlu0 %v2948_v31  ;;  %v2811_v36 = vpop.f32.mrf.mxu0 }
 0x782   :  { %v8715_v28 = vadd.f32 %v2811_v36, %v2675_v8 }
 0x783   :  { %5083 = vrsqrt.f32 %v3485_v11  ;;  %vm3801_vm7 = vweird.f32 %v3485_v11 }
 0x784   :  { %5085 = vrsqrt.f32 %v3477_v16 }
 0x786   :  { %4137 = vperm.xlu2 %4880, %v8551_v54   ;;  %v3318_v54 = vmul.f32 %v8706_v43, %v8706_v43 }
 0x788   :  { %v3358_v49 = vsub.f32 %v3278_v60, %v3318_v54 }
 0x789   :  { %v5084_v50 = vpop.eup %5083 }
 0x78a   :  { %v3796_v20 = vmul.f32 %v5084_v50, %v3485_v11  ;;  %vm3802_vm6 = vweird.f32 %v5084_v50  ;;  %v5086_v25 = vpop.eup %5085  ;;  %v3398_v60 = vmax.f32 %v3358_v49, 0.0 }
 0x78b   :  { %v4118_v0 = vpop.permute.xlu0 %4117  ;;  %vm3803_vm8 = vmor %vm3801_vm7, %vm3802_vm6  ;;  %v3716_v54 = vmul.f32 %v5086_v25, %v3477_v16  ;;  %vm3722_vm9 = vweird.f32 %v5086_v25 }
 0x78c   :  { %v3797_v40 = vmul.f32 %v5084_v50, %v3796_v20  ;;  %v4279_v2 = vmul.f32 %v4118_v0, %v9893_v14  ;;  %v4280_v56 = vmul.f32 %v4118_v0, %v9894_v21  ;;  %v9895_v20 = vld [vmem:[#allocation100_spill] sm:$0xff]  ;;  %v9896_v0 = vld [vmem:[#allocation101_spill] sm:$0xff]  ;;  %v9898_v21 = vsub.f32 %v8337_v30, %v8335_v52  ;;  %vm3723_vm11 = vmor %vm3721_vm10, %vm3722_vm9 }
 0x78d   :  { %v3717_v30 = vmul.f32 %v5086_v25, %v3716_v54 }
 0x78e   :  { %v3798_v31 = vmul.f32 0.5, %v3797_v40  ;;  %v4559_v48 = vadd.f32 %v8656_v27, %v4279_v2  ;;  %v4560_v13 = vadd.f32 %v8656_v27, %v4280_v56  ;;  %v9897_v40 = vsub.f32 %v9895_v20, %v9896_v0  ;;  %v3445_v27 = vld [vmem:[%s9421_s7 + $0xf0] sm:$0xff]  ;;  %v9899_v20 = vld [vmem:[#allocation62_spill] sm:$0xff] }
 0x78f   :  { %v3054_v2 = vmul.f32 %v8715_v28, %v8715_v28  ;;  %v3400_v56 = vmax.f32 %v9898_v21, 0.0  ;;  %v3053_v52 = vmul.f32 %v9899_v20, %v9899_v20 }
 0x790   :  { %v3799_v26 = vsub.f32 1.5, %v3798_v31  ;;  %4639 = vst [vmem:[%s9423_s9 + $0xc0] sm:$0xff] %v4559_v48  ;;  %v3393_v14 = vmax.f32 %v9897_v40, 0.0 }
 0x791   :  { %4640 = vst.msk [vmem:[%s9423_s9 + $0xc8] sm:$0xff] %vm2814_vm2, %v4560_v13  ;;  %v8740_v13 = vadd.f32 1e-05, %v3398_v60  ;;  %v8745_v49 = vadd.f32 1e-05, %v3400_v56 }
 0x792   :  { %v3800_v8 = vmul.f32 %v5084_v50, %v3799_v26  ;;  %v8738_v48 = vadd.f32 1e-05, %v3393_v14  ;;  %v3211_v26 = vsel %vm2814_vm2, %v3054_v2, 0.0  ;;  %v9901_v2 = vsub.f32 %v8501_v41, %v8499_v42 }
 0x793   :  { %vm3731_vm15 = vweird.f32 %v8740_v13  ;;  %vm3751_vm4 = vweird.f32 %v8745_v49 }
 0x794   :  { %v3804_v36 = vsel %vm3803_vm8, %v5084_v50, %v3800_v8  ;;  %5087 = vrsqrt.f32 %v8738_v48  ;;  %v3718_v50 = vmul.f32 0.5, %v3717_v30  ;;  %v9900_v8 = vsub.f32 %v8451_v57, %v8449_v10  ;;  %v3437_v57 = vld [vmem:[%s9421_s7 + $0xb0] sm:$0xff] }
 0x795   :  { %v8735_v31 = vmul.f32 %v3804_v36, %v3445_v27  ;;  %4132 = vperm.xlu0 %4878, %v8602_v38   ;;  %5089 = vrsqrt.f32 %v8740_v13  ;;  %v3212_v38 = vadd.f32 %v3211_v26, %v3053_v52  ;;  %v3403_v21 = vmax.f32 %v9901_v2, 0.0 }
 0x796   :  { %5091 = vrsqrt.f32 %v8745_v49  ;;  %v3719_v40 = vsub.f32 1.5, %v3718_v50  ;;  %v3401_v60 = vmax.f32 %v9900_v8, 0.0  ;;  %vm3681_vm0 = vweird.f32 %v8738_v48 }
 0x797   :  { %v8743_v11 = vmul.f32 %v8735_v31, %v3245_v4  ;;  %v8774_v10 = vadd.f32 1e-05, %v3403_v21 }
 0x798   :  { %v3720_v56 = vmul.f32 %v5086_v25, %v3719_v40  ;;  %v8772_v52 = vadd.f32 1e-05, %v3401_v60  ;;  %v9903_v60 = vld [vmem:[#allocation58_spill] sm:$0xff] }
 0x799   :  { %vm3781_vm10 = vweird.f32 %v8774_v10 }
 0x79a   :  { %v8753_v0 = vpop.eup %5087  ;;  %v3724_v42 = vsel %vm3723_vm11, %v5086_v25, %v3720_v56  ;;  %5093 = vrsqrt.f32 %v8772_v52  ;;  %vm3761_vm8 = vweird.f32 %v8772_v52 }
 0x79b   :  { %v8755_v4 = vpop.eup %5089  ;;  %v3676_v27 = vmul.f32 %v8753_v0, %v8738_v48  ;;  %v8784_v16 = vmul.f32 %v3724_v42, %v3437_v57  ;;  %5095 = vrsqrt.f32 %v8774_v10  ;;  %vm3682_vm1 = vweird.f32 %v8753_v0 }
 0x79c   :  { %v8757_v14 = vpop.eup %5091  ;;  %v3726_v36 = vmul.f32 %v8755_v4, %v8740_v13  ;;  %vm3732_vm12 = vweird.f32 %v8755_v4  ;;  %vm8816_vm14 = vmor %vm3681_vm0, %vm3682_vm1  ;;  %v3433_v13 = vld [vmem:[%s9421_s7 + $0x90] sm:$0xff] }
 0x79d   :  { %3213 = vadd.xlane.f32.xlu1 %v3212_v38  ;;  %v3746_v54 = vmul.f32 %v8757_v14, %v8745_v49  ;;  %v3677_v26 = vmul.f32 %v8753_v0, %v3676_v27  ;;  %v9902_v38 = vld [vmem:[#allocation106_spill] sm:$0xff]  ;;  %v3997_v25 = vmul.f32 %v8784_v16, %v8197_v55  ;;  %v9904_v55 = vsub.f32 %v8608_v19, %v8606_v29  ;;  %vm8823_vm3 = vmor %vm3731_vm15, %vm3732_vm12 }
 0x79e   :  { %v3727_v41 = vmul.f32 %v8755_v4, %v3726_v36  ;;  %v2955_v50 = vsel %vm2814_vm2, %v9902_v38, 0.0  ;;  %vm3752_vm13 = vweird.f32 %v8757_v14 }
 0x79f   :  { %v3747_v30 = vmul.f32 %v8757_v14, %v3746_v54  ;;  %v3678_v40 = vmul.f32 0.5, %v3677_v26  ;;  %v2956_v2 = vadd.f32 %v2955_v50, %v9903_v60  ;;  %v3957_v54 = vld [vmem:[%s9422_s8 + $0xb0] sm:$0xff]  ;;  %vm8840_vm5 = vmor %vm3751_vm4, %vm3752_vm13 }
 0x7a0   :  { %v3728_v27 = vmul.f32 0.5, %v3727_v41  ;;  %v2946_v56 = vpop.xlane.xlu2 %2945  ;;  %v8790_v36 = vpop.eup %5093 }
 0x7a1   :  { %v3748_v8 = vmul.f32 0.5, %v3747_v30  ;;  %v3679_v21 = vsub.f32 1.5, %v3678_v40  ;;  %v8795_v42 = vpop.eup %5095  ;;  %v3404_v30 = vmax.f32 %v9904_v55, 0.0  ;;  %v8803_v50 = vmul.f32 0.0051020407, %v2946_v56 }
 0x7a2   :  { %v3729_v26 = vsub.f32 1.5, %v3728_v27  ;;  %v4037_v40 = vsub.f32 %v3957_v54, %v3997_v25  ;;  %v3756_v27 = vmul.f32 %v8790_v36, %v8772_v52  ;;  %v3776_v29 = vmul.f32 %v8795_v42, %v8774_v10  ;;  %v3441_v10 = vld [vmem:[%s9421_s7 + $0xd0] sm:$0xff] }
 0x7a3   :  { %v3749_v57 = vsub.f32 1.5, %v3748_v8  ;;  %v3680_v41 = vmul.f32 %v8753_v0, %v3679_v21  ;;  %v9905_v8 = vsub.f32 %v8667_v6, %v8665_v34  ;;  %v3046_v34 = vmul.f32 %v9902_v38, %v9902_v38 }
 0x7a4   :  { %v3730_v19 = vmul.f32 %v8755_v4, %v3729_v26  ;;  %v8828_v56 = vadd.f32 1e-05, %v3404_v30  ;;  %v3327_v54 = vmul.f32 %v8803_v50, %v8803_v50  ;;  %v3757_v49 = vmul.f32 %v8790_v36, %v3756_v27  ;;  %v3440_v27 = vld [vmem:[%s9421_s7 + $0xc8] sm:$0xff] }
 0x7a5   :  { %v3406_v48 = vmax.f32 %v9905_v8, 0.0  ;;  %v3777_v8 = vmul.f32 %v8795_v42, %v3776_v29  ;;  %vm3762_vm6 = vweird.f32 %v8790_v36  ;;  %vm3782_vm7 = vweird.f32 %v8795_v42 }
 0x7a6   :  { %5097 = vrsqrt.f32 %v8828_v56  ;;  %v3758_v29 = vmul.f32 0.5, %v3757_v49  ;;  %vm8895_vm9 = vmor %vm3761_vm8, %vm3762_vm6  ;;  %vm3791_vm15 = vweird.f32 %v8828_v56 }
 0x7a7   :  { %v8845_v30 = vadd.f32 1e-05, %v3406_v48  ;;  %v3195_v48 = vsel %vm2814_vm2, %v3046_v34, 0.0  ;;  %v9912_v34 = vld [vmem:[#allocation99_spill] sm:$0xff]  ;;  %vm8900_vm11 = vmor %vm3781_vm10, %vm3782_vm7 }
 0x7a9   :  { %5099 = vrsqrt.f32 %v8845_v30  ;;  %vm3811_vm4 = vweird.f32 %v8845_v30 }
 0x7ac   :  { %v8876_v49 = vpop.eup %5097 }
 0x7ad   :  { %vm3792_vm13 = vweird.f32 %v8876_v49 }
 0x7af   :  { %2957 = vadd.xlane.f32.xlu2 %v2956_v2  ;;  %v3750_v2 = vmul.f32 %v8757_v14, %v3749_v57  ;;  %v3684_v57 = vsel %vm8816_vm14, %v8753_v0, %v3680_v41  ;;  %v3438_v0 = vld [vmem:[%s9421_s7 + $0xb8] sm:$0xff]  ;;  %v3734_v41 = vsel %vm8823_vm3, %v8755_v4, %v3730_v19  ;;  %v3778_v19 = vmul.f32 0.5, %v3777_v8  ;;  %v3953_v8 = vld [vmem:[%s9422_s8 + $0x90] sm:$0xff]  ;;  %vm3793_vm3 = vmor %vm3791_vm15, %vm3792_vm13 }
 0x7b0   :  { %v8861_v21 = vmul.f32 %v3684_v57, %v3433_v13  ;;  %v3759_v57 = vsub.f32 1.5, %v3758_v29  ;;  %v4128_v29 = vpop.permute.xlu1 %4127 }
 0x7b2   :  { %v3993_v13 = vmul.f32 %v8861_v21, %v9912_v34 }
 0x7b6   :  { %v3186_v25 = vpop.xlane.xlu0 %3185  ;;  %4447 = vperm.xlu1 %4879, %v4037_v40   ;;  %v3754_v40 = vsel %vm8840_vm5, %v8757_v14, %v3750_v2  ;;  %v3045_v2 = vmul.f32 %v9903_v60, %v9903_v60 }
 0x7b7   :  { %v3287_v26 = vmul.f32 0.0051020407, %v3186_v25  ;;  %v8869_v4 = vmul.f32 %v3754_v40, %v3440_v27  ;;  %v3960_v40 = vld [vmem:[%s9422_s8 + $0xc8] sm:$0xff]  ;;  %v4033_v27 = vsub.f32 %v3953_v8, %v3993_v13 }
 0x7b9   :  { %v3367_v25 = vsub.f32 %v3287_v26, %v3327_v54  ;;  %v8867_v54 = vmul.f32 %v3734_v41, %v3438_v0  ;;  %v3196_v26 = vadd.f32 %v3195_v48, %v3045_v2  ;;  %v4000_v55 = vmul.f32 %v8869_v4, %v8321_v39  ;;  %v8884_v0 = vpop.eup %5099 }
 0x7ba   :  { %v3760_v48 = vmul.f32 %v8790_v36, %v3759_v57  ;;  %v3786_v2 = vmul.f32 %v8876_v49, %v8828_v56  ;;  %v9917_v57 = vld [vmem:[#allocation6_spill] sm:$0xff]  ;;  %vm3812_vm14 = vweird.f32 %v8884_v0 }
 0x7bb   :  { %v3407_v14 = vmax.f32 %v3367_v25, 0.0  ;;  %v3779_v25 = vsub.f32 1.5, %v3778_v19  ;;  %v4040_v41 = vsub.f32 %v3960_v40, %v4000_v55  ;;  %v3806_v19 = vmul.f32 %v8884_v0, %v8845_v30  ;;  %vm3813_vm5 = vmor %vm3811_vm4, %vm3812_vm14 }
 0x7bc   :  { %v4283_v55 = vmul.f32 %v4128_v29, %v9917_v57  ;;  %v9919_v57 = vld [vmem:[#allocation95_spill] sm:$0xff] }
 0x7bd   :  { %v3487_v6 = vadd.f32 1e-05, %v3407_v14  ;;  %v3780_v14 = vmul.f32 %v8795_v42, %v3779_v25  ;;  %v9918_v25 = vld [vmem:[#allocation8_spill] sm:$0xff]  ;;  %v3807_v38 = vmul.f32 %v8884_v0, %v3806_v19 }
 0x7be   :  { %4172 = vperm.xlu1 %4879, %v8867_v54   ;;  %v4284_v40 = vmul.f32 %v4128_v29, %v9918_v25  ;;  %v3443_v29 = vld [vmem:[%s9421_s7 + $0xe0] sm:$0xff] }
 0x7bf   :  { %5101 = vrsqrt.f32 %v3487_v6  ;;  %3197 = vadd.xlane.f32.xlu0 %v3196_v26  ;;  %v3784_v52 = vsel %vm8900_vm11, %v8795_v42, %v3780_v14  ;;  %v3808_v34 = vmul.f32 0.5, %v3807_v38  ;;  %vm3821_vm1 = vweird.f32 %v3487_v6 }
 0x7c0   :  { %v8925_v19 = vmul.f32 %v3784_v52, %v3443_v29  ;;  %v3190_v52 = vpop.xlane.xlu1 %3189 }
 0x7c5   :  { %v5102_v39 = vpop.eup %5101 }
 0x7c6   :  { %v3816_v26 = vmul.f32 %v5102_v39, %v3487_v6  ;;  %4462 = vperm.xlu1 %4879, %v4040_v41   ;;  %v3787_v41 = vmul.f32 %v8876_v49, %v3786_v2  ;;  %vm3822_vm0 = vweird.f32 %v5102_v39 }
 0x7c7   :  { %4427 = vperm.xlu2 %4880, %v4033_v27   ;;  %v3764_v27 = vsel %vm8895_vm9, %v8790_v36, %v3760_v48  ;;  %v3992_v36 = vmul.f32 %v8584_v15, %v9919_v57  ;;  %vm3823_vm12 = vmor %vm3821_vm1, %vm3822_vm0  ;;  %v4003_v15 = vmul.f32 %v8925_v19, %v8495_v24 }
 0x7c8   :  { %v3817_v8 = vmul.f32 %v5102_v39, %v3816_v26  ;;  %v8923_v2 = vmul.f32 %v3764_v27, %v3441_v10  ;;  %v3788_v48 = vmul.f32 0.5, %v3787_v41  ;;  %v3963_v41 = vld [vmem:[%s9422_s8 + $0xe0] sm:$0xff]  ;;  %v2954_v56 = vpop.xlane.xlu1 %2953 }
 0x7c9   :  { %v4408_v60 = vpop.permute.xlu0 %4407  ;;  %v4043_v29 = vsub.f32 %v3963_v41, %v4003_v15  ;;  %v3249_v30 = vmul.f32 0.0051020407, %v2954_v56 }
 0x7ca   :  { %v3818_v26 = vmul.f32 0.5, %v3817_v8  ;;  %v4563_v13 = vadd.f32 %v4408_v60, %v4283_v55  ;;  %v4564_v42 = vadd.f32 %v4408_v60, %v4284_v40  ;;  %v3952_v60 = vld [vmem:[%s9422_s8 + $0x88] sm:$0xff]  ;;  %v3447_v55 = vld [vmem:[%s9421_s7 + $0x100] sm:$0xff]  ;;  %v3789_v40 = vsub.f32 1.5, %v3788_v48 }
 0x7cb   :  { %v3809_v8 = vsub.f32 1.5, %v3808_v34  ;;  %v4032_v6 = vsub.f32 %v3952_v60, %v3992_v36  ;;  %v3329_v34 = vmul.f32 %v3249_v30, %v3249_v30 }
 0x7cc   :  { %v3819_v14 = vsub.f32 1.5, %v3818_v26  ;;  %4643 = vst [vmem:[%s9423_s9 + $0xe0] sm:$0xff] %v4563_v13  ;;  %v3790_v24 = vmul.f32 %v8876_v49, %v3789_v40  ;;  %v3444_v13 = vld [vmem:[%s9421_s7 + $0xe8] sm:$0xff] }
 0x7cd   :  { %4644 = vst.msk [vmem:[%s9423_s9 + $0xe8] sm:$0xff] %vm2814_vm2, %v4564_v42  ;;  %v3810_v26 = vmul.f32 %v8884_v0, %v3809_v8 }
 0x7ce   :  { %4187 = vperm.xlu1 %4879, %v8923_v2   ;;  %v3820_v25 = vmul.f32 %v5102_v39, %v3819_v14  ;;  %v3794_v42 = vsel %vm3793_vm3, %v8876_v49, %v3790_v24  ;;  %v3446_v14 = vld [vmem:[%s9421_s7 + $0xf8] sm:$0xff] }
 0x7cf   :  { %v8964_v57 = vmul.f32 %v3794_v42, %v3444_v13  ;;  %v3966_v49 = vld [vmem:[%s9422_s8 + $0xf8] sm:$0xff] }
 0x7d0   :  { %v3824_v38 = vsel %vm3823_vm12, %v5102_v39, %v3820_v25  ;;  %v3814_v39 = vsel %vm3813_vm5, %v8884_v0, %v3810_v26  ;;  %v4418_v26 = vpop.permute.xlu1 %4417 }
 0x7d1   :  { %v3927_v10 = vmul.f32 %v3824_v38, %v3447_v55  ;;  %v8966_v36 = vmul.f32 %v3814_v39, %v3446_v14  ;;  %v3050_v38 = vmul.f32 %v8637_v12, %v8637_v12  ;;  %v3049_v39 = vmul.f32 %v9887_v18, %v9887_v18 }
 0x7d3   :  { %4422 = vperm.xlu0 %4878, %v4032_v6   ;;  %v8946_v27 = vmul.f32 %v3927_v10, %v8803_v50  ;;  %v8955_v50 = vpop.permute.xlu2 %4412  ;;  %v4006_v0 = vmul.f32 %v8966_v36, %v8658_v9  ;;  %v9920_v6 = vld [vmem:[#allocation79_spill] sm:$0xff]  ;;  %v9921_v9 = vld [vmem:[#allocation10_spill] sm:$0xff]  ;;  %v3203_v24 = vsel %vm2814_vm2, %v3050_v38, 0.0 }
 0x7d4   :  { %v3204_v14 = vadd.f32 %v3203_v24, %v3049_v39  ;;  %v3969_v24 = vld [vmem:[%s9422_s8 + $0x110] sm:$0xff] }
 0x7d5   :  { %v4046_v25 = vsub.f32 %v3966_v49, %v4006_v0 }
 0x7d6   :  { %4477 = vperm.xlu1 %4879, %v4043_v29  }
 0x7de   :  { %4202 = vperm.xlu1 %4879, %v8964_v57  }
 0x7e1   :  { %v3194_v48 = vpop.xlane.xlu2 %3193 }
 0x7e2   :  { %v3289_v60 = vmul.f32 0.0051020407, %v3194_v48 }
 0x7e4   :  { %v3369_v55 = vsub.f32 %v3289_v60, %v3329_v34 }
 0x7e6   :  { %v3409_v15 = vmax.f32 %v3369_v55, 0.0  ;;  %4492 = vperm.xlu1 %4879, %v4046_v25   ;;  %v3288_v55 = vmul.f32 0.0051020407, %v3190_v52 }
 0x7e8   :  { %v3489_v40 = vadd.f32 1e-05, %v3409_v15 }
 0x7e9   :  { %v4138_v8 = vpop.permute.xlu2 %4137 }
 0x7ea   :  { %5103 = vrsqrt.f32 %v3489_v40  ;;  %v4287_v41 = vmul.f32 %v4138_v8, %v9920_v6  ;;  %v4288_v29 = vmul.f32 %v4138_v8, %v9921_v9  ;;  %vm3841_vm7 = vweird.f32 %v3489_v40  ;;  %v3449_v6 = vld [vmem:[%s9421_s7 + $0x110] sm:$0xff] }
 0x7ec   :  { %v4567_v13 = vadd.f32 %v4418_v26, %v4287_v41  ;;  %v4568_v42 = vadd.f32 %v4418_v26, %v4288_v29 }
 0x7ee   :  { %4647 = vst [vmem:[%s9423_s9 + $0x100] sm:$0xff] %v4567_v13  ;;  %4217 = vperm.xlu1 %4879, %v3927_v10   ;;  %v2959_v10 = vsel %vm2814_vm2, %v8611_v37, 0.0 }
 0x7ef   :  { %4648 = vst.msk [vmem:[%s9423_s9 + $0x108] sm:$0xff] %vm2814_vm2, %v4568_v42  ;;  %v2960_v29 = vadd.f32 %v2959_v10, %v9883_v7 }
 0x7f0   :  { %v5104_v56 = vpop.eup %5103  ;;  %3205 = vadd.xlane.f32.xlu2 %v3204_v14 }
 0x7f1   :  { %v3836_v0 = vmul.f32 %v5104_v56, %v3489_v40  ;;  %vm3842_vm6 = vweird.f32 %v5104_v56 }
 0x7f2   :  { %vm3843_vm8 = vmor %vm3841_vm7, %vm3842_vm6 }
 0x7f3   :  { %v3837_v48 = vmul.f32 %v5104_v56, %v3836_v0  ;;  %v9922_v0 = vld [vmem:[#allocation50_spill] sm:$0xff] }
 0x7f4   :  { %v2950_v49 = vpop.xlane.xlu0 %2949 }
 0x7f5   :  { %v3838_v34 = vmul.f32 0.5, %v3837_v48  ;;  %v3248_v60 = vmul.f32 0.0051020407, %v2950_v49  ;;  %v9923_v49 = vld [vmem:[#allocation12_spill] sm:$0xff] }
 0x7f7   :  { %v3839_v25 = vsub.f32 1.5, %v3838_v34  ;;  %v3328_v15 = vmul.f32 %v3248_v60, %v3248_v60 }
 0x7f9   :  { %v3840_v38 = vmul.f32 %v5104_v56, %v3839_v25  ;;  %v3368_v8 = vsub.f32 %v3288_v55, %v3328_v15 }
 0x7fb   :  { %v3844_v41 = vsel %vm3843_vm8, %v5104_v56, %v3840_v38  ;;  %v3408_v9 = vmax.f32 %v3368_v8, 0.0 }
 0x7fc   :  { %v8994_v26 = vmul.f32 %v3844_v41, %v3449_v6  ;;  %v9924_v6 = vsub.f32 %v8232_v1, %v8236_v32 }
 0x7fd   :  { %v3488_v52 = vadd.f32 1e-05, %v3408_v9  ;;  %2961 = vadd.xlane.f32.xlu0 %v2960_v29 }
 0x7fe   :  { %v4009_v40 = vmul.f32 %v8994_v26, %v3249_v30  ;;  %v3396_v41 = vmax.f32 %v9924_v6, 0.0  ;;  %v3436_v6 = vld [vmem:[%s9421_s7 + $0xa8] sm:$0xff] }
 0x7ff   :  { %5105 = vrsqrt.f32 %v3488_v52  ;;  %vm3831_vm10 = vweird.f32 %v3488_v52 }
 0x800   :  { %v4049_v39 = vsub.f32 %v3969_v24, %v4009_v40  ;;  %v3476_v9 = vadd.f32 1e-05, %v3396_v41  ;;  %v9925_v24 = vsub.f32 %v8370_v35, %v8374_v61 }
 0x802   :  { %4507 = vperm.xlu1 %4879, %v4049_v39   ;;  %5107 = vrsqrt.f32 %v3476_v9  ;;  %vm3711_vm1 = vweird.f32 %v3476_v9 }
 0x805   :  { %v5106_v13 = vpop.eup %5105 }
 0x806   :  { %v3826_v42 = vmul.f32 %v5106_v13, %v3488_v52  ;;  %vm3832_vm9 = vweird.f32 %v5106_v13  ;;  %v3399_v52 = vmax.f32 %v9925_v24, 0.0 }
 0x807   :  { %v4133_v14 = vpop.permute.xlu0 %4132  ;;  %vm3833_vm11 = vmor %vm3831_vm10, %vm3832_vm9 }
 0x808   :  { %v3827_v56 = vmul.f32 %v5106_v13, %v3826_v42  ;;  %v4285_v48 = vmul.f32 %v4133_v14, %v9922_v0  ;;  %v4286_v34 = vmul.f32 %v4133_v14, %v9923_v49  ;;  %4152 = vperm.xlu2 %4880, %v8669_v33   ;;  %v3448_v33 = vld [vmem:[%s9421_s7 + $0x108] sm:$0xff]  ;;  %v5108_v29 = vpop.eup %5107  ;;  %v3479_v39 = vadd.f32 1e-05, %v3399_v52  ;;  %v9926_v14 = vld [vmem:[#allocation60_spill] sm:$0xff] }
 0x809   :  { %v3706_v40 = vmul.f32 %v5108_v29, %v3476_v9  ;;  %vm3712_vm0 = vweird.f32 %v5108_v29  ;;  %v3956_v9 = vld [vmem:[%s9422_s8 + $0xa8] sm:$0xff] }
 0x80a   :  { %v3828_v55 = vmul.f32 0.5, %v3827_v56  ;;  %v4565_v25 = vadd.f32 %v8955_v50, %v4285_v48  ;;  %v4566_v15 = vadd.f32 %v8955_v50, %v4286_v34  ;;  %5109 = vrsqrt.f32 %v3479_v39  ;;  %vm3713_vm12 = vmor %vm3711_vm1, %vm3712_vm0 }
 0x80b   :  { %v3052_v56 = vmul.f32 %v8129_v51, %v8129_v51  ;;  %vm3741_vm15 = vweird.f32 %v3479_v39 }
 0x80c   :  { %v3829_v10 = vsub.f32 1.5, %v3828_v55  ;;  %4645 = vst [vmem:[%s9423_s9 + $0xf0] sm:$0xff] %v4565_v25  ;;  %v3051_v25 = vmul.f32 %v9926_v14, %v9926_v14 }
 0x80d   :  { %4646 = vst.msk [vmem:[%s9423_s9 + $0xf8] sm:$0xff] %vm2814_vm2, %v4566_v15  ;;  %v3207_v55 = vsel %vm2814_vm2, %v3052_v56, 0.0  ;;  %v9927_v56 = vld [vmem:[#allocation53_spill] sm:$0xff] }
 0x80e   :  { %v3830_v30 = vmul.f32 %v5106_v13, %v3829_v10 }
 0x810   :  { %v3834_v38 = vsel %vm3833_vm11, %v5106_v13, %v3830_v30  ;;  %v3707_v13 = vmul.f32 %v5108_v29, %v3706_v40  ;;  %v5110_v49 = vpop.eup %5109 }
 0x811   :  { %v9015_v50 = vmul.f32 %v3834_v38, %v3448_v33  ;;  %4147 = vperm.xlu0 %4878, %v8861_v21   ;;  %v2967_v21 = vsel %vm2814_vm2, %v8129_v51, 0.0  ;;  %v3736_v33 = vmul.f32 %v5110_v49, %v3479_v39  ;;  %v3208_v38 = vadd.f32 %v3207_v55, %v3051_v25 }
 0x812   :  { %v2968_v1 = vadd.f32 %v2967_v21, %v9926_v14  ;;  %v3708_v32 = vmul.f32 0.5, %v3707_v13  ;;  %vm3742_vm13 = vweird.f32 %v5110_v49 }
 0x813   :  { %v9019_v8 = vmul.f32 %v9015_v50, %v3248_v60  ;;  %v3737_v24 = vmul.f32 %v5110_v49, %v3736_v33  ;;  %vm3743_vm3 = vmor %vm3741_vm15, %vm3742_vm13 }
 0x814   :  { %v3709_v48 = vsub.f32 1.5, %v3708_v32 }
 0x815   :  { %v3738_v40 = vmul.f32 0.5, %v3737_v24 }
 0x816   :  { %v3710_v10 = vmul.f32 %v5108_v29, %v3709_v48 }
 0x817   :  { %v3739_v32 = vsub.f32 1.5, %v3738_v40 }
 0x818   :  { %v3714_v41 = vsel %vm3713_vm12, %v5108_v29, %v3710_v10 }
 0x819   :  { %v9042_v52 = vmul.f32 %v3714_v41, %v3436_v6  ;;  %v3740_v10 = vmul.f32 %v5110_v49, %v3739_v32  ;;  %v3450_v6 = vld [vmem:[%s9421_s7 + $0x118] sm:$0xff]  ;;  %v3439_v41 = vld [vmem:[%s9421_s7 + $0xc0] sm:$0xff] }
 0x81b   :  { %v3744_v24 = vsel %vm3743_vm3, %v5110_v49, %v3740_v10  ;;  %v3962_v10 = vld [vmem:[%s9422_s8 + $0xd8] sm:$0xff] }
 0x822   :  { %v2958_v42 = vpop.xlane.xlu2 %2957 }
 0x823   :  { %v9029_v60 = vmul.f32 0.0051020407, %v2958_v42  ;;  %v4143_v42 = vpop.permute.xlu1 %4142 }
 0x825   :  { %v3330_v35 = vmul.f32 %v9029_v60, %v9029_v60 }
 0x831   :  { %2969 = vadd.xlane.f32.xlu2 %v2968_v1  ;;  %v3996_v1 = vmul.f32 %v9042_v52, %v8230_v58  ;;  %v3995_v58 = vmul.f32 %v8695_v23, %v8619_v59  ;;  %v9069_v23 = vmul.f32 %v3744_v24, %v3439_v41 }
 0x832   :  { %v3198_v0 = vpop.xlane.xlu0 %3197 }
 0x833   :  { %v3290_v61 = vmul.f32 0.0051020407, %v3198_v0  ;;  %v4289_v0 = vmul.f32 %v4143_v42, %v9927_v56 }
 0x835   :  { %v3370_v34 = vsub.f32 %v3290_v61, %v3330_v35  ;;  %v9928_v35 = vld [vmem:[#allocation14_spill] sm:$0xff] }
 0x836   :  { %v4290_v61 = vmul.f32 %v4143_v42, %v9928_v35  ;;  %v9930_v35 = vld [vmem:[#allocation15_spill] sm:$0xff] }
 0x837   :  { %v3410_v15 = vmax.f32 %v3370_v34, 0.0 }
 0x839   :  { %v3490_v30 = vadd.f32 1e-05, %v3410_v15  ;;  %v4036_v15 = vsub.f32 %v3956_v9, %v3996_v1  ;;  %v3959_v1 = vld [vmem:[%s9422_s8 + $0xc0] sm:$0xff]  ;;  %v4428_v9 = vpop.permute.xlu2 %4427 }
 0x83b   :  { %5111 = vrsqrt.f32 %v3490_v30  ;;  %3209 = vadd.xlane.f32.xlu0 %v3208_v38  ;;  %vm3851_vm4 = vweird.f32 %v3490_v30  ;;  %v3955_v38 = vld [vmem:[%s9422_s8 + $0xa0] sm:$0xff] }
 0x83c   :  { %v4035_v42 = vsub.f32 %v3955_v38, %v3995_v58  ;;  %v4042_v58 = vsub.f32 %v3962_v10, %v8582_v45  ;;  %v3965_v45 = vld [vmem:[%s9422_s8 + $0xf0] sm:$0xff]  ;;  %v4001_v10 = vmul.f32 %v8923_v2, %v8436_v5 }
 0x841   :  { %v5112_v13 = vpop.eup %5111 }
 0x842   :  { %v3846_v21 = vmul.f32 %v5112_v13, %v3490_v30  ;;  %vm3852_vm14 = vweird.f32 %v5112_v13 }
 0x843   :  { %vm3853_vm5 = vmor %vm3851_vm4, %vm3852_vm14 }
 0x844   :  { %v3847_v29 = vmul.f32 %v5112_v13, %v3846_v21  ;;  %v3999_v21 = vmul.f32 %v9069_v23, %v8366_v47  ;;  %v3935_v47 = vld [vmem:[%s9422_s8] sm:$0xff] }
 0x845   :  { %v4423_v48 = vpop.permute.xlu0 %4422 }
 0x846   :  { %v3848_v34 = vmul.f32 0.5, %v3847_v29  ;;  %v4569_v55 = vadd.f32 %v4423_v48, %v4289_v0  ;;  %v4570_v25 = vadd.f32 %v4423_v48, %v4290_v61  ;;  %v4039_v49 = vsub.f32 %v3959_v1, %v3999_v21  ;;  %v9929_v0 = vld [vmem:[#allocation16_spill] sm:$0xff]  ;;  %v9931_v21 = vld [vmem:[#allocation13_spill] sm:$0xff] }
 0x848   :  { %v3849_v33 = vsub.f32 1.5, %v3848_v34  ;;  %4649 = vst [vmem:[%s9423_s9 + $0x110] sm:$0xff] %v4569_v55  ;;  %v4015_v55 = vsub.f32 %v3935_v47, %v8493_v62  ;;  %v2971_v62 = vsel %vm2814_vm2, %v8715_v28, 0.0  ;;  %v3958_v47 = vld [vmem:[%s9422_s8 + $0xb8] sm:$0xff] }
 0x849   :  { %4650 = vst.msk [vmem:[%s9423_s9 + $0x118] sm:$0xff] %vm2814_vm2, %v4570_v25  ;;  %4442 = vperm.xlu2 %4880, %v4036_v15  }
 0x84a   :  { %v3850_v39 = vmul.f32 %v5112_v13, %v3849_v33 }
 0x84c   :  { %v3854_v40 = vsel %vm3853_vm5, %v5112_v13, %v3850_v39  ;;  %v3202_v13 = vpop.xlane.xlu1 %3201 }
 0x84d   :  { %v3930_v59 = vmul.f32 %v3854_v40, %v3450_v6  ;;  %v3291_v25 = vmul.f32 0.0051020407, %v3202_v13  ;;  %v2972_v6 = vadd.f32 %v2971_v62, %v9899_v20  ;;  %v3961_v62 = vld [vmem:[%s9422_s8 + $0xd0] sm:$0xff] }
 0x84f   :  { %4437 = vperm.xlu0 %4878, %v4035_v42   ;;  %4232 = vperm.xlu1 %4879, %v3930_v59   ;;  %v9072_v30 = vmul.f32 %v3930_v59, %v9029_v60 }
 0x851   :  { %4167 = vperm.xlu2 %4880, %v8784_v16  }
 0x854   :  { %v2966_v56 = vpop.xlane.xlu1 %2965 }
 0x855   :  { %v9102_v41 = vmul.f32 0.0051020407, %v2966_v56 }
 0x857   :  { %v3332_v40 = vmul.f32 %v9102_v41, %v9102_v41 }
 0x859   :  { %4457 = vperm.xlu2 %4880, %v4039_v49   ;;  %v9932_v49 = vld [vmem:[#allocation54_spill] sm:$0xff] }
 0x85c   :  { %v4433_v29 = vpop.permute.xlu1 %4432 }
 0x861   :  { %4182 = vperm.xlu2 %4880, %v8869_v4  }
 0x863   :  { %v3206_v32 = vpop.xlane.xlu2 %3205 }
 0x864   :  { %v3292_v24 = vmul.f32 0.0051020407, %v3206_v32  ;;  %v4045_v32 = vsub.f32 %v3965_v45, %v8743_v11  ;;  %v3998_v11 = vmul.f32 %v8867_v54, %v8706_v43  ;;  %v3451_v54 = vld [vmem:[%s9421_s7 + $0x120] sm:$0xff] }
 0x866   :  { %v3372_v42 = vsub.f32 %v3292_v24, %v3332_v40 }
 0x869   :  { %4057 = vperm.xlu2 %4880, %v8490_v46  }
 0x86b   :  { %v4153_v60 = vpop.permute.xlu2 %4152 }
 0x86c   :  { %v4293_v16 = vmul.f32 %v4153_v60, %v9929_v0  ;;  %v4294_v61 = vmul.f32 %v4153_v60, %v9930_v35 }
 0x86e   :  { %v4573_v48 = vadd.f32 %v4433_v29, %v4293_v16  ;;  %v4574_v34 = vadd.f32 %v4433_v29, %v4294_v61  ;;  %v3412_v16 = vmax.f32 %v3372_v42, 0.0  ;;  %v4038_v29 = vsub.f32 %v3958_v47, %v3998_v11 }
 0x870   :  { %4653 = vst [vmem:[%s9423_s9 + $0x130] sm:$0xff] %v4573_v48  ;;  %v2962_v4 = vpop.xlane.xlu0 %2961  ;;  %v3968_v48 = vld [vmem:[%s9422_s8 + $0x108] sm:$0xff] }
 0x871   :  { %4654 = vst.msk [vmem:[%s9423_s9 + $0x138] sm:$0xff] %vm2814_vm2, %v4574_v34  ;;  %v3251_v46 = vmul.f32 0.0051020407, %v2962_v4  ;;  %4337 = vperm.xlu2 %4880, %v4015_v55  }
 0x873   :  { %v3331_v15 = vmul.f32 %v3251_v46, %v3251_v46 }
 0x875   :  { %v3371_v33 = vsub.f32 %v3291_v25, %v3331_v15 }
 0x877   :  { %v3411_v38 = vmax.f32 %v3371_v33, 0.0  ;;  %v4158_v33 = vpop.permute.xlu1 %4157 }
 0x879   :  { %2973 = vadd.xlane.f32.xlu0 %v2972_v6  ;;  %4472 = vperm.xlu2 %4880, %v4042_v58   ;;  %v3491_v39 = vadd.f32 1e-05, %v3411_v38  ;;  %v4041_v38 = vsub.f32 %v3961_v62, %v4001_v10 }
 0x87b   :  { %5113 = vrsqrt.f32 %v3491_v39  ;;  %vm3861_vm7 = vweird.f32 %v3491_v39 }
 0x87f   :  { %v9147_v2 = vpop.xlane.xlu1 %3213 }
 0x881   :  { %4197 = vperm.xlu2 %4880, %v8925_v19   ;;  %v5114_v60 = vpop.eup %5113  ;;  %v3492_v19 = vadd.f32 1e-05, %v3412_v16 }
 0x882   :  { %v3856_v35 = vmul.f32 %v5114_v60, %v3491_v39  ;;  %vm3862_vm6 = vweird.f32 %v5114_v60 }
 0x883   :  { %v4148_v59 = vpop.permute.xlu0 %4147  ;;  %5115 = vrsqrt.f32 %v3492_v19  ;;  %vm3863_vm8 = vmor %vm3861_vm7, %vm3862_vm6  ;;  %vm3871_vm10 = vweird.f32 %v3492_v19 }
 0x884   :  { %v4291_v1 = vmul.f32 %v4148_v59, %v9931_v21  ;;  %v4292_v13 = vmul.f32 %v4148_v59, %v9932_v49  ;;  %v3857_v61 = vmul.f32 %v5114_v60, %v3856_v35  ;;  %v4004_v49 = vmul.f32 %v8964_v57, %v8590_v22 }
 0x886   :  { %v4571_v56 = vadd.f32 %v4428_v9, %v4291_v1  ;;  %v4572_v0 = vadd.f32 %v4428_v9, %v4292_v13  ;;  %v3858_v9 = vmul.f32 0.5, %v3857_v61  ;;  %v3964_v13 = vld [vmem:[%s9422_s8 + $0xe8] sm:$0xff]  ;;  %v9934_v61 = vld [vmem:[#allocation36_spill] sm:$0xff] }
 0x888   :  { %4651 = vst [vmem:[%s9423_s9 + $0x120] sm:$0xff] %v4571_v56  ;;  %v3859_v34 = vsub.f32 1.5, %v3858_v9  ;;  %v4448_v56 = vpop.permute.xlu1 %4447 }
 0x889   :  { %4652 = vst.msk [vmem:[%s9423_s9 + $0x128] sm:$0xff] %vm2814_vm2, %v4572_v0  ;;  %4487 = vperm.xlu2 %4880, %v4045_v32   ;;  %v5116_v55 = vpop.eup %5115  ;;  %v4044_v32 = vsub.f32 %v3964_v13, %v4004_v49  ;;  %v3970_v49 = vld [vmem:[%s9422_s8 + $0x118] sm:$0xff] }
 0x88a   :  { %v3866_v4 = vmul.f32 %v5116_v55, %v3492_v19  ;;  %v3860_v25 = vmul.f32 %v5114_v60, %v3859_v34  ;;  %vm3872_vm9 = vweird.f32 %v5116_v55  ;;  %v9933_v19 = vld [vmem:[#allocation48_spill] sm:$0xff]  ;;  %v9935_v34 = vld [vmem:[#allocation17_spill] sm:$0xff] }
 0x88b   :  { %vm3873_vm11 = vmor %vm3871_vm10, %vm3872_vm9 }
 0x88c   :  { %v3867_v43 = vmul.f32 %v5116_v55, %v3866_v4 }
 0x88d   :  { %4162 = vperm.xlu0 %4878, %v9042_v52   ;;  %v4048_v52 = vsub.f32 %v3968_v48, %v9019_v8 }
 0x88e   :  { %v3868_v8 = vmul.f32 0.5, %v3867_v43  ;;  %v3967_v43 = vld [vmem:[%s9422_s8 + $0x100] sm:$0xff] }
 0x88f   :  { %v4047_v62 = vsub.f32 %v3967_v43, %v8946_v27  ;;  %v3453_v27 = vld [vmem:[%s9421_s7 + $0x130] sm:$0xff] }
 0x890   :  { %v3869_v6 = vsub.f32 1.5, %v3868_v8  ;;  %v9169_v22 = vpop.permute.xlu1 %4172 }
 0x891   :  { %4212 = vperm.xlu2 %4880, %v8966_v36   ;;  %v3864_v36 = vsel %vm3863_vm8, %v5114_v60, %v3860_v25 }
 0x892   :  { %v9135_v15 = vmul.f32 %v3864_v36, %v3451_v54  ;;  %v3870_v5 = vmul.f32 %v5116_v55, %v3869_v6 }
 0x894   :  { %v4011_v58 = vmul.f32 %v9135_v15, %v3251_v46  ;;  %v3452_v46 = vld [vmem:[%s9421_s7 + $0x128] sm:$0xff]  ;;  %v3874_v42 = vsel %vm3873_vm11, %v5116_v55, %v3870_v5  ;;  %v4295_v55 = vmul.f32 %v4158_v33, %v9935_v34 }
 0x895   :  { %4452 = vperm.xlu0 %4878, %v4038_v29   ;;  %v3932_v1 = vmul.f32 %v3874_v42, %v3452_v46 }
 0x899   :  { %4502 = vperm.xlu2 %4880, %v4048_v52   ;;  %v9936_v52 = vld [vmem:[#allocation57_spill] sm:$0xff] }
 0x89a   :  { %v4296_v4 = vmul.f32 %v4158_v33, %v9936_v52  ;;  %v3294_v52 = vmul.f32 0.0051020407, %v9147_v2 }
 0x89d   :  { %4177 = vperm.xlu0 %4878, %v9069_v23   ;;  %v3971_v23 = vld [vmem:[%s9422_s8 + $0x120] sm:$0xff] }
 0x89e   :  { %v4051_v24 = vsub.f32 %v3971_v23, %v4011_v58  ;;  %v4463_v23 = vpop.permute.xlu1 %4462 }
 0x8a1   :  { %4227 = vperm.xlu2 %4880, %v8994_v26  }
 0x8a4   :  { %v2970_v39 = vpop.xlane.xlu2 %2969 }
 0x8a5   :  { %4467 = vperm.xlu0 %4878, %v4041_v38   ;;  %v3253_v26 = vmul.f32 0.0051020407, %v2970_v39  ;;  %v9937_v38 = vld [vmem:[#allocation72_spill] sm:$0xff] }
 0x8a7   :  { %v3333_v45 = vmul.f32 %v3253_v26, %v3253_v26 }
 0x8a9   :  { %4517 = vperm.xlu2 %4880, %v4051_v24  }
 0x8ac   :  { %v9149_v40 = vpop.permute.xlu2 %4442 }
 0x8ad   :  { %4192 = vperm.xlu0 %4878, %v8575_v17  }
 0x8ae   :  { %v3210_v59 = vpop.xlane.xlu0 %3209 }
 0x8af   :  { %v3293_v21 = vmul.f32 0.0051020407, %v3210_v59 }
 0x8b1   :  { %v3373_v60 = vsub.f32 %v3293_v21, %v3333_v45  ;;  %4242 = vperm.xlu2 %4880, %v3932_v1   ;;  %v4012_v45 = vmul.f32 %v3932_v1, %v9102_v41  ;;  %v3972_v21 = vld [vmem:[%s9422_s8 + $0x128] sm:$0xff]  ;;  %v9212_v41 = vpop.permute.xlu1 %4187 }
 0x8b3   :  { %v3413_v0 = vmax.f32 %v3373_v60, 0.0  ;;  %v4052_v13 = vsub.f32 %v3972_v21, %v4012_v45  ;;  %v9938_v60 = vld [vmem:[#allocation74_spill] sm:$0xff] }
 0x8b4   :  { %v4168_v16 = vpop.permute.xlu2 %4167 }
 0x8b5   :  { %v3493_v35 = vadd.f32 1e-05, %v3413_v0  ;;  %v4299_v17 = vmul.f32 %v4168_v16, %v9933_v19  ;;  %v4300_v11 = vmul.f32 %v4168_v16, %v9934_v61  ;;  %4482 = vperm.xlu0 %4878, %v4044_v32   ;;  %v9939_v0 = vld [vmem:[#allocation45_spill] sm:$0xff] }
 0x8b7   :  { %5117 = vrsqrt.f32 %v3493_v35  ;;  %v4579_v9 = vadd.f32 %v4448_v56, %v4299_v17  ;;  %v4580_v47 = vadd.f32 %v4448_v56, %v4300_v11  ;;  %vm3881_vm1 = vweird.f32 %v3493_v35  ;;  %v9940_v17 = vld [vmem:[#allocation49_spill] sm:$0xff]  ;;  %v9941_v11 = vld [vmem:[#allocation11_spill] sm:$0xff] }
 0x8b9   :  { %4659 = vst [vmem:[%s9423_s9 + $0x160] sm:$0xff] %v4579_v9 }
 0x8ba   :  { %4660 = vst.msk [vmem:[%s9423_s9 + $0x168] sm:$0xff] %vm2814_vm2, %v4580_v47 }
 0x8bc   :  { %v9171_v57 = vpop.permute.xlu2 %4457 }
 0x8bd   :  { %v5118_v29 = vpop.eup %5117  ;;  %4207 = vperm.xlu0 %4878, %v8735_v31  }
 0x8be   :  { %v3876_v48 = vmul.f32 %v5118_v29, %v3493_v35  ;;  %vm3882_vm0 = vweird.f32 %v5118_v29 }
 0x8bf   :  { %vm3883_vm12 = vmor %vm3881_vm1, %vm3882_vm0 }
 0x8c0   :  { %v3877_v25 = vmul.f32 %v5118_v29, %v3876_v48 }
 0x8c1   :  { %v4438_v54 = vpop.permute.xlu0 %4437 }
 0x8c2   :  { %v3878_v36 = vmul.f32 0.5, %v3877_v25  ;;  %v4575_v10 = vadd.f32 %v4438_v54, %v4295_v55  ;;  %v4576_v8 = vadd.f32 %v4438_v54, %v4296_v4 }
 0x8c4   :  { %v3879_v58 = vsub.f32 1.5, %v3878_v36  ;;  %4655 = vst [vmem:[%s9423_s9 + $0x140] sm:$0xff] %v4575_v10  ;;  %v4183_v31 = vpop.permute.xlu2 %4182 }
 0x8c5   :  { %4656 = vst.msk [vmem:[%s9423_s9 + $0x148] sm:$0xff] %vm2814_vm2, %v4576_v8  ;;  %v4305_v33 = vmul.f32 %v4183_v31, %v8161_v44  ;;  %v4306_v6 = vmul.f32 %v4183_v31, %v9937_v38  ;;  %4497 = vperm.xlu0 %4878, %v4047_v62   ;;  %v9942_v8 = vld [vmem:[#allocation81_spill] sm:$0xff] }
 0x8c6   :  { %v3880_v39 = vmul.f32 %v5118_v29, %v3879_v58  ;;  %v9943_v58 = vld [vmem:[#allocation27_spill] sm:$0xff] }
 0x8c7   :  { %v4585_v24 = vadd.f32 %v4463_v23, %v4305_v33  ;;  %v4586_v5 = vadd.f32 %v4463_v23, %v4306_v6 }
 0x8c8   :  { %v3884_v46 = vsel %vm3883_vm12, %v5118_v29, %v3880_v39 }
 0x8c9   :  { %4665 = vst [vmem:[%s9423_s9 + $0x190] sm:$0xff] %v4585_v24  ;;  %v3933_v42 = vmul.f32 %v3884_v46, %v3453_v27 }
 0x8ca   :  { %4666 = vst.msk [vmem:[%s9423_s9 + $0x198] sm:$0xff] %vm2814_vm2, %v4586_v5  ;;  %v9944_v5 = vld [vmem:[#allocation35_spill] sm:$0xff] }
 0x8cb   :  { %4247 = vperm.xlu1 %4879, %v3933_v42   ;;  %v9199_v44 = vmul.f32 %v3933_v42, %v3253_v26  ;;  %v4050_v26 = vsub.f32 %v3970_v49, %v9072_v30  ;;  %v4478_v30 = vpop.permute.xlu1 %4477  ;;  %v9945_v42 = vld [vmem:[#allocation71_spill] sm:$0xff] }
 0x8cc   :  { %v4058_v59 = vpop.permute.xlu2 %4057 }
 0x8cd   :  { %4222 = vperm.xlu0 %4878, %v9015_v50   ;;  %v4255_v56 = vmul.f32 %v4058_v59, %v9938_v60  ;;  %v4256_v32 = vmul.f32 %v4058_v59, %v9939_v0  ;;  %v9946_v0 = vld [vmem:[#allocation47_spill] sm:$0xff] }
 0x8d3   :  { %4522 = vperm.xlu1 %4879, %v4052_v13   ;;  %v9229_v48 = vpop.permute.xlu1 %4202 }
 0x8d4   :  { %v4338_v16 = vpop.permute.xlu2 %4337 }
 0x8d5   :  { %v4535_v50 = vadd.f32 %v4338_v16, %v4255_v56  ;;  %v4536_v35 = vadd.f32 %v4338_v16, %v4256_v32  ;;  %4512 = vperm.xlu0 %4878, %v4050_v26   ;;  %v9947_v26 = vld [vmem:[#allocation40_spill] sm:$0xff] }
 0x8d6   :  { %v4301_v16 = vmul.f32 %v9169_v22, %v9947_v26  ;;  %v9958_v26 = vld [vmem:[#allocation51_spill] sm:$0xff] }
 0x8d7   :  { %4615 = vst [vmem:[%s9423_s9] sm:$0xff] %v4535_v50 }
 0x8d8   :  { %4616 = vst.msk [vmem:[%s9423_s9 + $0x8] sm:$0xff] %vm2814_vm2, %v4536_v35 }
 0x8db   :  { %v4493_v54 = vpop.permute.xlu1 %4492 }
 0x8dc   :  { %v9221_v1 = vpop.permute.xlu2 %4472 }
 0x8dd   :  { %4237 = vperm.xlu0 %4878, %v9135_v15  }
 0x8e3   :  { %v9249_v23 = vpop.permute.xlu1 %4217 }
 0x8e4   :  { %v4198_v19 = vpop.permute.xlu2 %4197 }
 0x8e5   :  { %v4311_v61 = vmul.f32 %v4198_v19, %v9940_v17  ;;  %v4312_v9 = vmul.f32 %v4198_v19, %v9941_v11 }
 0x8e7   :  { %v4591_v47 = vadd.f32 %v4478_v30, %v4311_v61  ;;  %v4592_v29 = vadd.f32 %v4478_v30, %v4312_v9  ;;  %v3454_v30 = vld [vmem:[%s9421_s7 + $0x138] sm:$0xff] }
 0x8e9   :  { %4671 = vst [vmem:[%s9423_s9 + $0x1c0] sm:$0xff] %v4591_v47 }
 0x8ea   :  { %4672 = vst.msk [vmem:[%s9423_s9 + $0x1c8] sm:$0xff] %vm2814_vm2, %v4592_v29 }
 0x8eb   :  { %v4508_v35 = vpop.permute.xlu1 %4507 }
 0x8ec   :  { %v2974_v15 = vpop.xlane.xlu0 %2973  ;;  %v9235_v34 = vpop.permute.xlu2 %4487 }
 0x8ed   :  { %v3254_v55 = vmul.f32 0.0051020407, %v2974_v15 }
 0x8ef   :  { %v3334_v4 = vmul.f32 %v3254_v55, %v3254_v55 }
 0x8f1   :  { %v3374_v25 = vsub.f32 %v3294_v52, %v3334_v4  ;;  %v3973_v4 = vld [vmem:[%s9422_s8 + $0x130] sm:$0xff] }
 0x8f3   :  { %v3414_v43 = vmax.f32 %v3374_v25, 0.0 }
 0x8f4   :  { %v4213_v36 = vpop.permute.xlu2 %4212 }
 0x8f5   :  { %v3494_v10 = vadd.f32 1e-05, %v3414_v43  ;;  %v4317_v62 = vmul.f32 %v4213_v36, %v9942_v8  ;;  %v4318_v31 = vmul.f32 %v4213_v36, %v9943_v58  ;;  %v9949_v43 = vld [vmem:[#allocation43_spill] sm:$0xff]  ;;  %v9951_v58 = vld [vmem:[#allocation80_spill] sm:$0xff] }
 0x8f7   :  { %5119 = vrsqrt.f32 %v3494_v10  ;;  %v4597_v33 = vadd.f32 %v4493_v54, %v4317_v62  ;;  %v4598_v38 = vadd.f32 %v4493_v54, %v4318_v31  ;;  %vm3891_vm14 = vweird.f32 %v3494_v10 }
 0x8f8   :  { %v4307_v31 = vmul.f32 %v9212_v41, %v9951_v58 }
 0x8f9   :  { %4677 = vst [vmem:[%s9423_s9 + $0x1f0] sm:$0xff] %v4597_v33  ;;  %v9952_v33 = vld [vmem:[#allocation77_spill] sm:$0xff] }
 0x8fa   :  { %4678 = vst.msk [vmem:[%s9423_s9 + $0x1f8] sm:$0xff] %vm2814_vm2, %v4598_v38 }
 0x8fc   :  { %v9247_v2 = vpop.permute.xlu2 %4502 }
 0x8fd   :  { %v5120_v6 = vpop.eup %5119 }
 0x8fe   :  { %v3886_v27 = vmul.f32 %v5120_v6, %v3494_v10  ;;  %vm3892_vm13 = vweird.f32 %v5120_v6  ;;  %v4053_v10 = vsub.f32 %v3973_v4, %v9199_v44  ;;  %v4308_v44 = vmul.f32 %v9212_v41, %v9952_v33 }
 0x8ff   :  { %v4163_v39 = vpop.permute.xlu0 %4162  ;;  %vm3893_vm15 = vmor %vm3891_vm14, %vm3892_vm13 }
 0x900   :  { %v3887_v24 = vmul.f32 %v5120_v6, %v3886_v27  ;;  %v4297_v46 = vmul.f32 %v4163_v39, %v9944_v5  ;;  %v4298_v59 = vmul.f32 %v4163_v39, %v9945_v42  ;;  %v9953_v39 = vld [vmem:[#allocation4_spill] sm:$0xff]  ;;  %v9954_v5 = vld [vmem:[#allocation2_spill] sm:$0xff] }
 0x902   :  { %v3888_v45 = vmul.f32 0.5, %v3887_v24  ;;  %v4577_v21 = vadd.f32 %v9149_v40, %v4297_v46  ;;  %v4578_v49 = vadd.f32 %v9149_v40, %v4298_v59  ;;  %v9948_v40 = vld [vmem:[#allocation110_spill] sm:$0xff] }
 0x903   :  { %v4302_v50 = vmul.f32 %v9169_v22, %v9948_v40  ;;  %v3974_v22 = vld [vmem:[%s9422_s8 + $0x138] sm:$0xff]  ;;  %v9955_v59 = vld [vmem:[#allocation78_spill] sm:$0xff] }
 0x904   :  { %v3889_v13 = vsub.f32 1.5, %v3888_v45  ;;  %4657 = vst [vmem:[%s9423_s9 + $0x150] sm:$0xff] %v4577_v21  ;;  %v4228_v60 = vpop.permute.xlu2 %4227  ;;  %v4313_v45 = vmul.f32 %v9229_v48, %v9955_v59  ;;  %v9956_v21 = vld [vmem:[#allocation22_spill] sm:$0xff] }
 0x905   :  { %4658 = vst.msk [vmem:[%s9423_s9 + $0x158] sm:$0xff] %vm2814_vm2, %v4578_v49  ;;  %v4323_v56 = vmul.f32 %v4228_v60, %v9866_v53  ;;  %v4324_v32 = vmul.f32 %v4228_v60, %v9946_v0  ;;  %v4314_v49 = vmul.f32 %v9229_v48, %v9956_v21  ;;  %v9957_v0 = vld [vmem:[#allocation52_spill] sm:$0xff] }
 0x906   :  { %v3890_v19 = vmul.f32 %v5120_v6, %v3889_v13 }
 0x907   :  { %v4603_v17 = vadd.f32 %v4508_v35, %v4323_v56  ;;  %v4604_v61 = vadd.f32 %v4508_v35, %v4324_v32  ;;  %v4453_v11 = vpop.permute.xlu0 %4452  ;;  %v9959_v35 = vld [vmem:[#allocation55_spill] sm:$0xff] }
 0x908   :  { %v3894_v53 = vsel %vm3893_vm15, %v5120_v6, %v3890_v19  ;;  %v4581_v9 = vadd.f32 %v4453_v11, %v4301_v16  ;;  %v4582_v47 = vadd.f32 %v4453_v11, %v4302_v50  ;;  %v4233_v50 = vpop.permute.xlu1 %4232  ;;  %v9960_v19 = vld [vmem:[#allocation94_spill] sm:$0xff] }
 0x909   :  { %v3934_v29 = vmul.f32 %v3894_v53, %v3454_v30  ;;  %4683 = vst [vmem:[%s9423_s9 + $0x220] sm:$0xff] %v4603_v17  ;;  %v4319_v30 = vmul.f32 %v9249_v23, %v9959_v35  ;;  %v4320_v17 = vmul.f32 %v9249_v23, %v9960_v19 }
 0x90a   :  { %4684 = vst.msk [vmem:[%s9423_s9 + $0x228] sm:$0xff] %vm2814_vm2, %v4604_v61 }
 0x90b   :  { %v4014_v15 = vmul.f32 %v3934_v29, %v3254_v55  ;;  %4661 = vst [vmem:[%s9423_s9 + $0x170] sm:$0xff] %v4581_v9  ;;  %4252 = vperm.xlu0 %4878, %v3934_v29   ;;  %v9950_v55 = vld [vmem:[#allocation111_spill] sm:$0xff] }
 0x90c   :  { %4662 = vst.msk [vmem:[%s9423_s9 + $0x178] sm:$0xff] %vm2814_vm2, %v4582_v47  ;;  %v4518_v61 = vpop.permute.xlu2 %4517 }
 0x90d   :  { %v4054_v52 = vsub.f32 %v3974_v22, %v4014_v15 }
 0x90f   :  { %v4178_v25 = vpop.permute.xlu0 %4177  ;;  %4532 = vperm.xlu2 %4880, %v4054_v52  }
 0x910   :  { %v4303_v54 = vmul.f32 %v4178_v25, %v9949_v43  ;;  %v4304_v36 = vmul.f32 %v4178_v25, %v9950_v55 }
 0x912   :  { %v4583_v8 = vadd.f32 %v9171_v57, %v4303_v54  ;;  %v4584_v62 = vadd.f32 %v9171_v57, %v4304_v36  ;;  %v9962_v54 = vld [vmem:[#allocation106_spill] sm:$0xff] }
 0x913   :  { %4527 = vperm.xlu0 %4878, %v4053_v10   ;;  %v4326_v55 = vmul.f32 %v4233_v50, %v9962_v54 }
 0x914   :  { %4663 = vst [vmem:[%s9423_s9 + $0x180] sm:$0xff] %v4583_v8  ;;  %v4243_v23 = vpop.permute.xlu2 %4242 }
 0x915   :  { %4664 = vst.msk [vmem:[%s9423_s9 + $0x188] sm:$0xff] %vm2814_vm2, %v4584_v62  ;;  %v4329_v4 = vmul.f32 %v4243_v23, %v9887_v18  ;;  %v4330_v25 = vmul.f32 %v4243_v23, %v8637_v12 }
 0x917   :  { %v4468_v38 = vpop.permute.xlu0 %4467 }
 0x918   :  { %v4587_v6 = vadd.f32 %v4468_v38, %v4307_v31  ;;  %v4588_v27 = vadd.f32 %v4468_v38, %v4308_v44 }
 0x91a   :  { %4667 = vst [vmem:[%s9423_s9 + $0x1a0] sm:$0xff] %v4587_v6 }
 0x91b   :  { %4668 = vst.msk [vmem:[%s9423_s9 + $0x1a8] sm:$0xff] %vm2814_vm2, %v4588_v27 }
 0x91f   :  { %v4193_v57 = vpop.permute.xlu0 %4192 }
 0x920   :  { %v4309_v24 = vmul.f32 %v4193_v57, %v9953_v39  ;;  %v4310_v46 = vmul.f32 %v4193_v57, %v9954_v5 }
 0x922   :  { %v4589_v42 = vadd.f32 %v9221_v1, %v4309_v24  ;;  %v4590_v41 = vadd.f32 %v9221_v1, %v4310_v46 }
 0x924   :  { %4669 = vst [vmem:[%s9423_s9 + $0x1b0] sm:$0xff] %v4589_v42 }
 0x925   :  { %4670 = vst.msk [vmem:[%s9423_s9 + $0x1b8] sm:$0xff] %vm2814_vm2, %v4590_v41 }
 0x927   :  { %v4483_v13 = vpop.permute.xlu0 %4482 }
 0x928   :  { %v4593_v60 = vadd.f32 %v4483_v13, %v4313_v45  ;;  %v4594_v56 = vadd.f32 %v4483_v13, %v4314_v49 }
 0x92a   :  { %4673 = vst [vmem:[%s9423_s9 + $0x1d0] sm:$0xff] %v4593_v60 }
 0x92b   :  { %4674 = vst.msk [vmem:[%s9423_s9 + $0x1d8] sm:$0xff] %vm2814_vm2, %v4594_v56 }
 0x92f   :  { %v4208_v1 = vpop.permute.xlu0 %4207 }
 0x930   :  { %v4315_v32 = vmul.f32 %v4208_v1, %v9957_v0  ;;  %v4316_v16 = vmul.f32 %v4208_v1, %v9958_v26 }
 0x932   :  { %v4595_v40 = vadd.f32 %v9235_v34, %v4315_v32  ;;  %v4596_v48 = vadd.f32 %v9235_v34, %v4316_v16 }
 0x934   :  { %4675 = vst [vmem:[%s9423_s9 + $0x1e0] sm:$0xff] %v4595_v40 }
 0x935   :  { %4676 = vst.msk [vmem:[%s9423_s9 + $0x1e8] sm:$0xff] %vm2814_vm2, %v4596_v48 }
 0x937   :  { %v4498_v11 = vpop.permute.xlu0 %4497 }
 0x938   :  { %v4599_v53 = vadd.f32 %v4498_v11, %v4319_v30  ;;  %v4600_v34 = vadd.f32 %v4498_v11, %v4320_v17 }
 0x93a   :  { %4679 = vst [vmem:[%s9423_s9 + $0x200] sm:$0xff] %v4599_v53 }
 0x93b   :  { %4680 = vst.msk [vmem:[%s9423_s9 + $0x208] sm:$0xff] %vm2814_vm2, %v4600_v34 }
 0x93d   :  { %v4248_v9 = vpop.permute.xlu1 %4247 }
 0x93e   :  { %v4332_v39 = vmul.f32 %v4248_v9, %v8129_v51 }
 0x93f   :  { %v4223_v47 = vpop.permute.xlu0 %4222 }
 0x940   :  { %v4321_v29 = vmul.f32 %v4223_v47, %v9862_v63  ;;  %v4322_v22 = vmul.f32 %v4223_v47, %v8518_v3  ;;  %v9961_v3 = vld [vmem:[#allocation58_spill] sm:$0xff] }
 0x941   :  { %v4325_v43 = vmul.f32 %v4233_v50, %v9961_v3 }
 0x942   :  { %v4601_v15 = vadd.f32 %v9247_v2, %v4321_v29  ;;  %v4602_v52 = vadd.f32 %v9247_v2, %v4322_v22 }
 0x944   :  { %4681 = vst [vmem:[%s9423_s9 + $0x210] sm:$0xff] %v4601_v15 }
 0x945   :  { %4682 = vst.msk [vmem:[%s9423_s9 + $0x218] sm:$0xff] %vm2814_vm2, %v4602_v52  ;;  %v4523_v63 = vpop.permute.xlu1 %4522 }
 0x946   :  { %v4609_v36 = vadd.f32 %v4523_v63, %v4329_v4  ;;  %v4610_v2 = vadd.f32 %v4523_v63, %v4330_v25 }
 0x947   :  { %v4513_v10 = vpop.permute.xlu0 %4512 }
 0x948   :  { %4689 = vst [vmem:[%s9423_s9 + $0x250] sm:$0xff] %v4609_v36  ;;  %v4605_v12 = vadd.f32 %v4513_v10, %v4325_v43  ;;  %v4606_v18 = vadd.f32 %v4513_v10, %v4326_v55 }
 0x949   :  { %4690 = vst.msk [vmem:[%s9423_s9 + $0x258] sm:$0xff] %vm2814_vm2, %v4610_v2 }
 0x94a   :  { %4685 = vst [vmem:[%s9423_s9 + $0x230] sm:$0xff] %v4605_v12 }
 0x94b   :  { %4686 = vst.msk [vmem:[%s9423_s9 + $0x238] sm:$0xff] %vm2814_vm2, %v4606_v18 }
 0x94f   :  { %v4238_v8 = vpop.permute.xlu0 %4237 }
 0x950   :  { %v4327_v62 = vmul.f32 %v4238_v8, %v9883_v7  ;;  %v4328_v58 = vmul.f32 %v4238_v8, %v8611_v37  ;;  %v4331_v37 = vmul.f32 %v4248_v9, %v9926_v14 }
 0x952   :  { %v4607_v31 = vadd.f32 %v4518_v61, %v4327_v62  ;;  %v4608_v33 = vadd.f32 %v4518_v61, %v4328_v58 }
 0x954   :  { %4687 = vst [vmem:[%s9423_s9 + $0x240] sm:$0xff] %v4607_v31 }
 0x955   :  { %4688 = vst.msk [vmem:[%s9423_s9 + $0x248] sm:$0xff] %vm2814_vm2, %v4608_v33 }
 0x969   :  { %v4533_v27 = vpop.permute.xlu2 %4532 }
 0x97d   :  { %v4253_v44 = vpop.permute.xlu0 %4252 }
 0x97e   :  { %v4333_v38 = vmul.f32 %v4253_v44, %v9899_v20  ;;  %v4334_v6 = vmul.f32 %v4253_v44, %v8715_v28 }
 0x980   :  { %v4613_v7 = vadd.f32 %v4533_v27, %v4333_v38  ;;  %v4614_v57 = vadd.f32 %v4533_v27, %v4334_v6 }
 0x982   :  { %4693 = vst [vmem:[%s9423_s9 + $0x270] sm:$0xff] %v4613_v7 }
 0x983   :  { %4694 = vst.msk [vmem:[%s9423_s9 + $0x278] sm:$0xff] %vm2814_vm2, %v4614_v57 }
 0x985   :  { %v4528_v24 = vpop.permute.xlu0 %4527 }
 0x986   :  { %v4611_v20 = vadd.f32 %v4528_v24, %v4331_v37  ;;  %v4612_v5 = vadd.f32 %v4528_v24, %v4332_v39 }
 0x988   :  { %4691 = vst [vmem:[%s9423_s9 + $0x260] sm:$0xff] %v4611_v20 }
 0x989   :  { %4692 = vst.msk [vmem:[%s9423_s9 + $0x268] sm:$0xff] %vm2814_vm2, %v4612_v5 }

</bundles_post_ra>
